<compile_context>
chip_gen: v7x
topology: tpu7x:2x2x1
jax: 0.10.0
libtpu: 0.0.40
codegen_flags: <defaults>
</compile_context>

<pallas_src>
import jax
import jax.numpy as jnp
from jax.experimental import pallas as pl
from jax.experimental.pallas import tpu as pltpu

EPS = 1e-5


def rescnn_kernel(x_ref, w1_ref, w2_hbm_ref, pool_ref, spread_ref,
                  mdn_ref, mup_ref, g1_ref, b1_ref, g2_ref, b2_ref,
                  o_ref, w2_vmem, w2_sem):
    """Single invocation; activations + conv1 weights resident in VMEM.

    x_ref    : (R, W*C)      lane-dense input rows, R = N*H (also the residual)
    w1_ref   : (3*W*C, W*C)  K-stacked banded Toeplitz weights for conv1 (VMEM)
    w2_hbm   : (3*W*C, W*C)  same for conv2, left in HBM and DMA'd in-kernel
    pool     : (W*C, C)      0/1 matrix summing the W positions of each channel
    spread   : (C, W*C)      pool.T: per-channel broadcast back to lane layout
    mdn/mup  : (R, 1)        0/1 masks zeroing the top / bottom row of each image
    g*/b*    : (1, W*C)      BN gamma / beta, pre-tiled to the lane layout
    o_ref    : (R, W*C)      lane-dense output rows
    """
    # Kick off conv2's weight fetch immediately; it completes under conv1 + BN1.
    w2_copy = pltpu.make_async_copy(w2_hbm_ref, w2_vmem, w2_sem)
    w2_copy.start()

    rows = x_ref.shape[0]
    cout = pool_ref.shape[1]
    width = x_ref.shape[1] // cout
    inv_count = 1.0 / float(rows * width)       # BN averages N*H*W elems / channel

    mdn = mdn_ref[...]
    mup = mup_ref[...]
    pool = pool_ref[...]
    spread = spread_ref[...]

    def conv_bn(inp, w, g_t, b_t):
        # 3x3 conv, stride 1, pad 1 == one lane-dense MXU matmul with K = 3*W*C.
        # ky = +/-1 taps: sublane rolls (XLU) + image-boundary masks (VPU).
        x_dn = pltpu.roll(inp, shift=1, axis=0) * mdn          # row h-1 (0 at h==0)
        x_up = pltpu.roll(inp, shift=rows - 1, axis=0) * mup   # row h+1 (0 at h==H-1)
        xk = jnp.concatenate([x_dn, inp, x_up], axis=1)        # (R, 3*W*C)
        acc = jnp.dot(xk, w, preferred_element_type=jnp.float32)     # (R, W*C)

        # Fused training-mode BatchNorm, two-pass variance (matches reference).
        mean = jnp.dot(jnp.sum(acc, axis=0, keepdims=True), pool,
                       preferred_element_type=jnp.float32) * inv_count   # (1, C)
        mean_t = jnp.dot(mean, spread, preferred_element_type=jnp.float32)
        centered = acc - mean_t
        var = jnp.dot(jnp.sum(centered * centered, axis=0, keepdims=True), pool,
                      preferred_element_type=jnp.float32) * inv_count    # (1, C)
        var_t = jnp.dot(var, spread, preferred_element_type=jnp.float32)
        scale_t = g_t * jax.lax.rsqrt(var_t + EPS)              # rsqrt -> EUP slot
        return centered * scale_t + b_t

    y = jnp.maximum(conv_bn(x_ref[...], w1_ref[...], g1_ref[...], b1_ref[...]), 0.0)
    w2_copy.wait()
    y = conv_bn(y, w2_vmem[...], g2_ref[...], b2_ref[...])
    # Residual re-reads x_ref (not pinned across both convs) + final ReLU.
    o_ref[...] = jnp.maximum(y + x_ref[...], 0.0)


def rescnn_forward(x_nchw, params):
    N, Cin, H, W = x_nchw.shape
    Cout = params["w1"].shape[0]
    assert Cin == params["w1"].shape[1] and Cin == Cout, \
        "residual add requires in_channel == out_channel"

    # NHWC, flattened to lane-dense rows (N*H, W*C).  Also serves as the residual.
    x_rows = (jnp.transpose(x_nchw, (0, 2, 3, 1))
              .astype(jnp.float32)
              .reshape(N * H, W * Cin))

    def toeplitz_k(w_oihw):
        # OIHW -> (kh, kw, Cin, Cout); fold (kx, cin) and the W-dim zero padding
        # into a banded (W*Cin, W*Cout) matrix per ky; stack the 3 ky slabs along K.
        w = jnp.transpose(w_oihw, (2, 3, 1, 0)).astype(jnp.float32)
        ci, co = w.shape[2], w.shape[3]
        slabs = []
        for ky in range(3):
            m = jnp.zeros((W * ci, W * co), jnp.float32)
            for kx in range(3):
                band = jnp.eye(W, k=-(kx - 1), dtype=jnp.float32)
                m = m + jnp.kron(band, w[ky, kx])
            slabs.append(m)
        return jnp.concatenate(slabs, axis=0)                  # (3*W*Cin, W*Cout)

    w1c = toeplitz_k(params["w1"])
    w2c = toeplitz_k(params["w2"])

    # Image-boundary masks for the rolled ky = +/-1 taps (also kill the batch wrap).
    R = N * H
    r_in_img = jnp.arange(R) % H
    mask_dn = (r_in_img != 0).astype(jnp.float32).reshape(R, 1)
    mask_up = (r_in_img != H - 1).astype(jnp.float32).reshape(R, 1)

    # 0/1 channel pool / spread matrices for BN stats (exact in f32).
    pool = jnp.kron(jnp.ones((W, 1), jnp.float32), jnp.eye(Cout, dtype=jnp.float32))
    spread = pool.T

    tile_row = lambda v: jnp.tile(v.astype(jnp.float32).reshape(1, Cout), (1, W))

    vmem = pl.BlockSpec(memory_space=pltpu.MemorySpace.VMEM)
    out_rows = pl.pallas_call(
        rescnn_kernel,
        out_shape=jax.ShapeDtypeStruct((R, W * Cout), jnp.float32),
        in_specs=[vmem,                                 # x rows
                  vmem,                                 # conv1 Toeplitz weights
                  pl.BlockSpec(memory_space=pl.ANY),    # conv2 weights stay in HBM
                  vmem, vmem,                           # pool, spread
                  vmem, vmem,                           # boundary masks
                  vmem, vmem, vmem, vmem],              # g1t, b1t, g2t, b2t
        out_specs=vmem,
        scratch_shapes=[pltpu.VMEM((3 * W * Cin, W * Cout), jnp.float32),
                        pltpu.SemaphoreType.DMA],
        compiler_params=pltpu.CompilerParams(vmem_limit_bytes=32 * 1024 * 1024),
    )(x_rows, w1c, w2c, pool, spread, mask_dn, mask_up,
      tile_row(params["g1"]), tile_row(params["beta1"]),
      tile_row(params["g2"]), tile_row(params["beta2"]))
    # Conv biases b1/b2 intentionally not passed: training-mode BN subtracts the
    # per-channel batch mean, which cancels a per-channel constant exactly.

    return jnp.transpose(out_rows.reshape(N, H, W, Cout), (0, 3, 1, 2))   # NCHW


def rescnn_reference(x, params):
    """Pure-JAX reference mirroring the PyTorch forward (NCHW, with biases)."""
    def conv(x, w, b):
        y = jax.lax.conv_general_dilated(
            x, w, window_strides=(1, 1), padding=((1, 1), (1, 1)),
            dimension_numbers=("NCHW", "OIHW", "NCHW"))
        return y + b[None, :, None, None]

    def bn(x, g, beta):
        mean = jnp.mean(x, axis=(0, 2, 3), keepdims=True)
        var = jnp.mean((x - mean) ** 2, axis=(0, 2, 3), keepdims=True)
        return (g[None, :, None, None] * (x - mean) * jax.lax.rsqrt(var + EPS)
                + beta[None, :, None, None])

    res = x
    y = conv(x, params["w1"], params["b1"])
    y = jnp.maximum(bn(y, params["g1"], params["beta1"]), 0.0)
    y = conv(y, params["w2"], params["b2"])
    y = bn(y, params["g2"], params["beta2"])
    return jnp.maximum(y + res, 0.0)


if __name__ == "__main__":
    key = jax.random.PRNGKey(0)
    ks = jax.random.split(key, 8)
    N, C, H, W = 2, 32, 16, 16  # in_channel = out_channel = 32 (module defaults)

    params = {
        "w1": jax.random.normal(ks[0], (C, C, 3, 3), jnp.float32) * 0.05,  # OIHW
        "b1": jax.random.normal(ks[1], (C,), jnp.float32) * 0.05,
        "g1": 1.0 + 0.1 * jax.random.normal(ks[2], (C,), jnp.float32),
        "beta1": 0.1 * jax.random.normal(ks[3], (C,), jnp.float32),
        "w2": jax.random.normal(ks[4], (C, C, 3, 3), jnp.float32) * 0.05,
        "b2": jax.random.normal(ks[5], (C,), jnp.float32) * 0.05,
        "g2": 1.0 + 0.1 * jax.random.normal(ks[6], (C,), jnp.float32),
        "beta2": 0.1 * jax.random.normal(ks[7], (C,), jnp.float32),
    }
    x = jax.random.normal(jax.random.PRNGKey(1), (N, C, H, W), jnp.float32)

    out = jax.block_until_ready(jax.jit(rescnn_forward)(x, params))
    ref = jax.block_until_ready(rescnn_reference(x, params))
    err = float(jnp.max(jnp.abs(out - ref)))
    assert out.shape == (N, C, H, W) and out.dtype == jnp.float32
    assert err < 1e-4, f"max abs error {err}"
    print("KERNEL_OK")
</pallas_src>

<mosaic_0001>
module attributes {stable_mosaic.version = 11 : i64} {
  func.func @rescnn_kernel(%arg0: memref<32x512xf32, #tpu.memory_space<vmem>>, %arg1: memref<1536x512xf32, #tpu.memory_space<vmem>>, %arg2: memref<1536x512xf32, #tpu.memory_space<any>>, %arg3: memref<512x32xf32, #tpu.memory_space<vmem>>, %arg4: memref<32x512xf32, #tpu.memory_space<vmem>>, %arg5: memref<32x1xf32, #tpu.memory_space<vmem>>, %arg6: memref<32x1xf32, #tpu.memory_space<vmem>>, %arg7: memref<1x512xf32, #tpu.memory_space<vmem>>, %arg8: memref<1x512xf32, #tpu.memory_space<vmem>>, %arg9: memref<1x512xf32, #tpu.memory_space<vmem>>, %arg10: memref<1x512xf32, #tpu.memory_space<vmem>>, %arg11: memref<32x512xf32, #tpu.memory_space<vmem>>, %arg12: memref<1536x512xf32, #tpu.memory_space<vmem>>, %arg13: memref<!tpu.dma_semaphore, #tpu.memory_space<semaphore_mem>>) attributes {dimension_semantics = [], scalar_prefetch = 0 : i64, scratch_operands = 2 : i64, tpu.core_type = #tpu.core_type<tc>} {
    tpu.enqueue_dma source(%arg2 : memref<1536x512xf32, #tpu.memory_space<any>>) target(%arg12 : memref<1536x512xf32, #tpu.memory_space<vmem>>) target_semaphore(%arg13 : memref<!tpu.dma_semaphore, #tpu.memory_space<semaphore_mem>>)
    %c0 = arith.constant 0 : index
    %c0_0 = arith.constant 0 : index
    %0 = vector.load %arg5[%c0, %c0_0] : memref<32x1xf32, #tpu.memory_space<vmem>>, vector<32x1xf32>
    %c0_1 = arith.constant 0 : index
    %c0_2 = arith.constant 0 : index
    %1 = vector.load %arg6[%c0_1, %c0_2] : memref<32x1xf32, #tpu.memory_space<vmem>>, vector<32x1xf32>
    %c0_3 = arith.constant 0 : index
    %c0_4 = arith.constant 0 : index
    %2 = vector.load %arg3[%c0_3, %c0_4] : memref<512x32xf32, #tpu.memory_space<vmem>>, vector<512x32xf32>
    %c0_5 = arith.constant 0 : index
    %c0_6 = arith.constant 0 : index
    %3 = vector.load %arg4[%c0_5, %c0_6] : memref<32x512xf32, #tpu.memory_space<vmem>>, vector<32x512xf32>
    %c0_7 = arith.constant 0 : index
    %c0_8 = arith.constant 0 : index
    %4 = vector.load %arg0[%c0_7, %c0_8] : memref<32x512xf32, #tpu.memory_space<vmem>>, vector<32x512xf32>
    %c0_9 = arith.constant 0 : index
    %c0_10 = arith.constant 0 : index
    %5 = vector.load %arg1[%c0_9, %c0_10] : memref<1536x512xf32, #tpu.memory_space<vmem>>, vector<1536x512xf32>
    %c0_11 = arith.constant 0 : index
    %c0_12 = arith.constant 0 : index
    %6 = vector.load %arg7[%c0_11, %c0_12] : memref<1x512xf32, #tpu.memory_space<vmem>>, vector<1x512xf32>
    %c0_13 = arith.constant 0 : index
    %c0_14 = arith.constant 0 : index
    %7 = vector.load %arg8[%c0_13, %c0_14] : memref<1x512xf32, #tpu.memory_space<vmem>>, vector<1x512xf32>
    %c1_i32 = arith.constant 1 : i32
    %8 = tpu.dynamic_rotate %4 by %c1_i32 dim 0 : vector<32x512xf32>, i32 -> vector<32x512xf32>
    %9 = vector.broadcast %0 : vector<32x1xf32> to vector<32x512xf32>
    %10 = arith.mulf %8, %9 : vector<32x512xf32>
    %c31_i32 = arith.constant 31 : i32
    %11 = tpu.dynamic_rotate %4 by %c31_i32 dim 0 : vector<32x512xf32>, i32 -> vector<32x512xf32>
    %12 = vector.broadcast %1 : vector<32x1xf32> to vector<32x512xf32>
    %13 = arith.mulf %11, %12 : vector<32x512xf32>
    %14 = tpu.concatenate %10, %4, %13 in 1 : vector<32x512xf32>, vector<32x512xf32>, vector<32x512xf32> -> vector<32x1536xf32>
    %cst = arith.constant dense<0.000000e+00> : vector<32x512xf32>
    %15 = tpu.matmul %14, %5, %cst {dimension_numbers = #tpu.dot_dimension_numbers<[1], [0], [0], [1], [0, 0, 1, 1], [], []>} : vector<32x1536xf32>, vector<1536x512xf32>, vector<32x512xf32> -> vector<32x512xf32>
    %cst_15 = arith.constant dense<0.000000e+00> : vector<512xf32>
    %16 = vector.multi_reduction <add>, %15, %cst_15 [0] : vector<32x512xf32> to vector<512xf32>
    %17 = vector.shape_cast %16 : vector<512xf32> to vector<1x512xf32>
    %cst_16 = arith.constant dense<0.000000e+00> : vector<1x32xf32>
    %18 = tpu.matmul %17, %2, %cst_16 {dimension_numbers = #tpu.dot_dimension_numbers<[1], [0], [0], [1], [0, 0, 1, 1], [], []>} : vector<1x512xf32>, vector<512x32xf32>, vector<1x32xf32> -> vector<1x32xf32>
    %cst_17 = arith.constant 0.001953125 : f32
    %19 = vector.broadcast %cst_17 : f32 to vector<1x32xf32>
    %20 = arith.mulf %18, %19 : vector<1x32xf32>
    %cst_18 = arith.constant dense<0.000000e+00> : vector<1x512xf32>
    %21 = tpu.matmul %20, %3, %cst_18 {dimension_numbers = #tpu.dot_dimension_numbers<[1], [0], [0], [1], [0, 0, 1, 1], [], []>} : vector<1x32xf32>, vector<32x512xf32>, vector<1x512xf32> -> vector<1x512xf32>
    %22 = vector.broadcast %21 : vector<1x512xf32> to vector<32x512xf32>
    %23 = arith.subf %15, %22 : vector<32x512xf32>
    %24 = arith.mulf %23, %23 : vector<32x512xf32>
    %cst_19 = arith.constant dense<0.000000e+00> : vector<512xf32>
    %25 = vector.multi_reduction <add>, %24, %cst_19 [0] : vector<32x512xf32> to vector<512xf32>
    %26 = vector.shape_cast %25 : vector<512xf32> to vector<1x512xf32>
    %cst_20 = arith.constant dense<0.000000e+00> : vector<1x32xf32>
    %27 = tpu.matmul %26, %2, %cst_20 {dimension_numbers = #tpu.dot_dimension_numbers<[1], [0], [0], [1], [0, 0, 1, 1], [], []>} : vector<1x512xf32>, vector<512x32xf32>, vector<1x32xf32> -> vector<1x32xf32>
    %cst_21 = arith.constant 0.001953125 : f32
    %28 = vector.broadcast %cst_21 : f32 to vector<1x32xf32>
    %29 = arith.mulf %27, %28 : vector<1x32xf32>
    %cst_22 = arith.constant dense<0.000000e+00> : vector<1x512xf32>
    %30 = tpu.matmul %29, %3, %cst_22 {dimension_numbers = #tpu.dot_dimension_numbers<[1], [0], [0], [1], [0, 0, 1, 1], [], []>} : vector<1x32xf32>, vector<32x512xf32>, vector<1x512xf32> -> vector<1x512xf32>
    %cst_23 = arith.constant 9.99999974E-6 : f32
    %31 = vector.broadcast %cst_23 : f32 to vector<1x512xf32>
    %32 = arith.addf %30, %31 : vector<1x512xf32>
    %33 = math.rsqrt %32 : vector<1x512xf32>
    %34 = arith.mulf %6, %33 : vector<1x512xf32>
    %35 = vector.broadcast %34 : vector<1x512xf32> to vector<32x512xf32>
    %36 = arith.mulf %23, %35 : vector<32x512xf32>
    %37 = vector.broadcast %7 : vector<1x512xf32> to vector<32x512xf32>
    %38 = arith.addf %36, %37 : vector<32x512xf32>
    %cst_24 = arith.constant 0.000000e+00 : f32
    %39 = vector.broadcast %cst_24 : f32 to vector<32x512xf32>
    %40 = arith.maximumf %38, %39 : vector<32x512xf32>
    tpu.wait_dma2 semaphore(%arg13 : memref<!tpu.dma_semaphore, #tpu.memory_space<semaphore_mem>>) src(%arg2 : memref<1536x512xf32, #tpu.memory_space<any>>) dst(%arg12 : memref<1536x512xf32, #tpu.memory_space<vmem>>)
    %c0_25 = arith.constant 0 : index
    %c0_26 = arith.constant 0 : index
    %41 = vector.load %arg12[%c0_25, %c0_26] : memref<1536x512xf32, #tpu.memory_space<vmem>>, vector<1536x512xf32>
    %c0_27 = arith.constant 0 : index
    %c0_28 = arith.constant 0 : index
    %42 = vector.load %arg9[%c0_27, %c0_28] : memref<1x512xf32, #tpu.memory_space<vmem>>, vector<1x512xf32>
    %c0_29 = arith.constant 0 : index
    %c0_30 = arith.constant 0 : index
    %43 = vector.load %arg10[%c0_29, %c0_30] : memref<1x512xf32, #tpu.memory_space<vmem>>, vector<1x512xf32>
    %c1_i32_31 = arith.constant 1 : i32
    %44 = tpu.dynamic_rotate %40 by %c1_i32_31 dim 0 : vector<32x512xf32>, i32 -> vector<32x512xf32>
    %45 = vector.broadcast %0 : vector<32x1xf32> to vector<32x512xf32>
    %46 = arith.mulf %44, %45 : vector<32x512xf32>
    %c31_i32_32 = arith.constant 31 : i32
    %47 = tpu.dynamic_rotate %40 by %c31_i32_32 dim 0 : vector<32x512xf32>, i32 -> vector<32x512xf32>
    %48 = vector.broadcast %1 : vector<32x1xf32> to vector<32x512xf32>
    %49 = arith.mulf %47, %48 : vector<32x512xf32>
    %50 = tpu.concatenate %46, %40, %49 in 1 : vector<32x512xf32>, vector<32x512xf32>, vector<32x512xf32> -> vector<32x1536xf32>
    %cst_33 = arith.constant dense<0.000000e+00> : vector<32x512xf32>
    %51 = tpu.matmul %50, %41, %cst_33 {dimension_numbers = #tpu.dot_dimension_numbers<[1], [0], [0], [1], [0, 0, 1, 1], [], []>} : vector<32x1536xf32>, vector<1536x512xf32>, vector<32x512xf32> -> vector<32x512xf32>
    %cst_34 = arith.constant dense<0.000000e+00> : vector<512xf32>
    %52 = vector.multi_reduction <add>, %51, %cst_34 [0] : vector<32x512xf32> to vector<512xf32>
    %53 = vector.shape_cast %52 : vector<512xf32> to vector<1x512xf32>
    %cst_35 = arith.constant dense<0.000000e+00> : vector<1x32xf32>
    %54 = tpu.matmul %53, %2, %cst_35 {dimension_numbers = #tpu.dot_dimension_numbers<[1], [0], [0], [1], [0, 0, 1, 1], [], []>} : vector<1x512xf32>, vector<512x32xf32>, vector<1x32xf32> -> vector<1x32xf32>
    %cst_36 = arith.constant 0.001953125 : f32
    %55 = vector.broadcast %cst_36 : f32 to vector<1x32xf32>
    %56 = arith.mulf %54, %55 : vector<1x32xf32>
    %cst_37 = arith.constant dense<0.000000e+00> : vector<1x512xf32>
    %57 = tpu.matmul %56, %3, %cst_37 {dimension_numbers = #tpu.dot_dimension_numbers<[1], [0], [0], [1], [0, 0, 1, 1], [], []>} : vector<1x32xf32>, vector<32x512xf32>, vector<1x512xf32> -> vector<1x512xf32>
    %58 = vector.broadcast %57 : vector<1x512xf32> to vector<32x512xf32>
    %59 = arith.subf %51, %58 : vector<32x512xf32>
    %60 = arith.mulf %59, %59 : vector<32x512xf32>
    %cst_38 = arith.constant dense<0.000000e+00> : vector<512xf32>
    %61 = vector.multi_reduction <add>, %60, %cst_38 [0] : vector<32x512xf32> to vector<512xf32>
    %62 = vector.shape_cast %61 : vector<512xf32> to vector<1x512xf32>
    %cst_39 = arith.constant dense<0.000000e+00> : vector<1x32xf32>
    %63 = tpu.matmul %62, %2, %cst_39 {dimension_numbers = #tpu.dot_dimension_numbers<[1], [0], [0], [1], [0, 0, 1, 1], [], []>} : vector<1x512xf32>, vector<512x32xf32>, vector<1x32xf32> -> vector<1x32xf32>
    %cst_40 = arith.constant 0.001953125 : f32
    %64 = vector.broadcast %cst_40 : f32 to vector<1x32xf32>
    %65 = arith.mulf %63, %64 : vector<1x32xf32>
    %cst_41 = arith.constant dense<0.000000e+00> : vector<1x512xf32>
    %66 = tpu.matmul %65, %3, %cst_41 {dimension_numbers = #tpu.dot_dimension_numbers<[1], [0], [0], [1], [0, 0, 1, 1], [], []>} : vector<1x32xf32>, vector<32x512xf32>, vector<1x512xf32> -> vector<1x512xf32>
    %cst_42 = arith.constant 9.99999974E-6 : f32
    %67 = vector.broadcast %cst_42 : f32 to vector<1x512xf32>
    %68 = arith.addf %66, %67 : vector<1x512xf32>
    %69 = math.rsqrt %68 : vector<1x512xf32>
    %70 = arith.mulf %42, %69 : vector<1x512xf32>
    %71 = vector.broadcast %70 : vector<1x512xf32> to vector<32x512xf32>
    %72 = arith.mulf %59, %71 : vector<32x512xf32>
    %73 = vector.broadcast %43 : vector<1x512xf32> to vector<32x512xf32>
    %74 = arith.addf %72, %73 : vector<32x512xf32>
    %c0_43 = arith.constant 0 : index
    %c0_44 = arith.constant 0 : index
    %75 = vector.load %arg0[%c0_43, %c0_44] : memref<32x512xf32, #tpu.memory_space<vmem>>, vector<32x512xf32>
    %76 = arith.addf %74, %75 : vector<32x512xf32>
    %cst_45 = arith.constant 0.000000e+00 : f32
    %77 = vector.broadcast %cst_45 : f32 to vector<32x512xf32>
    %78 = arith.maximumf %76, %77 : vector<32x512xf32>
    %c0_46 = arith.constant 0 : index
    %c0_47 = arith.constant 0 : index
    %79 = vector.load %arg11[%c0_46, %c0_47] : memref<32x512xf32, #tpu.memory_space<vmem>>, vector<32x512xf32>
    tpu.vector_store %arg11[%c0_46, %c0_47], %78 {strides = array<i32>} : memref<32x512xf32, #tpu.memory_space<vmem>>, vector<32x512xf32>,
    return
  }
}

</mosaic_0001>

<bundles_post_ra>
// kernel: rescnn_forward.1
= control target key start
LH: loop header
LB: loop body
LE: loop exit
PB: predicated region body
PF: predicated region fallthrough
CT: control target
= control target key end

     0   :  { %s18261_s0 = inlined_call_operand.vmem [shape: f32[32,512], index: 0, kind: input, shape index: {}]   ;;  %s18262_s1 = inlined_call_operand.vmem [shape: f32[1536,512], index: 1, kind: input, shape index: {}]   ;;  %s18263_s2 = inlined_call_operand.vmem [shape: f32[1536,512], index: 2, kind: input, shape index: {}]   ;;  %s18264_s3 = inlined_call_operand.vmem [shape: f32[512,32], index: 3, kind: input, shape index: {}]   ;;  %s18265_s4 = inlined_call_operand.vmem [shape: f32[32,512], index: 4, kind: input, shape index: {}]   ;;  %s18266_s5 = inlined_call_operand.vmem [shape: f32[32,1], index: 5, kind: input, shape index: {}]   ;;  %s18267_s6 = inlined_call_operand.vmem [shape: f32[32,1], index: 6, kind: input, shape index: {}]   ;;  %s18268_s7 = inlined_call_operand.vmem [shape: f32[1,512], index: 7, kind: input, shape index: {}]   ;;  %s18269_s8 = inlined_call_operand.vmem [shape: f32[1,512], index: 8, kind: input, shape index: {}]   ;;  %s18270_s9 = inlined_call_operand.vmem [shape: f32[1,512], index: 9, kind: input, shape index: {}]   ;;  %s18271_s10 = inlined_call_operand.vmem [shape: f32[1,512], index: 10, kind: input, shape index: {}]   ;;  %s18272_s11 = inlined_call_operand.vmem [shape: f32[32,512], index: 11, kind: output, shape index: {}]  }
   0x1   :  { %v9741_v0 = vld [vmem:[%s18263_s2] sm:$0xff]  ;;  %v9746_v1 = vld [vmem:[%s18263_s2 + $0x8] sm:$0xff]  ;;  %v9751_v2 = vld [vmem:[%s18263_s2 + $0x10] sm:$0xff] }
   0x2   :  { %18379 = vst [vmem:[#allocation6_spill] sm:$0xff] %v9741_v0  ;;  %18380 = vst [vmem:[#allocation7_spill] sm:$0xff] %v9746_v1  ;;  %v9756_v3 = vld [vmem:[%s18263_s2 + $0x18] sm:$0xff]  ;;  %v9761_v4 = vld [vmem:[%s18263_s2 + $0x20] sm:$0xff] }
   0x3   :  { %18381 = vst [vmem:[#allocation8_spill] sm:$0xff] %v9751_v2  ;;  %18382 = vst [vmem:[#allocation9_spill] sm:$0xff] %v9756_v3  ;;  %v9766_v5 = vld [vmem:[%s18263_s2 + $0x28] sm:$0xff]  ;;  %v9771_v6 = vld [vmem:[%s18263_s2 + $0x30] sm:$0xff] }
   0x4   :  { %18383 = vst [vmem:[#allocation10_spill] sm:$0xff] %v9761_v4  ;;  %18384 = vst [vmem:[#allocation11_spill] sm:$0xff] %v9766_v5  ;;  %v9776_v7 = vld [vmem:[%s18263_s2 + $0x38] sm:$0xff]  ;;  %v9781_v8 = vld [vmem:[%s18263_s2 + $0x40] sm:$0xff] }
   0x5   :  { %18385 = vst [vmem:[#allocation12_spill] sm:$0xff] %v9771_v6  ;;  %18386 = vst [vmem:[#allocation13_spill] sm:$0xff] %v9776_v7  ;;  %v9786_v9 = vld [vmem:[%s18263_s2 + $0x48] sm:$0xff]  ;;  %v9791_v10 = vld [vmem:[%s18263_s2 + $0x50] sm:$0xff] }
   0x6   :  { %18387 = vst [vmem:[#allocation14_spill] sm:$0xff] %v9781_v8  ;;  %18388 = vst [vmem:[#allocation15_spill] sm:$0xff] %v9786_v9  ;;  %v9796_v11 = vld [vmem:[%s18263_s2 + $0x58] sm:$0xff]  ;;  %v9801_v12 = vld [vmem:[%s18263_s2 + $0x60] sm:$0xff] }
   0x7   :  { %18389 = vst [vmem:[#allocation16_spill] sm:$0xff] %v9791_v10  ;;  %18390 = vst [vmem:[#allocation17_spill] sm:$0xff] %v9796_v11  ;;  %v9806_v13 = vld [vmem:[%s18263_s2 + $0x68] sm:$0xff]  ;;  %v9811_v14 = vld [vmem:[%s18263_s2 + $0x70] sm:$0xff] }
   0x8   :  { %18391 = vst [vmem:[#allocation18_spill] sm:$0xff] %v9801_v12  ;;  %18392 = vst [vmem:[#allocation19_spill] sm:$0xff] %v9806_v13  ;;  %v9816_v15 = vld [vmem:[%s18263_s2 + $0x78] sm:$0xff]  ;;  %v9821_v16 = vld [vmem:[%s18263_s2 + $0x80] sm:$0xff] }
   0x9   :  { %18393 = vst [vmem:[#allocation20_spill] sm:$0xff] %v9811_v14  ;;  %18394 = vst [vmem:[#allocation21_spill] sm:$0xff] %v9816_v15  ;;  %v9826_v17 = vld [vmem:[%s18263_s2 + $0x88] sm:$0xff]  ;;  %v9831_v18 = vld [vmem:[%s18263_s2 + $0x90] sm:$0xff] }
   0xa   :  { %18395 = vst [vmem:[#allocation22_spill] sm:$0xff] %v9821_v16  ;;  %18396 = vst [vmem:[#allocation23_spill] sm:$0xff] %v9826_v17  ;;  %v9836_v19 = vld [vmem:[%s18263_s2 + $0x98] sm:$0xff]  ;;  %v9841_v20 = vld [vmem:[%s18263_s2 + $0xa0] sm:$0xff] }
   0xb   :  { %18397 = vst [vmem:[#allocation24_spill] sm:$0xff] %v9831_v18  ;;  %18398 = vst [vmem:[#allocation25_spill] sm:$0xff] %v9836_v19  ;;  %v9846_v21 = vld [vmem:[%s18263_s2 + $0xa8] sm:$0xff]  ;;  %v9851_v22 = vld [vmem:[%s18263_s2 + $0xb0] sm:$0xff] }
   0xc   :  { %18399 = vst [vmem:[#allocation26_spill] sm:$0xff] %v9841_v20  ;;  %18400 = vst [vmem:[#allocation27_spill] sm:$0xff] %v9846_v21  ;;  %v9856_v23 = vld [vmem:[%s18263_s2 + $0xb8] sm:$0xff]  ;;  %v9861_v24 = vld [vmem:[%s18263_s2 + $0xc0] sm:$0xff] }
   0xd   :  { %18401 = vst [vmem:[#allocation28_spill] sm:$0xff] %v9851_v22  ;;  %18402 = vst [vmem:[#allocation29_spill] sm:$0xff] %v9856_v23  ;;  %v9866_v25 = vld [vmem:[%s18263_s2 + $0xc8] sm:$0xff]  ;;  %v9871_v26 = vld [vmem:[%s18263_s2 + $0xd0] sm:$0xff] }
   0xe   :  { %18403 = vst [vmem:[#allocation30_spill] sm:$0xff] %v9861_v24  ;;  %18404 = vst [vmem:[#allocation31_spill] sm:$0xff] %v9866_v25  ;;  %v9876_v27 = vld [vmem:[%s18263_s2 + $0xd8] sm:$0xff]  ;;  %v9881_v28 = vld [vmem:[%s18263_s2 + $0xe0] sm:$0xff] }
   0xf   :  { %18405 = vst [vmem:[#allocation32_spill] sm:$0xff] %v9871_v26  ;;  %18406 = vst [vmem:[#allocation33_spill] sm:$0xff] %v9876_v27  ;;  %v9886_v29 = vld [vmem:[%s18263_s2 + $0xe8] sm:$0xff]  ;;  %v9891_v30 = vld [vmem:[%s18263_s2 + $0xf0] sm:$0xff] }
  0x10   :  { %18407 = vst [vmem:[#allocation34_spill] sm:$0xff] %v9881_v28  ;;  %18408 = vst [vmem:[#allocation35_spill] sm:$0xff] %v9886_v29  ;;  %v9896_v31 = vld [vmem:[%s18263_s2 + $0xf8] sm:$0xff]  ;;  %v9901_v32 = vld [vmem:[%s18263_s2 + $0x100] sm:$0xff] }
  0x11   :  { %18409 = vst [vmem:[#allocation36_spill] sm:$0xff] %v9891_v30  ;;  %18410 = vst [vmem:[#allocation37_spill] sm:$0xff] %v9896_v31  ;;  %v9906_v33 = vld [vmem:[%s18263_s2 + $0x108] sm:$0xff]  ;;  %v9911_v34 = vld [vmem:[%s18263_s2 + $0x110] sm:$0xff] }
  0x12   :  { %18411 = vst [vmem:[#allocation38_spill] sm:$0xff] %v9901_v32  ;;  %18412 = vst [vmem:[#allocation39_spill] sm:$0xff] %v9906_v33  ;;  %v9916_v35 = vld [vmem:[%s18263_s2 + $0x118] sm:$0xff]  ;;  %v9921_v36 = vld [vmem:[%s18263_s2 + $0x120] sm:$0xff] }
  0x13   :  { %18413 = vst [vmem:[#allocation40_spill] sm:$0xff] %v9911_v34  ;;  %18414 = vst [vmem:[#allocation41_spill] sm:$0xff] %v9916_v35  ;;  %v9926_v37 = vld [vmem:[%s18263_s2 + $0x128] sm:$0xff]  ;;  %v9931_v38 = vld [vmem:[%s18263_s2 + $0x130] sm:$0xff] }
  0x14   :  { %18415 = vst [vmem:[#allocation42_spill] sm:$0xff] %v9921_v36  ;;  %18416 = vst [vmem:[#allocation43_spill] sm:$0xff] %v9926_v37  ;;  %v9936_v39 = vld [vmem:[%s18263_s2 + $0x138] sm:$0xff]  ;;  %v9941_v40 = vld [vmem:[%s18263_s2 + $0x140] sm:$0xff] }
  0x15   :  { %18417 = vst [vmem:[#allocation44_spill] sm:$0xff] %v9931_v38  ;;  %18418 = vst [vmem:[#allocation45_spill] sm:$0xff] %v9936_v39  ;;  %v9946_v41 = vld [vmem:[%s18263_s2 + $0x148] sm:$0xff]  ;;  %v9951_v42 = vld [vmem:[%s18263_s2 + $0x150] sm:$0xff] }
  0x16   :  { %18419 = vst [vmem:[#allocation46_spill] sm:$0xff] %v9941_v40  ;;  %18420 = vst [vmem:[#allocation47_spill] sm:$0xff] %v9946_v41  ;;  %v9956_v43 = vld [vmem:[%s18263_s2 + $0x158] sm:$0xff]  ;;  %v9961_v44 = vld [vmem:[%s18263_s2 + $0x160] sm:$0xff] }
  0x17   :  { %18421 = vst [vmem:[#allocation48_spill] sm:$0xff] %v9951_v42  ;;  %18422 = vst [vmem:[#allocation49_spill] sm:$0xff] %v9956_v43  ;;  %v9966_v45 = vld [vmem:[%s18263_s2 + $0x168] sm:$0xff]  ;;  %v9971_v46 = vld [vmem:[%s18263_s2 + $0x170] sm:$0xff] }
  0x18   :  { %18423 = vst [vmem:[#allocation50_spill] sm:$0xff] %v9961_v44  ;;  %18424 = vst [vmem:[#allocation51_spill] sm:$0xff] %v9966_v45  ;;  %v9976_v47 = vld [vmem:[%s18263_s2 + $0x178] sm:$0xff]  ;;  %v9981_v48 = vld [vmem:[%s18263_s2 + $0x180] sm:$0xff] }
  0x19   :  { %18425 = vst [vmem:[#allocation52_spill] sm:$0xff] %v9971_v46  ;;  %18426 = vst [vmem:[#allocation53_spill] sm:$0xff] %v9976_v47  ;;  %v9986_v49 = vld [vmem:[%s18263_s2 + $0x188] sm:$0xff]  ;;  %v9991_v50 = vld [vmem:[%s18263_s2 + $0x190] sm:$0xff] }
  0x1a   :  { %18427 = vst [vmem:[#allocation54_spill] sm:$0xff] %v9981_v48  ;;  %18428 = vst [vmem:[#allocation55_spill] sm:$0xff] %v9986_v49  ;;  %v9996_v51 = vld [vmem:[%s18263_s2 + $0x198] sm:$0xff]  ;;  %v10001_v52 = vld [vmem:[%s18263_s2 + $0x1a0] sm:$0xff] }
  0x1b   :  { %18429 = vst [vmem:[#allocation56_spill] sm:$0xff] %v9991_v50  ;;  %18430 = vst [vmem:[#allocation57_spill] sm:$0xff] %v9996_v51  ;;  %v10006_v53 = vld [vmem:[%s18263_s2 + $0x1a8] sm:$0xff]  ;;  %v10011_v54 = vld [vmem:[%s18263_s2 + $0x1b0] sm:$0xff] }
  0x1c   :  { %18431 = vst [vmem:[#allocation58_spill] sm:$0xff] %v10001_v52  ;;  %18432 = vst [vmem:[#allocation59_spill] sm:$0xff] %v10006_v53  ;;  %v10016_v55 = vld [vmem:[%s18263_s2 + $0x1b8] sm:$0xff]  ;;  %v10021_v56 = vld [vmem:[%s18263_s2 + $0x1c0] sm:$0xff] }
  0x1d   :  { %18433 = vst [vmem:[#allocation60_spill] sm:$0xff] %v10011_v54  ;;  %18434 = vst [vmem:[#allocation61_spill] sm:$0xff] %v10016_v55  ;;  %v10026_v57 = vld [vmem:[%s18263_s2 + $0x1c8] sm:$0xff]  ;;  %v10031_v58 = vld [vmem:[%s18263_s2 + $0x1d0] sm:$0xff] }
  0x1e   :  { %18435 = vst [vmem:[#allocation62_spill] sm:$0xff] %v10021_v56  ;;  %18436 = vst [vmem:[#allocation63_spill] sm:$0xff] %v10026_v57  ;;  %v10036_v59 = vld [vmem:[%s18263_s2 + $0x1d8] sm:$0xff]  ;;  %v10041_v60 = vld [vmem:[%s18263_s2 + $0x1e0] sm:$0xff] }
  0x1f   :  { %18437 = vst [vmem:[#allocation64_spill] sm:$0xff] %v10031_v58  ;;  %18438 = vst [vmem:[#allocation65_spill] sm:$0xff] %v10036_v59  ;;  %v10046_v61 = vld [vmem:[%s18263_s2 + $0x1e8] sm:$0xff]  ;;  %v10051_v62 = vld [vmem:[%s18263_s2 + $0x1f0] sm:$0xff]  ;;  %v9675_v59 = vmov 0  }
  0x20   :  { %18439 = vst [vmem:[#allocation66_spill] sm:$0xff] %v10041_v60  ;;  %18440 = vst [vmem:[#allocation67_spill] sm:$0xff] %v10046_v61  ;;  %v10056_v63 = vld [vmem:[%s18263_s2 + $0x1f8] sm:$0xff]  ;;  %v10061_v58 = vld [vmem:[%s18263_s2 + $0x200] sm:$0xff]  ;;  %9639 = vset.pattern.permute.xlu0 %v9675_v59  ;;  %9640 = vset.pattern.permute.xlu1 %v9675_v59 }
  0x21   :  { %18441 = vst [vmem:[#allocation68_spill] sm:$0xff] %v10051_v62  ;;  %18442 = vst [vmem:[#allocation69_spill] sm:$0xff] %v10056_v63  ;;  %v10066_v60 = vld [vmem:[%s18263_s2 + $0x208] sm:$0xff]  ;;  %v10071_v56 = vld [vmem:[%s18263_s2 + $0x210] sm:$0xff] }
  0x22   :  { %18443 = vst [vmem:[#allocation70_spill] sm:$0xff] %v10061_v58  ;;  %18444 = vst [vmem:[#allocation71_spill] sm:$0xff] %v10066_v60  ;;  %v10076_v62 = vld [vmem:[%s18263_s2 + $0x218] sm:$0xff]  ;;  %v10081_v63 = vld [vmem:[%s18263_s2 + $0x220] sm:$0xff] }
  0x23   :  { %18445 = vst [vmem:[#allocation72_spill] sm:$0xff] %v10071_v56  ;;  %18446 = vst [vmem:[#allocation73_spill] sm:$0xff] %v10076_v62  ;;  %v10086_v58 = vld [vmem:[%s18263_s2 + $0x228] sm:$0xff]  ;;  %v10091_v60 = vld [vmem:[%s18263_s2 + $0x230] sm:$0xff] }
  0x24   :  { %18447 = vst [vmem:[#allocation74_spill] sm:$0xff] %v10081_v63  ;;  %18448 = vst [vmem:[#allocation75_spill] sm:$0xff] %v10086_v58  ;;  %v10096_v56 = vld [vmem:[%s18263_s2 + $0x238] sm:$0xff]  ;;  %v10101_v62 = vld [vmem:[%s18263_s2 + $0x240] sm:$0xff] }
  0x25   :  { %18449 = vst [vmem:[#allocation76_spill] sm:$0xff] %v10091_v60  ;;  %18450 = vst [vmem:[#allocation77_spill] sm:$0xff] %v10096_v56  ;;  %v10106_v63 = vld [vmem:[%s18263_s2 + $0x248] sm:$0xff]  ;;  %v10111_v58 = vld [vmem:[%s18263_s2 + $0x250] sm:$0xff] }
  0x26   :  { %18451 = vst [vmem:[#allocation78_spill] sm:$0xff] %v10101_v62  ;;  %18452 = vst [vmem:[#allocation79_spill] sm:$0xff] %v10106_v63  ;;  %v10116_v60 = vld [vmem:[%s18263_s2 + $0x258] sm:$0xff]  ;;  %v10121_v56 = vld [vmem:[%s18263_s2 + $0x260] sm:$0xff] }
  0x27   :  { %18453 = vst [vmem:[#allocation80_spill] sm:$0xff] %v10111_v58  ;;  %18454 = vst [vmem:[#allocation81_spill] sm:$0xff] %v10116_v60  ;;  %v10126_v62 = vld [vmem:[%s18263_s2 + $0x268] sm:$0xff]  ;;  %v10131_v63 = vld [vmem:[%s18263_s2 + $0x270] sm:$0xff] }
  0x28   :  { %18455 = vst [vmem:[#allocation82_spill] sm:$0xff] %v10121_v56  ;;  %18456 = vst [vmem:[#allocation83_spill] sm:$0xff] %v10126_v62  ;;  %v10136_v58 = vld [vmem:[%s18263_s2 + $0x278] sm:$0xff]  ;;  %v10141_v60 = vld [vmem:[%s18263_s2 + $0x280] sm:$0xff] }
  0x29   :  { %18457 = vst [vmem:[#allocation84_spill] sm:$0xff] %v10131_v63  ;;  %18458 = vst [vmem:[#allocation85_spill] sm:$0xff] %v10136_v58  ;;  %v10146_v56 = vld [vmem:[%s18263_s2 + $0x288] sm:$0xff]  ;;  %v10151_v62 = vld [vmem:[%s18263_s2 + $0x290] sm:$0xff] }
  0x2a   :  { %18459 = vst [vmem:[#allocation86_spill] sm:$0xff] %v10141_v60  ;;  %18460 = vst [vmem:[#allocation87_spill] sm:$0xff] %v10146_v56  ;;  %v10156_v63 = vld [vmem:[%s18263_s2 + $0x298] sm:$0xff]  ;;  %v10161_v58 = vld [vmem:[%s18263_s2 + $0x2a0] sm:$0xff] }
  0x2b   :  { %18461 = vst [vmem:[#allocation88_spill] sm:$0xff] %v10151_v62  ;;  %18462 = vst [vmem:[#allocation89_spill] sm:$0xff] %v10156_v63  ;;  %v10166_v60 = vld [vmem:[%s18263_s2 + $0x2a8] sm:$0xff]  ;;  %v10171_v56 = vld [vmem:[%s18263_s2 + $0x2b0] sm:$0xff] }
  0x2c   :  { %18463 = vst [vmem:[#allocation90_spill] sm:$0xff] %v10161_v58  ;;  %18464 = vst [vmem:[#allocation91_spill] sm:$0xff] %v10166_v60  ;;  %v10176_v62 = vld [vmem:[%s18263_s2 + $0x2b8] sm:$0xff]  ;;  %v10181_v63 = vld [vmem:[%s18263_s2 + $0x2c0] sm:$0xff] }
  0x2d   :  { %18465 = vst [vmem:[#allocation92_spill] sm:$0xff] %v10171_v56  ;;  %18466 = vst [vmem:[#allocation93_spill] sm:$0xff] %v10176_v62  ;;  %v10186_v58 = vld [vmem:[%s18263_s2 + $0x2c8] sm:$0xff]  ;;  %v10191_v60 = vld [vmem:[%s18263_s2 + $0x2d0] sm:$0xff] }
  0x2e   :  { %18467 = vst [vmem:[#allocation94_spill] sm:$0xff] %v10181_v63  ;;  %18468 = vst [vmem:[#allocation95_spill] sm:$0xff] %v10186_v58  ;;  %v10196_v56 = vld [vmem:[%s18263_s2 + $0x2d8] sm:$0xff]  ;;  %v10201_v62 = vld [vmem:[%s18263_s2 + $0x2e0] sm:$0xff] }
  0x2f   :  { %18469 = vst [vmem:[#allocation96_spill] sm:$0xff] %v10191_v60  ;;  %18470 = vst [vmem:[#allocation97_spill] sm:$0xff] %v10196_v56  ;;  %v10206_v63 = vld [vmem:[%s18263_s2 + $0x2e8] sm:$0xff]  ;;  %v10211_v58 = vld [vmem:[%s18263_s2 + $0x2f0] sm:$0xff] }
  0x30   :  { %18471 = vst [vmem:[#allocation98_spill] sm:$0xff] %v10201_v62  ;;  %18472 = vst [vmem:[#allocation99_spill] sm:$0xff] %v10206_v63  ;;  %v10216_v60 = vld [vmem:[%s18263_s2 + $0x2f8] sm:$0xff]  ;;  %v10221_v56 = vld [vmem:[%s18263_s2 + $0x300] sm:$0xff] }
  0x31   :  { %18473 = vst [vmem:[#allocation100_spill] sm:$0xff] %v10211_v58  ;;  %18474 = vst [vmem:[#allocation101_spill] sm:$0xff] %v10216_v60  ;;  %v10226_v62 = vld [vmem:[%s18263_s2 + $0x308] sm:$0xff]  ;;  %v10231_v63 = vld [vmem:[%s18263_s2 + $0x310] sm:$0xff] }
  0x32   :  { %18475 = vst [vmem:[#allocation102_spill] sm:$0xff] %v10221_v56  ;;  %18476 = vst [vmem:[#allocation103_spill] sm:$0xff] %v10226_v62  ;;  %v10236_v58 = vld [vmem:[%s18263_s2 + $0x318] sm:$0xff]  ;;  %v10241_v60 = vld [vmem:[%s18263_s2 + $0x320] sm:$0xff] }
  0x33   :  { %18477 = vst [vmem:[#allocation104_spill] sm:$0xff] %v10231_v63  ;;  %18478 = vst [vmem:[#allocation105_spill] sm:$0xff] %v10236_v58  ;;  %v10246_v56 = vld [vmem:[%s18263_s2 + $0x328] sm:$0xff]  ;;  %v10251_v62 = vld [vmem:[%s18263_s2 + $0x330] sm:$0xff] }
  0x34   :  { %18479 = vst [vmem:[#allocation106_spill] sm:$0xff] %v10241_v60  ;;  %18480 = vst [vmem:[#allocation107_spill] sm:$0xff] %v10246_v56  ;;  %v10256_v63 = vld [vmem:[%s18263_s2 + $0x338] sm:$0xff]  ;;  %v10261_v58 = vld [vmem:[%s18263_s2 + $0x340] sm:$0xff] }
  0x35   :  { %18481 = vst [vmem:[#allocation108_spill] sm:$0xff] %v10251_v62  ;;  %18482 = vst [vmem:[#allocation109_spill] sm:$0xff] %v10256_v63  ;;  %v10266_v60 = vld [vmem:[%s18263_s2 + $0x348] sm:$0xff]  ;;  %v10271_v56 = vld [vmem:[%s18263_s2 + $0x350] sm:$0xff] }
  0x36   :  { %18483 = vst [vmem:[#allocation110_spill] sm:$0xff] %v10261_v58  ;;  %18484 = vst [vmem:[#allocation111_spill] sm:$0xff] %v10266_v60  ;;  %v10276_v62 = vld [vmem:[%s18263_s2 + $0x358] sm:$0xff]  ;;  %v10281_v63 = vld [vmem:[%s18263_s2 + $0x360] sm:$0xff] }
  0x37   :  { %18485 = vst [vmem:[#allocation112_spill] sm:$0xff] %v10271_v56  ;;  %18486 = vst [vmem:[#allocation113_spill] sm:$0xff] %v10276_v62  ;;  %v10286_v58 = vld [vmem:[%s18263_s2 + $0x368] sm:$0xff]  ;;  %v10291_v60 = vld [vmem:[%s18263_s2 + $0x370] sm:$0xff] }
  0x38   :  { %18487 = vst [vmem:[#allocation114_spill] sm:$0xff] %v10281_v63  ;;  %18488 = vst [vmem:[#allocation115_spill] sm:$0xff] %v10286_v58  ;;  %v10296_v56 = vld [vmem:[%s18263_s2 + $0x378] sm:$0xff]  ;;  %v10301_v62 = vld [vmem:[%s18263_s2 + $0x380] sm:$0xff] }
  0x39   :  { %18489 = vst [vmem:[#allocation116_spill] sm:$0xff] %v10291_v60  ;;  %18490 = vst [vmem:[#allocation117_spill] sm:$0xff] %v10296_v56  ;;  %v10306_v63 = vld [vmem:[%s18263_s2 + $0x388] sm:$0xff]  ;;  %v10311_v58 = vld [vmem:[%s18263_s2 + $0x390] sm:$0xff] }
  0x3a   :  { %18491 = vst [vmem:[#allocation118_spill] sm:$0xff] %v10301_v62  ;;  %18492 = vst [vmem:[#allocation119_spill] sm:$0xff] %v10306_v63  ;;  %v10316_v60 = vld [vmem:[%s18263_s2 + $0x398] sm:$0xff]  ;;  %v10321_v56 = vld [vmem:[%s18263_s2 + $0x3a0] sm:$0xff] }
  0x3b   :  { %18493 = vst [vmem:[#allocation120_spill] sm:$0xff] %v10311_v58  ;;  %18494 = vst [vmem:[#allocation121_spill] sm:$0xff] %v10316_v60  ;;  %v10326_v62 = vld [vmem:[%s18263_s2 + $0x3a8] sm:$0xff]  ;;  %v10331_v63 = vld [vmem:[%s18263_s2 + $0x3b0] sm:$0xff] }
  0x3c   :  { %18495 = vst [vmem:[#allocation122_spill] sm:$0xff] %v10321_v56  ;;  %18496 = vst [vmem:[#allocation123_spill] sm:$0xff] %v10326_v62  ;;  %v10336_v58 = vld [vmem:[%s18263_s2 + $0x3b8] sm:$0xff]  ;;  %v10341_v60 = vld [vmem:[%s18263_s2 + $0x3c0] sm:$0xff] }
  0x3d   :  { %18497 = vst [vmem:[#allocation124_spill] sm:$0xff] %v10331_v63  ;;  %18498 = vst [vmem:[#allocation125_spill] sm:$0xff] %v10336_v58  ;;  %v10346_v56 = vld [vmem:[%s18263_s2 + $0x3c8] sm:$0xff]  ;;  %v10351_v62 = vld [vmem:[%s18263_s2 + $0x3d0] sm:$0xff] }
  0x3e   :  { %18499 = vst [vmem:[#allocation126_spill] sm:$0xff] %v10341_v60  ;;  %18500 = vst [vmem:[#allocation127_spill] sm:$0xff] %v10346_v56  ;;  %v10356_v63 = vld [vmem:[%s18263_s2 + $0x3d8] sm:$0xff]  ;;  %v10361_v58 = vld [vmem:[%s18263_s2 + $0x3e0] sm:$0xff] }
  0x3f   :  { %18501 = vst [vmem:[#allocation128_spill] sm:$0xff] %v10351_v62  ;;  %18502 = vst [vmem:[#allocation129_spill] sm:$0xff] %v10356_v63  ;;  %v10366_v60 = vld [vmem:[%s18263_s2 + $0x3e8] sm:$0xff]  ;;  %v10371_v56 = vld [vmem:[%s18263_s2 + $0x3f0] sm:$0xff] }
  0x40   :  { %18503 = vst [vmem:[#allocation130_spill] sm:$0xff] %v10361_v58  ;;  %18504 = vst [vmem:[#allocation131_spill] sm:$0xff] %v10366_v60  ;;  %v10376_v62 = vld [vmem:[%s18263_s2 + $0x3f8] sm:$0xff]  ;;  %v10381_v63 = vld [vmem:[%s18263_s2 + $0x400] sm:$0xff] }
  0x41   :  { %18505 = vst [vmem:[#allocation132_spill] sm:$0xff] %v10371_v56  ;;  %18506 = vst [vmem:[#allocation133_spill] sm:$0xff] %v10376_v62  ;;  %v10386_v58 = vld [vmem:[%s18263_s2 + $0x408] sm:$0xff]  ;;  %v10391_v60 = vld [vmem:[%s18263_s2 + $0x410] sm:$0xff] }
  0x42   :  { %18507 = vst [vmem:[#allocation134_spill] sm:$0xff] %v10381_v63  ;;  %18508 = vst [vmem:[#allocation135_spill] sm:$0xff] %v10386_v58  ;;  %v10396_v56 = vld [vmem:[%s18263_s2 + $0x418] sm:$0xff]  ;;  %v10401_v62 = vld [vmem:[%s18263_s2 + $0x420] sm:$0xff] }
  0x43   :  { %18509 = vst [vmem:[#allocation136_spill] sm:$0xff] %v10391_v60  ;;  %18510 = vst [vmem:[#allocation137_spill] sm:$0xff] %v10396_v56  ;;  %v10406_v63 = vld [vmem:[%s18263_s2 + $0x428] sm:$0xff]  ;;  %v10411_v58 = vld [vmem:[%s18263_s2 + $0x430] sm:$0xff] }
  0x44   :  { %18511 = vst [vmem:[#allocation138_spill] sm:$0xff] %v10401_v62  ;;  %18512 = vst [vmem:[#allocation139_spill] sm:$0xff] %v10406_v63  ;;  %v10416_v60 = vld [vmem:[%s18263_s2 + $0x438] sm:$0xff]  ;;  %v10421_v56 = vld [vmem:[%s18263_s2 + $0x440] sm:$0xff] }
  0x45   :  { %18513 = vst [vmem:[#allocation140_spill] sm:$0xff] %v10411_v58  ;;  %18514 = vst [vmem:[#allocation141_spill] sm:$0xff] %v10416_v60  ;;  %v10426_v62 = vld [vmem:[%s18263_s2 + $0x448] sm:$0xff]  ;;  %v10431_v63 = vld [vmem:[%s18263_s2 + $0x450] sm:$0xff] }
  0x46   :  { %18515 = vst [vmem:[#allocation142_spill] sm:$0xff] %v10421_v56  ;;  %18516 = vst [vmem:[#allocation143_spill] sm:$0xff] %v10426_v62  ;;  %v10436_v58 = vld [vmem:[%s18263_s2 + $0x458] sm:$0xff]  ;;  %v10441_v60 = vld [vmem:[%s18263_s2 + $0x460] sm:$0xff] }
  0x47   :  { %18517 = vst [vmem:[#allocation144_spill] sm:$0xff] %v10431_v63  ;;  %18518 = vst [vmem:[#allocation145_spill] sm:$0xff] %v10436_v58  ;;  %v10446_v56 = vld [vmem:[%s18263_s2 + $0x468] sm:$0xff]  ;;  %v10451_v62 = vld [vmem:[%s18263_s2 + $0x470] sm:$0xff] }
  0x48   :  { %18519 = vst [vmem:[#allocation146_spill] sm:$0xff] %v10441_v60  ;;  %18520 = vst [vmem:[#allocation147_spill] sm:$0xff] %v10446_v56  ;;  %v10456_v63 = vld [vmem:[%s18263_s2 + $0x478] sm:$0xff]  ;;  %v10461_v58 = vld [vmem:[%s18263_s2 + $0x480] sm:$0xff] }
  0x49   :  { %18521 = vst [vmem:[#allocation148_spill] sm:$0xff] %v10451_v62  ;;  %18522 = vst [vmem:[#allocation149_spill] sm:$0xff] %v10456_v63  ;;  %v10466_v60 = vld [vmem:[%s18263_s2 + $0x488] sm:$0xff]  ;;  %v10471_v56 = vld [vmem:[%s18263_s2 + $0x490] sm:$0xff] }
  0x4a   :  { %18523 = vst [vmem:[#allocation150_spill] sm:$0xff] %v10461_v58  ;;  %18524 = vst [vmem:[#allocation151_spill] sm:$0xff] %v10466_v60  ;;  %v10476_v62 = vld [vmem:[%s18263_s2 + $0x498] sm:$0xff]  ;;  %v10481_v63 = vld [vmem:[%s18263_s2 + $0x4a0] sm:$0xff] }
  0x4b   :  { %18525 = vst [vmem:[#allocation152_spill] sm:$0xff] %v10471_v56  ;;  %18526 = vst [vmem:[#allocation153_spill] sm:$0xff] %v10476_v62  ;;  %v10486_v58 = vld [vmem:[%s18263_s2 + $0x4a8] sm:$0xff]  ;;  %v10491_v60 = vld [vmem:[%s18263_s2 + $0x4b0] sm:$0xff] }
  0x4c   :  { %18527 = vst [vmem:[#allocation154_spill] sm:$0xff] %v10481_v63  ;;  %18528 = vst [vmem:[#allocation155_spill] sm:$0xff] %v10486_v58  ;;  %v10496_v56 = vld [vmem:[%s18263_s2 + $0x4b8] sm:$0xff]  ;;  %v10501_v62 = vld [vmem:[%s18263_s2 + $0x4c0] sm:$0xff] }
  0x4d   :  { %18529 = vst [vmem:[#allocation156_spill] sm:$0xff] %v10491_v60  ;;  %18530 = vst [vmem:[#allocation157_spill] sm:$0xff] %v10496_v56  ;;  %v10506_v63 = vld [vmem:[%s18263_s2 + $0x4c8] sm:$0xff]  ;;  %v10511_v58 = vld [vmem:[%s18263_s2 + $0x4d0] sm:$0xff] }
  0x4e   :  { %18531 = vst [vmem:[#allocation158_spill] sm:$0xff] %v10501_v62  ;;  %18532 = vst [vmem:[#allocation159_spill] sm:$0xff] %v10506_v63  ;;  %v10516_v60 = vld [vmem:[%s18263_s2 + $0x4d8] sm:$0xff]  ;;  %v10521_v56 = vld [vmem:[%s18263_s2 + $0x4e0] sm:$0xff] }
  0x4f   :  { %18533 = vst [vmem:[#allocation160_spill] sm:$0xff] %v10511_v58  ;;  %18534 = vst [vmem:[#allocation161_spill] sm:$0xff] %v10516_v60  ;;  %v10526_v62 = vld [vmem:[%s18263_s2 + $0x4e8] sm:$0xff]  ;;  %v10531_v63 = vld [vmem:[%s18263_s2 + $0x4f0] sm:$0xff] }
  0x50   :  { %18535 = vst [vmem:[#allocation162_spill] sm:$0xff] %v10521_v56  ;;  %18536 = vst [vmem:[#allocation163_spill] sm:$0xff] %v10526_v62  ;;  %v10536_v58 = vld [vmem:[%s18263_s2 + $0x4f8] sm:$0xff]  ;;  %v10541_v60 = vld [vmem:[%s18263_s2 + $0x500] sm:$0xff] }
  0x51   :  { %18537 = vst [vmem:[#allocation164_spill] sm:$0xff] %v10531_v63  ;;  %18538 = vst [vmem:[#allocation165_spill] sm:$0xff] %v10536_v58  ;;  %v10546_v56 = vld [vmem:[%s18263_s2 + $0x508] sm:$0xff]  ;;  %v10551_v62 = vld [vmem:[%s18263_s2 + $0x510] sm:$0xff] }
  0x52   :  { %18539 = vst [vmem:[#allocation166_spill] sm:$0xff] %v10541_v60  ;;  %18540 = vst [vmem:[#allocation167_spill] sm:$0xff] %v10546_v56  ;;  %v10556_v63 = vld [vmem:[%s18263_s2 + $0x518] sm:$0xff]  ;;  %v10561_v58 = vld [vmem:[%s18263_s2 + $0x520] sm:$0xff] }
  0x53   :  { %18541 = vst [vmem:[#allocation168_spill] sm:$0xff] %v10551_v62  ;;  %18542 = vst [vmem:[#allocation169_spill] sm:$0xff] %v10556_v63  ;;  %v10566_v60 = vld [vmem:[%s18263_s2 + $0x528] sm:$0xff]  ;;  %v10571_v56 = vld [vmem:[%s18263_s2 + $0x530] sm:$0xff] }
  0x54   :  { %18543 = vst [vmem:[#allocation170_spill] sm:$0xff] %v10561_v58  ;;  %18544 = vst [vmem:[#allocation171_spill] sm:$0xff] %v10566_v60  ;;  %v10576_v62 = vld [vmem:[%s18263_s2 + $0x538] sm:$0xff]  ;;  %v10581_v63 = vld [vmem:[%s18263_s2 + $0x540] sm:$0xff] }
  0x55   :  { %18545 = vst [vmem:[#allocation172_spill] sm:$0xff] %v10571_v56  ;;  %18546 = vst [vmem:[#allocation173_spill] sm:$0xff] %v10576_v62  ;;  %v10586_v58 = vld [vmem:[%s18263_s2 + $0x548] sm:$0xff]  ;;  %v10591_v60 = vld [vmem:[%s18263_s2 + $0x550] sm:$0xff] }
  0x56   :  { %18547 = vst [vmem:[#allocation174_spill] sm:$0xff] %v10581_v63  ;;  %18548 = vst [vmem:[#allocation175_spill] sm:$0xff] %v10586_v58  ;;  %v10596_v56 = vld [vmem:[%s18263_s2 + $0x558] sm:$0xff]  ;;  %v10601_v62 = vld [vmem:[%s18263_s2 + $0x560] sm:$0xff] }
  0x57   :  { %18549 = vst [vmem:[#allocation176_spill] sm:$0xff] %v10591_v60  ;;  %18550 = vst [vmem:[#allocation177_spill] sm:$0xff] %v10596_v56  ;;  %v10606_v63 = vld [vmem:[%s18263_s2 + $0x568] sm:$0xff]  ;;  %v10611_v58 = vld [vmem:[%s18263_s2 + $0x570] sm:$0xff] }
  0x58   :  { %18551 = vst [vmem:[#allocation178_spill] sm:$0xff] %v10601_v62  ;;  %18552 = vst [vmem:[#allocation179_spill] sm:$0xff] %v10606_v63  ;;  %v10616_v60 = vld [vmem:[%s18263_s2 + $0x578] sm:$0xff]  ;;  %v10621_v56 = vld [vmem:[%s18263_s2 + $0x580] sm:$0xff] }
  0x59   :  { %18553 = vst [vmem:[#allocation180_spill] sm:$0xff] %v10611_v58  ;;  %18554 = vst [vmem:[#allocation181_spill] sm:$0xff] %v10616_v60  ;;  %v10626_v62 = vld [vmem:[%s18263_s2 + $0x588] sm:$0xff]  ;;  %v10631_v63 = vld [vmem:[%s18263_s2 + $0x590] sm:$0xff] }
  0x5a   :  { %18555 = vst [vmem:[#allocation182_spill] sm:$0xff] %v10621_v56  ;;  %18556 = vst [vmem:[#allocation183_spill] sm:$0xff] %v10626_v62  ;;  %v10636_v58 = vld [vmem:[%s18263_s2 + $0x598] sm:$0xff]  ;;  %v10641_v60 = vld [vmem:[%s18263_s2 + $0x5a0] sm:$0xff] }
  0x5b   :  { %18557 = vst [vmem:[#allocation184_spill] sm:$0xff] %v10631_v63  ;;  %18558 = vst [vmem:[#allocation185_spill] sm:$0xff] %v10636_v58  ;;  %v10646_v56 = vld [vmem:[%s18263_s2 + $0x5a8] sm:$0xff]  ;;  %v10651_v62 = vld [vmem:[%s18263_s2 + $0x5b0] sm:$0xff] }
  0x5c   :  { %18559 = vst [vmem:[#allocation186_spill] sm:$0xff] %v10641_v60  ;;  %18560 = vst [vmem:[#allocation187_spill] sm:$0xff] %v10646_v56  ;;  %v10656_v63 = vld [vmem:[%s18263_s2 + $0x5b8] sm:$0xff]  ;;  %v10661_v58 = vld [vmem:[%s18263_s2 + $0x5c0] sm:$0xff] }
  0x5d   :  { %18561 = vst [vmem:[#allocation188_spill] sm:$0xff] %v10651_v62  ;;  %18562 = vst [vmem:[#allocation189_spill] sm:$0xff] %v10656_v63  ;;  %v10666_v60 = vld [vmem:[%s18263_s2 + $0x5c8] sm:$0xff]  ;;  %v10671_v56 = vld [vmem:[%s18263_s2 + $0x5d0] sm:$0xff] }
  0x5e   :  { %18563 = vst [vmem:[#allocation190_spill] sm:$0xff] %v10661_v58  ;;  %18564 = vst [vmem:[#allocation191_spill] sm:$0xff] %v10666_v60  ;;  %v10676_v62 = vld [vmem:[%s18263_s2 + $0x5d8] sm:$0xff]  ;;  %v10681_v63 = vld [vmem:[%s18263_s2 + $0x5e0] sm:$0xff] }
  0x5f   :  { %18565 = vst [vmem:[#allocation192_spill] sm:$0xff] %v10671_v56  ;;  %18566 = vst [vmem:[#allocation193_spill] sm:$0xff] %v10676_v62  ;;  %v10686_v58 = vld [vmem:[%s18263_s2 + $0x5e8] sm:$0xff]  ;;  %v10691_v60 = vld [vmem:[%s18263_s2 + $0x5f0] sm:$0xff] }
  0x60   :  { %18567 = vst [vmem:[#allocation194_spill] sm:$0xff] %v10681_v63  ;;  %18568 = vst [vmem:[#allocation195_spill] sm:$0xff] %v10686_v58  ;;  %v10696_v56 = vld [vmem:[%s18263_s2 + $0x5f8] sm:$0xff]  ;;  %v10701_v62 = vld [vmem:[%s18263_s2 + $0x600] sm:$0xff] }
  0x61   :  { %18569 = vst [vmem:[#allocation196_spill] sm:$0xff] %v10691_v60  ;;  %18570 = vst [vmem:[#allocation197_spill] sm:$0xff] %v10696_v56  ;;  %v10706_v63 = vld [vmem:[%s18263_s2 + $0x608] sm:$0xff]  ;;  %v10711_v58 = vld [vmem:[%s18263_s2 + $0x610] sm:$0xff] }
  0x62   :  { %18571 = vst [vmem:[#allocation198_spill] sm:$0xff] %v10701_v62  ;;  %18572 = vst [vmem:[#allocation199_spill] sm:$0xff] %v10706_v63  ;;  %v10716_v60 = vld [vmem:[%s18263_s2 + $0x618] sm:$0xff]  ;;  %v10721_v56 = vld [vmem:[%s18263_s2 + $0x620] sm:$0xff] }
  0x63   :  { %18573 = vst [vmem:[#allocation200_spill] sm:$0xff] %v10711_v58  ;;  %18574 = vst [vmem:[#allocation201_spill] sm:$0xff] %v10716_v60  ;;  %v10726_v62 = vld [vmem:[%s18263_s2 + $0x628] sm:$0xff]  ;;  %v10731_v63 = vld [vmem:[%s18263_s2 + $0x630] sm:$0xff] }
  0x64   :  { %18575 = vst [vmem:[#allocation202_spill] sm:$0xff] %v10721_v56  ;;  %18576 = vst [vmem:[#allocation203_spill] sm:$0xff] %v10726_v62  ;;  %v10736_v58 = vld [vmem:[%s18263_s2 + $0x638] sm:$0xff]  ;;  %v10741_v60 = vld [vmem:[%s18263_s2 + $0x640] sm:$0xff] }
  0x65   :  { %18577 = vst [vmem:[#allocation204_spill] sm:$0xff] %v10731_v63  ;;  %18578 = vst [vmem:[#allocation205_spill] sm:$0xff] %v10736_v58  ;;  %v10746_v56 = vld [vmem:[%s18263_s2 + $0x648] sm:$0xff]  ;;  %v10751_v62 = vld [vmem:[%s18263_s2 + $0x650] sm:$0xff] }
  0x66   :  { %18579 = vst [vmem:[#allocation206_spill] sm:$0xff] %v10741_v60  ;;  %18580 = vst [vmem:[#allocation207_spill] sm:$0xff] %v10746_v56  ;;  %v10756_v63 = vld [vmem:[%s18263_s2 + $0x658] sm:$0xff]  ;;  %v10761_v58 = vld [vmem:[%s18263_s2 + $0x660] sm:$0xff] }
  0x67   :  { %18581 = vst [vmem:[#allocation208_spill] sm:$0xff] %v10751_v62  ;;  %18582 = vst [vmem:[#allocation209_spill] sm:$0xff] %v10756_v63  ;;  %v10766_v60 = vld [vmem:[%s18263_s2 + $0x668] sm:$0xff]  ;;  %v10771_v56 = vld [vmem:[%s18263_s2 + $0x670] sm:$0xff] }
  0x68   :  { %18583 = vst [vmem:[#allocation210_spill] sm:$0xff] %v10761_v58  ;;  %18584 = vst [vmem:[#allocation211_spill] sm:$0xff] %v10766_v60  ;;  %v10776_v62 = vld [vmem:[%s18263_s2 + $0x678] sm:$0xff]  ;;  %v10781_v63 = vld [vmem:[%s18263_s2 + $0x680] sm:$0xff] }
  0x69   :  { %18585 = vst [vmem:[#allocation212_spill] sm:$0xff] %v10771_v56  ;;  %18586 = vst [vmem:[#allocation213_spill] sm:$0xff] %v10776_v62  ;;  %v10786_v58 = vld [vmem:[%s18263_s2 + $0x688] sm:$0xff]  ;;  %v10791_v60 = vld [vmem:[%s18263_s2 + $0x690] sm:$0xff] }
  0x6a   :  { %18587 = vst [vmem:[#allocation214_spill] sm:$0xff] %v10781_v63  ;;  %18588 = vst [vmem:[#allocation215_spill] sm:$0xff] %v10786_v58  ;;  %v10796_v56 = vld [vmem:[%s18263_s2 + $0x698] sm:$0xff]  ;;  %v10801_v62 = vld [vmem:[%s18263_s2 + $0x6a0] sm:$0xff] }
  0x6b   :  { %18589 = vst [vmem:[#allocation216_spill] sm:$0xff] %v10791_v60  ;;  %18590 = vst [vmem:[#allocation217_spill] sm:$0xff] %v10796_v56  ;;  %v10806_v63 = vld [vmem:[%s18263_s2 + $0x6a8] sm:$0xff]  ;;  %v10811_v58 = vld [vmem:[%s18263_s2 + $0x6b0] sm:$0xff] }
  0x6c   :  { %18591 = vst [vmem:[#allocation218_spill] sm:$0xff] %v10801_v62  ;;  %18592 = vst [vmem:[#allocation219_spill] sm:$0xff] %v10806_v63  ;;  %v10816_v60 = vld [vmem:[%s18263_s2 + $0x6b8] sm:$0xff]  ;;  %v10821_v56 = vld [vmem:[%s18263_s2 + $0x6c0] sm:$0xff] }
  0x6d   :  { %18593 = vst [vmem:[#allocation220_spill] sm:$0xff] %v10811_v58  ;;  %18594 = vst [vmem:[#allocation221_spill] sm:$0xff] %v10816_v60  ;;  %v10826_v62 = vld [vmem:[%s18263_s2 + $0x6c8] sm:$0xff]  ;;  %v10831_v63 = vld [vmem:[%s18263_s2 + $0x6d0] sm:$0xff] }
  0x6e   :  { %18595 = vst [vmem:[#allocation222_spill] sm:$0xff] %v10821_v56  ;;  %18596 = vst [vmem:[#allocation223_spill] sm:$0xff] %v10826_v62  ;;  %v10836_v58 = vld [vmem:[%s18263_s2 + $0x6d8] sm:$0xff]  ;;  %v10841_v60 = vld [vmem:[%s18263_s2 + $0x6e0] sm:$0xff] }
  0x6f   :  { %18597 = vst [vmem:[#allocation224_spill] sm:$0xff] %v10831_v63  ;;  %18598 = vst [vmem:[#allocation225_spill] sm:$0xff] %v10836_v58  ;;  %v10846_v56 = vld [vmem:[%s18263_s2 + $0x6e8] sm:$0xff]  ;;  %v10851_v62 = vld [vmem:[%s18263_s2 + $0x6f0] sm:$0xff] }
  0x70   :  { %18599 = vst [vmem:[#allocation226_spill] sm:$0xff] %v10841_v60  ;;  %18600 = vst [vmem:[#allocation227_spill] sm:$0xff] %v10846_v56  ;;  %v10856_v63 = vld [vmem:[%s18263_s2 + $0x6f8] sm:$0xff]  ;;  %v10861_v58 = vld [vmem:[%s18263_s2 + $0x700] sm:$0xff] }
  0x71   :  { %18601 = vst [vmem:[#allocation228_spill] sm:$0xff] %v10851_v62  ;;  %18602 = vst [vmem:[#allocation229_spill] sm:$0xff] %v10856_v63  ;;  %v10866_v60 = vld [vmem:[%s18263_s2 + $0x708] sm:$0xff]  ;;  %v10871_v56 = vld [vmem:[%s18263_s2 + $0x710] sm:$0xff] }
  0x72   :  { %18603 = vst [vmem:[#allocation230_spill] sm:$0xff] %v10861_v58  ;;  %18604 = vst [vmem:[#allocation231_spill] sm:$0xff] %v10866_v60  ;;  %v10876_v62 = vld [vmem:[%s18263_s2 + $0x718] sm:$0xff]  ;;  %v10881_v63 = vld [vmem:[%s18263_s2 + $0x720] sm:$0xff] }
  0x73   :  { %18605 = vst [vmem:[#allocation232_spill] sm:$0xff] %v10871_v56  ;;  %18606 = vst [vmem:[#allocation233_spill] sm:$0xff] %v10876_v62  ;;  %v10886_v58 = vld [vmem:[%s18263_s2 + $0x728] sm:$0xff]  ;;  %v10891_v60 = vld [vmem:[%s18263_s2 + $0x730] sm:$0xff] }
  0x74   :  { %18607 = vst [vmem:[#allocation234_spill] sm:$0xff] %v10881_v63  ;;  %18608 = vst [vmem:[#allocation235_spill] sm:$0xff] %v10886_v58  ;;  %v10896_v56 = vld [vmem:[%s18263_s2 + $0x738] sm:$0xff]  ;;  %v10901_v62 = vld [vmem:[%s18263_s2 + $0x740] sm:$0xff] }
  0x75   :  { %18609 = vst [vmem:[#allocation236_spill] sm:$0xff] %v10891_v60  ;;  %18610 = vst [vmem:[#allocation237_spill] sm:$0xff] %v10896_v56  ;;  %v10906_v63 = vld [vmem:[%s18263_s2 + $0x748] sm:$0xff]  ;;  %v10911_v58 = vld [vmem:[%s18263_s2 + $0x750] sm:$0xff] }
  0x76   :  { %18611 = vst [vmem:[#allocation238_spill] sm:$0xff] %v10901_v62  ;;  %18612 = vst [vmem:[#allocation239_spill] sm:$0xff] %v10906_v63  ;;  %v10916_v60 = vld [vmem:[%s18263_s2 + $0x758] sm:$0xff]  ;;  %v10921_v56 = vld [vmem:[%s18263_s2 + $0x760] sm:$0xff] }
  0x77   :  { %18613 = vst [vmem:[#allocation240_spill] sm:$0xff] %v10911_v58  ;;  %18614 = vst [vmem:[#allocation241_spill] sm:$0xff] %v10916_v60  ;;  %v10926_v62 = vld [vmem:[%s18263_s2 + $0x768] sm:$0xff]  ;;  %v10931_v63 = vld [vmem:[%s18263_s2 + $0x770] sm:$0xff] }
  0x78   :  { %18615 = vst [vmem:[#allocation242_spill] sm:$0xff] %v10921_v56  ;;  %18616 = vst [vmem:[#allocation243_spill] sm:$0xff] %v10926_v62  ;;  %v10936_v58 = vld [vmem:[%s18263_s2 + $0x778] sm:$0xff]  ;;  %v10941_v60 = vld [vmem:[%s18263_s2 + $0x780] sm:$0xff] }
  0x79   :  { %18617 = vst [vmem:[#allocation244_spill] sm:$0xff] %v10931_v63  ;;  %18618 = vst [vmem:[#allocation245_spill] sm:$0xff] %v10936_v58  ;;  %v10946_v56 = vld [vmem:[%s18263_s2 + $0x788] sm:$0xff]  ;;  %v10951_v62 = vld [vmem:[%s18263_s2 + $0x790] sm:$0xff] }
  0x7a   :  { %18619 = vst [vmem:[#allocation246_spill] sm:$0xff] %v10941_v60  ;;  %18620 = vst [vmem:[#allocation247_spill] sm:$0xff] %v10946_v56  ;;  %v10956_v63 = vld [vmem:[%s18263_s2 + $0x798] sm:$0xff]  ;;  %v10961_v58 = vld [vmem:[%s18263_s2 + $0x7a0] sm:$0xff] }
  0x7b   :  { %18621 = vst [vmem:[#allocation248_spill] sm:$0xff] %v10951_v62  ;;  %18622 = vst [vmem:[#allocation249_spill] sm:$0xff] %v10956_v63  ;;  %v10966_v60 = vld [vmem:[%s18263_s2 + $0x7a8] sm:$0xff]  ;;  %v10971_v56 = vld [vmem:[%s18263_s2 + $0x7b0] sm:$0xff] }
  0x7c   :  { %18623 = vst [vmem:[#allocation250_spill] sm:$0xff] %v10961_v58  ;;  %18624 = vst [vmem:[#allocation251_spill] sm:$0xff] %v10966_v60  ;;  %v10976_v62 = vld [vmem:[%s18263_s2 + $0x7b8] sm:$0xff]  ;;  %v10981_v63 = vld [vmem:[%s18263_s2 + $0x7c0] sm:$0xff] }
  0x7d   :  { %18625 = vst [vmem:[#allocation252_spill] sm:$0xff] %v10971_v56  ;;  %18626 = vst [vmem:[#allocation253_spill] sm:$0xff] %v10976_v62  ;;  %v10986_v58 = vld [vmem:[%s18263_s2 + $0x7c8] sm:$0xff]  ;;  %v10991_v60 = vld [vmem:[%s18263_s2 + $0x7d0] sm:$0xff] }
  0x7e   :  { %18627 = vst [vmem:[#allocation254_spill] sm:$0xff] %v10981_v63  ;;  %18628 = vst [vmem:[#allocation255_spill] sm:$0xff] %v10986_v58  ;;  %v10996_v56 = vld [vmem:[%s18263_s2 + $0x7d8] sm:$0xff]  ;;  %v11001_v62 = vld [vmem:[%s18263_s2 + $0x7e0] sm:$0xff] }
  0x7f   :  { %18629 = vst [vmem:[#allocation256_spill] sm:$0xff] %v10991_v60  ;;  %18630 = vst [vmem:[#allocation257_spill] sm:$0xff] %v10996_v56  ;;  %v11006_v63 = vld [vmem:[%s18263_s2 + $0x7e8] sm:$0xff]  ;;  %v11011_v58 = vld [vmem:[%s18263_s2 + $0x7f0] sm:$0xff] }
  0x80   :  { %18631 = vst [vmem:[#allocation258_spill] sm:$0xff] %v11001_v62  ;;  %18632 = vst [vmem:[#allocation259_spill] sm:$0xff] %v11006_v63  ;;  %v11016_v60 = vld [vmem:[%s18263_s2 + $0x7f8] sm:$0xff]  ;;  %v11021_v56 = vld [vmem:[%s18263_s2 + $0x800] sm:$0xff] }
  0x81   :  { %18633 = vst [vmem:[#allocation260_spill] sm:$0xff] %v11011_v58  ;;  %18634 = vst [vmem:[#allocation261_spill] sm:$0xff] %v11016_v60  ;;  %v11026_v62 = vld [vmem:[%s18263_s2 + $0x808] sm:$0xff]  ;;  %v11031_v63 = vld [vmem:[%s18263_s2 + $0x810] sm:$0xff] }
  0x82   :  { %18635 = vst [vmem:[#allocation262_spill] sm:$0xff] %v11021_v56  ;;  %18636 = vst [vmem:[#allocation263_spill] sm:$0xff] %v11026_v62  ;;  %v11036_v58 = vld [vmem:[%s18263_s2 + $0x818] sm:$0xff]  ;;  %v11041_v60 = vld [vmem:[%s18263_s2 + $0x820] sm:$0xff] }
  0x83   :  { %18637 = vst [vmem:[#allocation264_spill] sm:$0xff] %v11031_v63  ;;  %18638 = vst [vmem:[#allocation265_spill] sm:$0xff] %v11036_v58  ;;  %v11046_v56 = vld [vmem:[%s18263_s2 + $0x828] sm:$0xff]  ;;  %v11051_v62 = vld [vmem:[%s18263_s2 + $0x830] sm:$0xff] }
  0x84   :  { %18639 = vst [vmem:[#allocation266_spill] sm:$0xff] %v11041_v60  ;;  %18640 = vst [vmem:[#allocation267_spill] sm:$0xff] %v11046_v56  ;;  %v11056_v63 = vld [vmem:[%s18263_s2 + $0x838] sm:$0xff]  ;;  %v11061_v58 = vld [vmem:[%s18263_s2 + $0x840] sm:$0xff] }
  0x85   :  { %18641 = vst [vmem:[#allocation268_spill] sm:$0xff] %v11051_v62  ;;  %18642 = vst [vmem:[#allocation269_spill] sm:$0xff] %v11056_v63  ;;  %v11066_v60 = vld [vmem:[%s18263_s2 + $0x848] sm:$0xff]  ;;  %v11071_v56 = vld [vmem:[%s18263_s2 + $0x850] sm:$0xff] }
  0x86   :  { %18643 = vst [vmem:[#allocation270_spill] sm:$0xff] %v11061_v58  ;;  %18644 = vst [vmem:[#allocation271_spill] sm:$0xff] %v11066_v60  ;;  %v11076_v62 = vld [vmem:[%s18263_s2 + $0x858] sm:$0xff]  ;;  %v11081_v63 = vld [vmem:[%s18263_s2 + $0x860] sm:$0xff] }
  0x87   :  { %18645 = vst [vmem:[#allocation272_spill] sm:$0xff] %v11071_v56  ;;  %18646 = vst [vmem:[#allocation273_spill] sm:$0xff] %v11076_v62  ;;  %v11086_v58 = vld [vmem:[%s18263_s2 + $0x868] sm:$0xff]  ;;  %v11091_v60 = vld [vmem:[%s18263_s2 + $0x870] sm:$0xff] }
  0x88   :  { %18647 = vst [vmem:[#allocation274_spill] sm:$0xff] %v11081_v63  ;;  %18648 = vst [vmem:[#allocation275_spill] sm:$0xff] %v11086_v58  ;;  %v11096_v56 = vld [vmem:[%s18263_s2 + $0x878] sm:$0xff]  ;;  %v11101_v62 = vld [vmem:[%s18263_s2 + $0x880] sm:$0xff] }
  0x89   :  { %18649 = vst [vmem:[#allocation276_spill] sm:$0xff] %v11091_v60  ;;  %18650 = vst [vmem:[#allocation277_spill] sm:$0xff] %v11096_v56  ;;  %v11106_v63 = vld [vmem:[%s18263_s2 + $0x888] sm:$0xff]  ;;  %v11111_v58 = vld [vmem:[%s18263_s2 + $0x890] sm:$0xff] }
  0x8a   :  { %18651 = vst [vmem:[#allocation278_spill] sm:$0xff] %v11101_v62  ;;  %18652 = vst [vmem:[#allocation279_spill] sm:$0xff] %v11106_v63  ;;  %v11116_v60 = vld [vmem:[%s18263_s2 + $0x898] sm:$0xff]  ;;  %v11121_v56 = vld [vmem:[%s18263_s2 + $0x8a0] sm:$0xff] }
  0x8b   :  { %18653 = vst [vmem:[#allocation280_spill] sm:$0xff] %v11111_v58  ;;  %18654 = vst [vmem:[#allocation281_spill] sm:$0xff] %v11116_v60  ;;  %v11126_v62 = vld [vmem:[%s18263_s2 + $0x8a8] sm:$0xff]  ;;  %v11131_v63 = vld [vmem:[%s18263_s2 + $0x8b0] sm:$0xff] }
  0x8c   :  { %18655 = vst [vmem:[#allocation282_spill] sm:$0xff] %v11121_v56  ;;  %18656 = vst [vmem:[#allocation283_spill] sm:$0xff] %v11126_v62  ;;  %v11136_v58 = vld [vmem:[%s18263_s2 + $0x8b8] sm:$0xff]  ;;  %v11141_v60 = vld [vmem:[%s18263_s2 + $0x8c0] sm:$0xff] }
  0x8d   :  { %18657 = vst [vmem:[#allocation284_spill] sm:$0xff] %v11131_v63  ;;  %18658 = vst [vmem:[#allocation285_spill] sm:$0xff] %v11136_v58  ;;  %v11146_v56 = vld [vmem:[%s18263_s2 + $0x8c8] sm:$0xff]  ;;  %v11151_v62 = vld [vmem:[%s18263_s2 + $0x8d0] sm:$0xff] }
  0x8e   :  { %18659 = vst [vmem:[#allocation286_spill] sm:$0xff] %v11141_v60  ;;  %18660 = vst [vmem:[#allocation287_spill] sm:$0xff] %v11146_v56  ;;  %v11156_v63 = vld [vmem:[%s18263_s2 + $0x8d8] sm:$0xff]  ;;  %v11161_v58 = vld [vmem:[%s18263_s2 + $0x8e0] sm:$0xff] }
  0x8f   :  { %18661 = vst [vmem:[#allocation288_spill] sm:$0xff] %v11151_v62  ;;  %18662 = vst [vmem:[#allocation289_spill] sm:$0xff] %v11156_v63  ;;  %v11166_v60 = vld [vmem:[%s18263_s2 + $0x8e8] sm:$0xff]  ;;  %v11171_v56 = vld [vmem:[%s18263_s2 + $0x8f0] sm:$0xff] }
  0x90   :  { %18663 = vst [vmem:[#allocation290_spill] sm:$0xff] %v11161_v58  ;;  %18664 = vst [vmem:[#allocation291_spill] sm:$0xff] %v11166_v60  ;;  %v11176_v62 = vld [vmem:[%s18263_s2 + $0x8f8] sm:$0xff]  ;;  %v11181_v63 = vld [vmem:[%s18263_s2 + $0x900] sm:$0xff] }
  0x91   :  { %18665 = vst [vmem:[#allocation292_spill] sm:$0xff] %v11171_v56  ;;  %18666 = vst [vmem:[#allocation293_spill] sm:$0xff] %v11176_v62  ;;  %v11186_v58 = vld [vmem:[%s18263_s2 + $0x908] sm:$0xff]  ;;  %v11191_v60 = vld [vmem:[%s18263_s2 + $0x910] sm:$0xff] }
  0x92   :  { %18667 = vst [vmem:[#allocation294_spill] sm:$0xff] %v11181_v63  ;;  %18668 = vst [vmem:[#allocation295_spill] sm:$0xff] %v11186_v58  ;;  %v11196_v56 = vld [vmem:[%s18263_s2 + $0x918] sm:$0xff]  ;;  %v11201_v62 = vld [vmem:[%s18263_s2 + $0x920] sm:$0xff] }
  0x93   :  { %18669 = vst [vmem:[#allocation296_spill] sm:$0xff] %v11191_v60  ;;  %18670 = vst [vmem:[#allocation297_spill] sm:$0xff] %v11196_v56  ;;  %v11206_v63 = vld [vmem:[%s18263_s2 + $0x928] sm:$0xff]  ;;  %v11211_v58 = vld [vmem:[%s18263_s2 + $0x930] sm:$0xff] }
  0x94   :  { %18671 = vst [vmem:[#allocation298_spill] sm:$0xff] %v11201_v62  ;;  %18672 = vst [vmem:[#allocation299_spill] sm:$0xff] %v11206_v63  ;;  %v11216_v60 = vld [vmem:[%s18263_s2 + $0x938] sm:$0xff]  ;;  %v11221_v56 = vld [vmem:[%s18263_s2 + $0x940] sm:$0xff] }
  0x95   :  { %18673 = vst [vmem:[#allocation300_spill] sm:$0xff] %v11211_v58  ;;  %18674 = vst [vmem:[#allocation301_spill] sm:$0xff] %v11216_v60  ;;  %v11226_v62 = vld [vmem:[%s18263_s2 + $0x948] sm:$0xff]  ;;  %v11231_v63 = vld [vmem:[%s18263_s2 + $0x950] sm:$0xff] }
  0x96   :  { %18675 = vst [vmem:[#allocation302_spill] sm:$0xff] %v11221_v56  ;;  %18676 = vst [vmem:[#allocation303_spill] sm:$0xff] %v11226_v62  ;;  %v11236_v58 = vld [vmem:[%s18263_s2 + $0x958] sm:$0xff]  ;;  %v11241_v60 = vld [vmem:[%s18263_s2 + $0x960] sm:$0xff] }
  0x97   :  { %18677 = vst [vmem:[#allocation304_spill] sm:$0xff] %v11231_v63  ;;  %18678 = vst [vmem:[#allocation305_spill] sm:$0xff] %v11236_v58  ;;  %v11246_v56 = vld [vmem:[%s18263_s2 + $0x968] sm:$0xff]  ;;  %v11251_v62 = vld [vmem:[%s18263_s2 + $0x970] sm:$0xff] }
  0x98   :  { %18679 = vst [vmem:[#allocation306_spill] sm:$0xff] %v11241_v60  ;;  %18680 = vst [vmem:[#allocation307_spill] sm:$0xff] %v11246_v56  ;;  %v11256_v63 = vld [vmem:[%s18263_s2 + $0x978] sm:$0xff]  ;;  %v11261_v58 = vld [vmem:[%s18263_s2 + $0x980] sm:$0xff] }
  0x99   :  { %18681 = vst [vmem:[#allocation308_spill] sm:$0xff] %v11251_v62  ;;  %18682 = vst [vmem:[#allocation309_spill] sm:$0xff] %v11256_v63  ;;  %v11266_v60 = vld [vmem:[%s18263_s2 + $0x988] sm:$0xff]  ;;  %v11271_v56 = vld [vmem:[%s18263_s2 + $0x990] sm:$0xff] }
  0x9a   :  { %18683 = vst [vmem:[#allocation310_spill] sm:$0xff] %v11261_v58  ;;  %18684 = vst [vmem:[#allocation311_spill] sm:$0xff] %v11266_v60  ;;  %v11276_v62 = vld [vmem:[%s18263_s2 + $0x998] sm:$0xff]  ;;  %v11281_v63 = vld [vmem:[%s18263_s2 + $0x9a0] sm:$0xff] }
  0x9b   :  { %18685 = vst [vmem:[#allocation312_spill] sm:$0xff] %v11271_v56  ;;  %18686 = vst [vmem:[#allocation313_spill] sm:$0xff] %v11276_v62  ;;  %v11286_v58 = vld [vmem:[%s18263_s2 + $0x9a8] sm:$0xff]  ;;  %v11291_v60 = vld [vmem:[%s18263_s2 + $0x9b0] sm:$0xff] }
  0x9c   :  { %18687 = vst [vmem:[#allocation314_spill] sm:$0xff] %v11281_v63  ;;  %18688 = vst [vmem:[#allocation315_spill] sm:$0xff] %v11286_v58  ;;  %v11296_v56 = vld [vmem:[%s18263_s2 + $0x9b8] sm:$0xff]  ;;  %v11301_v62 = vld [vmem:[%s18263_s2 + $0x9c0] sm:$0xff] }
  0x9d   :  { %18689 = vst [vmem:[#allocation316_spill] sm:$0xff] %v11291_v60  ;;  %18690 = vst [vmem:[#allocation317_spill] sm:$0xff] %v11296_v56  ;;  %v11306_v63 = vld [vmem:[%s18263_s2 + $0x9c8] sm:$0xff]  ;;  %v11311_v58 = vld [vmem:[%s18263_s2 + $0x9d0] sm:$0xff] }
  0x9e   :  { %18691 = vst [vmem:[#allocation318_spill] sm:$0xff] %v11301_v62  ;;  %18692 = vst [vmem:[#allocation319_spill] sm:$0xff] %v11306_v63  ;;  %v11316_v60 = vld [vmem:[%s18263_s2 + $0x9d8] sm:$0xff]  ;;  %v11321_v56 = vld [vmem:[%s18263_s2 + $0x9e0] sm:$0xff] }
  0x9f   :  { %18693 = vst [vmem:[#allocation320_spill] sm:$0xff] %v11311_v58  ;;  %18694 = vst [vmem:[#allocation321_spill] sm:$0xff] %v11316_v60  ;;  %v11326_v62 = vld [vmem:[%s18263_s2 + $0x9e8] sm:$0xff]  ;;  %v11331_v63 = vld [vmem:[%s18263_s2 + $0x9f0] sm:$0xff] }
  0xa0   :  { %18695 = vst [vmem:[#allocation322_spill] sm:$0xff] %v11321_v56  ;;  %18696 = vst [vmem:[#allocation323_spill] sm:$0xff] %v11326_v62  ;;  %v11336_v58 = vld [vmem:[%s18263_s2 + $0x9f8] sm:$0xff]  ;;  %v11341_v60 = vld [vmem:[%s18263_s2 + $0xa00] sm:$0xff] }
  0xa1   :  { %18697 = vst [vmem:[#allocation324_spill] sm:$0xff] %v11331_v63  ;;  %18698 = vst [vmem:[#allocation325_spill] sm:$0xff] %v11336_v58  ;;  %v11346_v56 = vld [vmem:[%s18263_s2 + $0xa08] sm:$0xff]  ;;  %v11351_v62 = vld [vmem:[%s18263_s2 + $0xa10] sm:$0xff] }
  0xa2   :  { %18699 = vst [vmem:[#allocation326_spill] sm:$0xff] %v11341_v60  ;;  %18700 = vst [vmem:[#allocation327_spill] sm:$0xff] %v11346_v56  ;;  %v11356_v63 = vld [vmem:[%s18263_s2 + $0xa18] sm:$0xff]  ;;  %v11361_v58 = vld [vmem:[%s18263_s2 + $0xa20] sm:$0xff] }
  0xa3   :  { %18701 = vst [vmem:[#allocation328_spill] sm:$0xff] %v11351_v62  ;;  %18702 = vst [vmem:[#allocation329_spill] sm:$0xff] %v11356_v63  ;;  %v11366_v60 = vld [vmem:[%s18263_s2 + $0xa28] sm:$0xff]  ;;  %v11371_v56 = vld [vmem:[%s18263_s2 + $0xa30] sm:$0xff] }
  0xa4   :  { %18703 = vst [vmem:[#allocation330_spill] sm:$0xff] %v11361_v58  ;;  %18704 = vst [vmem:[#allocation331_spill] sm:$0xff] %v11366_v60  ;;  %v11376_v62 = vld [vmem:[%s18263_s2 + $0xa38] sm:$0xff]  ;;  %v11381_v63 = vld [vmem:[%s18263_s2 + $0xa40] sm:$0xff] }
  0xa5   :  { %18705 = vst [vmem:[#allocation332_spill] sm:$0xff] %v11371_v56  ;;  %18706 = vst [vmem:[#allocation333_spill] sm:$0xff] %v11376_v62  ;;  %v11386_v58 = vld [vmem:[%s18263_s2 + $0xa48] sm:$0xff]  ;;  %v11391_v60 = vld [vmem:[%s18263_s2 + $0xa50] sm:$0xff] }
  0xa6   :  { %18707 = vst [vmem:[#allocation334_spill] sm:$0xff] %v11381_v63  ;;  %18708 = vst [vmem:[#allocation335_spill] sm:$0xff] %v11386_v58  ;;  %v11396_v56 = vld [vmem:[%s18263_s2 + $0xa58] sm:$0xff]  ;;  %v11401_v62 = vld [vmem:[%s18263_s2 + $0xa60] sm:$0xff] }
  0xa7   :  { %18709 = vst [vmem:[#allocation336_spill] sm:$0xff] %v11391_v60  ;;  %18710 = vst [vmem:[#allocation337_spill] sm:$0xff] %v11396_v56  ;;  %v11406_v63 = vld [vmem:[%s18263_s2 + $0xa68] sm:$0xff]  ;;  %v11411_v58 = vld [vmem:[%s18263_s2 + $0xa70] sm:$0xff] }
  0xa8   :  { %18711 = vst [vmem:[#allocation338_spill] sm:$0xff] %v11401_v62  ;;  %18712 = vst [vmem:[#allocation339_spill] sm:$0xff] %v11406_v63  ;;  %v11416_v60 = vld [vmem:[%s18263_s2 + $0xa78] sm:$0xff]  ;;  %v11421_v56 = vld [vmem:[%s18263_s2 + $0xa80] sm:$0xff] }
  0xa9   :  { %18713 = vst [vmem:[#allocation340_spill] sm:$0xff] %v11411_v58  ;;  %18714 = vst [vmem:[#allocation341_spill] sm:$0xff] %v11416_v60  ;;  %v11426_v62 = vld [vmem:[%s18263_s2 + $0xa88] sm:$0xff]  ;;  %v11431_v63 = vld [vmem:[%s18263_s2 + $0xa90] sm:$0xff] }
  0xaa   :  { %18715 = vst [vmem:[#allocation342_spill] sm:$0xff] %v11421_v56  ;;  %18716 = vst [vmem:[#allocation343_spill] sm:$0xff] %v11426_v62  ;;  %v11436_v58 = vld [vmem:[%s18263_s2 + $0xa98] sm:$0xff]  ;;  %v11441_v60 = vld [vmem:[%s18263_s2 + $0xaa0] sm:$0xff] }
  0xab   :  { %18717 = vst [vmem:[#allocation344_spill] sm:$0xff] %v11431_v63  ;;  %18718 = vst [vmem:[#allocation345_spill] sm:$0xff] %v11436_v58  ;;  %v11446_v56 = vld [vmem:[%s18263_s2 + $0xaa8] sm:$0xff]  ;;  %v11451_v62 = vld [vmem:[%s18263_s2 + $0xab0] sm:$0xff] }
  0xac   :  { %18719 = vst [vmem:[#allocation346_spill] sm:$0xff] %v11441_v60  ;;  %18720 = vst [vmem:[#allocation347_spill] sm:$0xff] %v11446_v56  ;;  %v11456_v63 = vld [vmem:[%s18263_s2 + $0xab8] sm:$0xff]  ;;  %v11461_v58 = vld [vmem:[%s18263_s2 + $0xac0] sm:$0xff] }
  0xad   :  { %18721 = vst [vmem:[#allocation348_spill] sm:$0xff] %v11451_v62  ;;  %18722 = vst [vmem:[#allocation349_spill] sm:$0xff] %v11456_v63  ;;  %v11466_v60 = vld [vmem:[%s18263_s2 + $0xac8] sm:$0xff]  ;;  %v11471_v56 = vld [vmem:[%s18263_s2 + $0xad0] sm:$0xff] }
  0xae   :  { %18723 = vst [vmem:[#allocation350_spill] sm:$0xff] %v11461_v58  ;;  %18724 = vst [vmem:[#allocation351_spill] sm:$0xff] %v11466_v60  ;;  %v11476_v62 = vld [vmem:[%s18263_s2 + $0xad8] sm:$0xff]  ;;  %v11481_v63 = vld [vmem:[%s18263_s2 + $0xae0] sm:$0xff] }
  0xaf   :  { %18725 = vst [vmem:[#allocation352_spill] sm:$0xff] %v11471_v56  ;;  %18726 = vst [vmem:[#allocation353_spill] sm:$0xff] %v11476_v62  ;;  %v11486_v58 = vld [vmem:[%s18263_s2 + $0xae8] sm:$0xff]  ;;  %v11491_v60 = vld [vmem:[%s18263_s2 + $0xaf0] sm:$0xff] }
  0xb0   :  { %18727 = vst [vmem:[#allocation354_spill] sm:$0xff] %v11481_v63  ;;  %18728 = vst [vmem:[#allocation355_spill] sm:$0xff] %v11486_v58  ;;  %v11496_v56 = vld [vmem:[%s18263_s2 + $0xaf8] sm:$0xff]  ;;  %v11501_v62 = vld [vmem:[%s18263_s2 + $0xb00] sm:$0xff] }
  0xb1   :  { %18729 = vst [vmem:[#allocation356_spill] sm:$0xff] %v11491_v60  ;;  %18730 = vst [vmem:[#allocation357_spill] sm:$0xff] %v11496_v56  ;;  %v11506_v63 = vld [vmem:[%s18263_s2 + $0xb08] sm:$0xff]  ;;  %v11511_v58 = vld [vmem:[%s18263_s2 + $0xb10] sm:$0xff] }
  0xb2   :  { %18731 = vst [vmem:[#allocation358_spill] sm:$0xff] %v11501_v62  ;;  %18732 = vst [vmem:[#allocation359_spill] sm:$0xff] %v11506_v63  ;;  %v11516_v60 = vld [vmem:[%s18263_s2 + $0xb18] sm:$0xff]  ;;  %v11521_v56 = vld [vmem:[%s18263_s2 + $0xb20] sm:$0xff] }
  0xb3   :  { %18733 = vst [vmem:[#allocation360_spill] sm:$0xff] %v11511_v58  ;;  %18734 = vst [vmem:[#allocation361_spill] sm:$0xff] %v11516_v60  ;;  %v11526_v62 = vld [vmem:[%s18263_s2 + $0xb28] sm:$0xff]  ;;  %v11531_v63 = vld [vmem:[%s18263_s2 + $0xb30] sm:$0xff] }
  0xb4   :  { %18735 = vst [vmem:[#allocation362_spill] sm:$0xff] %v11521_v56  ;;  %18736 = vst [vmem:[#allocation363_spill] sm:$0xff] %v11526_v62  ;;  %v11536_v58 = vld [vmem:[%s18263_s2 + $0xb38] sm:$0xff]  ;;  %v11541_v60 = vld [vmem:[%s18263_s2 + $0xb40] sm:$0xff] }
  0xb5   :  { %18737 = vst [vmem:[#allocation364_spill] sm:$0xff] %v11531_v63  ;;  %18738 = vst [vmem:[#allocation365_spill] sm:$0xff] %v11536_v58  ;;  %v11546_v56 = vld [vmem:[%s18263_s2 + $0xb48] sm:$0xff]  ;;  %v11551_v62 = vld [vmem:[%s18263_s2 + $0xb50] sm:$0xff] }
  0xb6   :  { %18739 = vst [vmem:[#allocation366_spill] sm:$0xff] %v11541_v60  ;;  %18740 = vst [vmem:[#allocation367_spill] sm:$0xff] %v11546_v56  ;;  %v11556_v63 = vld [vmem:[%s18263_s2 + $0xb58] sm:$0xff]  ;;  %v11561_v58 = vld [vmem:[%s18263_s2 + $0xb60] sm:$0xff] }
  0xb7   :  { %18741 = vst [vmem:[#allocation368_spill] sm:$0xff] %v11551_v62  ;;  %18742 = vst [vmem:[#allocation369_spill] sm:$0xff] %v11556_v63  ;;  %v11566_v60 = vld [vmem:[%s18263_s2 + $0xb68] sm:$0xff]  ;;  %v11571_v56 = vld [vmem:[%s18263_s2 + $0xb70] sm:$0xff] }
  0xb8   :  { %18743 = vst [vmem:[#allocation370_spill] sm:$0xff] %v11561_v58  ;;  %18744 = vst [vmem:[#allocation371_spill] sm:$0xff] %v11566_v60  ;;  %v11576_v62 = vld [vmem:[%s18263_s2 + $0xb78] sm:$0xff]  ;;  %v11581_v63 = vld [vmem:[%s18263_s2 + $0xb80] sm:$0xff] }
  0xb9   :  { %18745 = vst [vmem:[#allocation372_spill] sm:$0xff] %v11571_v56  ;;  %18746 = vst [vmem:[#allocation373_spill] sm:$0xff] %v11576_v62  ;;  %v11586_v58 = vld [vmem:[%s18263_s2 + $0xb88] sm:$0xff]  ;;  %v11591_v60 = vld [vmem:[%s18263_s2 + $0xb90] sm:$0xff] }
  0xba   :  { %18747 = vst [vmem:[#allocation374_spill] sm:$0xff] %v11581_v63  ;;  %18748 = vst [vmem:[#allocation375_spill] sm:$0xff] %v11586_v58  ;;  %v11596_v56 = vld [vmem:[%s18263_s2 + $0xb98] sm:$0xff]  ;;  %v11601_v62 = vld [vmem:[%s18263_s2 + $0xba0] sm:$0xff] }
  0xbb   :  { %18749 = vst [vmem:[#allocation376_spill] sm:$0xff] %v11591_v60  ;;  %18750 = vst [vmem:[#allocation377_spill] sm:$0xff] %v11596_v56  ;;  %v11606_v63 = vld [vmem:[%s18263_s2 + $0xba8] sm:$0xff]  ;;  %v11611_v58 = vld [vmem:[%s18263_s2 + $0xbb0] sm:$0xff] }
  0xbc   :  { %18751 = vst [vmem:[#allocation378_spill] sm:$0xff] %v11601_v62  ;;  %18752 = vst [vmem:[#allocation379_spill] sm:$0xff] %v11606_v63  ;;  %v11616_v60 = vld [vmem:[%s18263_s2 + $0xbb8] sm:$0xff]  ;;  %v11621_v56 = vld [vmem:[%s18263_s2 + $0xbc0] sm:$0xff] }
  0xbd   :  { %18753 = vst [vmem:[#allocation380_spill] sm:$0xff] %v11611_v58  ;;  %18754 = vst [vmem:[#allocation381_spill] sm:$0xff] %v11616_v60  ;;  %v11626_v62 = vld [vmem:[%s18263_s2 + $0xbc8] sm:$0xff]  ;;  %v11631_v63 = vld [vmem:[%s18263_s2 + $0xbd0] sm:$0xff] }
  0xbe   :  { %18755 = vst [vmem:[#allocation382_spill] sm:$0xff] %v11621_v56  ;;  %18756 = vst [vmem:[#allocation383_spill] sm:$0xff] %v11626_v62  ;;  %v11636_v58 = vld [vmem:[%s18263_s2 + $0xbd8] sm:$0xff]  ;;  %v11641_v60 = vld [vmem:[%s18263_s2 + $0xbe0] sm:$0xff] }
  0xbf   :  { %18757 = vst [vmem:[#allocation384_spill] sm:$0xff] %v11631_v63  ;;  %18758 = vst [vmem:[#allocation385_spill] sm:$0xff] %v11636_v58  ;;  %v11646_v56 = vld [vmem:[%s18263_s2 + $0xbe8] sm:$0xff]  ;;  %v11651_v62 = vld [vmem:[%s18263_s2 + $0xbf0] sm:$0xff] }
  0xc0   :  { %18759 = vst [vmem:[#allocation386_spill] sm:$0xff] %v11641_v60  ;;  %18760 = vst [vmem:[#allocation387_spill] sm:$0xff] %v11646_v56  ;;  %v11656_v63 = vld [vmem:[%s18263_s2 + $0xbf8] sm:$0xff]  ;;  %v11661_v58 = vld [vmem:[%s18263_s2 + $0xc00] sm:$0xff] }
  0xc1   :  { %18761 = vst [vmem:[#allocation388_spill] sm:$0xff] %v11651_v62  ;;  %18762 = vst [vmem:[#allocation389_spill] sm:$0xff] %v11656_v63  ;;  %v11666_v60 = vld [vmem:[%s18263_s2 + $0xc08] sm:$0xff]  ;;  %v11671_v56 = vld [vmem:[%s18263_s2 + $0xc10] sm:$0xff] }
  0xc2   :  { %18763 = vst [vmem:[#allocation390_spill] sm:$0xff] %v11661_v58  ;;  %18764 = vst [vmem:[#allocation391_spill] sm:$0xff] %v11666_v60  ;;  %v11676_v62 = vld [vmem:[%s18263_s2 + $0xc18] sm:$0xff]  ;;  %v11681_v63 = vld [vmem:[%s18263_s2 + $0xc20] sm:$0xff] }
  0xc3   :  { %18765 = vst [vmem:[#allocation392_spill] sm:$0xff] %v11671_v56  ;;  %18766 = vst [vmem:[#allocation393_spill] sm:$0xff] %v11676_v62  ;;  %v11686_v58 = vld [vmem:[%s18263_s2 + $0xc28] sm:$0xff]  ;;  %v11691_v60 = vld [vmem:[%s18263_s2 + $0xc30] sm:$0xff] }
  0xc4   :  { %18767 = vst [vmem:[#allocation394_spill] sm:$0xff] %v11681_v63  ;;  %18768 = vst [vmem:[#allocation395_spill] sm:$0xff] %v11686_v58  ;;  %v11696_v56 = vld [vmem:[%s18263_s2 + $0xc38] sm:$0xff]  ;;  %v11701_v62 = vld [vmem:[%s18263_s2 + $0xc40] sm:$0xff] }
  0xc5   :  { %18769 = vst [vmem:[#allocation396_spill] sm:$0xff] %v11691_v60  ;;  %18770 = vst [vmem:[#allocation397_spill] sm:$0xff] %v11696_v56  ;;  %v11706_v63 = vld [vmem:[%s18263_s2 + $0xc48] sm:$0xff]  ;;  %v11711_v58 = vld [vmem:[%s18263_s2 + $0xc50] sm:$0xff] }
  0xc6   :  { %18771 = vst [vmem:[#allocation398_spill] sm:$0xff] %v11701_v62  ;;  %18772 = vst [vmem:[#allocation399_spill] sm:$0xff] %v11706_v63  ;;  %v11716_v60 = vld [vmem:[%s18263_s2 + $0xc58] sm:$0xff]  ;;  %v11721_v56 = vld [vmem:[%s18263_s2 + $0xc60] sm:$0xff] }
  0xc7   :  { %18773 = vst [vmem:[#allocation400_spill] sm:$0xff] %v11711_v58  ;;  %18774 = vst [vmem:[#allocation401_spill] sm:$0xff] %v11716_v60  ;;  %v11726_v62 = vld [vmem:[%s18263_s2 + $0xc68] sm:$0xff]  ;;  %v11731_v63 = vld [vmem:[%s18263_s2 + $0xc70] sm:$0xff] }
  0xc8   :  { %18775 = vst [vmem:[#allocation402_spill] sm:$0xff] %v11721_v56  ;;  %18776 = vst [vmem:[#allocation403_spill] sm:$0xff] %v11726_v62  ;;  %v11736_v58 = vld [vmem:[%s18263_s2 + $0xc78] sm:$0xff]  ;;  %v11741_v60 = vld [vmem:[%s18263_s2 + $0xc80] sm:$0xff] }
  0xc9   :  { %18777 = vst [vmem:[#allocation404_spill] sm:$0xff] %v11731_v63  ;;  %18778 = vst [vmem:[#allocation405_spill] sm:$0xff] %v11736_v58  ;;  %v11746_v56 = vld [vmem:[%s18263_s2 + $0xc88] sm:$0xff]  ;;  %v11751_v62 = vld [vmem:[%s18263_s2 + $0xc90] sm:$0xff] }
  0xca   :  { %18779 = vst [vmem:[#allocation406_spill] sm:$0xff] %v11741_v60  ;;  %18780 = vst [vmem:[#allocation407_spill] sm:$0xff] %v11746_v56  ;;  %v11756_v63 = vld [vmem:[%s18263_s2 + $0xc98] sm:$0xff]  ;;  %v11761_v58 = vld [vmem:[%s18263_s2 + $0xca0] sm:$0xff] }
  0xcb   :  { %18781 = vst [vmem:[#allocation408_spill] sm:$0xff] %v11751_v62  ;;  %18782 = vst [vmem:[#allocation409_spill] sm:$0xff] %v11756_v63  ;;  %v11766_v60 = vld [vmem:[%s18263_s2 + $0xca8] sm:$0xff]  ;;  %v11771_v56 = vld [vmem:[%s18263_s2 + $0xcb0] sm:$0xff] }
  0xcc   :  { %18783 = vst [vmem:[#allocation410_spill] sm:$0xff] %v11761_v58  ;;  %18784 = vst [vmem:[#allocation411_spill] sm:$0xff] %v11766_v60  ;;  %v11776_v62 = vld [vmem:[%s18263_s2 + $0xcb8] sm:$0xff]  ;;  %v11781_v63 = vld [vmem:[%s18263_s2 + $0xcc0] sm:$0xff] }
  0xcd   :  { %18785 = vst [vmem:[#allocation412_spill] sm:$0xff] %v11771_v56  ;;  %18786 = vst [vmem:[#allocation413_spill] sm:$0xff] %v11776_v62  ;;  %v11786_v58 = vld [vmem:[%s18263_s2 + $0xcc8] sm:$0xff]  ;;  %v11791_v60 = vld [vmem:[%s18263_s2 + $0xcd0] sm:$0xff] }
  0xce   :  { %18787 = vst [vmem:[#allocation414_spill] sm:$0xff] %v11781_v63  ;;  %18788 = vst [vmem:[#allocation415_spill] sm:$0xff] %v11786_v58  ;;  %v11796_v56 = vld [vmem:[%s18263_s2 + $0xcd8] sm:$0xff]  ;;  %v11801_v62 = vld [vmem:[%s18263_s2 + $0xce0] sm:$0xff] }
  0xcf   :  { %18789 = vst [vmem:[#allocation416_spill] sm:$0xff] %v11791_v60  ;;  %18790 = vst [vmem:[#allocation417_spill] sm:$0xff] %v11796_v56  ;;  %v11806_v63 = vld [vmem:[%s18263_s2 + $0xce8] sm:$0xff]  ;;  %v11811_v58 = vld [vmem:[%s18263_s2 + $0xcf0] sm:$0xff] }
  0xd0   :  { %18791 = vst [vmem:[#allocation418_spill] sm:$0xff] %v11801_v62  ;;  %18792 = vst [vmem:[#allocation419_spill] sm:$0xff] %v11806_v63  ;;  %v11816_v60 = vld [vmem:[%s18263_s2 + $0xcf8] sm:$0xff]  ;;  %v11821_v56 = vld [vmem:[%s18263_s2 + $0xd00] sm:$0xff] }
  0xd1   :  { %18793 = vst [vmem:[#allocation420_spill] sm:$0xff] %v11811_v58  ;;  %18794 = vst [vmem:[#allocation421_spill] sm:$0xff] %v11816_v60  ;;  %v11826_v62 = vld [vmem:[%s18263_s2 + $0xd08] sm:$0xff]  ;;  %v11831_v63 = vld [vmem:[%s18263_s2 + $0xd10] sm:$0xff] }
  0xd2   :  { %18795 = vst [vmem:[#allocation422_spill] sm:$0xff] %v11821_v56  ;;  %18796 = vst [vmem:[#allocation423_spill] sm:$0xff] %v11826_v62  ;;  %v11836_v58 = vld [vmem:[%s18263_s2 + $0xd18] sm:$0xff]  ;;  %v11841_v60 = vld [vmem:[%s18263_s2 + $0xd20] sm:$0xff] }
  0xd3   :  { %18797 = vst [vmem:[#allocation424_spill] sm:$0xff] %v11831_v63  ;;  %18798 = vst [vmem:[#allocation425_spill] sm:$0xff] %v11836_v58  ;;  %v11846_v56 = vld [vmem:[%s18263_s2 + $0xd28] sm:$0xff]  ;;  %v11851_v62 = vld [vmem:[%s18263_s2 + $0xd30] sm:$0xff] }
  0xd4   :  { %18799 = vst [vmem:[#allocation426_spill] sm:$0xff] %v11841_v60  ;;  %18800 = vst [vmem:[#allocation427_spill] sm:$0xff] %v11846_v56  ;;  %v11856_v63 = vld [vmem:[%s18263_s2 + $0xd38] sm:$0xff]  ;;  %v11861_v58 = vld [vmem:[%s18263_s2 + $0xd40] sm:$0xff] }
  0xd5   :  { %18801 = vst [vmem:[#allocation428_spill] sm:$0xff] %v11851_v62  ;;  %18802 = vst [vmem:[#allocation429_spill] sm:$0xff] %v11856_v63  ;;  %v11866_v60 = vld [vmem:[%s18263_s2 + $0xd48] sm:$0xff]  ;;  %v11871_v56 = vld [vmem:[%s18263_s2 + $0xd50] sm:$0xff] }
  0xd6   :  { %18803 = vst [vmem:[#allocation430_spill] sm:$0xff] %v11861_v58  ;;  %18804 = vst [vmem:[#allocation431_spill] sm:$0xff] %v11866_v60  ;;  %v11876_v62 = vld [vmem:[%s18263_s2 + $0xd58] sm:$0xff]  ;;  %v11881_v63 = vld [vmem:[%s18263_s2 + $0xd60] sm:$0xff] }
  0xd7   :  { %18805 = vst [vmem:[#allocation432_spill] sm:$0xff] %v11871_v56  ;;  %18806 = vst [vmem:[#allocation433_spill] sm:$0xff] %v11876_v62  ;;  %v11886_v58 = vld [vmem:[%s18263_s2 + $0xd68] sm:$0xff]  ;;  %v11891_v60 = vld [vmem:[%s18263_s2 + $0xd70] sm:$0xff] }
  0xd8   :  { %18807 = vst [vmem:[#allocation434_spill] sm:$0xff] %v11881_v63  ;;  %18808 = vst [vmem:[#allocation435_spill] sm:$0xff] %v11886_v58  ;;  %v11896_v56 = vld [vmem:[%s18263_s2 + $0xd78] sm:$0xff]  ;;  %v11901_v62 = vld [vmem:[%s18263_s2 + $0xd80] sm:$0xff] }
  0xd9   :  { %18809 = vst [vmem:[#allocation436_spill] sm:$0xff] %v11891_v60  ;;  %18810 = vst [vmem:[#allocation437_spill] sm:$0xff] %v11896_v56  ;;  %v11906_v63 = vld [vmem:[%s18263_s2 + $0xd88] sm:$0xff]  ;;  %v11911_v58 = vld [vmem:[%s18263_s2 + $0xd90] sm:$0xff] }
  0xda   :  { %18811 = vst [vmem:[#allocation438_spill] sm:$0xff] %v11901_v62  ;;  %18812 = vst [vmem:[#allocation439_spill] sm:$0xff] %v11906_v63  ;;  %v11916_v60 = vld [vmem:[%s18263_s2 + $0xd98] sm:$0xff]  ;;  %v11921_v56 = vld [vmem:[%s18263_s2 + $0xda0] sm:$0xff] }
  0xdb   :  { %18813 = vst [vmem:[#allocation440_spill] sm:$0xff] %v11911_v58  ;;  %18814 = vst [vmem:[#allocation441_spill] sm:$0xff] %v11916_v60  ;;  %v11926_v62 = vld [vmem:[%s18263_s2 + $0xda8] sm:$0xff]  ;;  %v11931_v63 = vld [vmem:[%s18263_s2 + $0xdb0] sm:$0xff] }
  0xdc   :  { %18815 = vst [vmem:[#allocation442_spill] sm:$0xff] %v11921_v56  ;;  %18816 = vst [vmem:[#allocation443_spill] sm:$0xff] %v11926_v62  ;;  %v11936_v58 = vld [vmem:[%s18263_s2 + $0xdb8] sm:$0xff]  ;;  %v11941_v60 = vld [vmem:[%s18263_s2 + $0xdc0] sm:$0xff] }
  0xdd   :  { %18817 = vst [vmem:[#allocation444_spill] sm:$0xff] %v11931_v63  ;;  %18818 = vst [vmem:[#allocation445_spill] sm:$0xff] %v11936_v58  ;;  %v11946_v56 = vld [vmem:[%s18263_s2 + $0xdc8] sm:$0xff]  ;;  %v11951_v62 = vld [vmem:[%s18263_s2 + $0xdd0] sm:$0xff] }
  0xde   :  { %18819 = vst [vmem:[#allocation446_spill] sm:$0xff] %v11941_v60  ;;  %18820 = vst [vmem:[#allocation447_spill] sm:$0xff] %v11946_v56  ;;  %v11956_v63 = vld [vmem:[%s18263_s2 + $0xdd8] sm:$0xff]  ;;  %v11961_v58 = vld [vmem:[%s18263_s2 + $0xde0] sm:$0xff] }
  0xdf   :  { %18821 = vst [vmem:[#allocation448_spill] sm:$0xff] %v11951_v62  ;;  %18822 = vst [vmem:[#allocation449_spill] sm:$0xff] %v11956_v63  ;;  %v11966_v60 = vld [vmem:[%s18263_s2 + $0xde8] sm:$0xff]  ;;  %v11971_v56 = vld [vmem:[%s18263_s2 + $0xdf0] sm:$0xff] }
  0xe0   :  { %18823 = vst [vmem:[#allocation450_spill] sm:$0xff] %v11961_v58  ;;  %18824 = vst [vmem:[#allocation451_spill] sm:$0xff] %v11966_v60  ;;  %v11976_v62 = vld [vmem:[%s18263_s2 + $0xdf8] sm:$0xff]  ;;  %v11981_v63 = vld [vmem:[%s18263_s2 + $0xe00] sm:$0xff] }
  0xe1   :  { %18825 = vst [vmem:[#allocation452_spill] sm:$0xff] %v11971_v56  ;;  %18826 = vst [vmem:[#allocation453_spill] sm:$0xff] %v11976_v62  ;;  %v11986_v58 = vld [vmem:[%s18263_s2 + $0xe08] sm:$0xff]  ;;  %v11991_v60 = vld [vmem:[%s18263_s2 + $0xe10] sm:$0xff] }
  0xe2   :  { %18827 = vst [vmem:[#allocation454_spill] sm:$0xff] %v11981_v63  ;;  %18828 = vst [vmem:[#allocation455_spill] sm:$0xff] %v11986_v58  ;;  %v11996_v56 = vld [vmem:[%s18263_s2 + $0xe18] sm:$0xff]  ;;  %v12001_v62 = vld [vmem:[%s18263_s2 + $0xe20] sm:$0xff] }
  0xe3   :  { %18829 = vst [vmem:[#allocation456_spill] sm:$0xff] %v11991_v60  ;;  %18830 = vst [vmem:[#allocation457_spill] sm:$0xff] %v11996_v56  ;;  %v12006_v63 = vld [vmem:[%s18263_s2 + $0xe28] sm:$0xff]  ;;  %v12011_v58 = vld [vmem:[%s18263_s2 + $0xe30] sm:$0xff] }
  0xe4   :  { %18831 = vst [vmem:[#allocation458_spill] sm:$0xff] %v12001_v62  ;;  %18832 = vst [vmem:[#allocation459_spill] sm:$0xff] %v12006_v63  ;;  %v12016_v60 = vld [vmem:[%s18263_s2 + $0xe38] sm:$0xff]  ;;  %v12021_v56 = vld [vmem:[%s18263_s2 + $0xe40] sm:$0xff] }
  0xe5   :  { %18833 = vst [vmem:[#allocation460_spill] sm:$0xff] %v12011_v58  ;;  %18834 = vst [vmem:[#allocation461_spill] sm:$0xff] %v12016_v60  ;;  %v12026_v62 = vld [vmem:[%s18263_s2 + $0xe48] sm:$0xff]  ;;  %v12031_v63 = vld [vmem:[%s18263_s2 + $0xe50] sm:$0xff] }
  0xe6   :  { %18835 = vst [vmem:[#allocation462_spill] sm:$0xff] %v12021_v56  ;;  %18836 = vst [vmem:[#allocation463_spill] sm:$0xff] %v12026_v62  ;;  %v12036_v58 = vld [vmem:[%s18263_s2 + $0xe58] sm:$0xff]  ;;  %v12041_v60 = vld [vmem:[%s18263_s2 + $0xe60] sm:$0xff] }
  0xe7   :  { %18837 = vst [vmem:[#allocation464_spill] sm:$0xff] %v12031_v63  ;;  %18838 = vst [vmem:[#allocation465_spill] sm:$0xff] %v12036_v58  ;;  %v12046_v56 = vld [vmem:[%s18263_s2 + $0xe68] sm:$0xff]  ;;  %v12051_v62 = vld [vmem:[%s18263_s2 + $0xe70] sm:$0xff] }
  0xe8   :  { %18839 = vst [vmem:[#allocation466_spill] sm:$0xff] %v12041_v60  ;;  %18840 = vst [vmem:[#allocation467_spill] sm:$0xff] %v12046_v56  ;;  %v12056_v63 = vld [vmem:[%s18263_s2 + $0xe78] sm:$0xff]  ;;  %v12061_v58 = vld [vmem:[%s18263_s2 + $0xe80] sm:$0xff] }
  0xe9   :  { %18841 = vst [vmem:[#allocation468_spill] sm:$0xff] %v12051_v62  ;;  %18842 = vst [vmem:[#allocation469_spill] sm:$0xff] %v12056_v63  ;;  %v12066_v60 = vld [vmem:[%s18263_s2 + $0xe88] sm:$0xff]  ;;  %v12071_v56 = vld [vmem:[%s18263_s2 + $0xe90] sm:$0xff] }
  0xea   :  { %18843 = vst [vmem:[#allocation470_spill] sm:$0xff] %v12061_v58  ;;  %18844 = vst [vmem:[#allocation471_spill] sm:$0xff] %v12066_v60  ;;  %v12076_v62 = vld [vmem:[%s18263_s2 + $0xe98] sm:$0xff]  ;;  %v12081_v63 = vld [vmem:[%s18263_s2 + $0xea0] sm:$0xff] }
  0xeb   :  { %18845 = vst [vmem:[#allocation472_spill] sm:$0xff] %v12071_v56  ;;  %18846 = vst [vmem:[#allocation473_spill] sm:$0xff] %v12076_v62  ;;  %v12086_v58 = vld [vmem:[%s18263_s2 + $0xea8] sm:$0xff]  ;;  %v12091_v60 = vld [vmem:[%s18263_s2 + $0xeb0] sm:$0xff] }
  0xec   :  { %18847 = vst [vmem:[#allocation474_spill] sm:$0xff] %v12081_v63  ;;  %18848 = vst [vmem:[#allocation475_spill] sm:$0xff] %v12086_v58  ;;  %v12096_v56 = vld [vmem:[%s18263_s2 + $0xeb8] sm:$0xff]  ;;  %v12101_v62 = vld [vmem:[%s18263_s2 + $0xec0] sm:$0xff] }
  0xed   :  { %18849 = vst [vmem:[#allocation476_spill] sm:$0xff] %v12091_v60  ;;  %18850 = vst [vmem:[#allocation477_spill] sm:$0xff] %v12096_v56  ;;  %v12106_v63 = vld [vmem:[%s18263_s2 + $0xec8] sm:$0xff]  ;;  %v12111_v58 = vld [vmem:[%s18263_s2 + $0xed0] sm:$0xff] }
  0xee   :  { %18851 = vst [vmem:[#allocation478_spill] sm:$0xff] %v12101_v62  ;;  %18852 = vst [vmem:[#allocation479_spill] sm:$0xff] %v12106_v63  ;;  %v12116_v60 = vld [vmem:[%s18263_s2 + $0xed8] sm:$0xff]  ;;  %v12121_v56 = vld [vmem:[%s18263_s2 + $0xee0] sm:$0xff] }
  0xef   :  { %18853 = vst [vmem:[#allocation480_spill] sm:$0xff] %v12111_v58  ;;  %18854 = vst [vmem:[#allocation481_spill] sm:$0xff] %v12116_v60  ;;  %v12126_v62 = vld [vmem:[%s18263_s2 + $0xee8] sm:$0xff]  ;;  %v12131_v63 = vld [vmem:[%s18263_s2 + $0xef0] sm:$0xff] }
  0xf0   :  { %18855 = vst [vmem:[#allocation482_spill] sm:$0xff] %v12121_v56  ;;  %18856 = vst [vmem:[#allocation483_spill] sm:$0xff] %v12126_v62  ;;  %v12136_v58 = vld [vmem:[%s18263_s2 + $0xef8] sm:$0xff]  ;;  %v12141_v60 = vld [vmem:[%s18263_s2 + $0xf00] sm:$0xff] }
  0xf1   :  { %18857 = vst [vmem:[#allocation484_spill] sm:$0xff] %v12131_v63  ;;  %18858 = vst [vmem:[#allocation485_spill] sm:$0xff] %v12136_v58  ;;  %v12146_v56 = vld [vmem:[%s18263_s2 + $0xf08] sm:$0xff]  ;;  %v12151_v62 = vld [vmem:[%s18263_s2 + $0xf10] sm:$0xff] }
  0xf2   :  { %18859 = vst [vmem:[#allocation486_spill] sm:$0xff] %v12141_v60  ;;  %18860 = vst [vmem:[#allocation487_spill] sm:$0xff] %v12146_v56  ;;  %v12156_v63 = vld [vmem:[%s18263_s2 + $0xf18] sm:$0xff]  ;;  %v12161_v58 = vld [vmem:[%s18263_s2 + $0xf20] sm:$0xff] }
  0xf3   :  { %18861 = vst [vmem:[#allocation488_spill] sm:$0xff] %v12151_v62  ;;  %18862 = vst [vmem:[#allocation489_spill] sm:$0xff] %v12156_v63  ;;  %v12166_v60 = vld [vmem:[%s18263_s2 + $0xf28] sm:$0xff]  ;;  %v12171_v56 = vld [vmem:[%s18263_s2 + $0xf30] sm:$0xff] }
  0xf4   :  { %18863 = vst [vmem:[#allocation490_spill] sm:$0xff] %v12161_v58  ;;  %18864 = vst [vmem:[#allocation491_spill] sm:$0xff] %v12166_v60  ;;  %v12176_v62 = vld [vmem:[%s18263_s2 + $0xf38] sm:$0xff]  ;;  %v12181_v63 = vld [vmem:[%s18263_s2 + $0xf40] sm:$0xff] }
  0xf5   :  { %18865 = vst [vmem:[#allocation492_spill] sm:$0xff] %v12171_v56  ;;  %18866 = vst [vmem:[#allocation493_spill] sm:$0xff] %v12176_v62  ;;  %v12186_v58 = vld [vmem:[%s18263_s2 + $0xf48] sm:$0xff]  ;;  %v12191_v60 = vld [vmem:[%s18263_s2 + $0xf50] sm:$0xff] }
  0xf6   :  { %18867 = vst [vmem:[#allocation494_spill] sm:$0xff] %v12181_v63  ;;  %18868 = vst [vmem:[#allocation495_spill] sm:$0xff] %v12186_v58  ;;  %v12196_v56 = vld [vmem:[%s18263_s2 + $0xf58] sm:$0xff]  ;;  %v12201_v62 = vld [vmem:[%s18263_s2 + $0xf60] sm:$0xff] }
  0xf7   :  { %18869 = vst [vmem:[#allocation496_spill] sm:$0xff] %v12191_v60  ;;  %18870 = vst [vmem:[#allocation497_spill] sm:$0xff] %v12196_v56  ;;  %v12206_v63 = vld [vmem:[%s18263_s2 + $0xf68] sm:$0xff]  ;;  %v12211_v58 = vld [vmem:[%s18263_s2 + $0xf70] sm:$0xff] }
  0xf8   :  { %18871 = vst [vmem:[#allocation498_spill] sm:$0xff] %v12201_v62  ;;  %18872 = vst [vmem:[#allocation499_spill] sm:$0xff] %v12206_v63  ;;  %v12216_v60 = vld [vmem:[%s18263_s2 + $0xf78] sm:$0xff]  ;;  %v12221_v56 = vld [vmem:[%s18263_s2 + $0xf80] sm:$0xff] }
  0xf9   :  { %18873 = vst [vmem:[#allocation500_spill] sm:$0xff] %v12211_v58  ;;  %18874 = vst [vmem:[#allocation501_spill] sm:$0xff] %v12216_v60  ;;  %v12226_v62 = vld [vmem:[%s18263_s2 + $0xf88] sm:$0xff]  ;;  %v12231_v63 = vld [vmem:[%s18263_s2 + $0xf90] sm:$0xff] }
  0xfa   :  { %18875 = vst [vmem:[#allocation502_spill] sm:$0xff] %v12221_v56  ;;  %18876 = vst [vmem:[#allocation503_spill] sm:$0xff] %v12226_v62  ;;  %v12236_v58 = vld [vmem:[%s18263_s2 + $0xf98] sm:$0xff]  ;;  %v12241_v60 = vld [vmem:[%s18263_s2 + $0xfa0] sm:$0xff] }
  0xfb   :  { %18877 = vst [vmem:[#allocation504_spill] sm:$0xff] %v12231_v63  ;;  %18878 = vst [vmem:[#allocation505_spill] sm:$0xff] %v12236_v58  ;;  %v12246_v56 = vld [vmem:[%s18263_s2 + $0xfa8] sm:$0xff]  ;;  %v12251_v62 = vld [vmem:[%s18263_s2 + $0xfb0] sm:$0xff] }
  0xfc   :  { %18879 = vst [vmem:[#allocation506_spill] sm:$0xff] %v12241_v60  ;;  %18880 = vst [vmem:[#allocation507_spill] sm:$0xff] %v12246_v56  ;;  %v12256_v63 = vld [vmem:[%s18263_s2 + $0xfb8] sm:$0xff]  ;;  %v12261_v58 = vld [vmem:[%s18263_s2 + $0xfc0] sm:$0xff] }
  0xfd   :  { %18881 = vst [vmem:[#allocation508_spill] sm:$0xff] %v12251_v62  ;;  %18882 = vst [vmem:[#allocation509_spill] sm:$0xff] %v12256_v63  ;;  %v12266_v60 = vld [vmem:[%s18263_s2 + $0xfc8] sm:$0xff]  ;;  %v12271_v56 = vld [vmem:[%s18263_s2 + $0xfd0] sm:$0xff] }
  0xfe   :  { %18883 = vst [vmem:[#allocation510_spill] sm:$0xff] %v12261_v58  ;;  %18884 = vst [vmem:[#allocation511_spill] sm:$0xff] %v12266_v60  ;;  %v12276_v62 = vld [vmem:[%s18263_s2 + $0xfd8] sm:$0xff]  ;;  %v12281_v63 = vld [vmem:[%s18263_s2 + $0xfe0] sm:$0xff] }
  0xff   :  { %18885 = vst [vmem:[#allocation512_spill] sm:$0xff] %v12271_v56  ;;  %18886 = vst [vmem:[#allocation513_spill] sm:$0xff] %v12276_v62  ;;  %v12286_v58 = vld [vmem:[%s18263_s2 + $0xfe8] sm:$0xff]  ;;  %v12291_v60 = vld [vmem:[%s18263_s2 + $0xff0] sm:$0xff] }
 0x100   :  { %18887 = vst [vmem:[#allocation514_spill] sm:$0xff] %v12281_v63  ;;  %18888 = vst [vmem:[#allocation515_spill] sm:$0xff] %v12286_v58  ;;  %v12296_v56 = vld [vmem:[%s18263_s2 + $0xff8] sm:$0xff]  ;;  %v12301_v62 = vld [vmem:[%s18263_s2 + $0x1000] sm:$0xff] }
 0x101   :  { %18889 = vst [vmem:[#allocation516_spill] sm:$0xff] %v12291_v60  ;;  %18890 = vst [vmem:[#allocation517_spill] sm:$0xff] %v12296_v56  ;;  %v12306_v63 = vld [vmem:[%s18263_s2 + $0x1008] sm:$0xff]  ;;  %v12311_v58 = vld [vmem:[%s18263_s2 + $0x1010] sm:$0xff] }
 0x102   :  { %18891 = vst [vmem:[#allocation518_spill] sm:$0xff] %v12301_v62  ;;  %18892 = vst [vmem:[#allocation519_spill] sm:$0xff] %v12306_v63  ;;  %v12316_v60 = vld [vmem:[%s18263_s2 + $0x1018] sm:$0xff]  ;;  %v12321_v56 = vld [vmem:[%s18263_s2 + $0x1020] sm:$0xff] }
 0x103   :  { %18893 = vst [vmem:[#allocation520_spill] sm:$0xff] %v12311_v58  ;;  %18894 = vst [vmem:[#allocation521_spill] sm:$0xff] %v12316_v60  ;;  %v12326_v62 = vld [vmem:[%s18263_s2 + $0x1028] sm:$0xff]  ;;  %v12331_v63 = vld [vmem:[%s18263_s2 + $0x1030] sm:$0xff] }
 0x104   :  { %18895 = vst [vmem:[#allocation522_spill] sm:$0xff] %v12321_v56  ;;  %18896 = vst [vmem:[#allocation523_spill] sm:$0xff] %v12326_v62  ;;  %v12336_v58 = vld [vmem:[%s18263_s2 + $0x1038] sm:$0xff]  ;;  %v12341_v60 = vld [vmem:[%s18263_s2 + $0x1040] sm:$0xff] }
 0x105   :  { %18897 = vst [vmem:[#allocation524_spill] sm:$0xff] %v12331_v63  ;;  %18898 = vst [vmem:[#allocation525_spill] sm:$0xff] %v12336_v58  ;;  %v12346_v56 = vld [vmem:[%s18263_s2 + $0x1048] sm:$0xff]  ;;  %v12351_v62 = vld [vmem:[%s18263_s2 + $0x1050] sm:$0xff] }
 0x106   :  { %18899 = vst [vmem:[#allocation526_spill] sm:$0xff] %v12341_v60  ;;  %18900 = vst [vmem:[#allocation527_spill] sm:$0xff] %v12346_v56  ;;  %v12356_v63 = vld [vmem:[%s18263_s2 + $0x1058] sm:$0xff]  ;;  %v12361_v58 = vld [vmem:[%s18263_s2 + $0x1060] sm:$0xff] }
 0x107   :  { %18901 = vst [vmem:[#allocation528_spill] sm:$0xff] %v12351_v62  ;;  %18902 = vst [vmem:[#allocation529_spill] sm:$0xff] %v12356_v63  ;;  %v12366_v60 = vld [vmem:[%s18263_s2 + $0x1068] sm:$0xff]  ;;  %v12371_v56 = vld [vmem:[%s18263_s2 + $0x1070] sm:$0xff] }
 0x108   :  { %18903 = vst [vmem:[#allocation530_spill] sm:$0xff] %v12361_v58  ;;  %18904 = vst [vmem:[#allocation531_spill] sm:$0xff] %v12366_v60  ;;  %v12376_v62 = vld [vmem:[%s18263_s2 + $0x1078] sm:$0xff]  ;;  %v12381_v63 = vld [vmem:[%s18263_s2 + $0x1080] sm:$0xff] }
 0x109   :  { %18905 = vst [vmem:[#allocation532_spill] sm:$0xff] %v12371_v56  ;;  %18906 = vst [vmem:[#allocation533_spill] sm:$0xff] %v12376_v62  ;;  %v12386_v58 = vld [vmem:[%s18263_s2 + $0x1088] sm:$0xff]  ;;  %v12391_v60 = vld [vmem:[%s18263_s2 + $0x1090] sm:$0xff] }
 0x10a   :  { %18907 = vst [vmem:[#allocation534_spill] sm:$0xff] %v12381_v63  ;;  %18908 = vst [vmem:[#allocation535_spill] sm:$0xff] %v12386_v58  ;;  %v12396_v56 = vld [vmem:[%s18263_s2 + $0x1098] sm:$0xff]  ;;  %v12401_v62 = vld [vmem:[%s18263_s2 + $0x10a0] sm:$0xff] }
 0x10b   :  { %18909 = vst [vmem:[#allocation536_spill] sm:$0xff] %v12391_v60  ;;  %18910 = vst [vmem:[#allocation537_spill] sm:$0xff] %v12396_v56  ;;  %v12406_v63 = vld [vmem:[%s18263_s2 + $0x10a8] sm:$0xff]  ;;  %v12411_v58 = vld [vmem:[%s18263_s2 + $0x10b0] sm:$0xff] }
 0x10c   :  { %18911 = vst [vmem:[#allocation538_spill] sm:$0xff] %v12401_v62  ;;  %18912 = vst [vmem:[#allocation539_spill] sm:$0xff] %v12406_v63  ;;  %v12416_v60 = vld [vmem:[%s18263_s2 + $0x10b8] sm:$0xff]  ;;  %v12421_v56 = vld [vmem:[%s18263_s2 + $0x10c0] sm:$0xff] }
 0x10d   :  { %18913 = vst [vmem:[#allocation540_spill] sm:$0xff] %v12411_v58  ;;  %18914 = vst [vmem:[#allocation541_spill] sm:$0xff] %v12416_v60  ;;  %v12426_v62 = vld [vmem:[%s18263_s2 + $0x10c8] sm:$0xff]  ;;  %v12431_v63 = vld [vmem:[%s18263_s2 + $0x10d0] sm:$0xff] }
 0x10e   :  { %18915 = vst [vmem:[#allocation542_spill] sm:$0xff] %v12421_v56  ;;  %18916 = vst [vmem:[#allocation543_spill] sm:$0xff] %v12426_v62  ;;  %v12436_v58 = vld [vmem:[%s18263_s2 + $0x10d8] sm:$0xff]  ;;  %v12441_v60 = vld [vmem:[%s18263_s2 + $0x10e0] sm:$0xff] }
 0x10f   :  { %18917 = vst [vmem:[#allocation544_spill] sm:$0xff] %v12431_v63  ;;  %18918 = vst [vmem:[#allocation545_spill] sm:$0xff] %v12436_v58  ;;  %v12446_v56 = vld [vmem:[%s18263_s2 + $0x10e8] sm:$0xff]  ;;  %v12451_v62 = vld [vmem:[%s18263_s2 + $0x10f0] sm:$0xff] }
 0x110   :  { %18919 = vst [vmem:[#allocation546_spill] sm:$0xff] %v12441_v60  ;;  %18920 = vst [vmem:[#allocation547_spill] sm:$0xff] %v12446_v56  ;;  %v12456_v63 = vld [vmem:[%s18263_s2 + $0x10f8] sm:$0xff]  ;;  %v12461_v58 = vld [vmem:[%s18263_s2 + $0x1100] sm:$0xff] }
 0x111   :  { %18921 = vst [vmem:[#allocation548_spill] sm:$0xff] %v12451_v62  ;;  %18922 = vst [vmem:[#allocation549_spill] sm:$0xff] %v12456_v63  ;;  %v12466_v60 = vld [vmem:[%s18263_s2 + $0x1108] sm:$0xff]  ;;  %v12471_v56 = vld [vmem:[%s18263_s2 + $0x1110] sm:$0xff] }
 0x112   :  { %18923 = vst [vmem:[#allocation550_spill] sm:$0xff] %v12461_v58  ;;  %18924 = vst [vmem:[#allocation551_spill] sm:$0xff] %v12466_v60  ;;  %v12476_v62 = vld [vmem:[%s18263_s2 + $0x1118] sm:$0xff]  ;;  %v12481_v63 = vld [vmem:[%s18263_s2 + $0x1120] sm:$0xff] }
 0x113   :  { %18925 = vst [vmem:[#allocation552_spill] sm:$0xff] %v12471_v56  ;;  %18926 = vst [vmem:[#allocation553_spill] sm:$0xff] %v12476_v62  ;;  %v12486_v58 = vld [vmem:[%s18263_s2 + $0x1128] sm:$0xff]  ;;  %v12491_v60 = vld [vmem:[%s18263_s2 + $0x1130] sm:$0xff] }
 0x114   :  { %18927 = vst [vmem:[#allocation554_spill] sm:$0xff] %v12481_v63  ;;  %18928 = vst [vmem:[#allocation555_spill] sm:$0xff] %v12486_v58  ;;  %v12496_v56 = vld [vmem:[%s18263_s2 + $0x1138] sm:$0xff]  ;;  %v12501_v62 = vld [vmem:[%s18263_s2 + $0x1140] sm:$0xff] }
 0x115   :  { %18929 = vst [vmem:[#allocation556_spill] sm:$0xff] %v12491_v60  ;;  %18930 = vst [vmem:[#allocation557_spill] sm:$0xff] %v12496_v56  ;;  %v12506_v63 = vld [vmem:[%s18263_s2 + $0x1148] sm:$0xff]  ;;  %v12511_v58 = vld [vmem:[%s18263_s2 + $0x1150] sm:$0xff] }
 0x116   :  { %18931 = vst [vmem:[#allocation558_spill] sm:$0xff] %v12501_v62  ;;  %18932 = vst [vmem:[#allocation559_spill] sm:$0xff] %v12506_v63  ;;  %v12516_v60 = vld [vmem:[%s18263_s2 + $0x1158] sm:$0xff]  ;;  %v12521_v56 = vld [vmem:[%s18263_s2 + $0x1160] sm:$0xff] }
 0x117   :  { %18933 = vst [vmem:[#allocation560_spill] sm:$0xff] %v12511_v58  ;;  %18934 = vst [vmem:[#allocation561_spill] sm:$0xff] %v12516_v60  ;;  %v12526_v62 = vld [vmem:[%s18263_s2 + $0x1168] sm:$0xff]  ;;  %v12531_v63 = vld [vmem:[%s18263_s2 + $0x1170] sm:$0xff] }
 0x118   :  { %18935 = vst [vmem:[#allocation562_spill] sm:$0xff] %v12521_v56  ;;  %18936 = vst [vmem:[#allocation563_spill] sm:$0xff] %v12526_v62  ;;  %v12536_v58 = vld [vmem:[%s18263_s2 + $0x1178] sm:$0xff]  ;;  %v12541_v60 = vld [vmem:[%s18263_s2 + $0x1180] sm:$0xff] }
 0x119   :  { %18937 = vst [vmem:[#allocation564_spill] sm:$0xff] %v12531_v63  ;;  %18938 = vst [vmem:[#allocation565_spill] sm:$0xff] %v12536_v58  ;;  %v12546_v56 = vld [vmem:[%s18263_s2 + $0x1188] sm:$0xff]  ;;  %v12551_v62 = vld [vmem:[%s18263_s2 + $0x1190] sm:$0xff] }
 0x11a   :  { %18939 = vst [vmem:[#allocation566_spill] sm:$0xff] %v12541_v60  ;;  %18940 = vst [vmem:[#allocation567_spill] sm:$0xff] %v12546_v56  ;;  %v12556_v63 = vld [vmem:[%s18263_s2 + $0x1198] sm:$0xff]  ;;  %v12561_v58 = vld [vmem:[%s18263_s2 + $0x11a0] sm:$0xff] }
 0x11b   :  { %18941 = vst [vmem:[#allocation568_spill] sm:$0xff] %v12551_v62  ;;  %18942 = vst [vmem:[#allocation569_spill] sm:$0xff] %v12556_v63  ;;  %v12566_v60 = vld [vmem:[%s18263_s2 + $0x11a8] sm:$0xff]  ;;  %v12571_v56 = vld [vmem:[%s18263_s2 + $0x11b0] sm:$0xff] }
 0x11c   :  { %18943 = vst [vmem:[#allocation570_spill] sm:$0xff] %v12561_v58  ;;  %18944 = vst [vmem:[#allocation571_spill] sm:$0xff] %v12566_v60  ;;  %v12576_v62 = vld [vmem:[%s18263_s2 + $0x11b8] sm:$0xff]  ;;  %v12581_v63 = vld [vmem:[%s18263_s2 + $0x11c0] sm:$0xff] }
 0x11d   :  { %18945 = vst [vmem:[#allocation572_spill] sm:$0xff] %v12571_v56  ;;  %18946 = vst [vmem:[#allocation573_spill] sm:$0xff] %v12576_v62  ;;  %v12586_v58 = vld [vmem:[%s18263_s2 + $0x11c8] sm:$0xff]  ;;  %v12591_v60 = vld [vmem:[%s18263_s2 + $0x11d0] sm:$0xff] }
 0x11e   :  { %18947 = vst [vmem:[#allocation574_spill] sm:$0xff] %v12581_v63  ;;  %18948 = vst [vmem:[#allocation575_spill] sm:$0xff] %v12586_v58  ;;  %v12596_v56 = vld [vmem:[%s18263_s2 + $0x11d8] sm:$0xff]  ;;  %v12601_v62 = vld [vmem:[%s18263_s2 + $0x11e0] sm:$0xff] }
 0x11f   :  { %18949 = vst [vmem:[#allocation576_spill] sm:$0xff] %v12591_v60  ;;  %18950 = vst [vmem:[#allocation577_spill] sm:$0xff] %v12596_v56  ;;  %v12606_v63 = vld [vmem:[%s18263_s2 + $0x11e8] sm:$0xff]  ;;  %v12611_v58 = vld [vmem:[%s18263_s2 + $0x11f0] sm:$0xff] }
 0x120   :  { %18951 = vst [vmem:[#allocation578_spill] sm:$0xff] %v12601_v62  ;;  %18952 = vst [vmem:[#allocation579_spill] sm:$0xff] %v12606_v63  ;;  %v12616_v60 = vld [vmem:[%s18263_s2 + $0x11f8] sm:$0xff]  ;;  %v12621_v56 = vld [vmem:[%s18263_s2 + $0x1200] sm:$0xff] }
 0x121   :  { %18953 = vst [vmem:[#allocation580_spill] sm:$0xff] %v12611_v58  ;;  %18954 = vst [vmem:[#allocation581_spill] sm:$0xff] %v12616_v60  ;;  %v12626_v62 = vld [vmem:[%s18263_s2 + $0x1208] sm:$0xff]  ;;  %v12631_v63 = vld [vmem:[%s18263_s2 + $0x1210] sm:$0xff] }
 0x122   :  { %18955 = vst [vmem:[#allocation582_spill] sm:$0xff] %v12621_v56  ;;  %18956 = vst [vmem:[#allocation583_spill] sm:$0xff] %v12626_v62  ;;  %v12636_v58 = vld [vmem:[%s18263_s2 + $0x1218] sm:$0xff]  ;;  %v12641_v60 = vld [vmem:[%s18263_s2 + $0x1220] sm:$0xff] }
 0x123   :  { %18957 = vst [vmem:[#allocation584_spill] sm:$0xff] %v12631_v63  ;;  %18958 = vst [vmem:[#allocation585_spill] sm:$0xff] %v12636_v58  ;;  %v12646_v56 = vld [vmem:[%s18263_s2 + $0x1228] sm:$0xff]  ;;  %v12651_v62 = vld [vmem:[%s18263_s2 + $0x1230] sm:$0xff] }
 0x124   :  { %18959 = vst [vmem:[#allocation586_spill] sm:$0xff] %v12641_v60  ;;  %18960 = vst [vmem:[#allocation587_spill] sm:$0xff] %v12646_v56  ;;  %v12656_v63 = vld [vmem:[%s18263_s2 + $0x1238] sm:$0xff]  ;;  %v12661_v58 = vld [vmem:[%s18263_s2 + $0x1240] sm:$0xff] }
 0x125   :  { %18961 = vst [vmem:[#allocation588_spill] sm:$0xff] %v12651_v62  ;;  %18962 = vst [vmem:[#allocation589_spill] sm:$0xff] %v12656_v63  ;;  %v12666_v60 = vld [vmem:[%s18263_s2 + $0x1248] sm:$0xff]  ;;  %v12671_v56 = vld [vmem:[%s18263_s2 + $0x1250] sm:$0xff] }
 0x126   :  { %18963 = vst [vmem:[#allocation590_spill] sm:$0xff] %v12661_v58  ;;  %18964 = vst [vmem:[#allocation591_spill] sm:$0xff] %v12666_v60  ;;  %v12676_v62 = vld [vmem:[%s18263_s2 + $0x1258] sm:$0xff]  ;;  %v12681_v63 = vld [vmem:[%s18263_s2 + $0x1260] sm:$0xff] }
 0x127   :  { %18965 = vst [vmem:[#allocation592_spill] sm:$0xff] %v12671_v56  ;;  %18966 = vst [vmem:[#allocation593_spill] sm:$0xff] %v12676_v62  ;;  %v12686_v58 = vld [vmem:[%s18263_s2 + $0x1268] sm:$0xff]  ;;  %v12691_v60 = vld [vmem:[%s18263_s2 + $0x1270] sm:$0xff] }
 0x128   :  { %18967 = vst [vmem:[#allocation594_spill] sm:$0xff] %v12681_v63  ;;  %18968 = vst [vmem:[#allocation595_spill] sm:$0xff] %v12686_v58  ;;  %v12696_v56 = vld [vmem:[%s18263_s2 + $0x1278] sm:$0xff]  ;;  %v12701_v62 = vld [vmem:[%s18263_s2 + $0x1280] sm:$0xff] }
 0x129   :  { %18969 = vst [vmem:[#allocation596_spill] sm:$0xff] %v12691_v60  ;;  %18970 = vst [vmem:[#allocation597_spill] sm:$0xff] %v12696_v56  ;;  %v12706_v63 = vld [vmem:[%s18263_s2 + $0x1288] sm:$0xff]  ;;  %v12711_v58 = vld [vmem:[%s18263_s2 + $0x1290] sm:$0xff] }
 0x12a   :  { %18971 = vst [vmem:[#allocation598_spill] sm:$0xff] %v12701_v62  ;;  %18972 = vst [vmem:[#allocation599_spill] sm:$0xff] %v12706_v63  ;;  %v12716_v60 = vld [vmem:[%s18263_s2 + $0x1298] sm:$0xff]  ;;  %v12721_v56 = vld [vmem:[%s18263_s2 + $0x12a0] sm:$0xff] }
 0x12b   :  { %18973 = vst [vmem:[#allocation600_spill] sm:$0xff] %v12711_v58  ;;  %18974 = vst [vmem:[#allocation601_spill] sm:$0xff] %v12716_v60  ;;  %v12726_v62 = vld [vmem:[%s18263_s2 + $0x12a8] sm:$0xff]  ;;  %v12731_v63 = vld [vmem:[%s18263_s2 + $0x12b0] sm:$0xff] }
 0x12c   :  { %18975 = vst [vmem:[#allocation602_spill] sm:$0xff] %v12721_v56  ;;  %18976 = vst [vmem:[#allocation603_spill] sm:$0xff] %v12726_v62  ;;  %v12736_v58 = vld [vmem:[%s18263_s2 + $0x12b8] sm:$0xff]  ;;  %v12741_v60 = vld [vmem:[%s18263_s2 + $0x12c0] sm:$0xff] }
 0x12d   :  { %18977 = vst [vmem:[#allocation604_spill] sm:$0xff] %v12731_v63  ;;  %18978 = vst [vmem:[#allocation605_spill] sm:$0xff] %v12736_v58  ;;  %v12746_v56 = vld [vmem:[%s18263_s2 + $0x12c8] sm:$0xff]  ;;  %v12751_v62 = vld [vmem:[%s18263_s2 + $0x12d0] sm:$0xff] }
 0x12e   :  { %18979 = vst [vmem:[#allocation606_spill] sm:$0xff] %v12741_v60  ;;  %18980 = vst [vmem:[#allocation607_spill] sm:$0xff] %v12746_v56  ;;  %v12756_v63 = vld [vmem:[%s18263_s2 + $0x12d8] sm:$0xff]  ;;  %v12761_v58 = vld [vmem:[%s18263_s2 + $0x12e0] sm:$0xff] }
 0x12f   :  { %18981 = vst [vmem:[#allocation608_spill] sm:$0xff] %v12751_v62  ;;  %18982 = vst [vmem:[#allocation609_spill] sm:$0xff] %v12756_v63  ;;  %v12766_v60 = vld [vmem:[%s18263_s2 + $0x12e8] sm:$0xff]  ;;  %v12771_v56 = vld [vmem:[%s18263_s2 + $0x12f0] sm:$0xff] }
 0x130   :  { %18983 = vst [vmem:[#allocation610_spill] sm:$0xff] %v12761_v58  ;;  %18984 = vst [vmem:[#allocation611_spill] sm:$0xff] %v12766_v60  ;;  %v12776_v62 = vld [vmem:[%s18263_s2 + $0x12f8] sm:$0xff]  ;;  %v12781_v63 = vld [vmem:[%s18263_s2 + $0x1300] sm:$0xff] }
 0x131   :  { %18985 = vst [vmem:[#allocation612_spill] sm:$0xff] %v12771_v56  ;;  %18986 = vst [vmem:[#allocation613_spill] sm:$0xff] %v12776_v62  ;;  %v12786_v58 = vld [vmem:[%s18263_s2 + $0x1308] sm:$0xff]  ;;  %v12791_v60 = vld [vmem:[%s18263_s2 + $0x1310] sm:$0xff] }
 0x132   :  { %18987 = vst [vmem:[#allocation614_spill] sm:$0xff] %v12781_v63  ;;  %18988 = vst [vmem:[#allocation615_spill] sm:$0xff] %v12786_v58  ;;  %v12796_v56 = vld [vmem:[%s18263_s2 + $0x1318] sm:$0xff]  ;;  %v12801_v62 = vld [vmem:[%s18263_s2 + $0x1320] sm:$0xff] }
 0x133   :  { %18989 = vst [vmem:[#allocation616_spill] sm:$0xff] %v12791_v60  ;;  %18990 = vst [vmem:[#allocation617_spill] sm:$0xff] %v12796_v56  ;;  %v12806_v63 = vld [vmem:[%s18263_s2 + $0x1328] sm:$0xff]  ;;  %v12811_v58 = vld [vmem:[%s18263_s2 + $0x1330] sm:$0xff] }
 0x134   :  { %18991 = vst [vmem:[#allocation618_spill] sm:$0xff] %v12801_v62  ;;  %18992 = vst [vmem:[#allocation619_spill] sm:$0xff] %v12806_v63  ;;  %v12816_v60 = vld [vmem:[%s18263_s2 + $0x1338] sm:$0xff]  ;;  %v12821_v56 = vld [vmem:[%s18263_s2 + $0x1340] sm:$0xff] }
 0x135   :  { %18993 = vst [vmem:[#allocation620_spill] sm:$0xff] %v12811_v58  ;;  %18994 = vst [vmem:[#allocation621_spill] sm:$0xff] %v12816_v60  ;;  %v12826_v62 = vld [vmem:[%s18263_s2 + $0x1348] sm:$0xff]  ;;  %v12831_v63 = vld [vmem:[%s18263_s2 + $0x1350] sm:$0xff] }
 0x136   :  { %18995 = vst [vmem:[#allocation622_spill] sm:$0xff] %v12821_v56  ;;  %18996 = vst [vmem:[#allocation623_spill] sm:$0xff] %v12826_v62  ;;  %v12836_v58 = vld [vmem:[%s18263_s2 + $0x1358] sm:$0xff]  ;;  %v12841_v60 = vld [vmem:[%s18263_s2 + $0x1360] sm:$0xff] }
 0x137   :  { %18997 = vst [vmem:[#allocation624_spill] sm:$0xff] %v12831_v63  ;;  %18998 = vst [vmem:[#allocation625_spill] sm:$0xff] %v12836_v58  ;;  %v12846_v56 = vld [vmem:[%s18263_s2 + $0x1368] sm:$0xff]  ;;  %v12851_v62 = vld [vmem:[%s18263_s2 + $0x1370] sm:$0xff] }
 0x138   :  { %18999 = vst [vmem:[#allocation626_spill] sm:$0xff] %v12841_v60  ;;  %19000 = vst [vmem:[#allocation627_spill] sm:$0xff] %v12846_v56  ;;  %v12856_v63 = vld [vmem:[%s18263_s2 + $0x1378] sm:$0xff]  ;;  %v12861_v58 = vld [vmem:[%s18263_s2 + $0x1380] sm:$0xff] }
 0x139   :  { %19001 = vst [vmem:[#allocation628_spill] sm:$0xff] %v12851_v62  ;;  %19002 = vst [vmem:[#allocation629_spill] sm:$0xff] %v12856_v63  ;;  %v12866_v60 = vld [vmem:[%s18263_s2 + $0x1388] sm:$0xff]  ;;  %v12871_v56 = vld [vmem:[%s18263_s2 + $0x1390] sm:$0xff] }
 0x13a   :  { %19003 = vst [vmem:[#allocation630_spill] sm:$0xff] %v12861_v58  ;;  %19004 = vst [vmem:[#allocation631_spill] sm:$0xff] %v12866_v60  ;;  %v12876_v62 = vld [vmem:[%s18263_s2 + $0x1398] sm:$0xff]  ;;  %v12881_v63 = vld [vmem:[%s18263_s2 + $0x13a0] sm:$0xff] }
 0x13b   :  { %19005 = vst [vmem:[#allocation632_spill] sm:$0xff] %v12871_v56  ;;  %19006 = vst [vmem:[#allocation633_spill] sm:$0xff] %v12876_v62  ;;  %v12886_v58 = vld [vmem:[%s18263_s2 + $0x13a8] sm:$0xff]  ;;  %v12891_v60 = vld [vmem:[%s18263_s2 + $0x13b0] sm:$0xff] }
 0x13c   :  { %19007 = vst [vmem:[#allocation634_spill] sm:$0xff] %v12881_v63  ;;  %19008 = vst [vmem:[#allocation635_spill] sm:$0xff] %v12886_v58  ;;  %v12896_v56 = vld [vmem:[%s18263_s2 + $0x13b8] sm:$0xff]  ;;  %v12901_v62 = vld [vmem:[%s18263_s2 + $0x13c0] sm:$0xff] }
 0x13d   :  { %19009 = vst [vmem:[#allocation636_spill] sm:$0xff] %v12891_v60  ;;  %19010 = vst [vmem:[#allocation637_spill] sm:$0xff] %v12896_v56  ;;  %v12906_v63 = vld [vmem:[%s18263_s2 + $0x13c8] sm:$0xff]  ;;  %v12911_v58 = vld [vmem:[%s18263_s2 + $0x13d0] sm:$0xff] }
 0x13e   :  { %19011 = vst [vmem:[#allocation638_spill] sm:$0xff] %v12901_v62  ;;  %19012 = vst [vmem:[#allocation639_spill] sm:$0xff] %v12906_v63  ;;  %v12916_v60 = vld [vmem:[%s18263_s2 + $0x13d8] sm:$0xff]  ;;  %v12921_v56 = vld [vmem:[%s18263_s2 + $0x13e0] sm:$0xff] }
 0x13f   :  { %19013 = vst [vmem:[#allocation640_spill] sm:$0xff] %v12911_v58  ;;  %19014 = vst [vmem:[#allocation641_spill] sm:$0xff] %v12916_v60  ;;  %v12926_v62 = vld [vmem:[%s18263_s2 + $0x13e8] sm:$0xff]  ;;  %v12931_v63 = vld [vmem:[%s18263_s2 + $0x13f0] sm:$0xff] }
 0x140   :  { %19015 = vst [vmem:[#allocation642_spill] sm:$0xff] %v12921_v56  ;;  %19016 = vst [vmem:[#allocation643_spill] sm:$0xff] %v12926_v62  ;;  %v12936_v58 = vld [vmem:[%s18263_s2 + $0x13f8] sm:$0xff]  ;;  %v12941_v60 = vld [vmem:[%s18263_s2 + $0x1400] sm:$0xff] }
 0x141   :  { %19017 = vst [vmem:[#allocation644_spill] sm:$0xff] %v12931_v63  ;;  %19018 = vst [vmem:[#allocation645_spill] sm:$0xff] %v12936_v58  ;;  %v12946_v56 = vld [vmem:[%s18263_s2 + $0x1408] sm:$0xff]  ;;  %v12951_v62 = vld [vmem:[%s18263_s2 + $0x1410] sm:$0xff] }
 0x142   :  { %19019 = vst [vmem:[#allocation646_spill] sm:$0xff] %v12941_v60  ;;  %19020 = vst [vmem:[#allocation647_spill] sm:$0xff] %v12946_v56  ;;  %v12956_v63 = vld [vmem:[%s18263_s2 + $0x1418] sm:$0xff]  ;;  %v12961_v58 = vld [vmem:[%s18263_s2 + $0x1420] sm:$0xff] }
 0x143   :  { %19021 = vst [vmem:[#allocation648_spill] sm:$0xff] %v12951_v62  ;;  %19022 = vst [vmem:[#allocation649_spill] sm:$0xff] %v12956_v63  ;;  %v12966_v60 = vld [vmem:[%s18263_s2 + $0x1428] sm:$0xff]  ;;  %v12971_v56 = vld [vmem:[%s18263_s2 + $0x1430] sm:$0xff] }
 0x144   :  { %19023 = vst [vmem:[#allocation650_spill] sm:$0xff] %v12961_v58  ;;  %19024 = vst [vmem:[#allocation651_spill] sm:$0xff] %v12966_v60  ;;  %v12976_v62 = vld [vmem:[%s18263_s2 + $0x1438] sm:$0xff]  ;;  %v12981_v63 = vld [vmem:[%s18263_s2 + $0x1440] sm:$0xff] }
 0x145   :  { %19025 = vst [vmem:[#allocation652_spill] sm:$0xff] %v12971_v56  ;;  %19026 = vst [vmem:[#allocation653_spill] sm:$0xff] %v12976_v62  ;;  %v12986_v58 = vld [vmem:[%s18263_s2 + $0x1448] sm:$0xff]  ;;  %v12991_v60 = vld [vmem:[%s18263_s2 + $0x1450] sm:$0xff] }
 0x146   :  { %19027 = vst [vmem:[#allocation654_spill] sm:$0xff] %v12981_v63  ;;  %19028 = vst [vmem:[#allocation655_spill] sm:$0xff] %v12986_v58  ;;  %v12996_v56 = vld [vmem:[%s18263_s2 + $0x1458] sm:$0xff]  ;;  %v13001_v62 = vld [vmem:[%s18263_s2 + $0x1460] sm:$0xff] }
 0x147   :  { %19029 = vst [vmem:[#allocation656_spill] sm:$0xff] %v12991_v60  ;;  %19030 = vst [vmem:[#allocation657_spill] sm:$0xff] %v12996_v56  ;;  %v13006_v63 = vld [vmem:[%s18263_s2 + $0x1468] sm:$0xff]  ;;  %v13011_v58 = vld [vmem:[%s18263_s2 + $0x1470] sm:$0xff] }
 0x148   :  { %19031 = vst [vmem:[#allocation658_spill] sm:$0xff] %v13001_v62  ;;  %19032 = vst [vmem:[#allocation659_spill] sm:$0xff] %v13006_v63  ;;  %v13016_v60 = vld [vmem:[%s18263_s2 + $0x1478] sm:$0xff]  ;;  %v13021_v56 = vld [vmem:[%s18263_s2 + $0x1480] sm:$0xff] }
 0x149   :  { %19033 = vst [vmem:[#allocation660_spill] sm:$0xff] %v13011_v58  ;;  %19034 = vst [vmem:[#allocation661_spill] sm:$0xff] %v13016_v60  ;;  %v13026_v62 = vld [vmem:[%s18263_s2 + $0x1488] sm:$0xff]  ;;  %v13031_v63 = vld [vmem:[%s18263_s2 + $0x1490] sm:$0xff] }
 0x14a   :  { %19035 = vst [vmem:[#allocation662_spill] sm:$0xff] %v13021_v56  ;;  %19036 = vst [vmem:[#allocation663_spill] sm:$0xff] %v13026_v62  ;;  %v13036_v58 = vld [vmem:[%s18263_s2 + $0x1498] sm:$0xff]  ;;  %v13041_v60 = vld [vmem:[%s18263_s2 + $0x14a0] sm:$0xff] }
 0x14b   :  { %19037 = vst [vmem:[#allocation664_spill] sm:$0xff] %v13031_v63  ;;  %19038 = vst [vmem:[#allocation665_spill] sm:$0xff] %v13036_v58  ;;  %v13046_v56 = vld [vmem:[%s18263_s2 + $0x14a8] sm:$0xff]  ;;  %v13051_v62 = vld [vmem:[%s18263_s2 + $0x14b0] sm:$0xff] }
 0x14c   :  { %19039 = vst [vmem:[#allocation666_spill] sm:$0xff] %v13041_v60  ;;  %19040 = vst [vmem:[#allocation667_spill] sm:$0xff] %v13046_v56  ;;  %v13056_v63 = vld [vmem:[%s18263_s2 + $0x14b8] sm:$0xff]  ;;  %v13061_v58 = vld [vmem:[%s18263_s2 + $0x14c0] sm:$0xff] }
 0x14d   :  { %19041 = vst [vmem:[#allocation668_spill] sm:$0xff] %v13051_v62  ;;  %19042 = vst [vmem:[#allocation669_spill] sm:$0xff] %v13056_v63  ;;  %v13066_v60 = vld [vmem:[%s18263_s2 + $0x14c8] sm:$0xff]  ;;  %v13071_v56 = vld [vmem:[%s18263_s2 + $0x14d0] sm:$0xff] }
 0x14e   :  { %19043 = vst [vmem:[#allocation670_spill] sm:$0xff] %v13061_v58  ;;  %19044 = vst [vmem:[#allocation671_spill] sm:$0xff] %v13066_v60  ;;  %v13076_v62 = vld [vmem:[%s18263_s2 + $0x14d8] sm:$0xff]  ;;  %v13081_v63 = vld [vmem:[%s18263_s2 + $0x14e0] sm:$0xff] }
 0x14f   :  { %19045 = vst [vmem:[#allocation672_spill] sm:$0xff] %v13071_v56  ;;  %19046 = vst [vmem:[#allocation673_spill] sm:$0xff] %v13076_v62  ;;  %v13086_v58 = vld [vmem:[%s18263_s2 + $0x14e8] sm:$0xff]  ;;  %v13091_v60 = vld [vmem:[%s18263_s2 + $0x14f0] sm:$0xff] }
 0x150   :  { %19047 = vst [vmem:[#allocation674_spill] sm:$0xff] %v13081_v63  ;;  %19048 = vst [vmem:[#allocation675_spill] sm:$0xff] %v13086_v58  ;;  %v13096_v56 = vld [vmem:[%s18263_s2 + $0x14f8] sm:$0xff]  ;;  %v13101_v62 = vld [vmem:[%s18263_s2 + $0x1500] sm:$0xff] }
 0x151   :  { %19049 = vst [vmem:[#allocation676_spill] sm:$0xff] %v13091_v60  ;;  %19050 = vst [vmem:[#allocation677_spill] sm:$0xff] %v13096_v56  ;;  %v13106_v63 = vld [vmem:[%s18263_s2 + $0x1508] sm:$0xff]  ;;  %v13111_v58 = vld [vmem:[%s18263_s2 + $0x1510] sm:$0xff] }
 0x152   :  { %19051 = vst [vmem:[#allocation678_spill] sm:$0xff] %v13101_v62  ;;  %19052 = vst [vmem:[#allocation679_spill] sm:$0xff] %v13106_v63  ;;  %v13116_v60 = vld [vmem:[%s18263_s2 + $0x1518] sm:$0xff]  ;;  %v13121_v56 = vld [vmem:[%s18263_s2 + $0x1520] sm:$0xff] }
 0x153   :  { %19053 = vst [vmem:[#allocation680_spill] sm:$0xff] %v13111_v58  ;;  %19054 = vst [vmem:[#allocation681_spill] sm:$0xff] %v13116_v60  ;;  %v13126_v62 = vld [vmem:[%s18263_s2 + $0x1528] sm:$0xff]  ;;  %v13131_v63 = vld [vmem:[%s18263_s2 + $0x1530] sm:$0xff] }
 0x154   :  { %19055 = vst [vmem:[#allocation682_spill] sm:$0xff] %v13121_v56  ;;  %19056 = vst [vmem:[#allocation683_spill] sm:$0xff] %v13126_v62  ;;  %v13136_v58 = vld [vmem:[%s18263_s2 + $0x1538] sm:$0xff]  ;;  %v13141_v60 = vld [vmem:[%s18263_s2 + $0x1540] sm:$0xff] }
 0x155   :  { %19057 = vst [vmem:[#allocation684_spill] sm:$0xff] %v13131_v63  ;;  %19058 = vst [vmem:[#allocation685_spill] sm:$0xff] %v13136_v58  ;;  %v13146_v56 = vld [vmem:[%s18263_s2 + $0x1548] sm:$0xff]  ;;  %v13151_v62 = vld [vmem:[%s18263_s2 + $0x1550] sm:$0xff] }
 0x156   :  { %19059 = vst [vmem:[#allocation686_spill] sm:$0xff] %v13141_v60  ;;  %19060 = vst [vmem:[#allocation687_spill] sm:$0xff] %v13146_v56  ;;  %v13156_v63 = vld [vmem:[%s18263_s2 + $0x1558] sm:$0xff]  ;;  %v13161_v58 = vld [vmem:[%s18263_s2 + $0x1560] sm:$0xff] }
 0x157   :  { %19061 = vst [vmem:[#allocation688_spill] sm:$0xff] %v13151_v62  ;;  %19062 = vst [vmem:[#allocation689_spill] sm:$0xff] %v13156_v63  ;;  %v13166_v60 = vld [vmem:[%s18263_s2 + $0x1568] sm:$0xff]  ;;  %v13171_v56 = vld [vmem:[%s18263_s2 + $0x1570] sm:$0xff] }
 0x158   :  { %19063 = vst [vmem:[#allocation690_spill] sm:$0xff] %v13161_v58  ;;  %19064 = vst [vmem:[#allocation691_spill] sm:$0xff] %v13166_v60  ;;  %v13176_v62 = vld [vmem:[%s18263_s2 + $0x1578] sm:$0xff]  ;;  %v13181_v63 = vld [vmem:[%s18263_s2 + $0x1580] sm:$0xff] }
 0x159   :  { %19065 = vst [vmem:[#allocation692_spill] sm:$0xff] %v13171_v56  ;;  %19066 = vst [vmem:[#allocation693_spill] sm:$0xff] %v13176_v62  ;;  %v13186_v58 = vld [vmem:[%s18263_s2 + $0x1588] sm:$0xff]  ;;  %v13191_v60 = vld [vmem:[%s18263_s2 + $0x1590] sm:$0xff] }
 0x15a   :  { %19067 = vst [vmem:[#allocation694_spill] sm:$0xff] %v13181_v63  ;;  %19068 = vst [vmem:[#allocation695_spill] sm:$0xff] %v13186_v58  ;;  %v13196_v56 = vld [vmem:[%s18263_s2 + $0x1598] sm:$0xff]  ;;  %v13201_v62 = vld [vmem:[%s18263_s2 + $0x15a0] sm:$0xff] }
 0x15b   :  { %19069 = vst [vmem:[#allocation696_spill] sm:$0xff] %v13191_v60  ;;  %19070 = vst [vmem:[#allocation697_spill] sm:$0xff] %v13196_v56  ;;  %v13206_v63 = vld [vmem:[%s18263_s2 + $0x15a8] sm:$0xff]  ;;  %v13211_v58 = vld [vmem:[%s18263_s2 + $0x15b0] sm:$0xff] }
 0x15c   :  { %19071 = vst [vmem:[#allocation698_spill] sm:$0xff] %v13201_v62  ;;  %19072 = vst [vmem:[#allocation699_spill] sm:$0xff] %v13206_v63  ;;  %v13216_v60 = vld [vmem:[%s18263_s2 + $0x15b8] sm:$0xff]  ;;  %v13221_v56 = vld [vmem:[%s18263_s2 + $0x15c0] sm:$0xff] }
 0x15d   :  { %19073 = vst [vmem:[#allocation700_spill] sm:$0xff] %v13211_v58  ;;  %19074 = vst [vmem:[#allocation701_spill] sm:$0xff] %v13216_v60  ;;  %v13226_v62 = vld [vmem:[%s18263_s2 + $0x15c8] sm:$0xff]  ;;  %v13231_v63 = vld [vmem:[%s18263_s2 + $0x15d0] sm:$0xff] }
 0x15e   :  { %19075 = vst [vmem:[#allocation702_spill] sm:$0xff] %v13221_v56  ;;  %19076 = vst [vmem:[#allocation703_spill] sm:$0xff] %v13226_v62  ;;  %v13236_v58 = vld [vmem:[%s18263_s2 + $0x15d8] sm:$0xff]  ;;  %v13241_v60 = vld [vmem:[%s18263_s2 + $0x15e0] sm:$0xff] }
 0x15f   :  { %19077 = vst [vmem:[#allocation704_spill] sm:$0xff] %v13231_v63  ;;  %19078 = vst [vmem:[#allocation705_spill] sm:$0xff] %v13236_v58  ;;  %v13246_v56 = vld [vmem:[%s18263_s2 + $0x15e8] sm:$0xff]  ;;  %v13251_v62 = vld [vmem:[%s18263_s2 + $0x15f0] sm:$0xff] }
 0x160   :  { %19079 = vst [vmem:[#allocation706_spill] sm:$0xff] %v13241_v60  ;;  %19080 = vst [vmem:[#allocation707_spill] sm:$0xff] %v13246_v56  ;;  %v13256_v63 = vld [vmem:[%s18263_s2 + $0x15f8] sm:$0xff]  ;;  %v13261_v58 = vld [vmem:[%s18263_s2 + $0x1600] sm:$0xff] }
 0x161   :  { %19081 = vst [vmem:[#allocation708_spill] sm:$0xff] %v13251_v62  ;;  %19082 = vst [vmem:[#allocation709_spill] sm:$0xff] %v13256_v63  ;;  %v13266_v60 = vld [vmem:[%s18263_s2 + $0x1608] sm:$0xff]  ;;  %v13271_v56 = vld [vmem:[%s18263_s2 + $0x1610] sm:$0xff] }
 0x162   :  { %19083 = vst [vmem:[#allocation710_spill] sm:$0xff] %v13261_v58  ;;  %19084 = vst [vmem:[#allocation711_spill] sm:$0xff] %v13266_v60  ;;  %v13276_v62 = vld [vmem:[%s18263_s2 + $0x1618] sm:$0xff]  ;;  %v13281_v63 = vld [vmem:[%s18263_s2 + $0x1620] sm:$0xff] }
 0x163   :  { %19085 = vst [vmem:[#allocation712_spill] sm:$0xff] %v13271_v56  ;;  %19086 = vst [vmem:[#allocation713_spill] sm:$0xff] %v13276_v62  ;;  %v13286_v58 = vld [vmem:[%s18263_s2 + $0x1628] sm:$0xff]  ;;  %v13291_v60 = vld [vmem:[%s18263_s2 + $0x1630] sm:$0xff] }
 0x164   :  { %19087 = vst [vmem:[#allocation714_spill] sm:$0xff] %v13281_v63  ;;  %19088 = vst [vmem:[#allocation715_spill] sm:$0xff] %v13286_v58  ;;  %v13296_v56 = vld [vmem:[%s18263_s2 + $0x1638] sm:$0xff]  ;;  %v13301_v62 = vld [vmem:[%s18263_s2 + $0x1640] sm:$0xff] }
 0x165   :  { %19089 = vst [vmem:[#allocation716_spill] sm:$0xff] %v13291_v60  ;;  %19090 = vst [vmem:[#allocation717_spill] sm:$0xff] %v13296_v56  ;;  %v13306_v63 = vld [vmem:[%s18263_s2 + $0x1648] sm:$0xff]  ;;  %v13311_v58 = vld [vmem:[%s18263_s2 + $0x1650] sm:$0xff] }
 0x166   :  { %19091 = vst [vmem:[#allocation718_spill] sm:$0xff] %v13301_v62  ;;  %19092 = vst [vmem:[#allocation719_spill] sm:$0xff] %v13306_v63  ;;  %v13316_v60 = vld [vmem:[%s18263_s2 + $0x1658] sm:$0xff]  ;;  %v13321_v56 = vld [vmem:[%s18263_s2 + $0x1660] sm:$0xff] }
 0x167   :  { %19093 = vst [vmem:[#allocation720_spill] sm:$0xff] %v13311_v58  ;;  %19094 = vst [vmem:[#allocation721_spill] sm:$0xff] %v13316_v60  ;;  %v13326_v62 = vld [vmem:[%s18263_s2 + $0x1668] sm:$0xff]  ;;  %v13331_v63 = vld [vmem:[%s18263_s2 + $0x1670] sm:$0xff] }
 0x168   :  { %19095 = vst [vmem:[#allocation722_spill] sm:$0xff] %v13321_v56  ;;  %19096 = vst [vmem:[#allocation723_spill] sm:$0xff] %v13326_v62  ;;  %v13336_v58 = vld [vmem:[%s18263_s2 + $0x1678] sm:$0xff]  ;;  %v13341_v60 = vld [vmem:[%s18263_s2 + $0x1680] sm:$0xff] }
 0x169   :  { %19097 = vst [vmem:[#allocation724_spill] sm:$0xff] %v13331_v63  ;;  %19098 = vst [vmem:[#allocation725_spill] sm:$0xff] %v13336_v58  ;;  %v13346_v56 = vld [vmem:[%s18263_s2 + $0x1688] sm:$0xff]  ;;  %v13351_v62 = vld [vmem:[%s18263_s2 + $0x1690] sm:$0xff] }
 0x16a   :  { %19099 = vst [vmem:[#allocation726_spill] sm:$0xff] %v13341_v60  ;;  %19100 = vst [vmem:[#allocation727_spill] sm:$0xff] %v13346_v56  ;;  %v13356_v63 = vld [vmem:[%s18263_s2 + $0x1698] sm:$0xff]  ;;  %v13361_v58 = vld [vmem:[%s18263_s2 + $0x16a0] sm:$0xff] }
 0x16b   :  { %19101 = vst [vmem:[#allocation728_spill] sm:$0xff] %v13351_v62  ;;  %19102 = vst [vmem:[#allocation729_spill] sm:$0xff] %v13356_v63  ;;  %v13366_v60 = vld [vmem:[%s18263_s2 + $0x16a8] sm:$0xff]  ;;  %v13371_v56 = vld [vmem:[%s18263_s2 + $0x16b0] sm:$0xff] }
 0x16c   :  { %19103 = vst [vmem:[#allocation730_spill] sm:$0xff] %v13361_v58  ;;  %19104 = vst [vmem:[#allocation731_spill] sm:$0xff] %v13366_v60  ;;  %v13376_v62 = vld [vmem:[%s18263_s2 + $0x16b8] sm:$0xff]  ;;  %v13381_v63 = vld [vmem:[%s18263_s2 + $0x16c0] sm:$0xff] }
 0x16d   :  { %19105 = vst [vmem:[#allocation732_spill] sm:$0xff] %v13371_v56  ;;  %19106 = vst [vmem:[#allocation733_spill] sm:$0xff] %v13376_v62  ;;  %v13386_v58 = vld [vmem:[%s18263_s2 + $0x16c8] sm:$0xff]  ;;  %v13391_v60 = vld [vmem:[%s18263_s2 + $0x16d0] sm:$0xff] }
 0x16e   :  { %19107 = vst [vmem:[#allocation734_spill] sm:$0xff] %v13381_v63  ;;  %19108 = vst [vmem:[#allocation735_spill] sm:$0xff] %v13386_v58  ;;  %v13396_v56 = vld [vmem:[%s18263_s2 + $0x16d8] sm:$0xff]  ;;  %v13401_v62 = vld [vmem:[%s18263_s2 + $0x16e0] sm:$0xff] }
 0x16f   :  { %19109 = vst [vmem:[#allocation736_spill] sm:$0xff] %v13391_v60  ;;  %19110 = vst [vmem:[#allocation737_spill] sm:$0xff] %v13396_v56  ;;  %v13406_v63 = vld [vmem:[%s18263_s2 + $0x16e8] sm:$0xff]  ;;  %v13411_v58 = vld [vmem:[%s18263_s2 + $0x16f0] sm:$0xff] }
 0x170   :  { %19111 = vst [vmem:[#allocation738_spill] sm:$0xff] %v13401_v62  ;;  %19112 = vst [vmem:[#allocation739_spill] sm:$0xff] %v13406_v63  ;;  %v13416_v60 = vld [vmem:[%s18263_s2 + $0x16f8] sm:$0xff]  ;;  %v13421_v56 = vld [vmem:[%s18263_s2 + $0x1700] sm:$0xff] }
 0x171   :  { %19113 = vst [vmem:[#allocation740_spill] sm:$0xff] %v13411_v58  ;;  %19114 = vst [vmem:[#allocation741_spill] sm:$0xff] %v13416_v60  ;;  %v13426_v62 = vld [vmem:[%s18263_s2 + $0x1708] sm:$0xff]  ;;  %v13431_v63 = vld [vmem:[%s18263_s2 + $0x1710] sm:$0xff] }
 0x172   :  { %19115 = vst [vmem:[#allocation742_spill] sm:$0xff] %v13421_v56  ;;  %19116 = vst [vmem:[#allocation743_spill] sm:$0xff] %v13426_v62  ;;  %v13436_v58 = vld [vmem:[%s18263_s2 + $0x1718] sm:$0xff]  ;;  %v13441_v60 = vld [vmem:[%s18263_s2 + $0x1720] sm:$0xff] }
 0x173   :  { %19117 = vst [vmem:[#allocation744_spill] sm:$0xff] %v13431_v63  ;;  %19118 = vst [vmem:[#allocation745_spill] sm:$0xff] %v13436_v58  ;;  %v13446_v56 = vld [vmem:[%s18263_s2 + $0x1728] sm:$0xff]  ;;  %v13451_v62 = vld [vmem:[%s18263_s2 + $0x1730] sm:$0xff] }
 0x174   :  { %19119 = vst [vmem:[#allocation746_spill] sm:$0xff] %v13441_v60  ;;  %19120 = vst [vmem:[#allocation747_spill] sm:$0xff] %v13446_v56  ;;  %v13456_v63 = vld [vmem:[%s18263_s2 + $0x1738] sm:$0xff]  ;;  %v13461_v58 = vld [vmem:[%s18263_s2 + $0x1740] sm:$0xff] }
 0x175   :  { %19121 = vst [vmem:[#allocation748_spill] sm:$0xff] %v13451_v62  ;;  %19122 = vst [vmem:[#allocation749_spill] sm:$0xff] %v13456_v63  ;;  %v13466_v60 = vld [vmem:[%s18263_s2 + $0x1748] sm:$0xff]  ;;  %v13471_v56 = vld [vmem:[%s18263_s2 + $0x1750] sm:$0xff] }
 0x176   :  { %19123 = vst [vmem:[#allocation750_spill] sm:$0xff] %v13461_v58  ;;  %19124 = vst [vmem:[#allocation751_spill] sm:$0xff] %v13466_v60  ;;  %v13476_v62 = vld [vmem:[%s18263_s2 + $0x1758] sm:$0xff]  ;;  %v13481_v63 = vld [vmem:[%s18263_s2 + $0x1760] sm:$0xff] }
 0x177   :  { %19125 = vst [vmem:[#allocation752_spill] sm:$0xff] %v13471_v56  ;;  %19126 = vst [vmem:[#allocation753_spill] sm:$0xff] %v13476_v62  ;;  %v13486_v58 = vld [vmem:[%s18263_s2 + $0x1768] sm:$0xff]  ;;  %v13491_v60 = vld [vmem:[%s18263_s2 + $0x1770] sm:$0xff] }
 0x178   :  { %19127 = vst [vmem:[#allocation754_spill] sm:$0xff] %v13481_v63  ;;  %19128 = vst [vmem:[#allocation755_spill] sm:$0xff] %v13486_v58  ;;  %v13496_v56 = vld [vmem:[%s18263_s2 + $0x1778] sm:$0xff]  ;;  %v13501_v62 = vld [vmem:[%s18263_s2 + $0x1780] sm:$0xff] }
 0x179   :  { %19129 = vst [vmem:[#allocation756_spill] sm:$0xff] %v13491_v60  ;;  %19130 = vst [vmem:[#allocation757_spill] sm:$0xff] %v13496_v56  ;;  %v13506_v63 = vld [vmem:[%s18263_s2 + $0x1788] sm:$0xff]  ;;  %v13511_v58 = vld [vmem:[%s18263_s2 + $0x1790] sm:$0xff] }
 0x17a   :  { %19131 = vst [vmem:[#allocation758_spill] sm:$0xff] %v13501_v62  ;;  %19132 = vst [vmem:[#allocation759_spill] sm:$0xff] %v13506_v63  ;;  %v13516_v60 = vld [vmem:[%s18263_s2 + $0x1798] sm:$0xff]  ;;  %v13521_v56 = vld [vmem:[%s18263_s2 + $0x17a0] sm:$0xff] }
 0x17b   :  { %19133 = vst [vmem:[#allocation760_spill] sm:$0xff] %v13511_v58  ;;  %19134 = vst [vmem:[#allocation761_spill] sm:$0xff] %v13516_v60  ;;  %v13526_v62 = vld [vmem:[%s18263_s2 + $0x17a8] sm:$0xff]  ;;  %v13531_v63 = vld [vmem:[%s18263_s2 + $0x17b0] sm:$0xff] }
 0x17c   :  { %19135 = vst [vmem:[#allocation762_spill] sm:$0xff] %v13521_v56  ;;  %19136 = vst [vmem:[#allocation763_spill] sm:$0xff] %v13526_v62  ;;  %v13536_v58 = vld [vmem:[%s18263_s2 + $0x17b8] sm:$0xff]  ;;  %v13541_v60 = vld [vmem:[%s18263_s2 + $0x17c0] sm:$0xff] }
 0x17d   :  { %19137 = vst [vmem:[#allocation764_spill] sm:$0xff] %v13531_v63  ;;  %19138 = vst [vmem:[#allocation765_spill] sm:$0xff] %v13536_v58  ;;  %v13546_v56 = vld [vmem:[%s18263_s2 + $0x17c8] sm:$0xff]  ;;  %v13551_v62 = vld [vmem:[%s18263_s2 + $0x17d0] sm:$0xff] }
 0x17e   :  { %19139 = vst [vmem:[#allocation766_spill] sm:$0xff] %v13541_v60  ;;  %19140 = vst [vmem:[#allocation767_spill] sm:$0xff] %v13546_v56  ;;  %v13556_v63 = vld [vmem:[%s18263_s2 + $0x17d8] sm:$0xff]  ;;  %v13561_v58 = vld [vmem:[%s18263_s2 + $0x17e0] sm:$0xff] }
 0x17f   :  { %19141 = vst [vmem:[#allocation768_spill] sm:$0xff] %v13551_v62  ;;  %19142 = vst [vmem:[#allocation769_spill] sm:$0xff] %v13556_v63  ;;  %v13566_v60 = vld [vmem:[%s18263_s2 + $0x17e8] sm:$0xff]  ;;  %v13571_v56 = vld [vmem:[%s18263_s2 + $0x17f0] sm:$0xff] }
 0x180   :  { %19143 = vst [vmem:[#allocation770_spill] sm:$0xff] %v13561_v58  ;;  %19144 = vst [vmem:[#allocation771_spill] sm:$0xff] %v13566_v60  ;;  %v13576_v62 = vld [vmem:[%s18263_s2 + $0x17f8] sm:$0xff]  ;;  %v1612_v63 = vld [vmem:[%s18266_s5] sm:$0xff] }
 0x181   :  { %19145 = vst [vmem:[#allocation772_spill] sm:$0xff] %v13571_v56  ;;  %19146 = vst [vmem:[#allocation773_spill] sm:$0xff] %v13576_v62  ;;  %v1614_v58 = vld [vmem:[%s18266_s5 + $0x10] sm:$0xff]  ;;  %2523 = vperm.xlu0 %9639, %v1612_v63   ;;  %v1613_v56 = vld [vmem:[%s18266_s5 + $0x8] sm:$0xff] }
 0x182   :  { %2533 = vperm.xlu1 %9640, %v1614_v58   ;;  %v1615_v62 = vld [vmem:[%s18266_s5 + $0x18] sm:$0xff] }
 0x183   :  { %1611 = vsyncadd [#allocation3], 98304  ;;  %v1717_v60 = vld [vmem:[%s18262_s1 + $0x8] sm:$0xff]  ;;  %v1719_v59 = vld [vmem:[%s18262_s1 + $0x18] sm:$0xff]  ;;  %vm3871_vm2 = vcmask 261120  }
 0x184   :  { %v1721_v61 = vld [vmem:[%s18262_s1 + $0x28] sm:$0xff]  ;;  %v1723_v58 = vld [vmem:[%s18262_s1 + $0x38] sm:$0xff]  ;;  %v1716_v57 = vld [vmem:[%s18262_s1] sm:$0xff] }
 0x185   :  { %v7620_v63 = vpack.c.bf16 %v1721_v61, %v1717_v60  ;;  %v1720_v54 = vld [vmem:[%s18262_s1 + $0x20] sm:$0xff]  ;;  %v1617_v60 = vld [vmem:[%s18267_s6 + $0x8] sm:$0xff]  ;;  %v8004_v61 = vpack.c.bf16 %v1723_v58, %v1719_v59  ;;  %v1718_v48 = vld [vmem:[%s18262_s1 + $0x10] sm:$0xff]  ;;  %2528 = vperm.xlu0 %9639, %v1613_v56  }
 0x186   :  { %v1616_v50 = vld [vmem:[%s18267_s6] sm:$0xff]  ;;  %v7622_v52 = vpack.c.bf16 %v1720_v54, %v1716_v57  ;;  %v1722_v55 = vld [vmem:[%s18262_s1 + $0x30] sm:$0xff]  ;;  %v1725_v51 = vld [vmem:[%s18262_s1 + $0x48] sm:$0xff]  ;;  %2538 = vperm.xlu1 %9640, %v1615_v62  }
 0x187   :  { %v8006_v53 = vpack.c.bf16 %v1722_v55, %v1718_v48  ;;  %v1729_v59 = vld [vmem:[%s18262_s1 + $0x68] sm:$0xff]  ;;  %v1727_v54 = vld [vmem:[%s18262_s1 + $0x58] sm:$0xff]  ;;  %7621 = vmatprep.subr.bf16.mxu0 %v7620_v63  ;;  %8005 = vmatprep.subr.bf16.mxu1 %v8004_v61  ;;  %v1724_v48 = vld [vmem:[%s18262_s1 + $0x40] sm:$0xff] }
 0x188   :  { %v1731_v57 = vld [vmem:[%s18262_s1 + $0x78] sm:$0xff]  ;;  %v7624_v58 = vpack.c.bf16 %v1729_v59, %v1725_v51  ;;  %v1728_v55 = vld [vmem:[%s18262_s1 + $0x60] sm:$0xff]  ;;  %v1726_v56 = vld [vmem:[%s18262_s1 + $0x50] sm:$0xff]  ;;  %7623 = vmatpush1.bf16.msra.mxu0 %v7622_v52 }
 0x189   :  { %v8008_v49 = vpack.c.bf16 %v1731_v57, %v1727_v54  ;;  %8007 = vmatpush1.bf16.msra.mxu1 %v8006_v53  ;;  %v7626_v62 = vpack.c.bf16 %v1728_v55, %v1724_v48  ;;  %v1730_v51 = vld [vmem:[%s18262_s1 + $0x70] sm:$0xff]  ;;  %v1733_v63 = vld [vmem:[%s18262_s1 + $0x88] sm:$0xff]  ;;  %v1619_v52 = vld [vmem:[%s18267_s6 + $0x18] sm:$0xff]  ;;  %2592 = vperm.xlu0 %9639, %v1616_v50  }
 0x18a   :  { %v1737_v61 = vld [vmem:[%s18262_s1 + $0xa8] sm:$0xff]  ;;  %v1618_v59 = vld [vmem:[%s18267_s6 + $0x10] sm:$0xff]  ;;  %7625 = vmatprep.subr.bf16.mxu0 %v7624_v58  ;;  %v8010_v53 = vpack.c.bf16 %v1730_v51, %v1726_v56  ;;  %v1735_v57 = vld [vmem:[%s18262_s1 + $0x98] sm:$0xff]  ;;  %2597 = vperm.xlu1 %9640, %v1617_v60  }
 0x18b   :  { %8009 = vmatprep.subr.bf16.mxu1 %v8008_v49  ;;  %v7628_v54 = vpack.c.bf16 %v1737_v61, %v1733_v63  ;;  %v1739_v48 = vld [vmem:[%s18262_s1 + $0xb8] sm:$0xff]  ;;  %v1732_v55 = vld [vmem:[%s18262_s1 + $0x80] sm:$0xff]  ;;  %v1734_v58 = vld [vmem:[%s18262_s1 + $0x90] sm:$0xff] }
 0x18c   :  { %v8012_v46 = vpack.c.bf16 %v1739_v48, %v1735_v57  ;;  %v1736_v49 = vld [vmem:[%s18262_s1 + $0xa0] sm:$0xff]  ;;  %v1738_v56 = vld [vmem:[%s18262_s1 + $0xb0] sm:$0xff]  ;;  %v1741_v51 = vld [vmem:[%s18262_s1 + $0xc8] sm:$0xff]  ;;  %7627 = vmatpush1.bf16.msra.mxu0 %v7626_v62 }
 0x18d   :  { %v1745_v50 = vld [vmem:[%s18262_s1 + $0xe8] sm:$0xff]  ;;  %v1743_v60 = vld [vmem:[%s18262_s1 + $0xd8] sm:$0xff]  ;;  %8011 = vmatpush1.bf16.msra.mxu1 %v8010_v53  ;;  %v7630_v63 = vpack.c.bf16 %v1736_v49, %v1732_v55  ;;  %v8014_v61 = vpack.c.bf16 %v1738_v56, %v1734_v58  ;;  %v1740_v48 = vld [vmem:[%s18262_s1 + $0xc0] sm:$0xff]  ;;  %7629 = vmatprep.subr.bf16.mxu0 %v7628_v54 }
 0x18e   :  { %v1747_v57 = vld [vmem:[%s18262_s1 + $0xf8] sm:$0xff]  ;;  %v1744_v42 = vld [vmem:[%s18262_s1 + $0xe0] sm:$0xff]  ;;  %8013 = vmatprep.subr.bf16.mxu1 %v8012_v46  ;;  %v7632_v44 = vpack.c.bf16 %v1745_v50, %v1741_v51  ;;  %v1742_v62 = vld [vmem:[%s18262_s1 + $0xd0] sm:$0xff]  ;;  %2602 = vperm.xlu0 %9639, %v1618_v59  }
 0x18f   :  { %v8016_v40 = vpack.c.bf16 %v1747_v57, %v1743_v60  ;;  %v1746_v53 = vld [vmem:[%s18262_s1 + $0xf0] sm:$0xff]  ;;  %v1749_v55 = vld [vmem:[%s18262_s1 + $0x108] sm:$0xff]  ;;  %2607 = vperm.xlu1 %9640, %v1619_v52   ;;  %v1751_v54 = vld [vmem:[%s18262_s1 + $0x118] sm:$0xff]  ;;  %v7634_v58 = vpack.c.bf16 %v1744_v42, %v1740_v48 }
 0x190   :  { %v1753_v46 = vld [vmem:[%s18262_s1 + $0x128] sm:$0xff]  ;;  %v1755_v49 = vld [vmem:[%s18262_s1 + $0x138] sm:$0xff]  ;;  %7631 = vmatpush1.bf16.msra.mxu0 %v7630_v63  ;;  %v8018_v56 = vpack.c.bf16 %v1746_v53, %v1742_v62  ;;  %v1748_v59 = vld [vmem:[%s18262_s1 + $0x100] sm:$0xff] }
 0x191   :  { %8015 = vmatpush1.bf16.msra.mxu1 %v8014_v61  ;;  %v1752_v52 = vld [vmem:[%s18262_s1 + $0x120] sm:$0xff]  ;;  %7633 = vmatprep.subr.bf16.mxu0 %v7632_v44  ;;  %v7636_v51 = vpack.c.bf16 %v1753_v46, %v1749_v55  ;;  %v8020_v50 = vpack.c.bf16 %v1755_v49, %v1751_v54  ;;  %v1750_v60 = vld [vmem:[%s18262_s1 + $0x110] sm:$0xff]  ;;  %v1757_v63 = vld [vmem:[%s18262_s1 + $0x148] sm:$0xff] }
 0x192   :  { %8017 = vmatprep.subr.bf16.mxu1 %v8016_v40  ;;  %v1754_v42 = vld [vmem:[%s18262_s1 + $0x130] sm:$0xff]  ;;  %v1761_v61 = vld [vmem:[%s18262_s1 + $0x168] sm:$0xff]  ;;  %v1759_v40 = vld [vmem:[%s18262_s1 + $0x158] sm:$0xff]  ;;  %v7638_v57 = vpack.c.bf16 %v1752_v52, %v1748_v59 }
 0x193   :  { %v1763_v44 = vld [vmem:[%s18262_s1 + $0x178] sm:$0xff]  ;;  %v8022_v48 = vpack.c.bf16 %v1754_v42, %v1750_v60  ;;  %v1756_v62 = vld [vmem:[%s18262_s1 + $0x140] sm:$0xff]  ;;  %v7640_v55 = vpack.c.bf16 %v1761_v61, %v1757_v63  ;;  %v1758_v54 = vld [vmem:[%s18262_s1 + $0x150] sm:$0xff] }
 0x194   :  { %7635 = vmatpush1.bf16.msra.mxu0 %v7634_v58  ;;  %v1760_v53 = vld [vmem:[%s18262_s1 + $0x160] sm:$0xff]  ;;  %v8024_v46 = vpack.c.bf16 %v1763_v44, %v1759_v40  ;;  %v1762_v49 = vld [vmem:[%s18262_s1 + $0x170] sm:$0xff]  ;;  %v1765_v58 = vld [vmem:[%s18262_s1 + $0x188] sm:$0xff] }
 0x195   :  { %8019 = vmatpush1.bf16.msra.mxu1 %v8018_v56  ;;  %7637 = vmatprep.subr.bf16.mxu0 %v7636_v51  ;;  %v1769_v56 = vld [vmem:[%s18262_s1 + $0x1a8] sm:$0xff]  ;;  %v1767_v59 = vld [vmem:[%s18262_s1 + $0x198] sm:$0xff]  ;;  %v7642_v51 = vpack.c.bf16 %v1760_v53, %v1756_v62  ;;  %v1764_v60 = vld [vmem:[%s18262_s1 + $0x180] sm:$0xff] }
 0x196   :  { %8021 = vmatprep.subr.bf16.mxu1 %v8020_v50  ;;  %v1771_v52 = vld [vmem:[%s18262_s1 + $0x1b8] sm:$0xff]  ;;  %v8026_v50 = vpack.c.bf16 %v1762_v49, %v1758_v54  ;;  %v1768_v42 = vld [vmem:[%s18262_s1 + $0x1a0] sm:$0xff]  ;;  %v7644_v63 = vpack.c.bf16 %v1769_v56, %v1765_v58  ;;  %v1766_v40 = vld [vmem:[%s18262_s1 + $0x190] sm:$0xff] }
 0x197   :  { %v8028_v61 = vpack.c.bf16 %v1771_v52, %v1767_v59  ;;  %v1770_v44 = vld [vmem:[%s18262_s1 + $0x1b0] sm:$0xff]  ;;  %v1775_v62 = vld [vmem:[%s18262_s1 + $0x1d8] sm:$0xff]  ;;  %v1772_v54 = vld [vmem:[%s18262_s1 + $0x1c0] sm:$0xff] }
 0x198   :  { %7639 = vmatpush1.bf16.msra.mxu0 %v7638_v57  ;;  %v1773_v57 = vld [vmem:[%s18262_s1 + $0x1c8] sm:$0xff]  ;;  %v1779_v53 = vld [vmem:[%s18262_s1 + $0x1f8] sm:$0xff]  ;;  %v1776_v49 = vld [vmem:[%s18262_s1 + $0x1e0] sm:$0xff] }
 0x199   :  { %8023 = vmatpush1.bf16.msra.mxu1 %v8022_v48  ;;  %7641 = vmatprep.subr.bf16.mxu0 %v7640_v55  ;;  %v1777_v48 = vld [vmem:[%s18262_s1 + $0x1e8] sm:$0xff]  ;;  %v7646_v55 = vpack.c.bf16 %v1768_v42, %v1764_v60  ;;  %v8032_v56 = vpack.c.bf16 %v1779_v53, %v1775_v62  ;;  %v1774_v59 = vld [vmem:[%s18262_s1 + $0x1d0] sm:$0xff]  ;;  %v1783_v60 = vld [vmem:[%s18262_s1 + $0x218] sm:$0xff] }
 0x19a   :  { %8025 = vmatprep.subr.bf16.mxu1 %v8024_v46  ;;  %v8030_v46 = vpack.c.bf16 %v1770_v44, %v1766_v40  ;;  %v7648_v58 = vpack.c.bf16 %v1777_v48, %v1773_v57  ;;  %v1778_v52 = vld [vmem:[%s18262_s1 + $0x1f0] sm:$0xff]  ;;  %v1787_v42 = vld [vmem:[%s18262_s1 + $0x238] sm:$0xff]  ;;  %v1780_v40 = vld [vmem:[%s18262_s1 + $0x200] sm:$0xff] }
 0x19b   :  { %v1784_v44 = vld [vmem:[%s18262_s1 + $0x220] sm:$0xff]  ;;  %v8036_v48 = vpack.c.bf16 %v1787_v42, %v1783_v60  ;;  %v1782_v62 = vld [vmem:[%s18262_s1 + $0x210] sm:$0xff]  ;;  %v1857_v45 = vld [vmem:[%s18262_s1 + $0x468] sm:$0xff] }
 0x19c   :  { %7643 = vmatpush1.bf16.msra.mxu0 %v7642_v51  ;;  %v1781_v51 = vld [vmem:[%s18262_s1 + $0x208] sm:$0xff]  ;;  %v1786_v53 = vld [vmem:[%s18262_s1 + $0x230] sm:$0xff]  ;;  %v1855_v41 = vld [vmem:[%s18262_s1 + $0x458] sm:$0xff] }
 0x19d   :  { %8027 = vmatpush1.bf16.msra.mxu1 %v8026_v50  ;;  %7645 = vmatprep.subr.bf16.mxu0 %v7644_v63  ;;  %v1785_v50 = vld [vmem:[%s18262_s1 + $0x228] sm:$0xff]  ;;  %v7650_v63 = vpack.c.bf16 %v1776_v49, %v1772_v54  ;;  %v1791_v54 = vld [vmem:[%s18262_s1 + $0x258] sm:$0xff]  ;;  %v1790_v60 = vld [vmem:[%s18262_s1 + $0x250] sm:$0xff] }
 0x19e   :  { %8029 = vmatprep.subr.bf16.mxu1 %v8028_v61  ;;  %v8034_v61 = vpack.c.bf16 %v1778_v52, %v1774_v59  ;;  %v7652_v57 = vpack.c.bf16 %v1785_v50, %v1781_v51  ;;  %v1795_v49 = vld [vmem:[%s18262_s1 + $0x278] sm:$0xff]  ;;  %v1788_v59 = vld [vmem:[%s18262_s1 + $0x240] sm:$0xff]  ;;  %v1794_v42 = vld [vmem:[%s18262_s1 + $0x270] sm:$0xff] }
 0x19f   :  { %v1792_v52 = vld [vmem:[%s18262_s1 + $0x260] sm:$0xff]  ;;  %v8040_v50 = vpack.c.bf16 %v1795_v49, %v1791_v54  ;;  %v1798_v54 = vld [vmem:[%s18262_s1 + $0x290] sm:$0xff]  ;;  %v1859_v38 = vld [vmem:[%s18262_s1 + $0x478] sm:$0xff] }
 0x1a0   :  { %7647 = vmatpush1.bf16.msra.mxu0 %v7646_v55  ;;  %v1789_v55 = vld [vmem:[%s18262_s1 + $0x248] sm:$0xff]  ;;  %v1802_v49 = vld [vmem:[%s18262_s1 + $0x2b0] sm:$0xff]  ;;  %v14099_v33 = vld [vmem:[%s18261_s0 + $0x40] sm:$0xff]  ;;  %v8072_v24 = vpack.c.bf16 %v1859_v38, %v1855_v41 }
 0x1a1   :  { %8031 = vmatpush1.bf16.msra.mxu1 %v8030_v46  ;;  %7649 = vmatprep.subr.bf16.mxu0 %v7648_v58  ;;  %v1793_v46 = vld [vmem:[%s18262_s1 + $0x268] sm:$0xff]  ;;  %v7654_v58 = vpack.c.bf16 %v1784_v44, %v1780_v40  ;;  %v1799_v40 = vld [vmem:[%s18262_s1 + $0x298] sm:$0xff]  ;;  %v14105_v26 = vld [vmem:[%s18262_s1 + $0x440] sm:$0xff] }
 0x1a2   :  { %8033 = vmatprep.subr.bf16.mxu1 %v8032_v56  ;;  %v8038_v56 = vpack.c.bf16 %v1786_v53, %v1782_v62  ;;  %v7656_v51 = vpack.c.bf16 %v1793_v46, %v1789_v55  ;;  %v1803_v44 = vld [vmem:[%s18262_s1 + $0x2b8] sm:$0xff]  ;;  %v1796_v62 = vld [vmem:[%s18262_s1 + $0x280] sm:$0xff]  ;;  %v14123_v27 = vld [vmem:[%s18262_s1 + $0x450] sm:$0xff] }
 0x1a3   :  { %v1800_v53 = vld [vmem:[%s18262_s1 + $0x2a0] sm:$0xff]  ;;  %v8044_v46 = vpack.c.bf16 %v1803_v44, %v1799_v40  ;;  %v1806_v40 = vld [vmem:[%s18262_s1 + $0x2d0] sm:$0xff]  ;;  %v14139_v41 = vld [vmem:[%s18262_s1 + $0x488] sm:$0xff] }
 0x1a4   :  { %7651 = vmatpush1.bf16.msra.mxu0 %v7650_v63  ;;  %v1797_v63 = vld [vmem:[%s18262_s1 + $0x288] sm:$0xff]  ;;  %v1810_v44 = vld [vmem:[%s18262_s1 + $0x2f0] sm:$0xff]  ;;  %v1864_v25 = vld [vmem:[%s18262_s1 + $0x4a0] sm:$0xff] }
 0x1a5   :  { %8035 = vmatpush1.bf16.msra.mxu1 %v8034_v61  ;;  %7653 = vmatprep.subr.bf16.mxu0 %v7652_v57  ;;  %v1801_v61 = vld [vmem:[%s18262_s1 + $0x2a8] sm:$0xff]  ;;  %v7658_v57 = vpack.c.bf16 %v1792_v52, %v1788_v59  ;;  %v1807_v59 = vld [vmem:[%s18262_s1 + $0x2d8] sm:$0xff]  ;;  %v1862_v22 = vld [vmem:[%s18262_s1 + $0x490] sm:$0xff] }
 0x1a6   :  { %8037 = vmatprep.subr.bf16.mxu1 %v8036_v48  ;;  %v8042_v48 = vpack.c.bf16 %v1794_v42, %v1790_v60  ;;  %v7660_v55 = vpack.c.bf16 %v1801_v61, %v1797_v63  ;;  %v1811_v52 = vld [vmem:[%s18262_s1 + $0x2f8] sm:$0xff]  ;;  %v1804_v60 = vld [vmem:[%s18262_s1 + $0x2c0] sm:$0xff] }
 0x1a7   :  { %v1808_v42 = vld [vmem:[%s18262_s1 + $0x2e0] sm:$0xff]  ;;  %v8048_v61 = vpack.c.bf16 %v1811_v52, %v1807_v59  ;;  %v1814_v59 = vld [vmem:[%s18262_s1 + $0x310] sm:$0xff]  ;;  %v1875_v18 = vld [vmem:[%s18262_s1 + $0x4f8] sm:$0xff] }
 0x1a8   :  { %7655 = vmatpush1.bf16.msra.mxu0 %v7654_v58  ;;  %v1805_v58 = vld [vmem:[%s18262_s1 + $0x2c8] sm:$0xff]  ;;  %v1818_v52 = vld [vmem:[%s18262_s1 + $0x330] sm:$0xff]  ;;  %v1868_v20 = vld [vmem:[%s18262_s1 + $0x4c0] sm:$0xff] }
 0x1a9   :  { %8039 = vmatpush1.bf16.msra.mxu1 %v8038_v56  ;;  %7657 = vmatprep.subr.bf16.mxu0 %v7656_v51  ;;  %v1809_v56 = vld [vmem:[%s18262_s1 + $0x2e8] sm:$0xff]  ;;  %v7662_v51 = vpack.c.bf16 %v1800_v53, %v1796_v62  ;;  %v1815_v62 = vld [vmem:[%s18262_s1 + $0x318] sm:$0xff] }
 0x1aa   :  { %8041 = vmatprep.subr.bf16.mxu1 %v8040_v50  ;;  %v8046_v50 = vpack.c.bf16 %v1802_v49, %v1798_v54  ;;  %v7664_v63 = vpack.c.bf16 %v1809_v56, %v1805_v58  ;;  %v1819_v53 = vld [vmem:[%s18262_s1 + $0x338] sm:$0xff]  ;;  %v1812_v54 = vld [vmem:[%s18262_s1 + $0x300] sm:$0xff] }
 0x1ab   :  { %v1816_v49 = vld [vmem:[%s18262_s1 + $0x320] sm:$0xff]  ;;  %v8052_v56 = vpack.c.bf16 %v1819_v53, %v1815_v62  ;;  %v1822_v62 = vld [vmem:[%s18262_s1 + $0x350] sm:$0xff] }
 0x1ac   :  { %7659 = vmatpush1.bf16.msra.mxu0 %v7658_v57  ;;  %v1813_v57 = vld [vmem:[%s18262_s1 + $0x308] sm:$0xff]  ;;  %v1826_v53 = vld [vmem:[%s18262_s1 + $0x370] sm:$0xff] }
 0x1ad   :  { %8043 = vmatpush1.bf16.msra.mxu1 %v8042_v48  ;;  %7661 = vmatprep.subr.bf16.mxu0 %v7660_v55  ;;  %v1817_v48 = vld [vmem:[%s18262_s1 + $0x328] sm:$0xff]  ;;  %v7666_v55 = vpack.c.bf16 %v1808_v42, %v1804_v60  ;;  %v1823_v60 = vld [vmem:[%s18262_s1 + $0x358] sm:$0xff] }
 0x1ae   :  { %8045 = vmatprep.subr.bf16.mxu1 %v8044_v46  ;;  %v8050_v46 = vpack.c.bf16 %v1810_v44, %v1806_v40  ;;  %v7668_v58 = vpack.c.bf16 %v1817_v48, %v1813_v57  ;;  %v1827_v42 = vld [vmem:[%s18262_s1 + $0x378] sm:$0xff]  ;;  %v1820_v40 = vld [vmem:[%s18262_s1 + $0x340] sm:$0xff] }
 0x1af   :  { %v1824_v44 = vld [vmem:[%s18262_s1 + $0x360] sm:$0xff]  ;;  %v8056_v48 = vpack.c.bf16 %v1827_v42, %v1823_v60  ;;  %v1830_v60 = vld [vmem:[%s18262_s1 + $0x390] sm:$0xff] }
 0x1b0   :  { %7663 = vmatpush1.bf16.msra.mxu0 %v7662_v51  ;;  %v1821_v51 = vld [vmem:[%s18262_s1 + $0x348] sm:$0xff]  ;;  %v1834_v42 = vld [vmem:[%s18262_s1 + $0x3b0] sm:$0xff] }
 0x1b1   :  { %8047 = vmatpush1.bf16.msra.mxu1 %v8046_v50  ;;  %7665 = vmatprep.subr.bf16.mxu0 %v7664_v63  ;;  %v1825_v50 = vld [vmem:[%s18262_s1 + $0x368] sm:$0xff]  ;;  %v7670_v63 = vpack.c.bf16 %v1816_v49, %v1812_v54  ;;  %v1831_v54 = vld [vmem:[%s18262_s1 + $0x398] sm:$0xff] }
 0x1b2   :  { %8049 = vmatprep.subr.bf16.mxu1 %v8048_v61  ;;  %v8054_v61 = vpack.c.bf16 %v1818_v52, %v1814_v59  ;;  %v7672_v57 = vpack.c.bf16 %v1825_v50, %v1821_v51  ;;  %v1835_v49 = vld [vmem:[%s18262_s1 + $0x3b8] sm:$0xff]  ;;  %v1828_v59 = vld [vmem:[%s18262_s1 + $0x380] sm:$0xff] }
 0x1b3   :  { %v1832_v52 = vld [vmem:[%s18262_s1 + $0x3a0] sm:$0xff]  ;;  %v8060_v50 = vpack.c.bf16 %v1835_v49, %v1831_v54  ;;  %v1838_v54 = vld [vmem:[%s18262_s1 + $0x3d0] sm:$0xff] }
 0x1b4   :  { %7667 = vmatpush1.bf16.msra.mxu0 %v7666_v55  ;;  %v1829_v55 = vld [vmem:[%s18262_s1 + $0x388] sm:$0xff]  ;;  %v1842_v49 = vld [vmem:[%s18262_s1 + $0x3f0] sm:$0xff] }
 0x1b5   :  { %8051 = vmatpush1.bf16.msra.mxu1 %v8050_v46  ;;  %7669 = vmatprep.subr.bf16.mxu0 %v7668_v58  ;;  %v1833_v46 = vld [vmem:[%s18262_s1 + $0x3a8] sm:$0xff]  ;;  %v7674_v58 = vpack.c.bf16 %v1824_v44, %v1820_v40  ;;  %v1839_v40 = vld [vmem:[%s18262_s1 + $0x3d8] sm:$0xff] }
 0x1b6   :  { %8053 = vmatprep.subr.bf16.mxu1 %v8052_v56  ;;  %v8058_v56 = vpack.c.bf16 %v1826_v53, %v1822_v62  ;;  %v7676_v51 = vpack.c.bf16 %v1833_v46, %v1829_v55  ;;  %v1843_v44 = vld [vmem:[%s18262_s1 + $0x3f8] sm:$0xff]  ;;  %v1836_v62 = vld [vmem:[%s18262_s1 + $0x3c0] sm:$0xff] }
 0x1b7   :  { %v1840_v53 = vld [vmem:[%s18262_s1 + $0x3e0] sm:$0xff]  ;;  %v8064_v46 = vpack.c.bf16 %v1843_v44, %v1839_v40  ;;  %v14003_v40 = vld [vmem:[%s18261_s0 + $0x10] sm:$0xff] }
 0x1b8   :  { %7671 = vmatpush1.bf16.msra.mxu0 %v7670_v63  ;;  %v1837_v63 = vld [vmem:[%s18262_s1 + $0x3c8] sm:$0xff]  ;;  %v14008_v44 = vld [vmem:[%s18261_s0 + $0x70] sm:$0xff] }
 0x1b9   :  { %8055 = vmatpush1.bf16.msra.mxu1 %v8054_v61  ;;  %7673 = vmatprep.subr.bf16.mxu0 %v7672_v57  ;;  %v1841_v61 = vld [vmem:[%s18262_s1 + $0x3e8] sm:$0xff]  ;;  %v7678_v57 = vpack.c.bf16 %v1832_v52, %v1828_v59  ;;  %v1847_v59 = vld [vmem:[%s18262_s1 + $0x418] sm:$0xff]  ;;  %v19147_v47 = vrot.slane %v14008_v44, 7 }
 0x1ba   :  { %8057 = vmatprep.subr.bf16.mxu1 %v8056_v48  ;;  %v8062_v48 = vpack.c.bf16 %v1834_v42, %v1830_v60  ;;  %v7680_v55 = vpack.c.bf16 %v1841_v61, %v1837_v63  ;;  %v1851_v52 = vld [vmem:[%s18262_s1 + $0x438] sm:$0xff]  ;;  %v2502_v63 = vlaneseq }
 0x1bb   :  { %v8068_v42 = vpack.c.bf16 %v1851_v52, %v1847_v59  ;;  %v14037_v59 = vld [vmem:[%s18262_s1 + $0x400] sm:$0xff] }
 0x1bc   :  { %7675 = vmatpush1.bf16.msra.mxu0 %v7674_v58  ;;  %v1845_v58 = vld [vmem:[%s18262_s1 + $0x408] sm:$0xff]  ;;  %v13998_v61 = vshrl.u32 %v2502_v63, 7  ;;  %v1848_v52 = vld [vmem:[%s18262_s1 + $0x420] sm:$0xff] }
 0x1bd   :  { %8059 = vmatpush1.bf16.msra.mxu1 %v8058_v56  ;;  %7677 = vmatprep.subr.bf16.mxu0 %v7676_v51  ;;  %v1849_v56 = vld [vmem:[%s18262_s1 + $0x428] sm:$0xff]  ;;  %v7682_v51 = vpack.c.bf16 %v1840_v53, %v1836_v62  ;;  %v1700_v62 = vld [vmem:[%s18261_s0] sm:$0xff]  ;;  %v7686_v30 = vpack.c.bf16 %v1848_v52, %v14037_v59 }
 0x1be   :  { %8061 = vmatprep.subr.bf16.mxu1 %v8060_v50  ;;  %v8066_v50 = vpack.c.bf16 %v1842_v49, %v1838_v54  ;;  %v7684_v60 = vpack.c.bf16 %v1849_v56, %v1845_v58  ;;  %v14026_v53 = vld [vmem:[%s18261_s0 + $0x60] sm:$0xff]  ;;  %vm2504_vm0 = vcmp.lt.s32.totalorder %v13998_v61, 1  ;;  %v2486_v58 = vrot.slane %v1700_v62, 7  ;;  %v1850_v56 = vld [vmem:[%s18262_s1 + $0x430] sm:$0xff]  ;;  %v1853_v49 = vld [vmem:[%s18262_s1 + $0x448] sm:$0xff] }
 0x1bf   :  { %v1704_v63 = vld [vmem:[%s18261_s0 + $0x20] sm:$0xff]  ;;  %vm2573_vm1 = vcmp.lt.s32.totalorder %v13998_v61, 7  ;;  %v19149_v32 = vrot.slane %v14026_v53, 7  ;;  %v7688_v52 = vpack.c.bf16 %v1857_v45, %v1853_v49  ;;  %v14144_v49 = vld [vmem:[%s18262_s1 + $0x4a8] sm:$0xff] }
 0x1c0   :  { %7679 = vmatpush1.bf16.msra.mxu0 %v7678_v57  ;;  %v14013_v57 = vld [vmem:[%s18261_s0 + $0x8] sm:$0xff]  ;;  %v2490_v37 = vrot.slane %v1704_v63, 7 }
 0x1c1   :  { %8063 = vmatpush1.bf16.msra.mxu1 %v8062_v48  ;;  %7681 = vmatprep.subr.bf16.mxu0 %v7680_v55  ;;  %v14018_v48 = vld [vmem:[%s18261_s0 + $0x68] sm:$0xff]  ;;  %v2488_v55 = vrot.slane %v14003_v40, 7  ;;  %v2487_v54 = vrot.slane %v14013_v57, 7  ;;  %v2517_v39 = vsel %vm2504_vm0, %v19149_v32, %v2486_v58  ;;  %v14128_v32 = vld [vmem:[%s18262_s1 + $0x470] sm:$0xff] }
 0x1c2   :  { %8065 = vmatprep.subr.bf16.mxu1 %v8064_v46  ;;  %v14071_v46 = vld [vmem:[%s18261_s0 + $0x48] sm:$0xff]  ;;  %v19148_v36 = vrot.slane %v14018_v48, 7 }
 0x1c3   :  { %v2519_v43 = vsel %vm2504_vm0, %v19147_v47, %v2488_v55 }
 0x1c4   :  { %7683 = vmatpush1.bf16.msra.mxu0 %v7682_v51  ;;  %v14045_v51 = vld [vmem:[%s18261_s0 + $0x30] sm:$0xff]  ;;  %v2518_v47 = vsel %vm2504_vm0, %v19148_v36, %v2487_v54  ;;  %v14110_v36 = vld [vmem:[%s18262_s1 + $0x460] sm:$0xff] }
 0x1c5   :  { %8067 = vmatpush1.bf16.msra.mxu1 %v8066_v50  ;;  %7685 = vmatprep.subr.bf16.mxu0 %v7684_v60  ;;  %v14050_v50 = vld [vmem:[%s18261_s0 + $0x50] sm:$0xff]  ;;  %v2492_v34 = vrot.slane %v14045_v51, 7 }
 0x1c6   :  { %8069 = vmatprep.subr.bf16.mxu1 %v8068_v42  ;;  %v1846_v60 = vld [vmem:[%s18262_s1 + $0x410] sm:$0xff]  ;;  %v1705_v42 = vld [vmem:[%s18261_s0 + $0x28] sm:$0xff]  ;;  %v2496_v62 = vrot.slane %v14050_v50, 7  ;;  %v19161_v16 = vrot.slane %v14050_v50, 1 }
 0x1c7   :  { %v2491_v35 = vrot.slane %v1705_v42, 7  ;;  %v2495_v42 = vrot.slane %v14071_v46, 7  ;;  %v8070_v59 = vpack.c.bf16 %v1850_v56, %v1846_v60  ;;  %v2494_v56 = vrot.slane %v14099_v33, 7 }
 0x1c8   :  { %v2511_v63 = vsel %vm2504_vm0, %v2492_v34, %v2496_v62  ;;  %v2513_v60 = vsel %vm2504_vm0, %v2486_v58, %v2490_v37  ;;  %v8074_v46 = vpack.c.bf16 %v14128_v32, %v14123_v27  ;;  %v2515_v58 = vsel %vm2504_vm0, %v2488_v55, %v2492_v34  ;;  %v14185_v34 = vld [vmem:[%s18262_s1 + $0x480] sm:$0xff]  ;;  %v14190_v55 = vld [vmem:[%s18261_s0 + $0x58] sm:$0xff] }
 0x1c9   :  { %v2510_v33 = vsel %vm2504_vm0, %v2491_v35, %v2495_v42  ;;  %v19153_v27 = vrot.slane %v14045_v51, 1 }
 0x200   :  { %v14116_v28 = vpop.permute.xlu0 %2523 }
 0x201   :  { %19150 = vst [vmem:[#allocation774_spill] sm:$0xff] %v14116_v28  ;;  %v14118_v31 = vpop.permute.xlu1 %2533  ;;  %v14132_v29 = vmul.f32 %v14116_v28, %v2519_v43  ;;  %v2542_v45 = vmul.f32 %v14116_v28, %v2518_v47  ;;  %v2541_v38 = vmul.f32 %v14116_v28, %v2517_v39  ;;  %v2514_v43 = vsel %vm2504_vm0, %v2487_v54, %v2491_v35  ;;  %v14163_v54 = vld [vmem:[%s18262_s1 + $0x498] sm:$0xff] }
 0x202   :  { %19151 = vst [vmem:[#allocation775_spill] sm:$0xff] %v14118_v31  ;;  %v7690_v39 = vpack.c.bf16 %v14110_v36, %v14105_v26  ;;  %v14154_v47 = vmul.f32 %v14118_v31, %v2511_v63  ;;  %v1867_v26 = vld [vmem:[%s18262_s1 + $0x4b8] sm:$0xff]  ;;  %v19154_v35 = vrot.slane %v14003_v40, 1  ;;  %v7692_v63 = vpack.c.bf16 %v14144_v49, %v14139_v41 }
 0x203   :  { %2690 = vmatprep.mubr.f32.mxu0 %v2542_v45  ;;  %3224 = vmatprep.mubr.f32.mxu1 %v2542_v45 }
 0x204   :  { %2691 = vmatmul.mubr.f32.vlgmr.msra.gmra.mrb[0].mxu0 %v2541_v38  ;;  %3225 = vmatmul.mubr.f32.vlgmr.msra.gmra.mrb[0].mxu1 %v2541_v38  ;;  %v14170_v36 = vpop.permute.xlu0 %2528  ;;  %v2584_v32 = vsel %vm2573_vm1, %v19154_v35, %v19153_v27  ;;  %v19156_v38 = vrot.slane %v14008_v44, 7  ;;  %v2509_v35 = vsel %vm2504_vm0, %v2490_v37, %v2494_v56  ;;  %v8076_v37 = vpack.c.bf16 %v1867_v26, %v14163_v54  ;;  %v1869_v26 = vld [vmem:[%s18262_s1 + $0x4c8] sm:$0xff] }
 0x205   :  { %19152 = vst [vmem:[#allocation776_spill] sm:$0xff] %v14170_v36  ;;  %v14180_v45 = vpop.permute.xlu1 %2538  ;;  %7687 = vmatpush1.bf16.msra.mxu0 %v7686_v30  ;;  %8071 = vmatpush1.bf16.msra.mxu1 %v8070_v59  ;;  %v2546_v41 = vmul.f32 %v14170_v36, %v2514_v43  ;;  %v2545_v49 = vmul.f32 %v14170_v36, %v2513_v60  ;;  %v1866_v30 = vld [vmem:[%s18262_s1 + $0x4b0] sm:$0xff]  ;;  %v14215_v43 = vld [vmem:[%s18261_s0 + $0x78] sm:$0xff] }
 0x206   :  { %19155 = vst [vmem:[#allocation777_spill] sm:$0xff] %v14180_v45  ;;  %v2507_v27 = vsel %vm2504_vm0, %v2496_v62, %v19156_v38  ;;  %v2571_v62 = vrot.slane %v14008_v44, 1  ;;  %7689 = vmatprep.subr.bf16.mxu0 %v7688_v52  ;;  %8073 = vmatprep.subr.bf16.mxu1 %v8072_v24  ;;  %v2550_v59 = vmul.f32 %v14118_v31, %v2510_v33  ;;  %v14221_v38 = vld [vmem:[%s18261_s0 + $0x18] sm:$0xff]  ;;  %v2572_v52 = vrot.slane %v14215_v43, 1 }
 0x207   :  { %v14224_v44 = vmul.f32 %v14170_v36, %v2515_v58  ;;  %2696 = vmatprep.mubr.f32.mxu0 %v2546_v41  ;;  %3230 = vmatprep.mubr.f32.mxu1 %v2546_v41  ;;  %v19157_v33 = vrot.slane %v14018_v48, 7  ;;  %v1873_v58 = vld [vmem:[%s18262_s1 + $0x4e8] sm:$0xff]  ;;  %v1871_v41 = vld [vmem:[%s18262_s1 + $0x4d8] sm:$0xff]  ;;  %v14242_v24 = vmul.f32 %v14180_v45, %v2507_v27  ;;  %v8078_v60 = vpack.c.bf16 %v1866_v30, %v1862_v22  ;;  %v1872_v27 = vld [vmem:[%s18262_s1 + $0x4e0] sm:$0xff] }
 0x208   :  { %2697 = vmatmul.mubr.f32.gmra.mrb[2].mxu0 %v2545_v49  ;;  %3231 = vmatmul.mubr.f32.gmra.mrb[2].mxu1 %v2545_v49  ;;  %v14244_v48 = vpop.permute.xlu0 %2592  ;;  %v19160_v22 = vrot.slane %v14026_v53, 7  ;;  %v1870_v53 = vld [vmem:[%s18262_s1 + $0x4d0] sm:$0xff]  ;;  %v8080_v30 = vpack.c.bf16 %v1875_v18, %v1871_v41  ;;  %v1883_v18 = vld [vmem:[%s18262_s1 + $0x538] sm:$0xff]  ;;  %v19166_v23 = vrot.slane %v14221_v38, 7 }
 0x209   :  { %v2506_v54 = vsel %vm2504_vm0, %v2495_v42, %v19157_v33  ;;  %19158 = vst [vmem:[#allocation778_spill] sm:$0xff] %v14244_v48  ;;  %v2549_v42 = vmul.f32 %v14118_v31, %v2509_v35  ;;  %v7694_v33 = vpack.c.bf16 %v1864_v25, %v14185_v34  ;;  %v14257_v49 = vpop.permute.xlu1 %2597  ;;  %7691 = vmatpush1.bf16.msra.mxu0 %v7690_v39 }
 0x20a   :  { %19159 = vst [vmem:[#allocation779_spill] sm:$0xff] %v14257_v49  ;;  %8075 = vmatpush1.bf16.msra.mxu1 %v8074_v46  ;;  %v14260_v35 = vmul.f32 %v14244_v48, %v2584_v32  ;;  %v2505_v25 = vsel %vm2504_vm0, %v2494_v56, %v19160_v22  ;;  %2702 = vmatprep.mubr.f32.mxu0 %v2550_v59  ;;  %v1874_v56 = vld [vmem:[%s18262_s1 + $0x4f0] sm:$0xff]  ;;  %v18273_v22 = vrot.slane %v14221_v38, 1 }
 0x20b   :  { %7693 = vmatprep.subr.bf16.mxu0 %v7692_v63  ;;  %v2576_v39 = vsel %vm2573_vm1, %v19161_v16, %v2571_v62  ;;  %v2554_v46 = vmul.f32 %v14180_v45, %v2506_v54  ;;  %v7696_v32 = vpack.c.bf16 %v1873_v58, %v1869_v26  ;;  %3236 = vmatprep.mubr.f32.mxu1 %v2550_v59  ;;  %v19162_v63 = vrot.slane %v14190_v55, 1  ;;  %v1877_v26 = vld [vmem:[%s18262_s1 + $0x508] sm:$0xff] }
 0x20c   :  { %8077 = vmatprep.subr.bf16.mxu1 %v8076_v37  ;;  %v7698_v54 = vpack.c.bf16 %v1872_v27, %v1868_v20  ;;  %v1881_v58 = vld [vmem:[%s18262_s1 + $0x528] sm:$0xff]  ;;  %2703 = vmatmul.mubr.f32.gmra.mrb[4].mxu0 %v2549_v42  ;;  %v2553_v59 = vmul.f32 %v14180_v45, %v2505_v25  ;;  %v1879_v37 = vld [vmem:[%s18262_s1 + $0x518] sm:$0xff]  ;;  %v19164_v20 = vrot.slane %v14003_v40, 1  ;;  %v19167_v40 = vrot.slane %v14215_v43, 7 }
 0x20d   :  { %v2577_v16 = vsel %vm2573_vm1, %v19162_v63, %v2572_v52  ;;  %3237 = vmatmul.mubr.f32.gmra.mrb[4].mxu1 %v2549_v42  ;;  %v14290_v34 = vpop.permute.xlu0 %2602  ;;  %v2589_v42 = vsel %vm2573_vm1, %v2572_v52, %v18273_v22  ;;  %7695 = vmatpush1.bf16.msra.mxu0 %v7694_v33  ;;  %v8082_v63 = vpack.c.bf16 %v1874_v56, %v1870_v53  ;;  %v1880_v52 = vld [vmem:[%s18262_s1 + $0x520] sm:$0xff]  ;;  %v1882_v53 = vld [vmem:[%s18262_s1 + $0x530] sm:$0xff]  ;;  %v1885_v56 = vld [vmem:[%s18262_s1 + $0x548] sm:$0xff] }
 0x20e   :  { %19163 = vst [vmem:[#allocation780_spill] sm:$0xff] %v14290_v34  ;;  %v2588_v41 = vsel %vm2573_vm1, %v2571_v62, %v19164_v20  ;;  %v14307_v27 = vpop.permute.xlu1 %2607  ;;  %8079 = vmatpush1.bf16.msra.mxu1 %v8078_v60  ;;  %v14310_v25 = vmul.f32 %v14290_v34, %v2576_v39  ;;  %v2520_v62 = vsel %vm2504_vm0, %v19167_v40, %v19166_v23  ;;  %v1876_v20 = vld [vmem:[%s18262_s1 + $0x500] sm:$0xff]  ;;  %v14327_v60 = vld [vmem:[%s18261_s0 + $0x38] sm:$0xff]  ;;  %v1878_v23 = vld [vmem:[%s18262_s1 + $0x510] sm:$0xff] }
 0x20f   :  { %19165 = vst [vmem:[#allocation781_spill] sm:$0xff] %v14307_v27  ;;  %v14330_v33 = vmul.f32 %v14290_v34, %v2577_v16  ;;  %2708 = vmatprep.mubr.f32.mxu0 %v2554_v46  ;;  %7697 = vmatprep.subr.bf16.mxu0 %v7696_v32  ;;  %v7700_v39 = vpack.c.bf16 %v1881_v58, %v1877_v26  ;;  %v1889_v32 = vld [vmem:[%s18262_s1 + $0x568] sm:$0xff]  ;;  %v1887_v26 = vld [vmem:[%s18262_s1 + $0x558] sm:$0xff] }
 0x210   :  { %3242 = vmatprep.mubr.f32.mxu1 %v2554_v46  ;;  %8081 = vmatprep.subr.bf16.mxu1 %v8080_v30  ;;  %v8084_v16 = vpack.c.bf16 %v1883_v18, %v1879_v37  ;;  %v1891_v58 = vld [vmem:[%s18262_s1 + $0x578] sm:$0xff]  ;;  %v14352_v22 = vmul.f32 %v14307_v27, %v2588_v41  ;;  %v14355_v40 = vmul.f32 %v14307_v27, %v2589_v42  ;;  %v19168_v46 = vrot.slane %v14190_v55, 1  ;;  %v1884_v41 = vld [vmem:[%s18262_s1 + $0x540] sm:$0xff] }
 0x211   :  { %2709 = vmatmul.mubr.f32.gmra.mrb[6].mxu0 %v2553_v59  ;;  %3243 = vmatmul.mubr.f32.gmra.mrb[6].mxu1 %v2553_v59  ;;  %v2544_v30 = vmul.f32 %v14116_v28, %v2520_v62  ;;  %v19169_v37 = vrot.slane %v14327_v60, 1  ;;  %v7702_v19 = vpack.c.bf16 %v1880_v52, %v1876_v20  ;;  %v8086_v21 = vpack.c.bf16 %v1882_v53, %v1878_v23  ;;  %v1888_v59 = vld [vmem:[%s18262_s1 + $0x560] sm:$0xff]  ;;  %v1886_v20 = vld [vmem:[%s18262_s1 + $0x550] sm:$0xff]  ;;  %v1895_v23 = vld [vmem:[%s18262_s1 + $0x598] sm:$0xff] }
 0x212   :  { %7699 = vmatpush1.bf16.msra.mxu0 %v7698_v54  ;;  %8083 = vmatpush1.bf16.msra.mxu1 %v8082_v63  ;;  %v19170_v42 = vrot.slane %v14050_v50, 1  ;;  %v19171_v62 = vrot.slane %v14045_v51, 1  ;;  %v7704_v54 = vpack.c.bf16 %v1889_v32, %v1885_v56  ;;  %v8088_v63 = vpack.c.bf16 %v1891_v58, %v1887_v26  ;;  %v1890_v52 = vld [vmem:[%s18262_s1 + $0x570] sm:$0xff]  ;;  %v1893_v50 = vld [vmem:[%s18262_s1 + $0x588] sm:$0xff]  ;;  %v1899_v53 = vld [vmem:[%s18262_s1 + $0x5b8] sm:$0xff] }
 0x213   :  { %v2581_v18 = vsel %vm2573_vm1, %v19169_v37, %v19168_v46  ;;  %2779 = vmatprep.mubr.f32.mxu0 %v2544_v30  ;;  %3313 = vmatprep.mubr.f32.mxu1 %v2544_v30  ;;  %v1897_v51 = vld [vmem:[%s18262_s1 + $0x5a8] sm:$0xff]  ;;  %v1892_v26 = vld [vmem:[%s18262_s1 + $0x580] sm:$0xff]  ;;  %v8092_v46 = vpack.c.bf16 %v1899_v53, %v1895_v23  ;;  %v1911_v53 = vld [vmem:[%s18262_s1 + $0x618] sm:$0xff] }
 0x214   :  { %v2580_v28 = vsel %vm2573_vm1, %v19171_v62, %v19170_v42  ;;  %7701 = vmatprep.subr.bf16.mxu0 %v7700_v39  ;;  %8085 = vmatprep.subr.bf16.mxu1 %v8084_v16  ;;  %v14395_v56 = vmul.f32 %v14257_v49, %v2581_v18  ;;  %v7706_v39 = vpack.c.bf16 %v1888_v59, %v1884_v41  ;;  %v1896_v58 = vld [vmem:[%s18262_s1 + $0x5a0] sm:$0xff]  ;;  %v1905_v37 = vld [vmem:[%s18262_s1 + $0x5e8] sm:$0xff]  ;;  %v1903_v18 = vld [vmem:[%s18262_s1 + $0x5d8] sm:$0xff] }
 0x215   :  { %v14398_v32 = vmul.f32 %v14257_v49, %v2580_v28  ;;  %v8090_v16 = vpack.c.bf16 %v1890_v52, %v1886_v20  ;;  %v7708_v30 = vpack.c.bf16 %v1897_v51, %v1893_v50  ;;  %v1894_v28 = vld [vmem:[%s18262_s1 + $0x590] sm:$0xff]  ;;  %v1907_v41 = vld [vmem:[%s18262_s1 + $0x5f8] sm:$0xff]  ;;  %v7710_v59 = vpack.c.bf16 %v1896_v58, %v1892_v26  ;;  %v1900_v62 = vld [vmem:[%s18262_s1 + $0x5c0] sm:$0xff] }
 0x216   :  { %7703 = vmatpush1.bf16.msra.mxu0 %v7702_v19  ;;  %8087 = vmatpush1.bf16.msra.mxu1 %v8086_v21  ;;  %v1898_v19 = vld [vmem:[%s18262_s1 + $0x5b0] sm:$0xff]  ;;  %v1901_v21 = vld [vmem:[%s18262_s1 + $0x5c8] sm:$0xff]  ;;  %v8096_v20 = vpack.c.bf16 %v1907_v41, %v1903_v18  ;;  %v1908_v58 = vld [vmem:[%s18262_s1 + $0x600] sm:$0xff] }
 0x217   :  { %7705 = vmatprep.subr.bf16.mxu0 %v7704_v54  ;;  %8089 = vmatprep.subr.bf16.mxu1 %v8088_v63  ;;  %v8094_v42 = vpack.c.bf16 %v1898_v19, %v1894_v28  ;;  %v1904_v54 = vld [vmem:[%s18262_s1 + $0x5e0] sm:$0xff]  ;;  %v7712_v63 = vpack.c.bf16 %v1905_v37, %v1901_v21  ;;  %v1902_v52 = vld [vmem:[%s18262_s1 + $0x5d0] sm:$0xff]  ;;  %v1909_v51 = vld [vmem:[%s18262_s1 + $0x608] sm:$0xff] }
 0x218   :  { %v1906_v50 = vld [vmem:[%s18262_s1 + $0x5f0] sm:$0xff]  ;;  %v1913_v23 = vld [vmem:[%s18262_s1 + $0x628] sm:$0xff]  ;;  %v1919_v41 = vld [vmem:[%s18262_s1 + $0x658] sm:$0xff] }
 0x219   :  { %v8098_v26 = vpack.c.bf16 %v1906_v50, %v1902_v52  ;;  %v1910_v19 = vld [vmem:[%s18262_s1 + $0x610] sm:$0xff]  ;;  %v1917_v37 = vld [vmem:[%s18262_s1 + $0x648] sm:$0xff] }
 0x21a   :  { %7707 = vmatpush1.bf16.msra.mxu0 %v7706_v39  ;;  %8091 = vmatpush1.bf16.msra.mxu1 %v8090_v16  ;;  %v1915_v39 = vld [vmem:[%s18262_s1 + $0x638] sm:$0xff]  ;;  %v7714_v16 = vpack.c.bf16 %v1904_v54, %v1900_v62  ;;  %v1914_v21 = vld [vmem:[%s18262_s1 + $0x630] sm:$0xff]  ;;  %v1921_v18 = vld [vmem:[%s18262_s1 + $0x668] sm:$0xff] }
 0x21b   :  { %7709 = vmatprep.subr.bf16.mxu0 %v7708_v30  ;;  %8093 = vmatprep.subr.bf16.mxu1 %v8092_v46  ;;  %v1912_v30 = vld [vmem:[%s18262_s1 + $0x620] sm:$0xff]  ;;  %v7716_v46 = vpack.c.bf16 %v1913_v23, %v1909_v51  ;;  %v8100_v28 = vpack.c.bf16 %v1915_v39, %v1911_v53  ;;  %v8102_v62 = vpack.c.bf16 %v1914_v21, %v1910_v19  ;;  %v1918_v50 = vld [vmem:[%s18262_s1 + $0x650] sm:$0xff]  ;;  %v1925_v23 = vld [vmem:[%s18262_s1 + $0x688] sm:$0xff] }
 0x21c   :  { %v1916_v54 = vld [vmem:[%s18262_s1 + $0x640] sm:$0xff]  ;;  %v1922_v51 = vld [vmem:[%s18262_s1 + $0x670] sm:$0xff]  ;;  %v1929_v53 = vld [vmem:[%s18262_s1 + $0x6a8] sm:$0xff] }
 0x21d   :  { %v1927_v39 = vld [vmem:[%s18262_s1 + $0x698] sm:$0xff]  ;;  %v1926_v21 = vld [vmem:[%s18262_s1 + $0x690] sm:$0xff] }
 0x21e   :  { %7711 = vmatpush1.bf16.msra.mxu0 %v7710_v59  ;;  %8095 = vmatpush1.bf16.msra.mxu1 %v8094_v42  ;;  %v1923_v59 = vld [vmem:[%s18262_s1 + $0x678] sm:$0xff]  ;;  %v7718_v42 = vpack.c.bf16 %v1912_v30, %v1908_v58  ;;  %v8106_v58 = vpack.c.bf16 %v1922_v51, %v1918_v50  ;;  %v1924_v30 = vld [vmem:[%s18262_s1 + $0x680] sm:$0xff]  ;;  %v1934_v51 = vld [vmem:[%s18262_s1 + $0x6d0] sm:$0xff] }
 0x21f   :  { %7713 = vmatprep.subr.bf16.mxu0 %v7712_v63  ;;  %8097 = vmatprep.subr.bf16.mxu1 %v8096_v20  ;;  %v1920_v63 = vld [vmem:[%s18262_s1 + $0x660] sm:$0xff]  ;;  %v7720_v20 = vpack.c.bf16 %v1921_v18, %v1917_v37  ;;  %v8104_v52 = vpack.c.bf16 %v1923_v59, %v1919_v41  ;;  %v1930_v37 = vld [vmem:[%s18262_s1 + $0x6b0] sm:$0xff]  ;;  %v1933_v18 = vld [vmem:[%s18262_s1 + $0x6c8] sm:$0xff] }
 0x220   :  { %v1937_v41 = vld [vmem:[%s18262_s1 + $0x6e8] sm:$0xff]  ;;  %v1935_v59 = vld [vmem:[%s18262_s1 + $0x6d8] sm:$0xff] }
 0x222   :  { %7715 = vmatpush1.bf16.msra.mxu0 %v7714_v16  ;;  %8099 = vmatpush1.bf16.msra.mxu1 %v8098_v26  ;;  %v1931_v16 = vld [vmem:[%s18262_s1 + $0x6b8] sm:$0xff]  ;;  %v7722_v26 = vpack.c.bf16 %v1920_v63, %v1916_v54  ;;  %v8110_v54 = vpack.c.bf16 %v1930_v37, %v1926_v21  ;;  %v1932_v63 = vld [vmem:[%s18262_s1 + $0x6c0] sm:$0xff]  ;;  %v1942_v37 = vld [vmem:[%s18262_s1 + $0x710] sm:$0xff] }
 0x223   :  { %7717 = vmatprep.subr.bf16.mxu0 %v7716_v46  ;;  %8101 = vmatprep.subr.bf16.mxu1 %v8100_v28  ;;  %v1928_v46 = vld [vmem:[%s18262_s1 + $0x6a0] sm:$0xff]  ;;  %v7724_v28 = vpack.c.bf16 %v1929_v53, %v1925_v23  ;;  %v8108_v19 = vpack.c.bf16 %v1931_v16, %v1927_v39  ;;  %v1938_v23 = vld [vmem:[%s18262_s1 + $0x6f0] sm:$0xff]  ;;  %v1941_v53 = vld [vmem:[%s18262_s1 + $0x708] sm:$0xff] }
 0x224   :  { %v1945_v39 = vld [vmem:[%s18262_s1 + $0x728] sm:$0xff]  ;;  %v1943_v16 = vld [vmem:[%s18262_s1 + $0x718] sm:$0xff] }
 0x226   :  { %7719 = vmatpush1.bf16.msra.mxu0 %v7718_v42  ;;  %8103 = vmatpush1.bf16.msra.mxu1 %v8102_v62  ;;  %v1939_v42 = vld [vmem:[%s18262_s1 + $0x6f8] sm:$0xff]  ;;  %v7726_v62 = vpack.c.bf16 %v1928_v46, %v1924_v30  ;;  %v8114_v30 = vpack.c.bf16 %v1938_v23, %v1934_v51  ;;  %v1940_v46 = vld [vmem:[%s18262_s1 + $0x700] sm:$0xff]  ;;  %v1950_v23 = vld [vmem:[%s18262_s1 + $0x750] sm:$0xff] }
 0x227   :  { %7721 = vmatprep.subr.bf16.mxu0 %v7720_v20  ;;  %8105 = vmatprep.subr.bf16.mxu1 %v8104_v52  ;;  %v1936_v20 = vld [vmem:[%s18262_s1 + $0x6e0] sm:$0xff]  ;;  %v7728_v52 = vpack.c.bf16 %v1937_v41, %v1933_v18  ;;  %v8112_v50 = vpack.c.bf16 %v1939_v42, %v1935_v59  ;;  %v1946_v18 = vld [vmem:[%s18262_s1 + $0x730] sm:$0xff]  ;;  %v1949_v41 = vld [vmem:[%s18262_s1 + $0x748] sm:$0xff] }
 0x228   :  { %v1953_v59 = vld [vmem:[%s18262_s1 + $0x768] sm:$0xff]  ;;  %v1951_v42 = vld [vmem:[%s18262_s1 + $0x758] sm:$0xff] }
 0x22a   :  { %7723 = vmatpush1.bf16.msra.mxu0 %v7722_v26  ;;  %8107 = vmatpush1.bf16.msra.mxu1 %v8106_v58  ;;  %v1947_v26 = vld [vmem:[%s18262_s1 + $0x738] sm:$0xff]  ;;  %v7730_v58 = vpack.c.bf16 %v1936_v20, %v1932_v63  ;;  %v8118_v63 = vpack.c.bf16 %v1946_v18, %v1942_v37  ;;  %v1948_v20 = vld [vmem:[%s18262_s1 + $0x740] sm:$0xff]  ;;  %v1958_v18 = vld [vmem:[%s18262_s1 + $0x790] sm:$0xff] }
 0x22b   :  { %7725 = vmatprep.subr.bf16.mxu0 %v7724_v28  ;;  %8109 = vmatprep.subr.bf16.mxu1 %v8108_v19  ;;  %v1944_v28 = vld [vmem:[%s18262_s1 + $0x720] sm:$0xff]  ;;  %v7732_v19 = vpack.c.bf16 %v1945_v39, %v1941_v53  ;;  %v8116_v21 = vpack.c.bf16 %v1947_v26, %v1943_v16  ;;  %v1954_v53 = vld [vmem:[%s18262_s1 + $0x770] sm:$0xff]  ;;  %v1957_v39 = vld [vmem:[%s18262_s1 + $0x788] sm:$0xff] }
 0x22c   :  { %v1961_v16 = vld [vmem:[%s18262_s1 + $0x7a8] sm:$0xff]  ;;  %v1959_v26 = vld [vmem:[%s18262_s1 + $0x798] sm:$0xff] }
 0x22e   :  { %7727 = vmatpush1.bf16.msra.mxu0 %v7726_v62  ;;  %8111 = vmatpush1.bf16.msra.mxu1 %v8110_v54  ;;  %v1955_v62 = vld [vmem:[%s18262_s1 + $0x778] sm:$0xff]  ;;  %v7734_v54 = vpack.c.bf16 %v1944_v28, %v1940_v46  ;;  %v8122_v46 = vpack.c.bf16 %v1954_v53, %v1950_v23  ;;  %v1956_v28 = vld [vmem:[%s18262_s1 + $0x780] sm:$0xff]  ;;  %v1966_v53 = vld [vmem:[%s18262_s1 + $0x7d0] sm:$0xff] }
 0x22f   :  { %7729 = vmatprep.subr.bf16.mxu0 %v7728_v52  ;;  %8113 = vmatprep.subr.bf16.mxu1 %v8112_v50  ;;  %v1952_v52 = vld [vmem:[%s18262_s1 + $0x760] sm:$0xff]  ;;  %v7736_v50 = vpack.c.bf16 %v1953_v59, %v1949_v41  ;;  %v8120_v51 = vpack.c.bf16 %v1955_v62, %v1951_v42  ;;  %v1962_v41 = vld [vmem:[%s18262_s1 + $0x7b0] sm:$0xff]  ;;  %v1965_v59 = vld [vmem:[%s18262_s1 + $0x7c8] sm:$0xff] }
 0x230   :  { %v1969_v42 = vld [vmem:[%s18262_s1 + $0x7e8] sm:$0xff]  ;;  %v1967_v62 = vld [vmem:[%s18262_s1 + $0x7d8] sm:$0xff] }
 0x232   :  { %7731 = vmatpush1.bf16.msra.mxu0 %v7730_v58  ;;  %8115 = vmatpush1.bf16.msra.mxu1 %v8114_v30  ;;  %v1963_v58 = vld [vmem:[%s18262_s1 + $0x7b8] sm:$0xff]  ;;  %v7738_v30 = vpack.c.bf16 %v1952_v52, %v1948_v20  ;;  %v8126_v20 = vpack.c.bf16 %v1962_v41, %v1958_v18  ;;  %v1964_v52 = vld [vmem:[%s18262_s1 + $0x7c0] sm:$0xff] }
 0x233   :  { %7733 = vmatprep.subr.bf16.mxu0 %v7732_v19  ;;  %8117 = vmatprep.subr.bf16.mxu1 %v8116_v21  ;;  %v1960_v19 = vld [vmem:[%s18262_s1 + $0x7a0] sm:$0xff]  ;;  %v7740_v21 = vpack.c.bf16 %v1961_v16, %v1957_v39  ;;  %v8124_v37 = vpack.c.bf16 %v1963_v58, %v1959_v26  ;;  %v1970_v39 = vld [vmem:[%s18262_s1 + $0x7f0] sm:$0xff]  ;;  %v1973_v16 = vld [vmem:[%s18262_s1 + $0x808] sm:$0xff] }
 0x234   :  { %v1977_v26 = vld [vmem:[%s18262_s1 + $0x828] sm:$0xff]  ;;  %v1975_v58 = vld [vmem:[%s18262_s1 + $0x818] sm:$0xff]  ;;  %v1972_v18 = vld [vmem:[%s18262_s1 + $0x800] sm:$0xff] }
 0x235   :  { %v1976_v41 = vld [vmem:[%s18262_s1 + $0x820] sm:$0xff] }
 0x236   :  { %7735 = vmatpush1.bf16.msra.mxu0 %v7734_v54  ;;  %8119 = vmatpush1.bf16.msra.mxu1 %v8118_v63  ;;  %v1971_v54 = vld [vmem:[%s18262_s1 + $0x7f8] sm:$0xff]  ;;  %v7742_v63 = vpack.c.bf16 %v1960_v19, %v1956_v28  ;;  %v8130_v19 = vpack.c.bf16 %v1970_v39, %v1966_v53  ;;  %v1980_v39 = vld [vmem:[%s18262_s1 + $0x840] sm:$0xff] }
 0x237   :  { %7737 = vmatprep.subr.bf16.mxu0 %v7736_v50  ;;  %8121 = vmatprep.subr.bf16.mxu1 %v8120_v51  ;;  %v1968_v50 = vld [vmem:[%s18262_s1 + $0x7e0] sm:$0xff]  ;;  %v7744_v51 = vpack.c.bf16 %v1969_v42, %v1965_v59  ;;  %v8128_v23 = vpack.c.bf16 %v1971_v54, %v1967_v62  ;;  %v1974_v59 = vld [vmem:[%s18262_s1 + $0x810] sm:$0xff]  ;;  %v1981_v62 = vld [vmem:[%s18262_s1 + $0x848] sm:$0xff]  ;;  %v19172_v54 = vrot.slane %v14221_v38, 7 }
 0x238   :  { %v7746_v28 = vpack.c.bf16 %v1968_v50, %v1964_v52  ;;  %v1978_v42 = vld [vmem:[%s18262_s1 + $0x830] sm:$0xff]  ;;  %v1983_v52 = vld [vmem:[%s18262_s1 + $0x858] sm:$0xff] }
 0x239   :  { %v1987_v50 = vld [vmem:[%s18262_s1 + $0x878] sm:$0xff]  ;;  %v8134_v53 = vpack.c.bf16 %v1978_v42, %v1974_v59  ;;  %v1992_v42 = vld [vmem:[%s18262_s1 + $0x8a0] sm:$0xff] }
 0x23a   :  { %7739 = vmatpush1.bf16.msra.mxu0 %v7738_v30  ;;  %8123 = vmatpush1.bf16.msra.mxu1 %v8122_v46  ;;  %v1979_v30 = vld [vmem:[%s18262_s1 + $0x838] sm:$0xff]  ;;  %v2493_v46 = vrot.slane %v14327_v60, 7 }
 0x23b   :  { %7741 = vmatprep.subr.bf16.mxu0 %v7740_v21  ;;  %8125 = vmatprep.subr.bf16.mxu1 %v8124_v37  ;;  %v7748_v21 = vpack.c.bf16 %v1977_v26, %v1973_v16  ;;  %v8132_v37 = vpack.c.bf16 %v1979_v30, %v1975_v58  ;;  %v1984_v16 = vld [vmem:[%s18262_s1 + $0x860] sm:$0xff]  ;;  %v8136_v30 = vpack.c.bf16 %v1987_v50, %v1983_v52  ;;  %v1994_v52 = vld [vmem:[%s18262_s1 + $0x8b0] sm:$0xff]  ;;  %v1997_v50 = vld [vmem:[%s18262_s1 + $0x8c8] sm:$0xff] }
 0x23c   :  { %v7754_v59 = vpack.c.bf16 %v1984_v16, %v1980_v39  ;;  %v2001_v39 = vld [vmem:[%s18262_s1 + $0x8e8] sm:$0xff]  ;;  %v1999_v16 = vld [vmem:[%s18262_s1 + $0x8d8] sm:$0xff] }
 0x23e   :  { %7743 = vmatpush1.bf16.msra.mxu0 %v7742_v63  ;;  %8127 = vmatpush1.bf16.msra.mxu1 %v8126_v20  ;;  %v2516_v63 = vsel %vm2504_vm0, %v19172_v54, %v2493_v46  ;;  %v1985_v20 = vld [vmem:[%s18262_s1 + $0x868] sm:$0xff] }
 0x23f   :  { %7745 = vmatprep.subr.bf16.mxu0 %v7744_v51  ;;  %8129 = vmatprep.subr.bf16.mxu1 %v8128_v23  ;;  %v2497_v51 = vrot.slane %v14190_v55, 7  ;;  %v7750_v23 = vpack.c.bf16 %v1976_v41, %v1972_v18  ;;  %v2548_v26 = vmul.f32 %v14170_v36, %v2516_v63  ;;  %v7752_v58 = vpack.c.bf16 %v1985_v20, %v1981_v62  ;;  %v1982_v55 = vld [vmem:[%s18262_s1 + $0x850] sm:$0xff]  ;;  %v1991_v18 = vld [vmem:[%s18262_s1 + $0x898] sm:$0xff] }
 0x240   :  { %v1995_v41 = vld [vmem:[%s18262_s1 + $0x8b8] sm:$0xff]  ;;  %v1990_v20 = vld [vmem:[%s18262_s1 + $0x890] sm:$0xff] }
 0x241   :  { %v8140_v63 = vpack.c.bf16 %v1995_v41, %v1991_v18  ;;  %v2009_v18 = vld [vmem:[%s18262_s1 + $0x928] sm:$0xff]  ;;  %v2007_v41 = vld [vmem:[%s18262_s1 + $0x918] sm:$0xff] }
 0x242   :  { %7747 = vmatpush1.bf16.msra.mxu0 %v7746_v28  ;;  %8131 = vmatpush1.bf16.msra.mxu1 %v8130_v19  ;;  %v1986_v28 = vld [vmem:[%s18262_s1 + $0x870] sm:$0xff]  ;;  %v1989_v19 = vld [vmem:[%s18262_s1 + $0x888] sm:$0xff] }
 0x243   :  { %7749 = vmatprep.subr.bf16.mxu0 %v7748_v21  ;;  %8133 = vmatprep.subr.bf16.mxu1 %v8132_v37  ;;  %v2512_v21 = vsel %vm2504_vm0, %v2493_v46, %v2497_v51  ;;  %v1993_v37 = vld [vmem:[%s18262_s1 + $0x8a8] sm:$0xff]  ;;  %v1988_v46 = vld [vmem:[%s18262_s1 + $0x880] sm:$0xff] }
 0x244   :  { %v2552_v62 = vmul.f32 %v14118_v31, %v2512_v21  ;;  %v7756_v54 = vpack.c.bf16 %v1993_v37, %v1989_v19  ;;  %v2002_v21 = vld [vmem:[%s18262_s1 + $0x8f0] sm:$0xff]  ;;  %v2005_v37 = vld [vmem:[%s18262_s1 + $0x908] sm:$0xff] }
 0x245   :  { %2780 = vmatmul.mubr.f32.vlgmr.msra.gmra.mrb[0].mxu0 %v14132_v29  ;;  %3314 = vmatmul.mubr.f32.vlgmr.msra.gmra.mrb[0].mxu1 %v14132_v29  ;;  %v8138_v29 = vpack.c.bf16 %v1986_v28, %v1982_v55  ;;  %v7760_v28 = vpack.c.bf16 %v2001_v39, %v1997_v50  ;;  %v2017_v50 = vld [vmem:[%s18262_s1 + $0x968] sm:$0xff] }
 0x246   :  { %2785 = vmatprep.mubr.f32.mxu0 %v2548_v26  ;;  %7751 = vmatpush1.bf16.msra.mxu0 %v7750_v23  ;;  %v19173_v23 = vrot.slane %v14215_v43, 7  ;;  %v8142_v43 = vpack.c.bf16 %v1994_v52, %v1990_v20  ;;  %v2010_v20 = vld [vmem:[%s18262_s1 + $0x930] sm:$0xff]  ;;  %v2013_v52 = vld [vmem:[%s18262_s1 + $0x948] sm:$0xff] }
 0x247   :  { %3319 = vmatprep.mubr.f32.mxu1 %v2548_v26  ;;  %8135 = vmatpush1.bf16.msra.mxu1 %v8134_v53  ;;  %v2003_v26 = vld [vmem:[%s18262_s1 + $0x8f8] sm:$0xff] }
 0x248   :  { %7753 = vmatprep.subr.bf16.mxu0 %v7752_v58  ;;  %8137 = vmatprep.subr.bf16.mxu1 %v8136_v30  ;;  %v2508_v53 = vsel %vm2504_vm0, %v2497_v51, %v19173_v23  ;;  %v1996_v51 = vld [vmem:[%s18262_s1 + $0x8c0] sm:$0xff]  ;;  %v1998_v30 = vld [vmem:[%s18262_s1 + $0x8d0] sm:$0xff]  ;;  %v8144_v19 = vpack.c.bf16 %v2003_v26, %v1999_v16  ;;  %v2015_v23 = vld [vmem:[%s18262_s1 + $0x958] sm:$0xff]  ;;  %v7768_v26 = vpack.c.bf16 %v2017_v50, %v2013_v52 }
 0x249   :  { %2786 = vmatmul.mubr.f32.gmra.mrb[2].mxu0 %v14224_v44  ;;  %3320 = vmatmul.mubr.f32.gmra.mrb[2].mxu1 %v14224_v44  ;;  %v7758_v44 = vpack.c.bf16 %v1992_v42, %v1988_v46  ;;  %v2000_v58 = vld [vmem:[%s18262_s1 + $0x8e0] sm:$0xff]  ;;  %v2556_v55 = vmul.f32 %v14180_v45, %v2508_v53  ;;  %v8146_v46 = vpack.c.bf16 %v2002_v21, %v1998_v30  ;;  %v2019_v53 = vld [vmem:[%s18262_s1 + $0x978] sm:$0xff]  ;;  %v2021_v30 = vld [vmem:[%s18262_s1 + $0x988] sm:$0xff] }
 0x24a   :  { %2791 = vmatprep.mubr.f32.mxu0 %v2552_v62  ;;  %7755 = vmatpush1.bf16.msra.mxu0 %v7754_v59  ;;  %v2011_v59 = vld [vmem:[%s18262_s1 + $0x938] sm:$0xff]  ;;  %v7764_v42 = vpack.c.bf16 %v2009_v18, %v2005_v37  ;;  %v2028_v50 = vld [vmem:[%s18262_s1 + $0x9c0] sm:$0xff] }
 0x24b   :  { %3325 = vmatprep.mubr.f32.mxu1 %v2552_v62  ;;  %8139 = vmatpush1.bf16.msra.mxu1 %v8138_v29  ;;  %v7762_v29 = vpack.c.bf16 %v2000_v58, %v1996_v51  ;;  %v2004_v62 = vld [vmem:[%s18262_s1 + $0x900] sm:$0xff]  ;;  %v8152_v51 = vpack.c.bf16 %v2019_v53, %v2015_v23  ;;  %v2018_v58 = vld [vmem:[%s18262_s1 + $0x970] sm:$0xff] }
 0x24c   :  { %7757 = vmatprep.subr.bf16.mxu0 %v7756_v54  ;;  %8141 = vmatprep.subr.bf16.mxu1 %v8140_v63  ;;  %v2006_v54 = vld [vmem:[%s18262_s1 + $0x910] sm:$0xff]  ;;  %v8148_v63 = vpack.c.bf16 %v2011_v59, %v2007_v41  ;;  %v2020_v41 = vld [vmem:[%s18262_s1 + $0x980] sm:$0xff] }
 0x24d   :  { %2792 = vmatmul.mubr.f32.gmra.mrb[4].mxu0 %v14154_v47  ;;  %3326 = vmatmul.mubr.f32.gmra.mrb[4].mxu1 %v14154_v47  ;;  %v2008_v47 = vld [vmem:[%s18262_s1 + $0x920] sm:$0xff]  ;;  %v8150_v16 = vpack.c.bf16 %v2010_v20, %v2006_v54  ;;  %v2022_v59 = vld [vmem:[%s18262_s1 + $0x990] sm:$0xff]  ;;  %v2035_v54 = vld [vmem:[%s18262_s1 + $0x9f8] sm:$0xff] }
 0x24e   :  { %2797 = vmatprep.mubr.f32.mxu0 %v2556_v55  ;;  %7759 = vmatpush1.bf16.msra.mxu0 %v7758_v44  ;;  %v7766_v39 = vpack.c.bf16 %v2008_v47, %v2004_v62  ;;  %v2016_v44 = vld [vmem:[%s18262_s1 + $0x960] sm:$0xff]  ;;  %v2033_v62 = vld [vmem:[%s18262_s1 + $0x9e8] sm:$0xff]  ;;  %v2031_v47 = vld [vmem:[%s18262_s1 + $0x9d8] sm:$0xff] }
 0x24f   :  { %3331 = vmatprep.mubr.f32.mxu1 %v2556_v55  ;;  %8143 = vmatpush1.bf16.msra.mxu1 %v8142_v43  ;;  %v2014_v43 = vld [vmem:[%s18262_s1 + $0x950] sm:$0xff]  ;;  %v2025_v55 = vld [vmem:[%s18262_s1 + $0x9a8] sm:$0xff]  ;;  %v2032_v23 = vld [vmem:[%s18262_s1 + $0x9e0] sm:$0xff] }
 0x250   :  { %7761 = vmatprep.subr.bf16.mxu0 %v7760_v28  ;;  %8145 = vmatprep.subr.bf16.mxu1 %v8144_v19  ;;  %v2023_v28 = vld [vmem:[%s18262_s1 + $0x998] sm:$0xff]  ;;  %v8154_v37 = vpack.c.bf16 %v2018_v58, %v2014_v43  ;;  %v7772_v18 = vpack.c.bf16 %v2025_v55, %v2021_v30  ;;  %v2030_v53 = vld [vmem:[%s18262_s1 + $0x9d0] sm:$0xff]  ;;  %v2036_v55 = vld [vmem:[%s18262_s1 + $0xa00] sm:$0xff] }
 0x251   :  { %2798 = vmatmul.mubr.f32.gmra.mrb[6].mxu0 %v14242_v24  ;;  %3332 = vmatmul.mubr.f32.gmra.mrb[6].mxu1 %v14242_v24  ;;  %v2012_v24 = vld [vmem:[%s18262_s1 + $0x940] sm:$0xff]  ;;  %v2027_v19 = vld [vmem:[%s18262_s1 + $0x9b8] sm:$0xff] }
 0x252   :  { %7763 = vmatpush1.bf16.msra.mxu0 %v7762_v29  ;;  %2868 = vmatprep.mubr.f32.mxu0 %v14013_v57  ;;  %v7770_v21 = vpack.c.bf16 %v2016_v44, %v2012_v24  ;;  %v8156_v29 = vpack.c.bf16 %v2027_v19, %v2023_v28  ;;  %v2041_v24 = vld [vmem:[%s18262_s1 + $0xa28] sm:$0xff]  ;;  %v2039_v44 = vld [vmem:[%s18262_s1 + $0xa18] sm:$0xff]  ;;  %v2040_v28 = vld [vmem:[%s18262_s1 + $0xa20] sm:$0xff] }
 0x253   :  { %8147 = vmatpush1.bf16.msra.mxu1 %v8146_v46  ;;  %7765 = vmatprep.subr.bf16.mxu0 %v7764_v42  ;;  %v2026_v46 = vld [vmem:[%s18262_s1 + $0x9b0] sm:$0xff]  ;;  %v2029_v42 = vld [vmem:[%s18262_s1 + $0x9c8] sm:$0xff]  ;;  %v2043_v43 = vld [vmem:[%s18262_s1 + $0xa38] sm:$0xff] }
 0x254   :  { %8149 = vmatprep.subr.bf16.mxu1 %v8148_v63  ;;  %3402 = vmatprep.mubr.f32.mxu1 %v14013_v57  ;;  %v2024_v57 = vld [vmem:[%s18262_s1 + $0x9a0] sm:$0xff]  ;;  %v8158_v20 = vpack.c.bf16 %v2026_v46, %v2022_v59  ;;  %v7776_v52 = vpack.c.bf16 %v2033_v62, %v2029_v42  ;;  %v2038_v19 = vld [vmem:[%s18262_s1 + $0xa10] sm:$0xff]  ;;  %v2051_v59 = vld [vmem:[%s18262_s1 + $0xa78] sm:$0xff] }
 0x255   :  { %v7774_v63 = vpack.c.bf16 %v2024_v57, %v2020_v41  ;;  %v2049_v41 = vld [vmem:[%s18262_s1 + $0xa68] sm:$0xff]  ;;  %v2047_v57 = vld [vmem:[%s18262_s1 + $0xa58] sm:$0xff]  ;;  %v2044_v62 = vld [vmem:[%s18262_s1 + $0xa40] sm:$0xff] }
 0x256   :  { %7767 = vmatpush1.bf16.msra.mxu0 %v7766_v39  ;;  %v8160_v39 = vpack.c.bf16 %v2035_v54, %v2031_v47  ;;  %v2048_v47 = vld [vmem:[%s18262_s1 + $0xa60] sm:$0xff]  ;;  %v2046_v54 = vld [vmem:[%s18262_s1 + $0xa50] sm:$0xff] }
 0x257   :  { %8151 = vmatpush1.bf16.msra.mxu1 %v8150_v16  ;;  %7769 = vmatprep.subr.bf16.mxu0 %v7768_v26  ;;  %v2034_v16 = vld [vmem:[%s18262_s1 + $0x9f0] sm:$0xff]  ;;  %v2037_v26 = vld [vmem:[%s18262_s1 + $0xa08] sm:$0xff] }
 0x258   :  { %8153 = vmatprep.subr.bf16.mxu1 %v8152_v51  ;;  %v7778_v51 = vpack.c.bf16 %v2032_v23, %v2028_v50  ;;  %v8162_v58 = vpack.c.bf16 %v2034_v16, %v2030_v53  ;;  %v7780_v30 = vpack.c.bf16 %v2041_v24, %v2037_v26  ;;  %v2057_v50 = vld [vmem:[%s18262_s1 + $0xaa8] sm:$0xff]  ;;  %v2055_v23 = vld [vmem:[%s18262_s1 + $0xa98] sm:$0xff]  ;;  %v2052_v24 = vld [vmem:[%s18262_s1 + $0xa80] sm:$0xff] }
 0x259   :  { %v2059_v53 = vld [vmem:[%s18262_s1 + $0xab8] sm:$0xff] }
 0x25a   :  { %7771 = vmatpush1.bf16.msra.mxu0 %v7770_v21  ;;  %v8164_v21 = vpack.c.bf16 %v2043_v43, %v2039_v44  ;;  %v2056_v44 = vld [vmem:[%s18262_s1 + $0xaa0] sm:$0xff]  ;;  %v2054_v43 = vld [vmem:[%s18262_s1 + $0xa90] sm:$0xff] }
 0x25b   :  { %8155 = vmatpush1.bf16.msra.mxu1 %v8154_v37  ;;  %7773 = vmatprep.subr.bf16.mxu0 %v7772_v18  ;;  %v2042_v37 = vld [vmem:[%s18262_s1 + $0xa30] sm:$0xff]  ;;  %v2045_v18 = vld [vmem:[%s18262_s1 + $0xa48] sm:$0xff] }
 0x25c   :  { %8157 = vmatprep.subr.bf16.mxu1 %v8156_v29  ;;  %v7782_v29 = vpack.c.bf16 %v2040_v28, %v2036_v55  ;;  %v8166_v46 = vpack.c.bf16 %v2042_v37, %v2038_v19  ;;  %v7784_v42 = vpack.c.bf16 %v2049_v41, %v2045_v18  ;;  %v2065_v55 = vld [vmem:[%s18262_s1 + $0xae8] sm:$0xff]  ;;  %v2063_v28 = vld [vmem:[%s18262_s1 + $0xad8] sm:$0xff]  ;;  %v2060_v41 = vld [vmem:[%s18262_s1 + $0xac0] sm:$0xff] }
 0x25d   :  { %v2067_v19 = vld [vmem:[%s18262_s1 + $0xaf8] sm:$0xff] }
 0x25e   :  { %7775 = vmatpush1.bf16.msra.mxu0 %v7774_v63  ;;  %v8168_v63 = vpack.c.bf16 %v2051_v59, %v2047_v57  ;;  %v2064_v57 = vld [vmem:[%s18262_s1 + $0xae0] sm:$0xff]  ;;  %v2062_v59 = vld [vmem:[%s18262_s1 + $0xad0] sm:$0xff] }
 0x25f   :  { %8159 = vmatpush1.bf16.msra.mxu1 %v8158_v20  ;;  %7777 = vmatprep.subr.bf16.mxu0 %v7776_v52  ;;  %v2050_v20 = vld [vmem:[%s18262_s1 + $0xa70] sm:$0xff]  ;;  %v2053_v52 = vld [vmem:[%s18262_s1 + $0xa88] sm:$0xff] }
 0x260   :  { %8161 = vmatprep.subr.bf16.mxu1 %v8160_v39  ;;  %v7786_v39 = vpack.c.bf16 %v2048_v47, %v2044_v62  ;;  %v8170_v16 = vpack.c.bf16 %v2050_v20, %v2046_v54  ;;  %v7788_v26 = vpack.c.bf16 %v2057_v50, %v2053_v52  ;;  %v2073_v62 = vld [vmem:[%s18262_s1 + $0xb28] sm:$0xff]  ;;  %v2071_v47 = vld [vmem:[%s18262_s1 + $0xb18] sm:$0xff]  ;;  %v2068_v50 = vld [vmem:[%s18262_s1 + $0xb00] sm:$0xff] }
 0x261   :  { %v2075_v54 = vld [vmem:[%s18262_s1 + $0xb38] sm:$0xff] }
 0x262   :  { %7779 = vmatpush1.bf16.msra.mxu0 %v7778_v51  ;;  %v8172_v51 = vpack.c.bf16 %v2059_v53, %v2055_v23  ;;  %v2072_v23 = vld [vmem:[%s18262_s1 + $0xb20] sm:$0xff]  ;;  %v2070_v53 = vld [vmem:[%s18262_s1 + $0xb10] sm:$0xff] }
 0x263   :  { %8163 = vmatpush1.bf16.msra.mxu1 %v8162_v58  ;;  %7781 = vmatprep.subr.bf16.mxu0 %v7780_v30  ;;  %v2058_v58 = vld [vmem:[%s18262_s1 + $0xab0] sm:$0xff]  ;;  %v2061_v30 = vld [vmem:[%s18262_s1 + $0xac8] sm:$0xff] }
 0x264   :  { %8165 = vmatprep.subr.bf16.mxu1 %v8164_v21  ;;  %v7790_v21 = vpack.c.bf16 %v2056_v44, %v2052_v24  ;;  %v8174_v37 = vpack.c.bf16 %v2058_v58, %v2054_v43  ;;  %v7792_v18 = vpack.c.bf16 %v2065_v55, %v2061_v30  ;;  %v2081_v24 = vld [vmem:[%s18262_s1 + $0xb68] sm:$0xff]  ;;  %v2079_v44 = vld [vmem:[%s18262_s1 + $0xb58] sm:$0xff]  ;;  %v2076_v55 = vld [vmem:[%s18262_s1 + $0xb40] sm:$0xff] }
 0x265   :  { %v2083_v43 = vld [vmem:[%s18262_s1 + $0xb78] sm:$0xff] }
 0x266   :  { %7783 = vmatpush1.bf16.msra.mxu0 %v7782_v29  ;;  %v8176_v29 = vpack.c.bf16 %v2067_v19, %v2063_v28  ;;  %v2080_v28 = vld [vmem:[%s18262_s1 + $0xb60] sm:$0xff]  ;;  %v2078_v19 = vld [vmem:[%s18262_s1 + $0xb50] sm:$0xff] }
 0x267   :  { %8167 = vmatpush1.bf16.msra.mxu1 %v8166_v46  ;;  %7785 = vmatprep.subr.bf16.mxu0 %v7784_v42  ;;  %v2066_v46 = vld [vmem:[%s18262_s1 + $0xaf0] sm:$0xff]  ;;  %v2069_v42 = vld [vmem:[%s18262_s1 + $0xb08] sm:$0xff] }
 0x268   :  { %8169 = vmatprep.subr.bf16.mxu1 %v8168_v63  ;;  %v7794_v63 = vpack.c.bf16 %v2064_v57, %v2060_v41  ;;  %v8178_v20 = vpack.c.bf16 %v2066_v46, %v2062_v59  ;;  %v7796_v52 = vpack.c.bf16 %v2073_v62, %v2069_v42  ;;  %v2089_v41 = vld [vmem:[%s18262_s1 + $0xba8] sm:$0xff]  ;;  %v2087_v57 = vld [vmem:[%s18262_s1 + $0xb98] sm:$0xff]  ;;  %v2084_v62 = vld [vmem:[%s18262_s1 + $0xb80] sm:$0xff] }
 0x269   :  { %v2091_v59 = vld [vmem:[%s18262_s1 + $0xbb8] sm:$0xff] }
 0x26a   :  { %7787 = vmatpush1.bf16.msra.mxu0 %v7786_v39  ;;  %v8180_v39 = vpack.c.bf16 %v2075_v54, %v2071_v47  ;;  %v2088_v47 = vld [vmem:[%s18262_s1 + $0xba0] sm:$0xff]  ;;  %v2086_v54 = vld [vmem:[%s18262_s1 + $0xb90] sm:$0xff] }
 0x26b   :  { %8171 = vmatpush1.bf16.msra.mxu1 %v8170_v16  ;;  %7789 = vmatprep.subr.bf16.mxu0 %v7788_v26  ;;  %v2074_v16 = vld [vmem:[%s18262_s1 + $0xb30] sm:$0xff]  ;;  %v2077_v26 = vld [vmem:[%s18262_s1 + $0xb48] sm:$0xff] }
 0x26c   :  { %8173 = vmatprep.subr.bf16.mxu1 %v8172_v51  ;;  %v7798_v51 = vpack.c.bf16 %v2072_v23, %v2068_v50  ;;  %v8182_v58 = vpack.c.bf16 %v2074_v16, %v2070_v53  ;;  %v7800_v30 = vpack.c.bf16 %v2081_v24, %v2077_v26  ;;  %v2097_v50 = vld [vmem:[%s18262_s1 + $0xbe8] sm:$0xff]  ;;  %v2095_v23 = vld [vmem:[%s18262_s1 + $0xbd8] sm:$0xff]  ;;  %v2092_v24 = vld [vmem:[%s18262_s1 + $0xbc0] sm:$0xff] }
 0x26d   :  { %v2099_v53 = vld [vmem:[%s18262_s1 + $0xbf8] sm:$0xff] }
 0x26e   :  { %7791 = vmatpush1.bf16.msra.mxu0 %v7790_v21  ;;  %v8184_v21 = vpack.c.bf16 %v2083_v43, %v2079_v44  ;;  %v2096_v44 = vld [vmem:[%s18262_s1 + $0xbe0] sm:$0xff]  ;;  %v2094_v43 = vld [vmem:[%s18262_s1 + $0xbd0] sm:$0xff] }
 0x26f   :  { %8175 = vmatpush1.bf16.msra.mxu1 %v8174_v37  ;;  %7793 = vmatprep.subr.bf16.mxu0 %v7792_v18  ;;  %v2082_v37 = vld [vmem:[%s18262_s1 + $0xb70] sm:$0xff]  ;;  %v2085_v18 = vld [vmem:[%s18262_s1 + $0xb88] sm:$0xff] }
 0x270   :  { %8177 = vmatprep.subr.bf16.mxu1 %v8176_v29  ;;  %v7802_v29 = vpack.c.bf16 %v2080_v28, %v2076_v55  ;;  %v8186_v46 = vpack.c.bf16 %v2082_v37, %v2078_v19  ;;  %v7804_v42 = vpack.c.bf16 %v2089_v41, %v2085_v18  ;;  %v2105_v55 = vld [vmem:[%s18262_s1 + $0xc28] sm:$0xff]  ;;  %v2103_v28 = vld [vmem:[%s18262_s1 + $0xc18] sm:$0xff]  ;;  %v2100_v41 = vld [vmem:[%s18262_s1 + $0xc00] sm:$0xff] }
 0x271   :  { %v2107_v19 = vld [vmem:[%s18262_s1 + $0xc38] sm:$0xff] }
 0x272   :  { %7795 = vmatpush1.bf16.msra.mxu0 %v7794_v63  ;;  %v8188_v63 = vpack.c.bf16 %v2091_v59, %v2087_v57  ;;  %v2104_v57 = vld [vmem:[%s18262_s1 + $0xc20] sm:$0xff]  ;;  %v2102_v59 = vld [vmem:[%s18262_s1 + $0xc10] sm:$0xff] }
 0x273   :  { %8179 = vmatpush1.bf16.msra.mxu1 %v8178_v20  ;;  %7797 = vmatprep.subr.bf16.mxu0 %v7796_v52  ;;  %v2090_v20 = vld [vmem:[%s18262_s1 + $0xbb0] sm:$0xff]  ;;  %v2093_v52 = vld [vmem:[%s18262_s1 + $0xbc8] sm:$0xff] }
 0x274   :  { %8181 = vmatprep.subr.bf16.mxu1 %v8180_v39  ;;  %v7806_v39 = vpack.c.bf16 %v2088_v47, %v2084_v62  ;;  %v8190_v16 = vpack.c.bf16 %v2090_v20, %v2086_v54  ;;  %v7808_v26 = vpack.c.bf16 %v2097_v50, %v2093_v52  ;;  %v2113_v62 = vld [vmem:[%s18262_s1 + $0xc68] sm:$0xff]  ;;  %v2111_v47 = vld [vmem:[%s18262_s1 + $0xc58] sm:$0xff]  ;;  %v2108_v50 = vld [vmem:[%s18262_s1 + $0xc40] sm:$0xff] }
 0x275   :  { %v2115_v54 = vld [vmem:[%s18262_s1 + $0xc78] sm:$0xff] }
 0x276   :  { %7799 = vmatpush1.bf16.msra.mxu0 %v7798_v51  ;;  %v8192_v51 = vpack.c.bf16 %v2099_v53, %v2095_v23  ;;  %v2112_v23 = vld [vmem:[%s18262_s1 + $0xc60] sm:$0xff]  ;;  %v2110_v53 = vld [vmem:[%s18262_s1 + $0xc50] sm:$0xff] }
 0x277   :  { %8183 = vmatpush1.bf16.msra.mxu1 %v8182_v58  ;;  %7801 = vmatprep.subr.bf16.mxu0 %v7800_v30  ;;  %v2098_v58 = vld [vmem:[%s18262_s1 + $0xbf0] sm:$0xff]  ;;  %v2101_v30 = vld [vmem:[%s18262_s1 + $0xc08] sm:$0xff] }
 0x278   :  { %8185 = vmatprep.subr.bf16.mxu1 %v8184_v21  ;;  %v7810_v21 = vpack.c.bf16 %v2096_v44, %v2092_v24  ;;  %v8194_v37 = vpack.c.bf16 %v2098_v58, %v2094_v43  ;;  %v7812_v18 = vpack.c.bf16 %v2105_v55, %v2101_v30  ;;  %v2121_v24 = vld [vmem:[%s18262_s1 + $0xca8] sm:$0xff]  ;;  %v15094_v44 = vld [vmem:[%s18261_s0] sm:$0xff]  ;;  %v2119_v43 = vld [vmem:[%s18262_s1 + $0xc98] sm:$0xff]  ;;  %v7818_v58 = vpack.c.bf16 %v2112_v23, %v2108_v50 }
 0x279   :  { %v2130_v23 = vld [vmem:[%s18262_s1 + $0xcf0] sm:$0xff] }
 0x27a   :  { %7803 = vmatpush1.bf16.msra.mxu0 %v7802_v29  ;;  %v8196_v29 = vpack.c.bf16 %v2107_v19, %v2103_v28  ;;  %v2116_v28 = vld [vmem:[%s18262_s1 + $0xc80] sm:$0xff] }
 0x27b   :  { %8187 = vmatpush1.bf16.msra.mxu1 %v8186_v46  ;;  %7805 = vmatprep.subr.bf16.mxu0 %v7804_v42  ;;  %v2106_v46 = vld [vmem:[%s18262_s1 + $0xc30] sm:$0xff]  ;;  %v2109_v42 = vld [vmem:[%s18262_s1 + $0xc48] sm:$0xff]  ;;  %v2120_v19 = vld [vmem:[%s18262_s1 + $0xca0] sm:$0xff] }
 0x27c   :  { %8189 = vmatprep.subr.bf16.mxu1 %v8188_v63  ;;  %v7814_v63 = vpack.c.bf16 %v2104_v57, %v2100_v41  ;;  %v8198_v20 = vpack.c.bf16 %v2106_v46, %v2102_v59  ;;  %v7816_v52 = vpack.c.bf16 %v2113_v62, %v2109_v42  ;;  %v2125_v41 = vld [vmem:[%s18262_s1 + $0xcc8] sm:$0xff]  ;;  %v2131_v46 = vld [vmem:[%s18262_s1 + $0xcf8] sm:$0xff]  ;;  %v15138_v42 = vld [vmem:[%s18261_s0 + $0x20] sm:$0xff]  ;;  %v7822_v62 = vpack.c.bf16 %v2120_v19, %v2116_v28 }
 0x27d   :  { %v2129_v57 = vld [vmem:[%s18262_s1 + $0xce8] sm:$0xff]  ;;  %v2136_v28 = vld [vmem:[%s18262_s1 + $0xd20] sm:$0xff]  ;;  %v2134_v19 = vld [vmem:[%s18262_s1 + $0xd10] sm:$0xff] }
 0x27e   :  { %7807 = vmatpush1.bf16.msra.mxu0 %v7806_v39  ;;  %v8200_v39 = vpack.c.bf16 %v2115_v54, %v2111_v47  ;;  %v15125_v59 = vld [vmem:[%s18261_s0 + $0x28] sm:$0xff]  ;;  %v7824_v54 = vpack.c.bf16 %v2129_v57, %v2125_v41 }
 0x27f   :  { %8191 = vmatpush1.bf16.msra.mxu1 %v8190_v16  ;;  %7809 = vmatprep.subr.bf16.mxu0 %v7808_v26  ;;  %v2114_v16 = vld [vmem:[%s18262_s1 + $0xc70] sm:$0xff]  ;;  %v2117_v26 = vld [vmem:[%s18262_s1 + $0xc88] sm:$0xff] }
 0x280   :  { %8193 = vmatprep.subr.bf16.mxu1 %v8192_v51  ;;  %v2123_v51 = vld [vmem:[%s18262_s1 + $0xcb8] sm:$0xff]  ;;  %v8202_v30 = vpack.c.bf16 %v2114_v16, %v2110_v53  ;;  %v7820_v55 = vpack.c.bf16 %v2121_v24, %v2117_v26  ;;  %v2133_v53 = vld [vmem:[%s18262_s1 + $0xd08] sm:$0xff] }
 0x281   :  { %v15163_v16 = vld [vmem:[%s18261_s0 + $0x48] sm:$0xff]  ;;  %v2135_v26 = vld [vmem:[%s18262_s1 + $0xd18] sm:$0xff] }
 0x282   :  { %7811 = vmatpush1.bf16.msra.mxu0 %v7810_v21  ;;  %v2118_v21 = vld [vmem:[%s18262_s1 + $0xc90] sm:$0xff]  ;;  %v2139_v24 = vld [vmem:[%s18262_s1 + $0xd38] sm:$0xff]  ;;  %v2145_v41 = vld [vmem:[%s18262_s1 + $0xd68] sm:$0xff] }
 0x283   :  { %8195 = vmatpush1.bf16.msra.mxu1 %v8194_v37  ;;  %7813 = vmatprep.subr.bf16.mxu0 %v7812_v18  ;;  %v8204_v37 = vpack.c.bf16 %v2123_v51, %v2119_v43  ;;  %v2122_v18 = vld [vmem:[%s18262_s1 + $0xcb0] sm:$0xff]  ;;  %v15176_v43 = vld [vmem:[%s18261_s0 + $0x40] sm:$0xff]  ;;  %v15201_v57 = vld [vmem:[%s18261_s0 + $0x68] sm:$0xff] }
 0x284   :  { %8197 = vmatprep.subr.bf16.mxu1 %v8196_v29  ;;  %v2127_v29 = vld [vmem:[%s18262_s1 + $0xcd8] sm:$0xff]  ;;  %v8206_v47 = vpack.c.bf16 %v2122_v18, %v2118_v21  ;;  %v8212_v21 = vpack.c.bf16 %v2139_v24, %v2135_v26  ;;  %v2141_v18 = vld [vmem:[%s18262_s1 + $0xd48] sm:$0xff] }
 0x285   :  { %2869 = vmatmul.mubr.f32.vlgmr.msra.gmra.mrb[0].mxu0 %v15094_v44  ;;  %v8208_v50 = vpack.c.bf16 %v2131_v46, %v2127_v29  ;;  %v2143_v29 = vld [vmem:[%s18262_s1 + $0xd58] sm:$0xff]  ;;  %v2153_v26 = vld [vmem:[%s18262_s1 + $0xda8] sm:$0xff] }
 0x286   :  { %7815 = vmatpush1.bf16.msra.mxu0 %v7814_v63  ;;  %3403 = vmatmul.mubr.f32.vlgmr.msra.gmra.mrb[0].mxu1 %v15094_v44  ;;  %v2124_v63 = vld [vmem:[%s18262_s1 + $0xcc0] sm:$0xff]  ;;  %v2147_v46 = vld [vmem:[%s18262_s1 + $0xd78] sm:$0xff] }
 0x287   :  { %8199 = vmatpush1.bf16.msra.mxu1 %v8198_v20  ;;  %7817 = vmatprep.subr.bf16.mxu0 %v7816_v52  ;;  %v2128_v20 = vld [vmem:[%s18262_s1 + $0xce0] sm:$0xff]  ;;  %v2126_v52 = vld [vmem:[%s18262_s1 + $0xcd0] sm:$0xff]  ;;  %v9656_v24 = vld [vmem:[%s18261_s0 + $0x18] sm:$0xff] }
 0x288   :  { %8201 = vmatprep.subr.bf16.mxu1 %v8200_v39  ;;  %2874 = vmatprep.mubr.f32.mxu0 %v15125_v59  ;;  %v2137_v39 = vld [vmem:[%s18262_s1 + $0xd28] sm:$0xff]  ;;  %v7826_v51 = vpack.c.bf16 %v2128_v20, %v2124_v63  ;;  %v7832_v63 = vpack.c.bf16 %v2145_v41, %v2141_v18  ;;  %v2140_v20 = vld [vmem:[%s18262_s1 + $0xd40] sm:$0xff]  ;;  %v2154_v41 = vld [vmem:[%s18262_s1 + $0xdb0] sm:$0xff] }
 0x289   :  { %3408 = vmatprep.mubr.f32.mxu1 %v15125_v59  ;;  %2875 = vmatmul.mubr.f32.gmra.mrb[2].mxu0 %v15138_v42 }
 0x28a   :  { %7819 = vmatpush1.bf16.msra.mxu0 %v7818_v58  ;;  %3409 = vmatmul.mubr.f32.gmra.mrb[2].mxu1 %v15138_v42  ;;  %v8210_v58 = vpack.c.bf16 %v2130_v23, %v2126_v52  ;;  %v2144_v52 = vld [vmem:[%s18262_s1 + $0xd60] sm:$0xff]  ;;  %v8216_v23 = vpack.c.bf16 %v2147_v46, %v2143_v29  ;;  %v2157_v29 = vld [vmem:[%s18262_s1 + $0xdc8] sm:$0xff] }
 0x28b   :  { %8203 = vmatpush1.bf16.msra.mxu1 %v8202_v30  ;;  %7821 = vmatprep.subr.bf16.mxu0 %v7820_v55  ;;  %v7828_v30 = vpack.c.bf16 %v2137_v39, %v2133_v53  ;;  %v2132_v55 = vld [vmem:[%s18262_s1 + $0xd00] sm:$0xff]  ;;  %v2146_v53 = vld [vmem:[%s18262_s1 + $0xd70] sm:$0xff]  ;;  %v2149_v39 = vld [vmem:[%s18262_s1 + $0xd88] sm:$0xff] }
 0x28c   :  { %8205 = vmatprep.subr.bf16.mxu1 %v8204_v37  ;;  %2880 = vmatprep.mubr.f32.mxu0 %v15163_v16  ;;  %v2138_v37 = vld [vmem:[%s18262_s1 + $0xd30] sm:$0xff]  ;;  %v2161_v46 = vld [vmem:[%s18262_s1 + $0xde8] sm:$0xff] }
 0x28d   :  { %3414 = vmatprep.mubr.f32.mxu1 %v15163_v16  ;;  %2881 = vmatmul.mubr.f32.gmra.mrb[4].mxu0 %v15176_v43 }
 0x28e   :  { %7823 = vmatpush1.bf16.msra.mxu0 %v7822_v62  ;;  %3415 = vmatmul.mubr.f32.gmra.mrb[4].mxu1 %v15176_v43  ;;  %v15214_v62 = vld [vmem:[%s18261_s0 + $0x60] sm:$0xff] }
 0x28f   :  { %8207 = vmatpush1.bf16.msra.mxu1 %v8206_v47  ;;  %7825 = vmatprep.subr.bf16.mxu0 %v7824_v54  ;;  %v7830_v47 = vpack.c.bf16 %v2136_v28, %v2132_v55  ;;  %v8214_v54 = vpack.c.bf16 %v2138_v37, %v2134_v19  ;;  %v7836_v28 = vpack.c.bf16 %v2153_v26, %v2149_v39  ;;  %v2148_v19 = vld [vmem:[%s18262_s1 + $0xd80] sm:$0xff]  ;;  %v2150_v37 = vld [vmem:[%s18262_s1 + $0xd90] sm:$0xff] }
 0x290   :  { %8209 = vmatprep.subr.bf16.mxu1 %v8208_v50  ;;  %2886 = vmatprep.mubr.f32.mxu0 %v15201_v57  ;;  %v2142_v50 = vld [vmem:[%s18262_s1 + $0xd50] sm:$0xff] }
 0x291   :  { %3420 = vmatprep.mubr.f32.mxu1 %v15201_v57  ;;  %2887 = vmatmul.mubr.f32.gmra.mrb[6].mxu0 %v15214_v62  ;;  %v8218_v55 = vpack.c.bf16 %v2146_v53, %v2142_v50  ;;  %v2156_v50 = vld [vmem:[%s18262_s1 + $0xdc0] sm:$0xff]  ;;  %v2158_v53 = vld [vmem:[%s18262_s1 + $0xdd0] sm:$0xff] }
 0x292   :  { %7827 = vmatpush1.bf16.msra.mxu0 %v7826_v51  ;;  %3421 = vmatmul.mubr.f32.gmra.mrb[6].mxu1 %v15214_v62  ;;  %v2151_v51 = vld [vmem:[%s18262_s1 + $0xd98] sm:$0xff]  ;;  %v2162_v26 = vld [vmem:[%s18262_s1 + $0xdf0] sm:$0xff] }
 0x293   :  { %8211 = vmatpush1.bf16.msra.mxu1 %v8210_v58  ;;  %7829 = vmatprep.subr.bf16.mxu0 %v7828_v30  ;;  %v2155_v58 = vld [vmem:[%s18262_s1 + $0xdb8] sm:$0xff]  ;;  %v7834_v30 = vpack.c.bf16 %v2144_v52, %v2140_v20  ;;  %v8222_v20 = vpack.c.bf16 %v2154_v41, %v2150_v37  ;;  %v7840_v52 = vpack.c.bf16 %v2161_v46, %v2157_v29  ;;  %v2168_v37 = vld [vmem:[%s18262_s1 + $0xe20] sm:$0xff]  ;;  %v2170_v29 = vld [vmem:[%s18262_s1 + $0xe30] sm:$0xff] }
 0x294   :  { %8213 = vmatprep.subr.bf16.mxu1 %v8212_v21  ;;  %2957 = vmatprep.mubr.f32.mxu0 %v9656_v24  ;;  %v2152_v21 = vld [vmem:[%s18262_s1 + $0xda0] sm:$0xff]  ;;  %v8220_v18 = vpack.c.bf16 %v2155_v58, %v2151_v51  ;;  %v2169_v51 = vld [vmem:[%s18262_s1 + $0xe28] sm:$0xff]  ;;  %v2167_v58 = vld [vmem:[%s18262_s1 + $0xe18] sm:$0xff] }
 0x295   :  { %3491 = vmatprep.mubr.f32.mxu1 %v9656_v24  ;;  %v2165_v24 = vld [vmem:[%s18262_s1 + $0xe08] sm:$0xff] }
 0x296   :  { %7831 = vmatpush1.bf16.msra.mxu0 %v7830_v47  ;;  %v2159_v47 = vld [vmem:[%s18262_s1 + $0xdd8] sm:$0xff]  ;;  %v2173_v46 = vld [vmem:[%s18262_s1 + $0xe48] sm:$0xff] }
 0x297   :  { %8215 = vmatpush1.bf16.msra.mxu1 %v8214_v54  ;;  %7833 = vmatprep.subr.bf16.mxu0 %v7832_v63  ;;  %v2163_v54 = vld [vmem:[%s18262_s1 + $0xdf8] sm:$0xff]  ;;  %v7838_v63 = vpack.c.bf16 %v2152_v21, %v2148_v19  ;;  %v7844_v19 = vpack.c.bf16 %v2169_v51, %v2165_v24  ;;  %v2164_v21 = vld [vmem:[%s18262_s1 + $0xe00] sm:$0xff]  ;;  %v2178_v24 = vld [vmem:[%s18262_s1 + $0xe70] sm:$0xff] }
 0x298   :  { %8217 = vmatprep.subr.bf16.mxu1 %v8216_v23  ;;  %v2160_v23 = vld [vmem:[%s18262_s1 + $0xde0] sm:$0xff]  ;;  %v8224_v39 = vpack.c.bf16 %v2163_v54, %v2159_v47  ;;  %v2177_v47 = vld [vmem:[%s18262_s1 + $0xe68] sm:$0xff]  ;;  %v2175_v54 = vld [vmem:[%s18262_s1 + $0xe58] sm:$0xff] }
 0x299   :  { %v2181_v51 = vld [vmem:[%s18262_s1 + $0xe88] sm:$0xff] }
 0x29a   :  { %7835 = vmatpush1.bf16.msra.mxu0 %v7834_v30  ;;  %v2171_v30 = vld [vmem:[%s18262_s1 + $0xe38] sm:$0xff] }
 0x29b   :  { %8219 = vmatpush1.bf16.msra.mxu1 %v8218_v55  ;;  %7837 = vmatprep.subr.bf16.mxu0 %v7836_v28  ;;  %v7842_v55 = vpack.c.bf16 %v2160_v23, %v2156_v50  ;;  %v8226_v28 = vpack.c.bf16 %v2162_v26, %v2158_v53  ;;  %v8228_v41 = vpack.c.bf16 %v2171_v30, %v2167_v58  ;;  %v2172_v23 = vld [vmem:[%s18262_s1 + $0xe40] sm:$0xff]  ;;  %v2185_v58 = vld [vmem:[%s18262_s1 + $0xea8] sm:$0xff]  ;;  %v2183_v30 = vld [vmem:[%s18262_s1 + $0xe98] sm:$0xff] }
 0x29c   :  { %8221 = vmatprep.subr.bf16.mxu1 %v8220_v18  ;;  %v2166_v18 = vld [vmem:[%s18262_s1 + $0xe10] sm:$0xff]  ;;  %v7848_v50 = vpack.c.bf16 %v2177_v47, %v2173_v46  ;;  %v2176_v53 = vld [vmem:[%s18262_s1 + $0xe60] sm:$0xff]  ;;  %v2189_v47 = vld [vmem:[%s18262_s1 + $0xec8] sm:$0xff] }
 0x29d   :  { %v2186_v46 = vld [vmem:[%s18262_s1 + $0xeb0] sm:$0xff] }
 0x29e   :  { %7839 = vmatpush1.bf16.msra.mxu0 %v7838_v63  ;;  %v2179_v63 = vld [vmem:[%s18262_s1 + $0xe78] sm:$0xff] }
 0x29f   :  { %8223 = vmatpush1.bf16.msra.mxu1 %v8222_v20  ;;  %7841 = vmatprep.subr.bf16.mxu0 %v7840_v52  ;;  %v7846_v20 = vpack.c.bf16 %v2168_v37, %v2164_v21  ;;  %v8230_v52 = vpack.c.bf16 %v2170_v29, %v2166_v18  ;;  %v8232_v26 = vpack.c.bf16 %v2179_v63, %v2175_v54  ;;  %v2180_v37 = vld [vmem:[%s18262_s1 + $0xe80] sm:$0xff]  ;;  %v2193_v54 = vld [vmem:[%s18262_s1 + $0xee8] sm:$0xff]  ;;  %v2191_v63 = vld [vmem:[%s18262_s1 + $0xed8] sm:$0xff] }
 0x2a0   :  { %8225 = vmatprep.subr.bf16.mxu1 %v8224_v39  ;;  %v2174_v39 = vld [vmem:[%s18262_s1 + $0xe50] sm:$0xff]  ;;  %v7852_v21 = vpack.c.bf16 %v2185_v58, %v2181_v51  ;;  %v2184_v18 = vld [vmem:[%s18262_s1 + $0xea0] sm:$0xff]  ;;  %v2197_v58 = vld [vmem:[%s18262_s1 + $0xf08] sm:$0xff] }
 0x2a1   :  { %v2194_v51 = vld [vmem:[%s18262_s1 + $0xef0] sm:$0xff] }
 0x2a2   :  { %7843 = vmatpush1.bf16.msra.mxu0 %v7842_v55  ;;  %v2187_v55 = vld [vmem:[%s18262_s1 + $0xeb8] sm:$0xff] }
 0x2a3   :  { %8227 = vmatpush1.bf16.msra.mxu1 %v8226_v28  ;;  %7845 = vmatprep.subr.bf16.mxu0 %v7844_v19  ;;  %v7850_v28 = vpack.c.bf16 %v2176_v53, %v2172_v23  ;;  %v8234_v19 = vpack.c.bf16 %v2178_v24, %v2174_v39  ;;  %v8236_v29 = vpack.c.bf16 %v2187_v55, %v2183_v30  ;;  %v2188_v53 = vld [vmem:[%s18262_s1 + $0xec0] sm:$0xff]  ;;  %v2201_v30 = vld [vmem:[%s18262_s1 + $0xf28] sm:$0xff]  ;;  %v2199_v55 = vld [vmem:[%s18262_s1 + $0xf18] sm:$0xff] }
 0x2a4   :  { %8229 = vmatprep.subr.bf16.mxu1 %v8228_v41  ;;  %v2182_v41 = vld [vmem:[%s18262_s1 + $0xe90] sm:$0xff]  ;;  %v7856_v23 = vpack.c.bf16 %v2193_v54, %v2189_v47  ;;  %v2192_v39 = vld [vmem:[%s18262_s1 + $0xee0] sm:$0xff]  ;;  %v2205_v54 = vld [vmem:[%s18262_s1 + $0xf48] sm:$0xff] }
 0x2a5   :  { %v2202_v47 = vld [vmem:[%s18262_s1 + $0xf30] sm:$0xff] }
 0x2a6   :  { %7847 = vmatpush1.bf16.msra.mxu0 %v7846_v20  ;;  %v2195_v20 = vld [vmem:[%s18262_s1 + $0xef8] sm:$0xff] }
 0x2a7   :  { %8231 = vmatpush1.bf16.msra.mxu1 %v8230_v52  ;;  %7849 = vmatprep.subr.bf16.mxu0 %v7848_v50  ;;  %v7854_v52 = vpack.c.bf16 %v2184_v18, %v2180_v37  ;;  %v8238_v50 = vpack.c.bf16 %v2186_v46, %v2182_v41  ;;  %v8240_v24 = vpack.c.bf16 %v2195_v20, %v2191_v63  ;;  %v2196_v18 = vld [vmem:[%s18262_s1 + $0xf00] sm:$0xff]  ;;  %v2209_v63 = vld [vmem:[%s18262_s1 + $0xf68] sm:$0xff]  ;;  %v2207_v20 = vld [vmem:[%s18262_s1 + $0xf58] sm:$0xff] }
 0x2a8   :  { %8233 = vmatprep.subr.bf16.mxu1 %v8232_v26  ;;  %v2190_v26 = vld [vmem:[%s18262_s1 + $0xed0] sm:$0xff]  ;;  %v7860_v37 = vpack.c.bf16 %v2201_v30, %v2197_v58  ;;  %v2200_v41 = vld [vmem:[%s18262_s1 + $0xf20] sm:$0xff]  ;;  %v2213_v30 = vld [vmem:[%s18262_s1 + $0xf88] sm:$0xff] }
 0x2a9   :  { %v2210_v58 = vld [vmem:[%s18262_s1 + $0xf70] sm:$0xff] }
 0x2aa   :  { %7851 = vmatpush1.bf16.msra.mxu0 %v7850_v28  ;;  %v2203_v28 = vld [vmem:[%s18262_s1 + $0xf38] sm:$0xff] }
 0x2ab   :  { %8235 = vmatpush1.bf16.msra.mxu1 %v8234_v19  ;;  %7853 = vmatprep.subr.bf16.mxu0 %v7852_v21  ;;  %v7858_v19 = vpack.c.bf16 %v2192_v39, %v2188_v53  ;;  %v8242_v21 = vpack.c.bf16 %v2194_v51, %v2190_v26  ;;  %v8244_v46 = vpack.c.bf16 %v2203_v28, %v2199_v55  ;;  %v2204_v39 = vld [vmem:[%s18262_s1 + $0xf40] sm:$0xff]  ;;  %v2217_v55 = vld [vmem:[%s18262_s1 + $0xfa8] sm:$0xff]  ;;  %v2215_v28 = vld [vmem:[%s18262_s1 + $0xf98] sm:$0xff] }
 0x2ac   :  { %8237 = vmatprep.subr.bf16.mxu1 %v8236_v29  ;;  %v2198_v29 = vld [vmem:[%s18262_s1 + $0xf10] sm:$0xff]  ;;  %v7864_v53 = vpack.c.bf16 %v2209_v63, %v2205_v54  ;;  %v2208_v26 = vld [vmem:[%s18262_s1 + $0xf60] sm:$0xff]  ;;  %v2221_v63 = vld [vmem:[%s18262_s1 + $0xfc8] sm:$0xff] }
 0x2ad   :  { %v2218_v54 = vld [vmem:[%s18262_s1 + $0xfb0] sm:$0xff] }
 0x2ae   :  { %7855 = vmatpush1.bf16.msra.mxu0 %v7854_v52  ;;  %v2211_v52 = vld [vmem:[%s18262_s1 + $0xf78] sm:$0xff] }
 0x2af   :  { %8239 = vmatpush1.bf16.msra.mxu1 %v8238_v50  ;;  %7857 = vmatprep.subr.bf16.mxu0 %v7856_v23  ;;  %v7862_v50 = vpack.c.bf16 %v2200_v41, %v2196_v18  ;;  %v8246_v23 = vpack.c.bf16 %v2202_v47, %v2198_v29  ;;  %v8248_v51 = vpack.c.bf16 %v2211_v52, %v2207_v20  ;;  %v2212_v41 = vld [vmem:[%s18262_s1 + $0xf80] sm:$0xff]  ;;  %v2225_v20 = vld [vmem:[%s18262_s1 + $0xfe8] sm:$0xff]  ;;  %v2223_v52 = vld [vmem:[%s18262_s1 + $0xfd8] sm:$0xff] }
 0x2b0   :  { %8241 = vmatprep.subr.bf16.mxu1 %v8240_v24  ;;  %v2206_v24 = vld [vmem:[%s18262_s1 + $0xf50] sm:$0xff]  ;;  %v7868_v18 = vpack.c.bf16 %v2217_v55, %v2213_v30  ;;  %v2216_v29 = vld [vmem:[%s18262_s1 + $0xfa0] sm:$0xff]  ;;  %v2229_v55 = vld [vmem:[%s18262_s1 + $0x1008] sm:$0xff] }
 0x2b1   :  { %v2226_v30 = vld [vmem:[%s18262_s1 + $0xff0] sm:$0xff] }
 0x2b2   :  { %7859 = vmatpush1.bf16.msra.mxu0 %v7858_v19  ;;  %v2219_v19 = vld [vmem:[%s18262_s1 + $0xfb8] sm:$0xff] }
 0x2b3   :  { %8243 = vmatpush1.bf16.msra.mxu1 %v8242_v21  ;;  %7861 = vmatprep.subr.bf16.mxu0 %v7860_v37  ;;  %v7866_v21 = vpack.c.bf16 %v2208_v26, %v2204_v39  ;;  %v8250_v37 = vpack.c.bf16 %v2210_v58, %v2206_v24  ;;  %v8252_v47 = vpack.c.bf16 %v2219_v19, %v2215_v28  ;;  %v2220_v26 = vld [vmem:[%s18262_s1 + $0xfc0] sm:$0xff]  ;;  %v2233_v28 = vld [vmem:[%s18262_s1 + $0x1028] sm:$0xff]  ;;  %v2231_v19 = vld [vmem:[%s18262_s1 + $0x1018] sm:$0xff] }
 0x2b4   :  { %8245 = vmatprep.subr.bf16.mxu1 %v8244_v46  ;;  %v2214_v46 = vld [vmem:[%s18262_s1 + $0xf90] sm:$0xff]  ;;  %v7872_v39 = vpack.c.bf16 %v2225_v20, %v2221_v63  ;;  %v2224_v24 = vld [vmem:[%s18262_s1 + $0xfe0] sm:$0xff]  ;;  %v2237_v20 = vld [vmem:[%s18262_s1 + $0x1048] sm:$0xff] }
 0x2b5   :  { %v2234_v63 = vld [vmem:[%s18262_s1 + $0x1030] sm:$0xff] }
 0x2b6   :  { %7863 = vmatpush1.bf16.msra.mxu0 %v7862_v50  ;;  %v2227_v50 = vld [vmem:[%s18262_s1 + $0xff8] sm:$0xff] }
 0x2b7   :  { %8247 = vmatpush1.bf16.msra.mxu1 %v8246_v23  ;;  %7865 = vmatprep.subr.bf16.mxu0 %v7864_v53  ;;  %v7870_v23 = vpack.c.bf16 %v2216_v29, %v2212_v41  ;;  %v8254_v53 = vpack.c.bf16 %v2218_v54, %v2214_v46  ;;  %v8256_v58 = vpack.c.bf16 %v2227_v50, %v2223_v52  ;;  %v2228_v29 = vld [vmem:[%s18262_s1 + $0x1000] sm:$0xff]  ;;  %v2230_v54 = vld [vmem:[%s18262_s1 + $0x1010] sm:$0xff]  ;;  %v2241_v52 = vld [vmem:[%s18262_s1 + $0x1068] sm:$0xff] }
 0x2b8   :  { %8249 = vmatprep.subr.bf16.mxu1 %v8248_v51  ;;  %v2222_v51 = vld [vmem:[%s18262_s1 + $0xfd0] sm:$0xff]  ;;  %v7876_v41 = vpack.c.bf16 %v2233_v28, %v2229_v55  ;;  %v2232_v46 = vld [vmem:[%s18262_s1 + $0x1020] sm:$0xff] }
 0x2b9   :  { %v7878_v50 = vpack.c.bf16 %v2232_v46, %v2228_v29  ;;  %v9657_v55 = vld [vmem:[%s18261_s0 + $0x10] sm:$0xff]  ;;  %v9658_v29 = vld [vmem:[%s18261_s0 + $0x38] sm:$0xff] }
 0x2ba   :  { %7867 = vmatpush1.bf16.msra.mxu0 %v7866_v21  ;;  %v2235_v21 = vld [vmem:[%s18262_s1 + $0x1038] sm:$0xff] }
 0x2bb   :  { %8251 = vmatpush1.bf16.msra.mxu1 %v8250_v37  ;;  %7869 = vmatprep.subr.bf16.mxu0 %v7868_v18  ;;  %v7874_v37 = vpack.c.bf16 %v2224_v24, %v2220_v26  ;;  %v8258_v18 = vpack.c.bf16 %v2226_v30, %v2222_v51  ;;  %v2236_v26 = vld [vmem:[%s18262_s1 + $0x1040] sm:$0xff]  ;;  %v7880_v51 = vpack.c.bf16 %v2241_v52, %v2237_v20  ;;  %v2242_v30 = vld [vmem:[%s18262_s1 + $0x1070] sm:$0xff] }
 0x2bc   :  { %8253 = vmatprep.subr.bf16.mxu1 %v8252_v47  ;;  %v8260_v47 = vpack.c.bf16 %v2235_v21, %v2231_v19  ;;  %v2240_v24 = vld [vmem:[%s18262_s1 + $0x1060] sm:$0xff]  ;;  %v2245_v19 = vld [vmem:[%s18262_s1 + $0x1088] sm:$0xff]  ;;  %v2246_v20 = vld [vmem:[%s18262_s1 + $0x1090] sm:$0xff] }
 0x2bd   :  { %v2249_v21 = vld [vmem:[%s18262_s1 + $0x10a8] sm:$0xff]  ;;  %v2250_v52 = vld [vmem:[%s18262_s1 + $0x10b0] sm:$0xff] }
 0x2be   :  { %7871 = vmatpush1.bf16.msra.mxu0 %v7870_v23  ;;  %v2239_v23 = vld [vmem:[%s18262_s1 + $0x1058] sm:$0xff] }
 0x2bf   :  { %8255 = vmatpush1.bf16.msra.mxu1 %v8254_v53  ;;  %7873 = vmatprep.subr.bf16.mxu0 %v7872_v39  ;;  %v2243_v53 = vld [vmem:[%s18262_s1 + $0x1078] sm:$0xff]  ;;  %v8262_v39 = vpack.c.bf16 %v2234_v63, %v2230_v54  ;;  %v2248_v54 = vld [vmem:[%s18262_s1 + $0x10a0] sm:$0xff]  ;;  %v7884_v63 = vpack.c.bf16 %v2249_v21, %v2245_v19  ;;  %v8270_v19 = vpack.c.bf16 %v2250_v52, %v2246_v20 }
 0x2c0   :  { %8257 = vmatprep.subr.bf16.mxu1 %v8256_v58  ;;  %v2238_v58 = vld [vmem:[%s18262_s1 + $0x1050] sm:$0xff]  ;;  %v8264_v28 = vpack.c.bf16 %v2243_v53, %v2239_v23  ;;  %v2253_v53 = vld [vmem:[%s18262_s1 + $0x10c8] sm:$0xff]  ;;  %v2252_v21 = vld [vmem:[%s18262_s1 + $0x10c0] sm:$0xff] }
 0x2c1   :  { %v8266_v46 = vpack.c.bf16 %v2242_v30, %v2238_v58  ;;  %v2255_v58 = vld [vmem:[%s18262_s1 + $0x10d8] sm:$0xff] }
 0x2c2   :  { %7875 = vmatpush1.bf16.msra.mxu0 %v7874_v37  ;;  %v7882_v37 = vpack.c.bf16 %v2240_v24, %v2236_v26  ;;  %v15563_v26 = vld [vmem:[%s18261_s0 + $0x8] sm:$0xff]  ;;  %v2259_v30 = vld [vmem:[%s18262_s1 + $0x10f8] sm:$0xff] }
 0x2c3   :  { %8259 = vmatpush1.bf16.msra.mxu1 %v8258_v18  ;;  %7877 = vmatprep.subr.bf16.mxu0 %v7876_v41  ;;  %v2247_v18 = vld [vmem:[%s18262_s1 + $0x1098] sm:$0xff]  ;;  %v18276_v24 = vrot.slane %v15563_v26, 1 }
 0x2c4   :  { %8261 = vmatprep.subr.bf16.mxu1 %v8260_v47  ;;  %v2251_v41 = vld [vmem:[%s18262_s1 + $0x10b8] sm:$0xff]  ;;  %v2244_v47 = vld [vmem:[%s18262_s1 + $0x1080] sm:$0xff] }
 0x2c5   :  { %2958 = vmatmul.mubr.f32.vlgmr.msra.gmra.mrb[0].mxu0 %v9657_v55  ;;  %v8268_v23 = vpack.c.bf16 %v2251_v41, %v2247_v18  ;;  %v2254_v41 = vld [vmem:[%s18262_s1 + $0x10d0] sm:$0xff] }
 0x2c6   :  { %3492 = vmatmul.mubr.f32.vlgmr.msra.gmra.mrb[0].mxu1 %v9657_v55  ;;  %7879 = vmatpush1.bf16.msra.mxu0 %v7878_v50  ;;  %v9659_v50 = vld [vmem:[%s18261_s0 + $0x30] sm:$0xff]  ;;  %v2562_v55 = vrot.slane %v15125_v59, 1  ;;  %v2367_v59 = vld [vmem:[%s18262_s1 + $0x1458] sm:$0xff] }
 0x2c7   :  { %8263 = vmatpush1.bf16.msra.mxu1 %v8262_v39  ;;  %2963 = vmatprep.mubr.f32.mxu0 %v9658_v29  ;;  %v2257_v39 = vld [vmem:[%s18262_s1 + $0x10e8] sm:$0xff] }
 0x2c8   :  { %3497 = vmatprep.mubr.f32.mxu1 %v9658_v29  ;;  %7881 = vmatprep.subr.bf16.mxu0 %v7880_v51  ;;  %v7886_v51 = vpack.c.bf16 %v2248_v54, %v2244_v47  ;;  %v7888_v18 = vpack.c.bf16 %v2257_v39, %v2253_v53  ;;  %v2258_v29 = vld [vmem:[%s18262_s1 + $0x10f0] sm:$0xff]  ;;  %v8272_v47 = vpack.c.bf16 %v2259_v30, %v2255_v58  ;;  %v2261_v54 = vld [vmem:[%s18262_s1 + $0x1108] sm:$0xff]  ;;  %v9663_v53 = vld [vmem:[%s18261_s0 + $0x78] sm:$0xff] }
 0x2c9   :  { %2964 = vmatmul.mubr.f32.gmra.mrb[2].mxu0 %v9659_v50  ;;  %8265 = vmatprep.subr.bf16.mxu1 %v8264_v28  ;;  %v9661_v28 = vld [vmem:[%s18261_s0 + $0x58] sm:$0xff]  ;;  %v2583_v52 = vsel %vm2573_vm1, %v18276_v24, %v2562_v55  ;;  %v8274_v39 = vpack.c.bf16 %v2258_v29, %v2254_v41  ;;  %v2264_v58 = vld [vmem:[%s18262_s1 + $0x1120] sm:$0xff]  ;;  %v2262_v30 = vld [vmem:[%s18262_s1 + $0x1110] sm:$0xff] }
 0x2ca   :  { %3498 = vmatmul.mubr.f32.gmra.mrb[2].mxu1 %v9659_v50  ;;  %7883 = vmatpush1.bf16.msra.mxu0 %v7882_v37  ;;  %v2256_v37 = vld [vmem:[%s18262_s1 + $0x10e0] sm:$0xff]  ;;  %v2263_v50 = vld [vmem:[%s18262_s1 + $0x1118] sm:$0xff]  ;;  %v9664_v41 = vld [vmem:[%s18261_s0 + $0x70] sm:$0xff] }
 0x2cb   :  { %8267 = vmatpush1.bf16.msra.mxu1 %v8266_v46  ;;  %2969 = vmatprep.mubr.f32.mxu0 %v9661_v28  ;;  %v9662_v46 = vld [vmem:[%s18261_s0 + $0x50] sm:$0xff]  ;;  %v7890_v20 = vpack.c.bf16 %v2256_v37, %v2252_v21  ;;  %v2269_v21 = vld [vmem:[%s18262_s1 + $0x1148] sm:$0xff] }
 0x2cc   :  { %3503 = vmatprep.mubr.f32.mxu1 %v9661_v28  ;;  %7885 = vmatprep.subr.bf16.mxu0 %v7884_v63  ;;  %v2265_v63 = vld [vmem:[%s18262_s1 + $0x1128] sm:$0xff] }
 0x2cd   :  { %2970 = vmatmul.mubr.f32.gmra.mrb[4].mxu0 %v9662_v46  ;;  %8269 = vmatprep.subr.bf16.mxu1 %v8268_v23  ;;  %v2267_v23 = vld [vmem:[%s18262_s1 + $0x1138] sm:$0xff]  ;;  %v7892_v28 = vpack.c.bf16 %v2265_v63, %v2261_v54  ;;  %v2273_v37 = vld [vmem:[%s18262_s1 + $0x1168] sm:$0xff] }
 0x2ce   :  { %3504 = vmatmul.mubr.f32.gmra.mrb[4].mxu1 %v9662_v46  ;;  %7887 = vmatpush1.bf16.msra.mxu0 %v7886_v51  ;;  %v2260_v51 = vld [vmem:[%s18262_s1 + $0x1100] sm:$0xff]  ;;  %v8276_v29 = vpack.c.bf16 %v2267_v23, %v2263_v50  ;;  %v2271_v46 = vld [vmem:[%s18262_s1 + $0x1158] sm:$0xff]  ;;  %v7896_v24 = vpack.c.bf16 %v2273_v37, %v2269_v21  ;;  %v2270_v50 = vld [vmem:[%s18262_s1 + $0x1150] sm:$0xff] }
 0x2cf   :  { %8271 = vmatpush1.bf16.msra.mxu1 %v8270_v19  ;;  %2975 = vmatprep.mubr.f32.mxu0 %v9663_v53  ;;  %v2266_v19 = vld [vmem:[%s18262_s1 + $0x1130] sm:$0xff]  ;;  %v2275_v54 = vld [vmem:[%s18262_s1 + $0x1178] sm:$0xff]  ;;  %v7894_v63 = vpack.c.bf16 %v2264_v58, %v2260_v51  ;;  %v2281_v51 = vld [vmem:[%s18262_s1 + $0x11a8] sm:$0xff] }
 0x2d0   :  { %3509 = vmatprep.mubr.f32.mxu1 %v9663_v53  ;;  %7889 = vmatprep.subr.bf16.mxu0 %v7888_v18  ;;  %v2611_v18 = vmul.f32 %v14244_v48, %v2583_v52  ;;  %v8278_v53 = vpack.c.bf16 %v2266_v19, %v2262_v30  ;;  %v2272_v52 = vld [vmem:[%s18262_s1 + $0x1160] sm:$0xff]  ;;  %v2274_v23 = vld [vmem:[%s18262_s1 + $0x1170] sm:$0xff]  ;;  %v2279_v58 = vld [vmem:[%s18262_s1 + $0x1198] sm:$0xff] }
 0x2d1   :  { %2976 = vmatmul.mubr.f32.gmra.mrb[6].mxu0 %v9664_v41  ;;  %8273 = vmatprep.subr.bf16.mxu1 %v8272_v47  ;;  %v2268_v47 = vld [vmem:[%s18262_s1 + $0x1140] sm:$0xff]  ;;  %v2283_v30 = vld [vmem:[%s18262_s1 + $0x11b8] sm:$0xff]  ;;  %v8282_v19 = vpack.c.bf16 %v2274_v23, %v2270_v50 }
 0x2d2   :  { %3510 = vmatmul.mubr.f32.gmra.mrb[6].mxu1 %v9664_v41  ;;  %7891 = vmatpush1.bf16.msra.mxu0 %v7890_v20  ;;  %v8280_v20 = vpack.c.bf16 %v2275_v54, %v2271_v46  ;;  %v2276_v37 = vld [vmem:[%s18262_s1 + $0x1180] sm:$0xff]  ;;  %v2285_v46 = vld [vmem:[%s18262_s1 + $0x11c8] sm:$0xff] }
 0x2d3   :  { %3046 = vmatprep.mubr.f32.mxu0 %v2611_v18  ;;  %8275 = vmatpush1.bf16.msra.mxu1 %v8274_v39  ;;  %v2277_v39 = vld [vmem:[%s18262_s1 + $0x1188] sm:$0xff]  ;;  %v2280_v41 = vld [vmem:[%s18262_s1 + $0x11a0] sm:$0xff] }
 0x2d4   :  { %3580 = vmatprep.mubr.f32.mxu1 %v2611_v18  ;;  %7893 = vmatprep.subr.bf16.mxu0 %v7892_v28  ;;  %v7898_v28 = vpack.c.bf16 %v2272_v52, %v2268_v47  ;;  %v7900_v21 = vpack.c.bf16 %v2281_v51, %v2277_v39  ;;  %v2278_v18 = vld [vmem:[%s18262_s1 + $0x1190] sm:$0xff]  ;;  %v2289_v54 = vld [vmem:[%s18262_s1 + $0x11e8] sm:$0xff]  ;;  %v7902_v47 = vpack.c.bf16 %v2280_v41, %v2276_v37  ;;  %v2288_v23 = vld [vmem:[%s18262_s1 + $0x11e0] sm:$0xff] }
 0x2d5   :  { %8277 = vmatprep.subr.bf16.mxu1 %v8276_v29  ;;  %v8284_v29 = vpack.c.bf16 %v2283_v30, %v2279_v58  ;;  %v7904_v50 = vpack.c.bf16 %v2289_v54, %v2285_v46  ;;  %v2286_v39 = vld [vmem:[%s18262_s1 + $0x11d0] sm:$0xff]  ;;  %v2293_v30 = vld [vmem:[%s18262_s1 + $0x1208] sm:$0xff] }
 0x2d6   :  { %7895 = vmatpush1.bf16.msra.mxu0 %v7894_v63  ;;  %v2287_v63 = vld [vmem:[%s18262_s1 + $0x11d8] sm:$0xff]  ;;  %v2290_v58 = vld [vmem:[%s18262_s1 + $0x11f0] sm:$0xff] }
 0x2d7   :  { %8279 = vmatpush1.bf16.msra.mxu1 %v8278_v53  ;;  %7897 = vmatprep.subr.bf16.mxu0 %v7896_v24  ;;  %v2282_v24 = vld [vmem:[%s18262_s1 + $0x11b0] sm:$0xff]  ;;  %v2291_v53 = vld [vmem:[%s18262_s1 + $0x11f8] sm:$0xff]  ;;  %v8290_v41 = vpack.c.bf16 %v2290_v58, %v2286_v39  ;;  %v2304_v58 = vld [vmem:[%s18262_s1 + $0x1260] sm:$0xff] }
 0x2d8   :  { %8281 = vmatprep.subr.bf16.mxu1 %v8280_v20  ;;  %v8286_v52 = vpack.c.bf16 %v2282_v24, %v2278_v18  ;;  %v2284_v20 = vld [vmem:[%s18262_s1 + $0x11c0] sm:$0xff]  ;;  %v8288_v51 = vpack.c.bf16 %v2291_v53, %v2287_v63  ;;  %v2294_v46 = vld [vmem:[%s18262_s1 + $0x1210] sm:$0xff]  ;;  %v2301_v53 = vld [vmem:[%s18262_s1 + $0x1248] sm:$0xff] }
 0x2d9   :  { %v7906_v37 = vpack.c.bf16 %v2288_v23, %v2284_v20  ;;  %v2296_v24 = vld [vmem:[%s18262_s1 + $0x1220] sm:$0xff]  ;;  %v2298_v63 = vld [vmem:[%s18262_s1 + $0x1230] sm:$0xff] }
 0x2da   :  { %7899 = vmatpush1.bf16.msra.mxu0 %v7898_v28  ;;  %v2297_v28 = vld [vmem:[%s18262_s1 + $0x1228] sm:$0xff]  ;;  %v8294_v23 = vpack.c.bf16 %v2298_v63, %v2294_v46  ;;  %v2312_v63 = vld [vmem:[%s18262_s1 + $0x12a0] sm:$0xff] }
 0x2db   :  { %8283 = vmatpush1.bf16.msra.mxu1 %v8282_v19  ;;  %7901 = vmatprep.subr.bf16.mxu0 %v7900_v21  ;;  %v2295_v19 = vld [vmem:[%s18262_s1 + $0x1218] sm:$0xff]  ;;  %v7908_v18 = vpack.c.bf16 %v2297_v28, %v2293_v30  ;;  %v2302_v30 = vld [vmem:[%s18262_s1 + $0x1250] sm:$0xff] }
 0x2dc   :  { %8285 = vmatprep.subr.bf16.mxu1 %v8284_v29  ;;  %v2299_v21 = vld [vmem:[%s18262_s1 + $0x1238] sm:$0xff]  ;;  %v2292_v29 = vld [vmem:[%s18262_s1 + $0x1200] sm:$0xff] }
 0x2dd   :  { %v8292_v54 = vpack.c.bf16 %v2299_v21, %v2295_v19  ;;  %v7910_v20 = vpack.c.bf16 %v2296_v24, %v2292_v29  ;;  %v2306_v19 = vld [vmem:[%s18262_s1 + $0x1270] sm:$0xff]  ;;  %v2309_v21 = vld [vmem:[%s18262_s1 + $0x1288] sm:$0xff] }
 0x2de   :  { %7903 = vmatpush1.bf16.msra.mxu0 %v7902_v47  ;;  %v2305_v47 = vld [vmem:[%s18262_s1 + $0x1268] sm:$0xff]  ;;  %v8298_v24 = vpack.c.bf16 %v2306_v19, %v2302_v30  ;;  %v2320_v19 = vld [vmem:[%s18262_s1 + $0x12e0] sm:$0xff] }
 0x2df   :  { %8287 = vmatpush1.bf16.msra.mxu1 %v8286_v52  ;;  %7905 = vmatprep.subr.bf16.mxu0 %v7904_v50  ;;  %v2303_v52 = vld [vmem:[%s18262_s1 + $0x1258] sm:$0xff]  ;;  %v7912_v39 = vpack.c.bf16 %v2305_v47, %v2301_v53  ;;  %v2310_v53 = vld [vmem:[%s18262_s1 + $0x1290] sm:$0xff] }
 0x2e0   :  { %8289 = vmatprep.subr.bf16.mxu1 %v8288_v51  ;;  %v2307_v50 = vld [vmem:[%s18262_s1 + $0x1278] sm:$0xff]  ;;  %v2300_v51 = vld [vmem:[%s18262_s1 + $0x1240] sm:$0xff] }
 0x2e1   :  { %v8296_v28 = vpack.c.bf16 %v2307_v50, %v2303_v52  ;;  %v7914_v29 = vpack.c.bf16 %v2304_v58, %v2300_v51  ;;  %v2314_v52 = vld [vmem:[%s18262_s1 + $0x12b0] sm:$0xff]  ;;  %v2317_v50 = vld [vmem:[%s18262_s1 + $0x12c8] sm:$0xff] }
 0x2e2   :  { %7907 = vmatpush1.bf16.msra.mxu0 %v7906_v37  ;;  %v2313_v37 = vld [vmem:[%s18262_s1 + $0x12a8] sm:$0xff]  ;;  %v8302_v58 = vpack.c.bf16 %v2314_v52, %v2310_v53  ;;  %v2328_v52 = vld [vmem:[%s18262_s1 + $0x1320] sm:$0xff] }
 0x2e3   :  { %8291 = vmatpush1.bf16.msra.mxu1 %v8290_v41  ;;  %7909 = vmatprep.subr.bf16.mxu0 %v7908_v18  ;;  %v2311_v41 = vld [vmem:[%s18262_s1 + $0x1298] sm:$0xff]  ;;  %v7916_v46 = vpack.c.bf16 %v2313_v37, %v2309_v21  ;;  %v2318_v21 = vld [vmem:[%s18262_s1 + $0x12d0] sm:$0xff] }
 0x2e4   :  { %8293 = vmatprep.subr.bf16.mxu1 %v8292_v54  ;;  %v2315_v18 = vld [vmem:[%s18262_s1 + $0x12b8] sm:$0xff]  ;;  %v2308_v54 = vld [vmem:[%s18262_s1 + $0x1280] sm:$0xff] }
 0x2e5   :  { %v8300_v47 = vpack.c.bf16 %v2315_v18, %v2311_v41  ;;  %v7918_v51 = vpack.c.bf16 %v2312_v63, %v2308_v54  ;;  %v2322_v41 = vld [vmem:[%s18262_s1 + $0x12f0] sm:$0xff]  ;;  %v2325_v18 = vld [vmem:[%s18262_s1 + $0x1308] sm:$0xff] }
 0x2e6   :  { %7911 = vmatpush1.bf16.msra.mxu0 %v7910_v20  ;;  %v2321_v20 = vld [vmem:[%s18262_s1 + $0x12e8] sm:$0xff]  ;;  %v8306_v63 = vpack.c.bf16 %v2322_v41, %v2318_v21  ;;  %v2336_v41 = vld [vmem:[%s18262_s1 + $0x1360] sm:$0xff] }
 0x2e7   :  { %8295 = vmatpush1.bf16.msra.mxu1 %v8294_v23  ;;  %7913 = vmatprep.subr.bf16.mxu0 %v7912_v39  ;;  %v2319_v23 = vld [vmem:[%s18262_s1 + $0x12d8] sm:$0xff]  ;;  %v7920_v30 = vpack.c.bf16 %v2321_v20, %v2317_v50  ;;  %v2326_v50 = vld [vmem:[%s18262_s1 + $0x1310] sm:$0xff] }
 0x2e8   :  { %8297 = vmatprep.subr.bf16.mxu1 %v8296_v28  ;;  %v2323_v39 = vld [vmem:[%s18262_s1 + $0x12f8] sm:$0xff]  ;;  %v2316_v28 = vld [vmem:[%s18262_s1 + $0x12c0] sm:$0xff] }
 0x2e9   :  { %v8304_v37 = vpack.c.bf16 %v2323_v39, %v2319_v23  ;;  %v7922_v54 = vpack.c.bf16 %v2320_v19, %v2316_v28  ;;  %v2330_v23 = vld [vmem:[%s18262_s1 + $0x1330] sm:$0xff]  ;;  %v2333_v39 = vld [vmem:[%s18262_s1 + $0x1348] sm:$0xff] }
 0x2ea   :  { %7915 = vmatpush1.bf16.msra.mxu0 %v7914_v29  ;;  %v2329_v29 = vld [vmem:[%s18262_s1 + $0x1328] sm:$0xff]  ;;  %v8310_v19 = vpack.c.bf16 %v2330_v23, %v2326_v50  ;;  %v2344_v23 = vld [vmem:[%s18262_s1 + $0x13a0] sm:$0xff] }
 0x2eb   :  { %8299 = vmatpush1.bf16.msra.mxu1 %v8298_v24  ;;  %7917 = vmatprep.subr.bf16.mxu0 %v7916_v46  ;;  %v2327_v24 = vld [vmem:[%s18262_s1 + $0x1318] sm:$0xff]  ;;  %v7924_v53 = vpack.c.bf16 %v2329_v29, %v2325_v18  ;;  %v2334_v18 = vld [vmem:[%s18262_s1 + $0x1350] sm:$0xff] }
 0x2ec   :  { %8301 = vmatprep.subr.bf16.mxu1 %v8300_v47  ;;  %v2331_v46 = vld [vmem:[%s18262_s1 + $0x1338] sm:$0xff]  ;;  %v2324_v47 = vld [vmem:[%s18262_s1 + $0x1300] sm:$0xff] }
 0x2ed   :  { %v8308_v20 = vpack.c.bf16 %v2331_v46, %v2327_v24  ;;  %v7926_v28 = vpack.c.bf16 %v2328_v52, %v2324_v47  ;;  %v2338_v24 = vld [vmem:[%s18262_s1 + $0x1370] sm:$0xff]  ;;  %v2341_v46 = vld [vmem:[%s18262_s1 + $0x1388] sm:$0xff] }
 0x2ee   :  { %7919 = vmatpush1.bf16.msra.mxu0 %v7918_v51  ;;  %v2337_v51 = vld [vmem:[%s18262_s1 + $0x1368] sm:$0xff]  ;;  %v8314_v52 = vpack.c.bf16 %v2338_v24, %v2334_v18  ;;  %v2352_v24 = vld [vmem:[%s18262_s1 + $0x13e0] sm:$0xff] }
 0x2ef   :  { %8303 = vmatpush1.bf16.msra.mxu1 %v8302_v58  ;;  %7921 = vmatprep.subr.bf16.mxu0 %v7920_v30  ;;  %v2335_v58 = vld [vmem:[%s18262_s1 + $0x1358] sm:$0xff]  ;;  %v7928_v21 = vpack.c.bf16 %v2337_v51, %v2333_v39  ;;  %v2342_v39 = vld [vmem:[%s18262_s1 + $0x1390] sm:$0xff] }
 0x2f0   :  { %8305 = vmatprep.subr.bf16.mxu1 %v8304_v37  ;;  %v2339_v30 = vld [vmem:[%s18262_s1 + $0x1378] sm:$0xff]  ;;  %v2332_v37 = vld [vmem:[%s18262_s1 + $0x1340] sm:$0xff] }
 0x2f1   :  { %v8312_v29 = vpack.c.bf16 %v2339_v30, %v2335_v58  ;;  %v7930_v47 = vpack.c.bf16 %v2336_v41, %v2332_v37  ;;  %v2346_v58 = vld [vmem:[%s18262_s1 + $0x13b0] sm:$0xff]  ;;  %v2349_v30 = vld [vmem:[%s18262_s1 + $0x13c8] sm:$0xff] }
 0x2f2   :  { %7923 = vmatpush1.bf16.msra.mxu0 %v7922_v54  ;;  %v2345_v54 = vld [vmem:[%s18262_s1 + $0x13a8] sm:$0xff]  ;;  %v8318_v41 = vpack.c.bf16 %v2346_v58, %v2342_v39  ;;  %v2566_v39 = vrot.slane %v15163_v16, 1  ;;  %v2358_v16 = vld [vmem:[%s18262_s1 + $0x1410] sm:$0xff] }
 0x2f3   :  { %8307 = vmatpush1.bf16.msra.mxu1 %v8306_v63  ;;  %7925 = vmatprep.subr.bf16.mxu0 %v7924_v53  ;;  %v2343_v63 = vld [vmem:[%s18262_s1 + $0x1398] sm:$0xff]  ;;  %v7932_v50 = vpack.c.bf16 %v2345_v54, %v2341_v46  ;;  %v2350_v46 = vld [vmem:[%s18262_s1 + $0x13d0] sm:$0xff]  ;;  %v2557_v54 = vrot.slane %v15094_v44, 1  ;;  %v2384_v44 = vld [vmem:[%s18262_s1 + $0x14e0] sm:$0xff] }
 0x2f4   :  { %8309 = vmatprep.subr.bf16.mxu1 %v8308_v20  ;;  %v2347_v53 = vld [vmem:[%s18262_s1 + $0x13b8] sm:$0xff]  ;;  %v2340_v20 = vld [vmem:[%s18262_s1 + $0x1380] sm:$0xff] }
 0x2f5   :  { %v8316_v51 = vpack.c.bf16 %v2347_v53, %v2343_v63  ;;  %v7934_v37 = vpack.c.bf16 %v2344_v23, %v2340_v20  ;;  %v2561_v63 = vrot.slane %v15138_v42, 1  ;;  %v2359_v20 = vld [vmem:[%s18262_s1 + $0x1418] sm:$0xff] }
 0x2f6   :  { %7927 = vmatpush1.bf16.msra.mxu0 %v7926_v28  ;;  %v2353_v28 = vld [vmem:[%s18262_s1 + $0x13e8] sm:$0xff]  ;;  %v2363_v42 = vld [vmem:[%s18262_s1 + $0x1438] sm:$0xff] }
 0x2f7   :  { %8311 = vmatpush1.bf16.msra.mxu1 %v8310_v19  ;;  %7929 = vmatprep.subr.bf16.mxu0 %v7928_v21  ;;  %v2351_v19 = vld [vmem:[%s18262_s1 + $0x13d8] sm:$0xff]  ;;  %v7936_v18 = vpack.c.bf16 %v2353_v28, %v2349_v30  ;;  %v2582_v30 = vsel %vm2573_vm1, %v2557_v54, %v2561_v63  ;;  %v8324_v28 = vpack.c.bf16 %v2363_v42, %v2359_v20  ;;  %v2364_v42 = vld [vmem:[%s18262_s1 + $0x1440] sm:$0xff] }
 0x2f8   :  { %8313 = vmatprep.subr.bf16.mxu1 %v8312_v29  ;;  %v2355_v21 = vld [vmem:[%s18262_s1 + $0x13f8] sm:$0xff]  ;;  %v2348_v29 = vld [vmem:[%s18262_s1 + $0x13c0] sm:$0xff] }
 0x2f9   :  { %v8320_v53 = vpack.c.bf16 %v2355_v21, %v2351_v19  ;;  %v7938_v23 = vpack.c.bf16 %v2352_v24, %v2348_v29  ;;  %v2356_v19 = vld [vmem:[%s18262_s1 + $0x1400] sm:$0xff]  ;;  %v2365_v29 = vld [vmem:[%s18262_s1 + $0x1448] sm:$0xff] }
 0x2fa   :  { %7931 = vmatpush1.bf16.msra.mxu0 %v7930_v47  ;;  %v2354_v47 = vld [vmem:[%s18262_s1 + $0x13f0] sm:$0xff]  ;;  %v2360_v21 = vld [vmem:[%s18262_s1 + $0x1420] sm:$0xff]  ;;  %v2369_v24 = vld [vmem:[%s18262_s1 + $0x1468] sm:$0xff] }
 0x2fb   :  { %8315 = vmatpush1.bf16.msra.mxu1 %v8314_v52  ;;  %7933 = vmatprep.subr.bf16.mxu0 %v7932_v50  ;;  %v2357_v52 = vld [vmem:[%s18262_s1 + $0x1408] sm:$0xff]  ;;  %v7944_v20 = vpack.c.bf16 %v2369_v24, %v2365_v29 }
 0x2fc   :  { %8317 = vmatprep.subr.bf16.mxu1 %v8316_v51  ;;  %v2361_v50 = vld [vmem:[%s18262_s1 + $0x1428] sm:$0xff]  ;;  %v8322_v51 = vpack.c.bf16 %v2354_v47, %v2350_v46  ;;  %v2565_v46 = vrot.slane %v15176_v43, 1  ;;  %v7942_v47 = vpack.c.bf16 %v2360_v21, %v2356_v19  ;;  %v2379_v19 = vld [vmem:[%s18262_s1 + $0x14b8] sm:$0xff] }
 0x2fd   :  { %v7940_v58 = vpack.c.bf16 %v2361_v50, %v2357_v52 }
 0x2fe   :  { %7935 = vmatpush1.bf16.msra.mxu0 %v7934_v37  ;;  %v2570_v37 = vrot.slane %v15201_v57, 1  ;;  %v2371_v57 = vld [vmem:[%s18262_s1 + $0x1478] sm:$0xff]  ;;  %v2578_v50 = vsel %vm2573_vm1, %v2561_v63, %v2565_v46  ;;  %v2370_v63 = vld [vmem:[%s18262_s1 + $0x1470] sm:$0xff] }
 0x2ff   :  { %8319 = vmatpush1.bf16.msra.mxu1 %v8318_v41  ;;  %7937 = vmatprep.subr.bf16.mxu0 %v7936_v18  ;;  %v2579_v41 = vsel %vm2573_vm1, %v2562_v55, %v2566_v39  ;;  %v2362_v18 = vld [vmem:[%s18262_s1 + $0x1430] sm:$0xff]  ;;  %v2610_v55 = vmul.f32 %v14244_v48, %v2582_v30  ;;  %v2373_v30 = vld [vmem:[%s18262_s1 + $0x1488] sm:$0xff] }
 0x300   :  { %8321 = vmatprep.subr.bf16.mxu1 %v8320_v53  ;;  %v2569_v53 = vrot.slane %v15214_v62, 1  ;;  %v2615_v52 = vmul.f32 %v14257_v49, %v2579_v41  ;;  %v8326_v43 = vpack.c.bf16 %v2362_v18, %v2358_v16  ;;  %v2366_v62 = vld [vmem:[%s18262_s1 + $0x1450] sm:$0xff]  ;;  %v2614_v16 = vmul.f32 %v14257_v49, %v2578_v50  ;;  %v2381_v50 = vld [vmem:[%s18262_s1 + $0x14c8] sm:$0xff] }
 0x301   :  { %v8330_v29 = vpack.c.bf16 %v2370_v63, %v2366_v62 }
 0x302   :  { %7939 = vmatpush1.bf16.msra.mxu0 %v7938_v23  ;;  %v2368_v23 = vld [vmem:[%s18262_s1 + $0x1460] sm:$0xff]  ;;  %v2574_v21 = vsel %vm2573_vm1, %v2565_v46, %v2569_v53  ;;  %v2374_v46 = vld [vmem:[%s18262_s1 + $0x1490] sm:$0xff] }
 0x303   :  { %8323 = vmatpush1.bf16.msra.mxu1 %v8322_v51  ;;  %7941 = vmatprep.subr.bf16.mxu0 %v7940_v58  ;;  %v2575_v51 = vsel %vm2573_vm1, %v2566_v39, %v2570_v37  ;;  %v8328_v58 = vpack.c.bf16 %v2371_v57, %v2367_v59  ;;  %v2375_v39 = vld [vmem:[%s18262_s1 + $0x1498] sm:$0xff]  ;;  %v7946_v41 = vpack.c.bf16 %v2368_v23, %v2364_v42  ;;  %v2372_v59 = vld [vmem:[%s18262_s1 + $0x1480] sm:$0xff] }
 0x304   :  { %8325 = vmatprep.subr.bf16.mxu1 %v8324_v28  ;;  %v2377_v28 = vld [vmem:[%s18262_s1 + $0x14a8] sm:$0xff]  ;;  %v2619_v18 = vmul.f32 %v14290_v34, %v2575_v51  ;;  %v2376_v57 = vld [vmem:[%s18262_s1 + $0x14a0] sm:$0xff]  ;;  %v2618_v42 = vmul.f32 %v14290_v34, %v2574_v21  ;;  %v2586_v23 = vsel %vm2573_vm1, %v2569_v53, %v2557_v54  ;;  %v2382_v54 = vld [vmem:[%s18262_s1 + $0x14d0] sm:$0xff] }
 0x305   :  { %3047 = vmatmul.mubr.f32.vlgmr.msra.gmra.mrb[0].mxu0 %v2610_v55  ;;  %v7948_v24 = vpack.c.bf16 %v2377_v28, %v2373_v30  ;;  %v7950_v62 = vpack.c.bf16 %v2376_v57, %v2372_v59  ;;  %v2380_v30 = vld [vmem:[%s18262_s1 + $0x14c0] sm:$0xff]  ;;  %v19175_v28 = vrot.slane %v14327_v60, 1  ;;  %v2386_v21 = vld [vmem:[%s18262_s1 + $0x14f0] sm:$0xff]  ;;  %v2395_v60 = vld [vmem:[%s18262_s1 + $0x1538] sm:$0xff] }
 0x306   :  { %3581 = vmatmul.mubr.f32.vlgmr.msra.gmra.mrb[0].mxu1 %v2610_v55  ;;  %3052 = vmatprep.mubr.f32.mxu0 %v2615_v52  ;;  %v19174_v55 = vrot.slane %v15563_v26, 1  ;;  %v2383_v26 = vld [vmem:[%s18262_s1 + $0x14d8] sm:$0xff]  ;;  %v8338_v59 = vpack.c.bf16 %v2386_v21, %v2382_v54  ;;  %v2405_v54 = vld [vmem:[%s18262_s1 + $0x1588] sm:$0xff] }
 0x307   :  { %7943 = vmatpush1.bf16.msra.mxu0 %v7942_v47  ;;  %3586 = vmatprep.mubr.f32.mxu1 %v2615_v52  ;;  %v8332_v52 = vpack.c.bf16 %v2379_v19, %v2375_v39  ;;  %v19176_v39 = vrot.slane %v14221_v38, 1  ;;  %v2391_v38 = vld [vmem:[%s18262_s1 + $0x1518] sm:$0xff] }
 0x308   :  { %8327 = vmatpush1.bf16.msra.mxu1 %v8326_v43  ;;  %7945 = vmatprep.subr.bf16.mxu0 %v7944_v20  ;;  %v2587_v47 = vsel %vm2573_vm1, %v2570_v37, %v19174_v55  ;;  %v2378_v43 = vld [vmem:[%s18262_s1 + $0x14b0] sm:$0xff]  ;;  %v2385_v20 = vld [vmem:[%s18262_s1 + $0x14e8] sm:$0xff]  ;;  %v2387_v37 = vld [vmem:[%s18262_s1 + $0x14f8] sm:$0xff] }
 0x309   :  { %3053 = vmatmul.mubr.f32.gmra.mrb[2].mxu0 %v2614_v16  ;;  %8329 = vmatprep.subr.bf16.mxu1 %v8328_v58  ;;  %v2623_v51 = vmul.f32 %v14307_v27, %v2587_v47  ;;  %v8334_v58 = vpack.c.bf16 %v2378_v43, %v2374_v46  ;;  %v7952_v63 = vpack.c.bf16 %v2385_v20, %v2381_v50  ;;  %v2388_v46 = vld [vmem:[%s18262_s1 + $0x1500] sm:$0xff]  ;;  %v2390_v47 = vld [vmem:[%s18262_s1 + $0x1510] sm:$0xff]  ;;  %v2397_v50 = vld [vmem:[%s18262_s1 + $0x1548] sm:$0xff] }
 0x30a   :  { %3587 = vmatmul.mubr.f32.gmra.mrb[2].mxu1 %v2614_v16  ;;  %3058 = vmatprep.mubr.f32.mxu0 %v2619_v18  ;;  %v8336_v53 = vpack.c.bf16 %v2387_v37, %v2383_v26  ;;  %v2585_v19 = vsel %vm2573_vm1, %v19176_v39, %v19175_v28  ;;  %v2389_v16 = vld [vmem:[%s18262_s1 + $0x1508] sm:$0xff]  ;;  %v2392_v55 = vld [vmem:[%s18262_s1 + $0x1520] sm:$0xff]  ;;  %v2394_v43 = vld [vmem:[%s18262_s1 + $0x1530] sm:$0xff] }
 0x30b   :  { %7947 = vmatpush1.bf16.msra.mxu0 %v7946_v41  ;;  %3592 = vmatprep.mubr.f32.mxu1 %v2619_v18  ;;  %v2393_v41 = vld [vmem:[%s18262_s1 + $0x1528] sm:$0xff]  ;;  %v2622_v18 = vmul.f32 %v14307_v27, %v2586_v23  ;;  %v2399_v26 = vld [vmem:[%s18262_s1 + $0x1558] sm:$0xff]  ;;  %v8342_v23 = vpack.c.bf16 %v2394_v43, %v2390_v47  ;;  %v2412_v43 = vld [vmem:[%s18262_s1 + $0x15c0] sm:$0xff] }
 0x30c   :  { %8331 = vmatpush1.bf16.msra.mxu1 %v8330_v29  ;;  %7949 = vmatprep.subr.bf16.mxu0 %v7948_v24  ;;  %v7954_v29 = vpack.c.bf16 %v2384_v44, %v2380_v30  ;;  %v2613_v24 = vmul.f32 %v14244_v48, %v2585_v19  ;;  %v7956_v57 = vpack.c.bf16 %v2393_v41, %v2389_v16  ;;  %v2401_v20 = vld [vmem:[%s18262_s1 + $0x1568] sm:$0xff]  ;;  %v2403_v37 = vld [vmem:[%s18262_s1 + $0x1578] sm:$0xff]  ;;  %v2402_v44 = vld [vmem:[%s18262_s1 + $0x1570] sm:$0xff] }
 0x30d   :  { %3059 = vmatmul.mubr.f32.gmra.mrb[4].mxu0 %v2618_v42  ;;  %8333 = vmatprep.subr.bf16.mxu1 %v8332_v52  ;;  %v8340_v52 = vpack.c.bf16 %v2395_v60, %v2391_v38  ;;  %v8344_v30 = vpack.c.bf16 %v2403_v37, %v2399_v26  ;;  %v2407_v28 = vld [vmem:[%s18262_s1 + $0x1598] sm:$0xff]  ;;  %v2404_v41 = vld [vmem:[%s18262_s1 + $0x1580] sm:$0xff]  ;;  %v2406_v60 = vld [vmem:[%s18262_s1 + $0x1590] sm:$0xff] }
 0x30e   :  { %3593 = vmatmul.mubr.f32.gmra.mrb[4].mxu1 %v2618_v42  ;;  %3064 = vmatprep.mubr.f32.mxu0 %v2623_v51  ;;  %v7958_v42 = vpack.c.bf16 %v2392_v55, %v2388_v46  ;;  %v2411_v39 = vld [vmem:[%s18262_s1 + $0x15b8] sm:$0xff]  ;;  %v2408_v38 = vld [vmem:[%s18262_s1 + $0x15a0] sm:$0xff]  ;;  %v2418_v37 = vld [vmem:[%s18262_s1 + $0x15f0] sm:$0xff] }
 0x30f   :  { %7951 = vmatpush1.bf16.msra.mxu0 %v7950_v62  ;;  %3598 = vmatprep.mubr.f32.mxu1 %v2623_v51  ;;  %v7960_v62 = vpack.c.bf16 %v2401_v20, %v2397_v50  ;;  %v2396_v51 = vld [vmem:[%s18262_s1 + $0x1540] sm:$0xff]  ;;  %v2419_v46 = vld [vmem:[%s18262_s1 + $0x15f8] sm:$0xff]  ;;  %v7966_v55 = vpack.c.bf16 %v2408_v38, %v2404_v41  ;;  %v2414_v20 = vld [vmem:[%s18262_s1 + $0x15d0] sm:$0xff] }
 0x310   :  { %8335 = vmatpush1.bf16.msra.mxu1 %v8334_v58  ;;  %7953 = vmatprep.subr.bf16.mxu0 %v7952_v63  ;;  %v2400_v58 = vld [vmem:[%s18262_s1 + $0x1560] sm:$0xff]  ;;  %v2398_v63 = vld [vmem:[%s18262_s1 + $0x1550] sm:$0xff]  ;;  %v2435_v41 = vld [vmem:[%s18262_s1 + $0x1678] sm:$0xff] }
 0x311   :  { %3065 = vmatmul.mubr.f32.gmra.mrb[6].mxu0 %v2622_v18  ;;  %8337 = vmatprep.subr.bf16.mxu1 %v8336_v53  ;;  %v2409_v53 = vld [vmem:[%s18262_s1 + $0x15a8] sm:$0xff]  ;;  %v7962_v19 = vpack.c.bf16 %v2400_v58, %v2396_v51  ;;  %v8346_v21 = vpack.c.bf16 %v2402_v44, %v2398_v63  ;;  %v2416_v50 = vld [vmem:[%s18262_s1 + $0x15e0] sm:$0xff]  ;;  %v2427_v51 = vld [vmem:[%s18262_s1 + $0x1638] sm:$0xff]  ;;  %v8354_v63 = vpack.c.bf16 %v2418_v37, %v2414_v20 }
 0x312   :  { %3599 = vmatmul.mubr.f32.gmra.mrb[6].mxu1 %v2622_v18  ;;  %3135 = vmatprep.mubr.f32.mxu0 %v2613_v24  ;;  %v7964_v16 = vpack.c.bf16 %v2409_v53, %v2405_v54  ;;  %v8348_v18 = vpack.c.bf16 %v2411_v39, %v2407_v28  ;;  %v7970_v58 = vpack.c.bf16 %v2416_v50, %v2412_v43  ;;  %v2420_v44 = vld [vmem:[%s18262_s1 + $0x1600] sm:$0xff]  ;;  %v2422_v53 = vld [vmem:[%s18262_s1 + $0x1610] sm:$0xff]  ;;  %v2443_v43 = vld [vmem:[%s18262_s1 + $0x16b8] sm:$0xff] }
 0x313   :  { %7955 = vmatpush1.bf16.msra.mxu0 %v7954_v29  ;;  %3669 = vmatprep.mubr.f32.mxu1 %v2613_v24  ;;  %v2410_v29 = vld [vmem:[%s18262_s1 + $0x15b0] sm:$0xff]  ;;  %v2413_v24 = vld [vmem:[%s18262_s1 + $0x15c8] sm:$0xff]  ;;  %v2424_v54 = vld [vmem:[%s18262_s1 + $0x1620] sm:$0xff] }
 0x314   :  { %8339 = vmatpush1.bf16.msra.mxu1 %v8338_v59  ;;  %7957 = vmatprep.subr.bf16.mxu0 %v7956_v57  ;;  %v2417_v59 = vld [vmem:[%s18262_s1 + $0x15e8] sm:$0xff]  ;;  %v2415_v57 = vld [vmem:[%s18262_s1 + $0x15d8] sm:$0xff]  ;;  %v8350_v47 = vpack.c.bf16 %v2410_v29, %v2406_v60  ;;  %v2426_v39 = vld [vmem:[%s18262_s1 + $0x1630] sm:$0xff]  ;;  %v7974_v38 = vpack.c.bf16 %v2424_v54, %v2420_v44 }
 0x315   :  { %8341 = vmatprep.subr.bf16.mxu1 %v8340_v52  ;;  %v7968_v52 = vpack.c.bf16 %v2417_v59, %v2413_v24  ;;  %v8352_v26 = vpack.c.bf16 %v2419_v46, %v2415_v57  ;;  %v8358_v60 = vpack.c.bf16 %v2426_v39, %v2422_v53  ;;  %v2428_v29 = vld [vmem:[%s18262_s1 + $0x1640] sm:$0xff]  ;;  %v2430_v59 = vld [vmem:[%s18262_s1 + $0x1650] sm:$0xff]  ;;  %v2451_v44 = vld [vmem:[%s18262_s1 + $0x16f8] sm:$0xff] }
 0x316   :  { %v2432_v24 = vld [vmem:[%s18262_s1 + $0x1660] sm:$0xff]  ;;  %v2434_v46 = vld [vmem:[%s18262_s1 + $0x1670] sm:$0xff] }
 0x317   :  { %7959 = vmatpush1.bf16.msra.mxu0 %v7958_v42  ;;  %v2421_v42 = vld [vmem:[%s18262_s1 + $0x1608] sm:$0xff]  ;;  %v7978_v50 = vpack.c.bf16 %v2432_v24, %v2428_v29  ;;  %v8362_v20 = vpack.c.bf16 %v2434_v46, %v2430_v59  ;;  %v2436_v37 = vld [vmem:[%s18262_s1 + $0x1680] sm:$0xff]  ;;  %v2459_v29 = vld [vmem:[%s18262_s1 + $0x1738] sm:$0xff] }
 0x318   :  { %8343 = vmatpush1.bf16.msra.mxu1 %v8342_v23  ;;  %7961 = vmatprep.subr.bf16.mxu0 %v7960_v62  ;;  %v2425_v23 = vld [vmem:[%s18262_s1 + $0x1628] sm:$0xff]  ;;  %v2423_v62 = vld [vmem:[%s18262_s1 + $0x1618] sm:$0xff]  ;;  %v2444_v39 = vld [vmem:[%s18262_s1 + $0x16c0] sm:$0xff] }
 0x319   :  { %8345 = vmatprep.subr.bf16.mxu1 %v8344_v30  ;;  %v7972_v30 = vpack.c.bf16 %v2425_v23, %v2421_v42  ;;  %v8356_v28 = vpack.c.bf16 %v2427_v51, %v2423_v62  ;;  %v2440_v42 = vld [vmem:[%s18262_s1 + $0x16a0] sm:$0xff]  ;;  %v2438_v23 = vld [vmem:[%s18262_s1 + $0x1690] sm:$0xff] }
 0x31a   :  { %v2442_v51 = vld [vmem:[%s18262_s1 + $0x16b0] sm:$0xff]  ;;  %v7982_v54 = vpack.c.bf16 %v2440_v42, %v2436_v37  ;;  %v2452_v46 = vld [vmem:[%s18262_s1 + $0x1700] sm:$0xff]  ;;  %v2467_v37 = vld [vmem:[%s18262_s1 + $0x1778] sm:$0xff] }
 0x31b   :  { %7963 = vmatpush1.bf16.msra.mxu0 %v7962_v19  ;;  %v2429_v19 = vld [vmem:[%s18262_s1 + $0x1648] sm:$0xff]  ;;  %v8366_v53 = vpack.c.bf16 %v2442_v51, %v2438_v23  ;;  %v2460_v51 = vld [vmem:[%s18262_s1 + $0x1740] sm:$0xff] }
 0x31c   :  { %8347 = vmatpush1.bf16.msra.mxu1 %v8346_v21  ;;  %7965 = vmatprep.subr.bf16.mxu0 %v7964_v16  ;;  %v2433_v21 = vld [vmem:[%s18262_s1 + $0x1668] sm:$0xff]  ;;  %v2431_v16 = vld [vmem:[%s18262_s1 + $0x1658] sm:$0xff] }
 0x31d   :  { %8349 = vmatprep.subr.bf16.mxu1 %v8348_v18  ;;  %v7976_v18 = vpack.c.bf16 %v2433_v21, %v2429_v19  ;;  %v8360_v57 = vpack.c.bf16 %v2435_v41, %v2431_v16  ;;  %v2448_v19 = vld [vmem:[%s18262_s1 + $0x16e0] sm:$0xff]  ;;  %v2446_v21 = vld [vmem:[%s18262_s1 + $0x16d0] sm:$0xff] }
 0x31e   :  { %v2450_v41 = vld [vmem:[%s18262_s1 + $0x16f0] sm:$0xff]  ;;  %v7986_v24 = vpack.c.bf16 %v2448_v19, %v2444_v39  ;;  %v2475_v39 = vld [vmem:[%s18262_s1 + $0x17b8] sm:$0xff] }
 0x31f   :  { %7967 = vmatpush1.bf16.msra.mxu0 %v7966_v55  ;;  %v2437_v55 = vld [vmem:[%s18262_s1 + $0x1688] sm:$0xff]  ;;  %v8370_v59 = vpack.c.bf16 %v2450_v41, %v2446_v21  ;;  %v2468_v41 = vld [vmem:[%s18262_s1 + $0x1780] sm:$0xff] }
 0x320   :  { %8351 = vmatpush1.bf16.msra.mxu1 %v8350_v47  ;;  %7969 = vmatprep.subr.bf16.mxu0 %v7968_v52  ;;  %v2441_v47 = vld [vmem:[%s18262_s1 + $0x16a8] sm:$0xff]  ;;  %v2439_v52 = vld [vmem:[%s18262_s1 + $0x1698] sm:$0xff] }
 0x321   :  { %8353 = vmatprep.subr.bf16.mxu1 %v8352_v26  ;;  %v7980_v26 = vpack.c.bf16 %v2441_v47, %v2437_v55  ;;  %v8364_v62 = vpack.c.bf16 %v2443_v43, %v2439_v52  ;;  %v2456_v55 = vld [vmem:[%s18262_s1 + $0x1720] sm:$0xff]  ;;  %v2454_v47 = vld [vmem:[%s18262_s1 + $0x1710] sm:$0xff] }
 0x322   :  { %v2458_v43 = vld [vmem:[%s18262_s1 + $0x1730] sm:$0xff]  ;;  %v7990_v42 = vpack.c.bf16 %v2456_v55, %v2452_v46  ;;  %v2483_v46 = vld [vmem:[%s18262_s1 + $0x17f8] sm:$0xff] }
 0x323   :  { %7971 = vmatpush1.bf16.msra.mxu0 %v7970_v58  ;;  %v2445_v58 = vld [vmem:[%s18262_s1 + $0x16c8] sm:$0xff]  ;;  %v8374_v23 = vpack.c.bf16 %v2458_v43, %v2454_v47  ;;  %v2476_v43 = vld [vmem:[%s18262_s1 + $0x17c0] sm:$0xff] }
 0x324   :  { %8355 = vmatpush1.bf16.msra.mxu1 %v8354_v63  ;;  %7973 = vmatprep.subr.bf16.mxu0 %v7972_v30  ;;  %v2449_v63 = vld [vmem:[%s18262_s1 + $0x16e8] sm:$0xff]  ;;  %v2447_v30 = vld [vmem:[%s18262_s1 + $0x16d8] sm:$0xff] }
 0x325   :  { %8357 = vmatprep.subr.bf16.mxu1 %v8356_v28  ;;  %v7984_v28 = vpack.c.bf16 %v2449_v63, %v2445_v58  ;;  %v8368_v16 = vpack.c.bf16 %v2451_v44, %v2447_v30  ;;  %v2464_v58 = vld [vmem:[%s18262_s1 + $0x1760] sm:$0xff]  ;;  %v2462_v63 = vld [vmem:[%s18262_s1 + $0x1750] sm:$0xff] }
 0x326   :  { %v2466_v44 = vld [vmem:[%s18262_s1 + $0x1770] sm:$0xff]  ;;  %v7994_v19 = vpack.c.bf16 %v2464_v58, %v2460_v51  ;;  %v1669_v51 = vld [vmem:[%s18264_s3 + $0x188] sm:$0xff] }
 0x327   :  { %7975 = vmatpush1.bf16.msra.mxu0 %v7974_v38  ;;  %v2453_v38 = vld [vmem:[%s18262_s1 + $0x1708] sm:$0xff]  ;;  %v8378_v21 = vpack.c.bf16 %v2466_v44, %v2462_v63 }
 0x328   :  { %8359 = vmatpush1.bf16.msra.mxu1 %v8358_v60  ;;  %7977 = vmatprep.subr.bf16.mxu0 %v7976_v18  ;;  %v2457_v60 = vld [vmem:[%s18262_s1 + $0x1728] sm:$0xff]  ;;  %v2455_v18 = vld [vmem:[%s18262_s1 + $0x1718] sm:$0xff] }
 0x329   :  { %8361 = vmatprep.subr.bf16.mxu1 %v8360_v57  ;;  %v7988_v57 = vpack.c.bf16 %v2457_v60, %v2453_v38  ;;  %v8372_v52 = vpack.c.bf16 %v2459_v29, %v2455_v18  ;;  %v2472_v38 = vld [vmem:[%s18262_s1 + $0x17a0] sm:$0xff]  ;;  %v2470_v60 = vld [vmem:[%s18262_s1 + $0x1790] sm:$0xff] }
 0x32a   :  { %v2474_v29 = vld [vmem:[%s18262_s1 + $0x17b0] sm:$0xff]  ;;  %v7998_v55 = vpack.c.bf16 %v2472_v38, %v2468_v41 }
 0x32b   :  { %7979 = vmatpush1.bf16.msra.mxu0 %v7978_v50  ;;  %v2461_v50 = vld [vmem:[%s18262_s1 + $0x1748] sm:$0xff]  ;;  %v8382_v47 = vpack.c.bf16 %v2474_v29, %v2470_v60  ;;  %v1654_v38 = vld [vmem:[%s18264_s3 + $0x110] sm:$0xff]  ;;  %v1655_v60 = vld [vmem:[%s18264_s3 + $0x118] sm:$0xff] }
 0x32c   :  { %8363 = vmatpush1.bf16.msra.mxu1 %v8362_v20  ;;  %7981 = vmatprep.subr.bf16.mxu0 %v7980_v26  ;;  %v2465_v20 = vld [vmem:[%s18262_s1 + $0x1768] sm:$0xff]  ;;  %v2463_v26 = vld [vmem:[%s18262_s1 + $0x1758] sm:$0xff]  ;;  %v1640_v29 = vld [vmem:[%s18264_s3 + $0xa0] sm:$0xff] }
 0x32d   :  { %8365 = vmatprep.subr.bf16.mxu1 %v8364_v62  ;;  %v7992_v62 = vpack.c.bf16 %v2465_v20, %v2461_v50  ;;  %v8376_v30 = vpack.c.bf16 %v2467_v37, %v2463_v26  ;;  %v2480_v50 = vld [vmem:[%s18262_s1 + $0x17e0] sm:$0xff]  ;;  %v2478_v20 = vld [vmem:[%s18262_s1 + $0x17d0] sm:$0xff] }
 0x32e   :  { %v2482_v37 = vld [vmem:[%s18262_s1 + $0x17f0] sm:$0xff]  ;;  %v8002_v58 = vpack.c.bf16 %v2480_v50, %v2476_v43  ;;  %v1656_v50 = vld [vmem:[%s18264_s3 + $0x120] sm:$0xff] }
 0x32f   :  { %7983 = vmatpush1.bf16.msra.mxu0 %v7982_v54  ;;  %v2469_v54 = vld [vmem:[%s18262_s1 + $0x1788] sm:$0xff]  ;;  %v8386_v63 = vpack.c.bf16 %v2482_v37, %v2478_v20  ;;  %v1642_v37 = vld [vmem:[%s18264_s3 + $0xb0] sm:$0xff] }
 0x330   :  { %8367 = vmatpush1.bf16.msra.mxu1 %v8366_v53  ;;  %7985 = vmatprep.subr.bf16.mxu0 %v7984_v28  ;;  %v2473_v53 = vld [vmem:[%s18262_s1 + $0x17a8] sm:$0xff]  ;;  %v2471_v28 = vld [vmem:[%s18262_s1 + $0x1798] sm:$0xff] }
 0x331   :  { %8369 = vmatprep.subr.bf16.mxu1 %v8368_v16  ;;  %v7996_v16 = vpack.c.bf16 %v2473_v53, %v2469_v54  ;;  %v8380_v18 = vpack.c.bf16 %v2475_v39, %v2471_v28  ;;  %v1620_v54 = vld [vmem:[%s18264_s3] sm:$0xff]  ;;  %v1621_v53 = vld [vmem:[%s18264_s3 + $0x8] sm:$0xff] }
 0x332   :  { %v1652_v28 = vld [vmem:[%s18264_s3 + $0x100] sm:$0xff]  ;;  %v1653_v39 = vld [vmem:[%s18264_s3 + $0x108] sm:$0xff] }
 0x333   :  { %7987 = vmatpush1.bf16.msra.mxu0 %v7986_v24  ;;  %v2477_v24 = vld [vmem:[%s18262_s1 + $0x17c8] sm:$0xff] }
 0x334   :  { %8371 = vmatpush1.bf16.msra.mxu1 %v8370_v59  ;;  %7989 = vmatprep.subr.bf16.mxu0 %v7988_v57  ;;  %v2481_v59 = vld [vmem:[%s18262_s1 + $0x17e8] sm:$0xff]  ;;  %v2479_v57 = vld [vmem:[%s18262_s1 + $0x17d8] sm:$0xff] }
 0x335   :  { %8373 = vmatprep.subr.bf16.mxu1 %v8372_v52  ;;  %v8000_v52 = vpack.c.bf16 %v2481_v59, %v2477_v24  ;;  %v8384_v26 = vpack.c.bf16 %v2483_v46, %v2479_v57  ;;  %v1641_v24 = vld [vmem:[%s18264_s3 + $0xa8] sm:$0xff]  ;;  %v1672_v59 = vld [vmem:[%s18264_s3 + $0x1a0] sm:$0xff] }
 0x336   :  { %v16413_v57 = vpack.c.bf16 %v1641_v24, %v1640_v29  ;;  %v1673_v46 = vld [vmem:[%s18264_s3 + $0x1a8] sm:$0xff] }
 0x337   :  { %7991 = vmatpush1.bf16.msra.mxu0 %v7990_v42  ;;  %v1636_v42 = vld [vmem:[%s18264_s3 + $0x80] sm:$0xff]  ;;  %v1657_v20 = vld [vmem:[%s18264_s3 + $0x128] sm:$0xff] }
 0x338   :  { %8375 = vmatpush1.bf16.msra.mxu1 %v8374_v23  ;;  %7993 = vmatprep.subr.bf16.mxu0 %v7992_v62  ;;  %v1637_v23 = vld [vmem:[%s18264_s3 + $0x88] sm:$0xff]  ;;  %v1668_v62 = vld [vmem:[%s18264_s3 + $0x180] sm:$0xff] }
 0x339   :  { %8377 = vmatprep.subr.bf16.mxu1 %v8376_v30  ;;  %v16330_v30 = vpack.c.bf16 %v1637_v23, %v1636_v42  ;;  %v16332_v44 = vpack.c.bf16 %v1669_v51, %v1668_v62  ;;  %v1643_v42 = vld [vmem:[%s18264_s3 + $0xb8] sm:$0xff]  ;;  %v1674_v23 = vld [vmem:[%s18264_s3 + $0x1b0] sm:$0xff] }
 0x33a   :  { %v16449_v62 = vpack.c.bf16 %v1643_v42, %v1642_v37  ;;  %v1675_v51 = vld [vmem:[%s18264_s3 + $0x1b8] sm:$0xff] }
 0x33b   :  { %7995 = vmatpush1.bf16.msra.mxu0 %v7994_v19  ;;  %v16347_v19 = vpack.c.bf16 %v1621_v53, %v1620_v54  ;;  %v16460_v54 = vpack.c.bf16 %v1675_v51, %v1674_v23  ;;  %v1679_v42 = vld [vmem:[%s18264_s3 + $0x1d8] sm:$0xff]  ;;  %v1630_v23 = vld [vmem:[%s18264_s3 + $0x50] sm:$0xff] }
 0x33c   :  { %8379 = vmatpush1.bf16.msra.mxu1 %v8378_v21  ;;  %7997 = vmatprep.subr.bf16.mxu0 %v7996_v16  ;;  %v16350_v21 = vpack.c.bf16 %v1653_v39, %v1652_v28  ;;  %19178 = vst [vmem:[#allocation783_spill] sm:$0xff] %v16449_v62  ;;  %v1658_v28 = vld [vmem:[%s18264_s3 + $0x130] sm:$0xff]  ;;  %v1659_v39 = vld [vmem:[%s18264_s3 + $0x138] sm:$0xff] }
 0x33d   :  { %8381 = vmatprep.subr.bf16.mxu1 %v8380_v18  ;;  %v16399_v18 = vpack.c.bf16 %v1655_v60, %v1654_v38  ;;  %19179 = vst [vmem:[#allocation784_spill] sm:$0xff] %v16460_v54  ;;  %v1628_v38 = vld [vmem:[%s18264_s3 + $0x40] sm:$0xff]  ;;  %v1629_v60 = vld [vmem:[%s18264_s3 + $0x48] sm:$0xff]  ;;  %v1631_v51 = vld [vmem:[%s18264_s3 + $0x58] sm:$0xff] }
 0x33e   :  { %v16498_v24 = vpack.c.bf16 %v1629_v60, %v1628_v38  ;;  %v1681_v60 = vld [vmem:[%s18264_s3 + $0x1e8] sm:$0xff] }
 0x33f   :  { %7999 = vmatpush1.bf16.msra.mxu0 %v7998_v55  ;;  %v1624_v55 = vld [vmem:[%s18264_s3 + $0x20] sm:$0xff] }
 0x340   :  { %8383 = vmatpush1.bf16.msra.mxu1 %v8382_v47  ;;  %8001 = vmatprep.subr.bf16.mxu0 %v8000_v52  ;;  %v1625_v47 = vld [vmem:[%s18264_s3 + $0x28] sm:$0xff]  ;;  %v16424_v52 = vpack.c.bf16 %v1673_v46, %v1672_v59  ;;  %19184 = vst [vmem:[#allocation789_spill] sm:$0xff] %v16498_v24  ;;  %v1660_v59 = vld [vmem:[%s18264_s3 + $0x140] sm:$0xff] }
 0x341   :  { %8385 = vmatprep.subr.bf16.mxu1 %v8384_v26  ;;  %v16426_v43 = vpack.c.bf16 %v1625_v47, %v1624_v55  ;;  %v16435_v26 = vpack.c.bf16 %v1657_v20, %v1656_v50  ;;  %v1661_v46 = vld [vmem:[%s18264_s3 + $0x148] sm:$0xff]  ;;  %v1646_v47 = vld [vmem:[%s18264_s3 + $0xd0] sm:$0xff]  ;;  %v1647_v50 = vld [vmem:[%s18264_s3 + $0xd8] sm:$0xff] }
 0x342   :  { %v16507_v55 = vpack.c.bf16 %v1661_v46, %v1660_v59  ;;  %v1678_v20 = vld [vmem:[%s18264_s3 + $0x1d0] sm:$0xff]  ;;  %v16521_v37 = vpack.c.bf16 %v1647_v50, %v1646_v47  ;;  %v1632_v59 = vld [vmem:[%s18264_s3 + $0x60] sm:$0xff]  ;;  %v1633_v46 = vld [vmem:[%s18264_s3 + $0x68] sm:$0xff] }
 0x343   :  { %8003 = vmatpush1.bf16.msra.mxu0 %v8002_v58  ;;  %19177 = vst [vmem:[#allocation782_spill] sm:$0xff] %v16435_v26  ;;  %v1626_v58 = vld [vmem:[%s18264_s3 + $0x30] sm:$0xff]  ;;  %v16570_v50 = vpack.c.bf16 %v1633_v46, %v1632_v59  ;;  %v1635_v59 = vld [vmem:[%s18264_s3 + $0x78] sm:$0xff] }
 0x344   :  { %8387 = vmatpush1.bf16.msra.mxu1 %v8386_v63  ;;  %8389 = vmatprep.subr.bf16.mxu0 %v16330_v30  ;;  %v1627_v63 = vld [vmem:[%s18264_s3 + $0x38] sm:$0xff]  ;;  %19185 = vst [vmem:[#allocation790_spill] sm:$0xff] %v16507_v55  ;;  %19186 = vst [vmem:[#allocation791_spill] sm:$0xff] %v16521_v37  ;;  %v1666_v46 = vld [vmem:[%s18264_s3 + $0x170] sm:$0xff] }
 0x345   :  { %8421 = vmatprep.subr.bf16.mxu1 %v16332_v44  ;;  %v16462_v53 = vpack.c.bf16 %v1627_v63, %v1626_v58  ;;  %v16532_v58 = vpack.c.bf16 %v1679_v42, %v1678_v20  ;;  %v16534_v63 = vpack.c.bf16 %v1631_v51, %v1630_v23  ;;  %19192 = vst [vmem:[#allocation797_spill] sm:$0xff] %v16570_v50  ;;  %v1664_v20 = vld [vmem:[%s18264_s3 + $0x160] sm:$0xff]  ;;  %v1665_v42 = vld [vmem:[%s18264_s3 + $0x168] sm:$0xff]  ;;  %v1650_v23 = vld [vmem:[%s18264_s3 + $0xf0] sm:$0xff] }
 0x346   :  { %3136 = vmatmul.mubr.f32.vlgmr.msra.gmra.mrb[0].mxu0 %v14260_v35  ;;  %v16582_v51 = vpack.c.bf16 %v1665_v42, %v1664_v20  ;;  %v1667_v42 = vld [vmem:[%s18264_s3 + $0x178] sm:$0xff] }
 0x347   :  { %3670 = vmatmul.mubr.f32.vlgmr.msra.gmra.mrb[0].mxu1 %v14260_v35  ;;  %3141 = vmatprep.mubr.f32.mxu0 %v14395_v56  ;;  %v1638_v35 = vld [vmem:[%s18264_s3 + $0x90] sm:$0xff]  ;;  %19180 = vst [vmem:[#allocation785_spill] sm:$0xff] %v16462_v53  ;;  %19187 = vst [vmem:[#allocation792_spill] sm:$0xff] %v16532_v58 }
 0x348   :  { %3675 = vmatprep.mubr.f32.mxu1 %v14395_v56  ;;  %8391 = vmatpush3.bf16.msra.mxu0 %v16347_v19  ;;  %19188 = vst [vmem:[#allocation793_spill] sm:$0xff] %v16534_v63  ;;  %19193 = vst [vmem:[#allocation798_spill] sm:$0xff] %v16582_v51 }
 0x349   :  { %8423 = vmatpush3.bf16.msra.mxu1 %v16350_v21 }
 0x34a   :  { %3142 = vmatmul.mubr.f32.gmra.mrb[2].mxu0 %v14398_v32 }
 0x34b   :  { %3676 = vmatmul.mubr.f32.gmra.mrb[2].mxu1 %v14398_v32  ;;  %3147 = vmatprep.mubr.f32.mxu0 %v14330_v33  ;;  %v1623_v32 = vld [vmem:[%s18264_s3 + $0x18] sm:$0xff] }
 0x34c   :  { %3681 = vmatprep.mubr.f32.mxu1 %v14330_v33  ;;  %v1639_v33 = vld [vmem:[%s18264_s3 + $0x98] sm:$0xff] }
 0x34d   :  { %v16377_v56 = vpack.c.bf16 %v1639_v33, %v1638_v35  ;;  %v16471_v35 = vpack.c.bf16 %v1659_v39, %v1658_v28  ;;  %v1644_v33 = vld [vmem:[%s18264_s3 + $0xc0] sm:$0xff]  ;;  %v1662_v28 = vld [vmem:[%s18264_s3 + $0x150] sm:$0xff]  ;;  %v1663_v39 = vld [vmem:[%s18264_s3 + $0x158] sm:$0xff] }
 0x34e   :  { %3148 = vmatmul.mubr.f32.gmra.mrb[4].mxu0 %v14310_v25 }
 0x34f   :  { %3682 = vmatmul.mubr.f32.gmra.mrb[4].mxu1 %v14310_v25  ;;  %3153 = vmatprep.mubr.f32.mxu0 %v14355_v40  ;;  %v1670_v25 = vld [vmem:[%s18264_s3 + $0x190] sm:$0xff]  ;;  %19181 = vst [vmem:[#allocation786_spill] sm:$0xff] %v16471_v35 }
 0x350   :  { %3687 = vmatprep.mubr.f32.mxu1 %v14355_v40  ;;  %v1671_v40 = vld [vmem:[%s18264_s3 + $0x198] sm:$0xff]  ;;  %8393 = vmatprep.subr.bf16.mxu0 %v16377_v56 }
 0x351   :  { %v16388_v16 = vpack.c.bf16 %v1671_v40, %v1670_v25  ;;  %v1645_v25 = vld [vmem:[%s18264_s3 + $0xc8] sm:$0xff]  ;;  %v1676_v40 = vld [vmem:[%s18264_s3 + $0x1c0] sm:$0xff] }
 0x352   :  { %3154 = vmatmul.mubr.f32.gmra.mrb[6].mxu0 %v14352_v22 }
 0x353   :  { %3688 = vmatmul.mubr.f32.gmra.mrb[6].mxu1 %v14352_v22  ;;  %v1622_v22 = vld [vmem:[%s18264_s3 + $0x10] sm:$0xff]  ;;  %8425 = vmatprep.subr.bf16.mxu1 %v16388_v16 }
 0x354   :  { %v16390_v41 = vpack.c.bf16 %v1623_v32, %v1622_v22  ;;  %8427 = vmatpush3.bf16.msra.mxu1 %v16399_v18  ;;  %v16485_v22 = vpack.c.bf16 %v1645_v25, %v1644_v33  ;;  %v1677_v32 = vld [vmem:[%s18264_s3 + $0x1c8] sm:$0xff]  ;;  %v16543_v33 = vpack.c.bf16 %v1663_v39, %v1662_v28  ;;  %v1648_v25 = vld [vmem:[%s18264_s3 + $0xe0] sm:$0xff]  ;;  %v1651_v28 = vld [vmem:[%s18264_s3 + $0xf8] sm:$0xff] }
 0x355   :  { %8429 = vmatprep.subr.bf16.mxu1 %v16424_v52  ;;  %v16496_v29 = vpack.c.bf16 %v1677_v32, %v1676_v40  ;;  %v1649_v40 = vld [vmem:[%s18264_s3 + $0xe8] sm:$0xff]  ;;  %v1680_v32 = vld [vmem:[%s18264_s3 + $0x1e0] sm:$0xff]  ;;  %v1682_v39 = vld [vmem:[%s18264_s3 + $0x1f0] sm:$0xff] }
 0x356   :  { %8395 = vmatpush3.bf16.msra.mxu0 %v16390_v41  ;;  %19182 = vst [vmem:[#allocation787_spill] sm:$0xff] %v16485_v22  ;;  %19189 = vst [vmem:[#allocation794_spill] sm:$0xff] %v16543_v33  ;;  %v16557_v38 = vpack.c.bf16 %v1649_v40, %v1648_v25  ;;  %v16568_v47 = vpack.c.bf16 %v1681_v60, %v1680_v32  ;;  %v1683_v25 = vld [vmem:[%s18264_s3 + $0x1f8] sm:$0xff]  ;;  %v16595_v40 = vpack.c.bf16 %v1651_v28, %v1650_v23  ;;  %v1634_v60 = vld [vmem:[%s18264_s3 + $0x70] sm:$0xff] }
 0x357   :  { %8397 = vmatprep.subr.bf16.mxu0 %v16413_v57  ;;  %19183 = vst [vmem:[#allocation788_spill] sm:$0xff] %v16496_v29  ;;  %v16597_v32 = vpack.c.bf16 %v1683_v25, %v1682_v39  ;;  %v16609_v20 = vpack.c.bf16 %v1635_v59, %v1634_v60  ;;  %v16616_v23 = vpack.c.bf16 %v1667_v42, %v1666_v46 }
 0x358   :  { %8431 = vmatpush3.bf16.msra.mxu1 %v16435_v26  ;;  %19190 = vst [vmem:[#allocation795_spill] sm:$0xff] %v16557_v38  ;;  %19191 = vst [vmem:[#allocation796_spill] sm:$0xff] %v16568_v47 }
 0x359   :  { %8433 = vmatprep.subr.bf16.mxu1 %v16460_v54  ;;  %19194 = vst [vmem:[#allocation799_spill] sm:$0xff] %v16595_v40  ;;  %19195 = vst [vmem:[#allocation800_spill] sm:$0xff] %v16597_v32 }
 0x35a   :  { %8399 = vmatpush3.bf16.msra.mxu0 %v16426_v43  ;;  %19196 = vst [vmem:[#allocation801_spill] sm:$0xff] %v16609_v20  ;;  %19197 = vst [vmem:[#allocation802_spill] sm:$0xff] %v16616_v23 }
 0x35b   :  { %8401 = vmatprep.subr.bf16.mxu0 %v16449_v62 }
 0x35c   :  { %8435 = vmatpush3.bf16.msra.mxu1 %v16471_v35 }
 0x35d   :  { %8437 = vmatprep.subr.bf16.mxu1 %v16496_v29 }
 0x35e   :  { %8403 = vmatpush3.bf16.msra.mxu0 %v16462_v53 }
 0x35f   :  { %8405 = vmatprep.subr.bf16.mxu0 %v16485_v22 }
 0x360   :  { %8439 = vmatpush3.bf16.msra.mxu1 %v16507_v55 }
 0x361   :  { %8441 = vmatprep.subr.bf16.mxu1 %v16532_v58 }
 0x362   :  { %8407 = vmatpush3.bf16.msra.mxu0 %v16498_v24 }
 0x363   :  { %8409 = vmatprep.subr.bf16.mxu0 %v16521_v37 }
 0x364   :  { %8443 = vmatpush3.bf16.msra.mxu1 %v16543_v33 }
 0x365   :  { %8445 = vmatprep.subr.bf16.mxu1 %v16568_v47 }
 0x366   :  { %8411 = vmatpush3.bf16.msra.mxu0 %v16534_v63 }
 0x367   :  { %8413 = vmatprep.subr.bf16.mxu0 %v16557_v38 }
 0x368   :  { %8447 = vmatpush3.bf16.msra.mxu1 %v16582_v51 }
 0x369   :  { %8449 = vmatprep.subr.bf16.mxu1 %v16597_v32 }
 0x36a   :  { %8415 = vmatpush3.bf16.msra.mxu0 %v16570_v50 }
 0x36b   :  { %8417 = vmatprep.subr.bf16.mxu0 %v16595_v40 }
 0x36c   :  { %8451 = vmatpush3.bf16.msra.mxu1 %v16616_v23 }
 0x36e   :  { %8419 = vmatpush3.bf16.msra.mxu0 %v16609_v20 }
 0x419   :  { %v16620_v28 = vpop.f32.mrb[0].mxu0 }
 0x41a   :  { %v16622_v39 = vpop.f32.mrb[0].mxu1  ;;  %v16624_v25 = vpop.f32.mrb[1].mxu0 }
 0x41b   :  { %19198 = vst [vmem:[#allocation803_spill] sm:$0xff] %v16622_v39  ;;  %19199 = vst [vmem:[#allocation804_spill] sm:$0xff] %v16624_v25  ;;  %v16626_v60 = vpop.f32.mrb[1].mxu1 }
 0x41c   :  { %19200 = vst [vmem:[#allocation805_spill] sm:$0xff] %v16626_v60 }
 0x41d   :  { %v16628_v59 = vpop.f32.mrb[2].mxu0 }
 0x41e   :  { %v3694_v27 = vadd.f32 %v16628_v59, %v16620_v28  ;;  %v16632_v34 = vpop.f32.mrb[2].mxu1  ;;  %v16634_v46 = vpop.f32.mrb[3].mxu0 }
 0x41f   :  { %19201 = vst [vmem:[#allocation806_spill] sm:$0xff] %v16632_v34  ;;  %19202 = vst [vmem:[#allocation807_spill] sm:$0xff] %v16634_v46  ;;  %v3712_v42 = vadd.f32 %v16632_v34, %v16622_v39  ;;  %v3703_v49 = vadd.f32 %v16634_v46, %v16624_v25  ;;  %v16640_v48 = vpop.f32.mrb[3].mxu1 }
 0x420   :  { %19203 = vst [vmem:[#allocation808_spill] sm:$0xff] %v16640_v48  ;;  %v3721_v45 = vadd.f32 %v16640_v48, %v16626_v60 }
 0x421   :  { %v16644_v31 = vpop.f32.mrb[4].mxu0 }
 0x422   :  { %v3695_v36 = vadd.f32 %v3694_v27, %v16644_v31  ;;  %v16647_v17 = vpop.f32.mrb[4].mxu1  ;;  %v16649_v14 = vpop.f32.mrb[5].mxu0 }
 0x423   :  { %19204 = vst [vmem:[#allocation809_spill] sm:$0xff] %v16647_v17  ;;  %19205 = vst [vmem:[#allocation810_spill] sm:$0xff] %v16649_v14  ;;  %v3713_v10 = vadd.f32 %v3712_v42, %v16647_v17  ;;  %v3704_v12 = vadd.f32 %v3703_v49, %v16649_v14  ;;  %v16653_v8 = vpop.f32.mrb[5].mxu1 }
 0x424   :  { %19206 = vst [vmem:[#allocation811_spill] sm:$0xff] %v16653_v8  ;;  %v3722_v15 = vadd.f32 %v3721_v45, %v16653_v8 }
 0x425   :  { %v16656_v11 = vpop.f32.mrb[6].mxu0 }
 0x426   :  { %v3696_v13 = vadd.f32 %v3695_v36, %v16656_v11  ;;  %v16659_v9 = vpop.f32.mrb[6].mxu1  ;;  %v16661_v6 = vpop.f32.mrb[7].mxu0 }
 0x427   :  { %19207 = vst [vmem:[#allocation812_spill] sm:$0xff] %v16659_v9  ;;  %19208 = vst [vmem:[#allocation813_spill] sm:$0xff] %v16661_v6  ;;  %v3714_v27 = vadd.f32 %v3713_v10, %v16659_v9  ;;  %v3705_v2 = vadd.f32 %v3704_v12, %v16661_v6  ;;  %v16665_v4 = vpop.f32.mrb[7].mxu1 }
 0x428   :  { %19209 = vst [vmem:[#allocation814_spill] sm:$0xff] %v16665_v4  ;;  %v3697_v42 = vrot.slane %v3696_v13, 4  ;;  %v3723_v49 = vadd.f32 %v3722_v15, %v16665_v4 }
 0x429   :  { %v3715_v0 = vrot.slane %v3714_v27, 4  ;;  %v3706_v7 = vrot.slane %v3705_v2, 4 }
 0x42a   :  { %v3698_v45 = vadd.f32 %v3697_v42, %v3696_v13  ;;  %v3724_v3 = vrot.slane %v3723_v49, 4 }
 0x42b   :  { %v3716_v5 = vadd.f32 %v3715_v0, %v3714_v27  ;;  %v3707_v1 = vadd.f32 %v3706_v7, %v3705_v2  ;;  %v1685_v0 = vld [vmem:[%s18265_s4 + $0x8] sm:$0xff]  ;;  %v1687_v2 = vld [vmem:[%s18265_s4 + $0x18] sm:$0xff]  ;;  %v1688_v7 = vld [vmem:[%s18265_s4 + $0x20] sm:$0xff]  ;;  %v18303_v27 = vmov 0.0  }
 0x42c   :  { %v3699_v36 = vrot.slane %v3698_v45, 2  ;;  %v3725_v8 = vadd.f32 %v3724_v3, %v3723_v49  ;;  %v1696_v49 = vld [vmem:[%s18265_s4 + $0x60] sm:$0xff] }
 0x42d   :  { %v3717_v48 = vrot.slane %v3716_v5, 2  ;;  %v3708_v60 = vrot.slane %v3707_v1, 2 }
 0x42e   :  { %v3700_v14 = vadd.f32 %v3699_v36, %v3698_v45  ;;  %v3726_v46 = vrot.slane %v3725_v8, 2  ;;  %v1694_v45 = vld [vmem:[%s18265_s4 + $0x50] sm:$0xff] }
 0x42f   :  { %v3718_v10 = vadd.f32 %v3717_v48, %v3716_v5  ;;  %v3709_v25 = vadd.f32 %v3708_v60, %v3707_v1  ;;  %v1689_v1 = vld [vmem:[%s18265_s4 + $0x28] sm:$0xff]  ;;  %v1691_v5 = vld [vmem:[%s18265_s4 + $0x38] sm:$0xff]  ;;  %v1698_v36 = vld [vmem:[%s18265_s4 + $0x70] sm:$0xff] }
 0x430   :  { %v3701_v12 = vrot.slane %v3700_v14, 1  ;;  %v3727_v6 = vadd.f32 %v3726_v46, %v3725_v8  ;;  %v16677_v3 = vpack.c.bf16 %v1689_v1, %v1685_v0  ;;  %v1686_v8 = vld [vmem:[%s18265_s4 + $0x10] sm:$0xff]  ;;  %v1697_v48 = vld [vmem:[%s18265_s4 + $0x68] sm:$0xff]  ;;  %v1699_v60 = vld [vmem:[%s18265_s4 + $0x78] sm:$0xff] }
 0x431   :  { %v3719_v9 = vrot.slane %v3718_v10, 1  ;;  %v3710_v17 = vrot.slane %v3709_v25, 1  ;;  %v1692_v46 = vld [vmem:[%s18265_s4 + $0x40] sm:$0xff] }
 0x432   :  { %v3728_v34 = vrot.slane %v3727_v6, 1  ;;  %v3702_v4 = vadd.f32 %v3701_v12, %v3700_v14  ;;  %19210 = vst [vmem:[#allocation815_spill] sm:$0xff] %v16677_v3  ;;  %8453 = vmatprep.subr.bf16.mxu0 %v16677_v3  ;;  %v1690_v14 = vld [vmem:[%s18265_s4 + $0x30] sm:$0xff]  ;;  %v16737_v12 = vpack.c.bf16 %v1698_v36, %v1694_v45 }
 0x433   :  { %v3711_v15 = vadd.f32 %v3710_v17, %v3709_v25  ;;  %v3720_v13 = vadd.f32 %v3719_v9, %v3718_v10  ;;  %v1693_v17 = vld [vmem:[%s18265_s4 + $0x48] sm:$0xff]  ;;  %v1695_v25 = vld [vmem:[%s18265_s4 + $0x58] sm:$0xff]  ;;  %v16735_v10 = vpack.c.bf16 %v1696_v49, %v1692_v46 }
 0x434   :  { %v3729_v39 = vadd.f32 %v3728_v34, %v3727_v6  ;;  %v1684_v6 = vld [vmem:[%s18265_s4] sm:$0xff]  ;;  %v16706_v34 = vpack.c.bf16 %v1690_v14, %v1686_v8  ;;  %v16722_v42 = vpack.c.bf16 %v1699_v60, %v1695_v25  ;;  %v16779_v8 = vsub.s32 0, %v13998_v61 }
 0x435   :  { %3794 = vmatprep.mubr.f32.mxu0 %v3711_v15  ;;  %v16695_v9 = vpack.c.bf16 %v1688_v7, %v1684_v6 }
 0x436   :  { %3864 = vmatprep.mubr.f32.mxu1 %v3729_v39  ;;  %3795 = vmatmul.mubr.f32.vlgmr.msra.gmra.mrb[8].mxu0 %v3702_v4  ;;  %v16682_v4 = vpack.c.bf16 %v1691_v5, %v1687_v2  ;;  %v16708_v39 = vpack.c.bf16 %v1697_v48, %v1693_v17  ;;  %19212 = vst [vmem:[#allocation817_spill] sm:$0xff] %v16779_v8 }
 0x437   :  { %3865 = vmatmul.mubr.f32.vlgmr.msra.gmra.mrb[8].mxu1 %v3720_v13  ;;  %3939 = vmatprep.mubr.f32.mxu0 %v18303_v27 }
 0x438   :  { %19211 = vst [vmem:[#allocation816_spill] sm:$0xff] %v16682_v4  ;;  %8461 = vmatprep.subr.bf16.mxu1 %v16682_v4  ;;  %4010 = vmatprep.mubr.f32.mxu1 %v18303_v27 }
 0x439   :  { %8455 = vmatpush1.bf16.msra.mxu0 %v16695_v9  ;;  %8463 = vmatpush1.bf16.msra.mxu1 %v16706_v34 }
 0x43a   :  { %8457 = vmatprep.subr.bf16.mxu0 %v16708_v39  ;;  %8465 = vmatprep.subr.bf16.mxu1 %v16722_v42 }
 0x43d   :  { %8459 = vmatpush1.bf16.msra.mxu0 %v16735_v10  ;;  %8467 = vmatpush1.bf16.msra.mxu1 %v16737_v12 }
 0x43e   :  { %8469 = vmatprep.subr.bf16.mxu0 %v16330_v30  ;;  %8501 = vmatprep.subr.bf16.mxu1 %v16332_v44 }
 0x509   :  { %v7372_v15 = vpop.f32.mrb[8].mxu0 }
 0x50a   :  { %v7407_v13 = vpop.f32.mrb[8].mxu1  ;;  %v7373_v0 = vpop.f32.mrb[9].mxu0 }
 0x50b   :  { %v7374_v1 = vadd.f32 %v7373_v0, %v7372_v15  ;;  %v7408_v2 = vpop.f32.mrb[9].mxu1 }
 0x50c   :  { %v7409_v5 = vadd.f32 %v7408_v2, %v7407_v13 }
 0x50e   :  { %v3867_v6 = vadd.f32 %v7409_v5, %v7374_v1  ;;  %v19213_v1 = vld [vmem:[#allocation803_spill] sm:$0xff]  ;;  %v19214_v5 = vld [vmem:[#allocation806_spill] sm:$0xff] }
 0x510   :  { %v3870_v7 = vmul.f32 0.001953125, %v3867_v6 }
 0x512   :  { %7331 = vmatmul.mubr.msk.f32.vlgmr.msra.gmra.mrb[10].mxu0 %vm3871_vm2, %v3870_v7  ;;  %7332 = vmatmul.mubr.msk.f32.vlgmr.msra.gmra.mrb[10].mxu1 %vm3871_vm2, %v3870_v7  ;;  %v19215_v7 = vld [vmem:[#allocation809_spill] sm:$0xff] }
 0x513   :  { %8471 = vmatpush3.bf16.msra.mxu0 %v16347_v19  ;;  %8503 = vmatpush3.bf16.msra.mxu1 %v16350_v21 }
 0x514   :  { %8473 = vmatprep.subr.bf16.mxu0 %v16377_v56  ;;  %8505 = vmatprep.subr.bf16.mxu1 %v16388_v16 }
 0x517   :  { %8475 = vmatpush3.bf16.msra.mxu0 %v16390_v41  ;;  %8507 = vmatpush3.bf16.msra.mxu1 %v16399_v18 }
 0x518   :  { %8477 = vmatprep.subr.bf16.mxu0 %v16413_v57  ;;  %8509 = vmatprep.subr.bf16.mxu1 %v16424_v52 }
 0x51b   :  { %8479 = vmatpush3.bf16.msra.mxu0 %v16426_v43  ;;  %8511 = vmatpush3.bf16.msra.mxu1 %v16435_v26 }
 0x51c   :  { %8481 = vmatprep.subr.bf16.mxu0 %v16449_v62  ;;  %8513 = vmatprep.subr.bf16.mxu1 %v16460_v54 }
 0x51f   :  { %8483 = vmatpush3.bf16.msra.mxu0 %v16462_v53  ;;  %8515 = vmatpush3.bf16.msra.mxu1 %v16471_v35 }
 0x520   :  { %8485 = vmatprep.subr.bf16.mxu0 %v16485_v22  ;;  %8517 = vmatprep.subr.bf16.mxu1 %v16496_v29 }
 0x523   :  { %8487 = vmatpush3.bf16.msra.mxu0 %v16498_v24  ;;  %8519 = vmatpush3.bf16.msra.mxu1 %v16507_v55 }
 0x524   :  { %8489 = vmatprep.subr.bf16.mxu0 %v16521_v37  ;;  %8521 = vmatprep.subr.bf16.mxu1 %v16532_v58 }
 0x527   :  { %8491 = vmatpush3.bf16.msra.mxu0 %v16534_v63  ;;  %8523 = vmatpush3.bf16.msra.mxu1 %v16543_v33 }
 0x528   :  { %8493 = vmatprep.subr.bf16.mxu0 %v16557_v38  ;;  %8525 = vmatprep.subr.bf16.mxu1 %v16568_v47 }
 0x52b   :  { %8495 = vmatpush3.bf16.msra.mxu0 %v16570_v50  ;;  %8527 = vmatpush3.bf16.msra.mxu1 %v16582_v51  ;;  %v19222_v50 = vld [vmem:[#allocation808_spill] sm:$0xff] }
 0x52c   :  { %8497 = vmatprep.subr.bf16.mxu0 %v16595_v40  ;;  %8529 = vmatprep.subr.bf16.mxu1 %v16597_v32  ;;  %v19221_v40 = vld [vmem:[#allocation805_spill] sm:$0xff] }
 0x52f   :  { %8499 = vmatpush3.bf16.msra.mxu0 %v16609_v20  ;;  %8531 = vmatpush3.bf16.msra.mxu1 %v16616_v23  ;;  %v19220_v20 = vld [vmem:[#allocation813_spill] sm:$0xff] }
 0x530   :  { %8533 = vmatprep.subr.bf16.mxu0 %v16677_v3  ;;  %8541 = vmatprep.subr.bf16.mxu1 %v16682_v4  ;;  %v19219_v4 = vld [vmem:[#allocation810_spill] sm:$0xff] }
 0x5e5   :  { %v3941_v14 = vpop.f32.mrb[10].mxu0  ;;  %v4012_v17 = vpop.f32.mrb[10].mxu1 }
 0x5e6   :  { %v4020_v48 = vrot.slane %v3941_v14, %v16779_v8  ;;  %v4028_v25 = vrot.slane %v4012_v17, %v16779_v8  ;;  %v3943_v60 = vpop.f32.mrb[11].mxu0  ;;  %v4014_v46 = vpop.f32.mrb[11].mxu1 }
 0x5e7   :  { %v4024_v49 = vrot.slane %v3943_v60, %v16779_v8  ;;  %v4032_v45 = vrot.slane %v4014_v46, %v16779_v8 }
 0x5e8   :  { %v16786_v36 = vsub.f32 %v16620_v28, %v4020_v48  ;;  %v16789_v15 = vsub.f32 %v16628_v59, %v4020_v48  ;;  %v16792_v13 = vsub.f32 %v16644_v31, %v4020_v48  ;;  %v16795_v0 = vsub.f32 %v16656_v11, %v4020_v48  ;;  %v19216_v28 = vld [vmem:[#allocation812_spill] sm:$0xff] }
 0x5e9   :  { %v16798_v2 = vsub.f32 %v19213_v1, %v4028_v25  ;;  %v16801_v6 = vsub.f32 %v19214_v5, %v4028_v25  ;;  %v16804_v14 = vsub.f32 %v19215_v7, %v4028_v25  ;;  %v16807_v17 = vsub.f32 %v19216_v28, %v4028_v25  ;;  %v19217_v5 = vld [vmem:[#allocation804_spill] sm:$0xff]  ;;  %v19218_v28 = vld [vmem:[#allocation807_spill] sm:$0xff] }
 0x5ea   :  { %v4049_v59 = vmul.f32 %v16786_v36, %v16786_v36  ;;  %v4053_v31 = vmul.f32 %v16789_v15, %v16789_v15  ;;  %v4057_v11 = vmul.f32 %v16792_v13, %v16792_v13  ;;  %v4061_v48 = vmul.f32 %v16795_v0, %v16795_v0 }
 0x5eb   :  { %v4051_v60 = vmul.f32 %v16798_v2, %v16798_v2  ;;  %v4055_v46 = vmul.f32 %v16801_v6, %v16801_v6  ;;  %v4059_v25 = vmul.f32 %v16804_v14, %v16804_v14  ;;  %v16824_v7 = vsub.f32 %v19217_v5, %v4024_v49 }
 0x5ec   :  { %v4065_v1 = vadd.f32 %v4053_v31, %v4049_v59  ;;  %v16827_v27 = vsub.f32 %v19218_v28, %v4024_v49  ;;  %v16830_v3 = vsub.f32 %v19219_v4, %v4024_v49  ;;  %v16833_v32 = vsub.f32 %v19220_v20, %v4024_v49  ;;  %v19223_v49 = vld [vmem:[#allocation811_spill] sm:$0xff] }
 0x5ed   :  { %v4083_v23 = vadd.f32 %v4055_v46, %v4051_v60  ;;  %v16836_v51 = vsub.f32 %v19221_v40, %v4032_v45  ;;  %v16839_v47 = vsub.f32 %v19222_v50, %v4032_v45  ;;  %v4063_v31 = vmul.f32 %v16807_v17, %v16807_v17  ;;  %v19224_v46 = vld [vmem:[#allocation814_spill] sm:$0xff] }
 0x5ee   :  { %v4066_v59 = vadd.f32 %v4065_v1, %v4057_v11  ;;  %v4050_v5 = vmul.f32 %v16824_v7, %v16824_v7  ;;  %v4054_v4 = vmul.f32 %v16827_v27, %v16827_v27  ;;  %v4058_v20 = vmul.f32 %v16830_v3, %v16830_v3 }
 0x5ef   :  { %v4084_v60 = vadd.f32 %v4083_v23, %v4059_v25  ;;  %v16850_v40 = vsub.f32 %v19223_v49, %v4032_v45  ;;  %v16853_v50 = vsub.f32 %v19224_v46, %v4032_v45  ;;  %v4052_v28 = vmul.f32 %v16836_v51, %v16836_v51 }
 0x5f0   :  { %v4067_v11 = vadd.f32 %v4066_v59, %v4061_v48  ;;  %v4074_v1 = vadd.f32 %v4054_v4, %v4050_v5  ;;  %v4056_v38 = vmul.f32 %v16839_v47, %v16839_v47  ;;  %v4062_v23 = vmul.f32 %v16833_v32, %v16833_v32 }
 0x5f1   :  { %v4085_v33 = vadd.f32 %v4084_v60, %v4063_v31  ;;  %v4060_v25 = vmul.f32 %v16850_v40, %v16850_v40  ;;  %v4064_v48 = vmul.f32 %v16853_v50, %v16853_v50 }
 0x5f2   :  { %v4092_v49 = vadd.f32 %v4056_v38, %v4052_v28  ;;  %v4075_v63 = vadd.f32 %v4074_v1, %v4058_v20  ;;  %v4068_v58 = vrot.slane %v4067_v11, 4 }
 0x5f3   :  { %v4086_v45 = vrot.slane %v4085_v33, 4 }
 0x5f4   :  { %v4076_v59 = vadd.f32 %v4075_v63, %v4062_v23  ;;  %v4093_v5 = vadd.f32 %v4092_v49, %v4060_v25  ;;  %v4069_v4 = vadd.f32 %v4068_v58, %v4067_v11 }
 0x5f5   :  { %v4087_v46 = vadd.f32 %v4086_v45, %v4085_v33 }
 0x5f6   :  { %v4077_v37 = vrot.slane %v4076_v59, 4  ;;  %v4094_v55 = vadd.f32 %v4093_v5, %v4064_v48  ;;  %v4070_v31 = vrot.slane %v4069_v4, 2 }
 0x5f7   :  { %v4088_v60 = vrot.slane %v4087_v46, 2 }
 0x5f8   :  { %v4078_v24 = vadd.f32 %v4077_v37, %v4076_v59  ;;  %v4095_v29 = vrot.slane %v4094_v55, 4  ;;  %v4071_v22 = vadd.f32 %v4070_v31, %v4069_v4 }
 0x5f9   :  { %v4089_v38 = vadd.f32 %v4088_v60, %v4087_v46  ;;  %v9677_v46 = vmov 1966171168  }
 0x5fa   :  { %v4079_v35 = vrot.slane %v4078_v24, 2  ;;  %v4096_v53 = vadd.f32 %v4095_v29, %v4094_v55  ;;  %v4072_v28 = vrot.slane %v4071_v22, 1  ;;  %v4398_v31 = vunpack.c.l.s4 %v9677_v46 }
 0x5fb   :  { %v4090_v26 = vrot.slane %v4089_v38, 1 }
 0x5fc   :  { %v4080_v20 = vadd.f32 %v4079_v35, %v4078_v24  ;;  %v4097_v1 = vrot.slane %v4096_v53, 2  ;;  %v4073_v58 = vadd.f32 %v4072_v28, %v4071_v22  ;;  %v19225_v35 = vmov 0.0  }
 0x5fd   :  { %v4091_v11 = vadd.f32 %v4090_v26, %v4089_v38  ;;  %v4399_v60 = vunpack.c.0.s8 %v4398_v31 }
 0x5fe   :  { %v4081_v54 = vrot.slane %v4080_v20, 1  ;;  %v4098_v62 = vadd.f32 %v4097_v1, %v4096_v53 }
 0x5ff   :  { %v16876_v1 = vsub.s32 %v4399_v60, %v13998_v61 }
 0x600   :  { %v4082_v63 = vadd.f32 %v4081_v54, %v4080_v20  ;;  %v4099_v23 = vrot.slane %v4098_v62, 1 }
 0x601   :  { %19226 = vst [vmem:[#allocation803_spill] sm:$0xff] %v16876_v1 }
 0x602   :  { %4165 = vmatprep.mubr.f32.mxu0 %v4082_v63  ;;  %v4100_v33 = vadd.f32 %v4099_v23, %v4098_v62 }
 0x603   :  { %4166 = vmatmul.mubr.f32.vlgmr.msra.gmra.mrb[12].mxu0 %v4073_v58 }
 0x604   :  { %4235 = vmatprep.mubr.f32.mxu1 %v4100_v33  ;;  %8535 = vmatpush1.bf16.msra.mxu0 %v16695_v9 }
 0x605   :  { %4236 = vmatmul.mubr.f32.vlgmr.msra.gmra.mrb[12].mxu1 %v4091_v11  ;;  %8537 = vmatprep.subr.bf16.mxu0 %v16708_v39 }
 0x606   :  { %8543 = vmatpush1.bf16.msra.mxu1 %v16706_v34  ;;  %4309 = vmatprep.mubr.f32.mxu0 %v19225_v35 }
 0x607   :  { %8545 = vmatprep.subr.bf16.mxu1 %v16722_v42  ;;  %4380 = vmatprep.mubr.f32.mxu1 %v19225_v35 }
 0x608   :  { %8539 = vmatpush1.bf16.msra.mxu0 %v16735_v10 }
 0x60a   :  { %8547 = vmatpush1.bf16.msra.mxu1 %v16737_v12 }
 0x6d6   :  { %v7442_v62 = vpop.f32.mrb[12].mxu0 }
 0x6d7   :  { %v7443_v26 = vpop.f32.mrb[13].mxu0 }
 0x6d8   :  { %v7477_v54 = vpop.f32.mrb[12].mxu1  ;;  %v7444_v53 = vadd.f32 %v7443_v26, %v7442_v62  ;;  %v2484_v26 = vld [vmem:[%s18268_s7] sm:$0xf] }
 0x6d9   :  { %v7478_v22 = vpop.f32.mrb[13].mxu1 }
 0x6da   :  { %v7479_v29 = vadd.f32 %v7478_v22, %v7477_v54  ;;  %v16888_v22 = vsub.s32 2, %v13998_v61 }
 0x6dc   :  { %v4238_v24 = vadd.f32 %v7479_v29, %v7444_v53  ;;  %v16885_v53 = vsub.s32 1, %v13998_v61  ;;  %19228 = vst [vmem:[#allocation809_spill] sm:$0xff] %v16888_v22  ;;  %v16891_v29 = vsub.s32 3, %v13998_v61 }
 0x6de   :  { %v4241_v55 = vmul.f32 0.001953125, %v4238_v24  ;;  %19227 = vst [vmem:[#allocation806_spill] sm:$0xff] %v16885_v53  ;;  %19229 = vst [vmem:[#allocation812_spill] sm:$0xff] %v16891_v29  ;;  %v2485_v24 = vld [vmem:[%s18269_s8] sm:$0xf] }
 0x6e0   :  { %7333 = vmatmul.mubr.msk.f32.vlgmr.msra.gmra.mrb[14].mxu0 %vm3871_vm2, %v4241_v55  ;;  %7334 = vmatmul.mubr.msk.f32.vlgmr.msra.gmra.mrb[14].mxu1 %vm3871_vm2, %v4241_v55 }
 0x7b3   :  { %v4311_v37 = vpop.f32.mrb[14].mxu0  ;;  %v4382_v25 = vpop.f32.mrb[14].mxu1 }
 0x7b4   :  { %v4312_v49 = vadd.f32 1e-05, %v4311_v37  ;;  %v4383_v45 = vadd.f32 1e-05, %v4382_v25  ;;  %v4313_v48 = vpop.f32.mrb[15].mxu0  ;;  %v4384_v59 = vpop.f32.mrb[15].mxu1 }
 0x7b5   :  { %v4314_v5 = vadd.f32 1e-05, %v4313_v48  ;;  %v4385_v4 = vadd.f32 1e-05, %v4384_v59  ;;  %v4462_v48 = vrot.slane %v2485_v24, %v16779_v8  ;;  %v4466_v59 = vrot.slane %v2485_v24, %v16885_v53 }
 0x7b6   :  { %9641 = vrsqrt.f32 %v4312_v49 }
 0x7b7   :  { %9643 = vrsqrt.f32 %v4383_v45 }
 0x7b8   :  { %9645 = vrsqrt.f32 %v4314_v5  ;;  %v4470_v5 = vrot.slane %v2485_v24, %v16888_v22 }
 0x7b9   :  { %9647 = vrsqrt.f32 %v4385_v4  ;;  %v4474_v4 = vrot.slane %v2485_v24, %v16891_v29 }
 0x7c0   :  { %v9642_v38 = vpop.eup %9641 }
 0x7c1   :  { %v9644_v20 = vpop.eup %9643 }
 0x7c2   :  { %v9646_v28 = vpop.eup %9645 }
 0x7c3   :  { %v9648_v63 = vpop.eup %9647  ;;  %v4395_v23 = vcombine.low %v9642_v38, %v9646_v28 }
 0x7c4   :  { %v4396_v58 = vcombine.low %v9644_v20, %v9648_v63 }
 0x7c5   :  { %v4403_v33 = vrot.slane %v4395_v23, %v16876_v1 }
 0x7c6   :  { %v4410_v11 = vrot.slane %v4396_v58, %v16876_v1 }
 0x7c8   :  { %v4411_v62 = vcombine.low %v4403_v33, %v4410_v11 }
 0x7ca   :  { %v4418_v54 = vrot.slane %v4411_v62, %v16876_v1 }
 0x7cc   :  { %v4420_v55 = vmul.f32 %v4418_v54, %v2484_v26 }
 0x7ce   :  { %v4425_v37 = vrot.slane %v4420_v55, %v16779_v8  ;;  %v4429_v25 = vrot.slane %v4420_v55, %v16885_v53  ;;  %v4433_v49 = vrot.slane %v4420_v55, %v16888_v22  ;;  %v4437_v45 = vrot.slane %v4420_v55, %v16891_v29 }
 0x7d0   :  { %v4442_v46 = vmul.f32 %v4425_v37, %v16786_v36  ;;  %v4443_v31 = vmul.f32 %v4429_v25, %v16824_v7  ;;  %v4444_v60 = vmul.f32 %v4433_v49, %v16798_v2  ;;  %v4445_v38 = vmul.f32 %v4437_v45, %v16836_v51 }
 0x7d1   :  { %v4446_v20 = vmul.f32 %v4425_v37, %v16789_v15  ;;  %v4447_v28 = vmul.f32 %v4429_v25, %v16827_v27  ;;  %v4448_v63 = vmul.f32 %v4433_v49, %v16801_v6  ;;  %v4449_v23 = vmul.f32 %v4437_v45, %v16839_v47 }
 0x7d2   :  { %v4450_v58 = vmul.f32 %v4425_v37, %v16792_v13  ;;  %v4451_v33 = vmul.f32 %v4429_v25, %v16830_v3  ;;  %v4452_v36 = vmul.f32 %v4433_v49, %v16804_v14  ;;  %v4453_v7 = vmul.f32 %v4437_v45, %v16850_v40 }
 0x7d3   :  { %v4454_v2 = vmul.f32 %v4425_v37, %v16795_v0  ;;  %v4455_v51 = vmul.f32 %v4429_v25, %v16833_v32  ;;  %v4456_v15 = vmul.f32 %v4433_v49, %v16807_v17  ;;  %v4457_v27 = vmul.f32 %v4437_v45, %v16853_v50 }
 0x7d4   :  { %v4479_v11 = vadd.f32 %v4462_v48, %v4442_v46  ;;  %v4480_v6 = vadd.f32 %v4466_v59, %v4443_v31  ;;  %v4481_v62 = vadd.f32 %v4470_v5, %v4444_v60  ;;  %v4482_v47 = vadd.f32 %v4474_v4, %v4445_v38 }
 0x7d5   :  { %v4483_v26 = vadd.f32 %v4462_v48, %v4446_v20  ;;  %v4484_v13 = vadd.f32 %v4466_v59, %v4447_v28  ;;  %v4485_v54 = vadd.f32 %v4470_v5, %v4448_v63  ;;  %v4486_v3 = vadd.f32 %v4474_v4, %v4449_v23  ;;  %v19230_v23 = vld [vmem:[#allocation7_spill] sm:$0xff] }
 0x7d6   :  { %v4487_v24 = vadd.f32 %v4462_v48, %v4450_v58  ;;  %v4488_v14 = vadd.f32 %v4466_v59, %v4451_v33  ;;  %v4489_v55 = vadd.f32 %v4470_v5, %v4452_v36  ;;  %v4490_v40 = vadd.f32 %v4474_v4, %v4453_v7  ;;  %v19231_v58 = vld [vmem:[#allocation11_spill] sm:$0xff]  ;;  %v19232_v36 = vld [vmem:[#allocation9_spill] sm:$0xff] }
 0x7d7   :  { %v4491_v29 = vadd.f32 %v4462_v48, %v4454_v2  ;;  %v4492_v0 = vadd.f32 %v4466_v59, %v4455_v51  ;;  %v4493_v37 = vadd.f32 %v4470_v5, %v4456_v15  ;;  %v4494_v32 = vadd.f32 %v4474_v4, %v4457_v27  ;;  %v19233_v7 = vld [vmem:[#allocation13_spill] sm:$0xff]  ;;  %v19234_v51 = vld [vmem:[#allocation6_spill] sm:$0xff] }
 0x7d8   :  { %v16920_v25 = vmax.f32 %v4479_v11, 0.0  ;;  %v16922_v17 = vmax.f32 %v4480_v6, 0.0  ;;  %v16924_v50 = vmax.f32 %v4481_v62, 0.0  ;;  %v16926_v49 = vmax.f32 %v4482_v47, 0.0  ;;  %v19235_v15 = vld [vmem:[#allocation10_spill] sm:$0xff]  ;;  %v19236_v11 = vld [vmem:[#allocation8_spill] sm:$0xff] }
 0x7d9   :  { %v16928_v45 = vmax.f32 %v4483_v26, 0.0  ;;  %v16930_v46 = vmax.f32 %v4484_v13, 0.0  ;;  %v16932_v31 = vmax.f32 %v4485_v54, 0.0  ;;  %v16934_v60 = vmax.f32 %v4486_v3, 0.0  ;;  %v19237_v6 = vld [vmem:[#allocation12_spill] sm:$0xff] }
 0x7da   :  { %v16936_v48 = vmax.f32 %v4487_v24, 0.0  ;;  %v16938_v59 = vmax.f32 %v4488_v14, 0.0  ;;  %v16940_v5 = vmax.f32 %v4489_v55, 0.0  ;;  %v16942_v4 = vmax.f32 %v4490_v40, 0.0 }
 0x7db   :  { %v16944_v38 = vmax.f32 %v4491_v29, 0.0  ;;  %v16946_v20 = vmax.f32 %v4492_v0, 0.0  ;;  %v16948_v28 = vmax.f32 %v4493_v37, 0.0  ;;  %v16950_v63 = vmax.f32 %v4494_v32, 0.0 }
 0x7dc   :  { %v8548_v33 = vpack.c.bf16 %v19231_v58, %v19230_v23  ;;  %v8932_v2 = vpack.c.bf16 %v19233_v7, %v19232_v36  ;;  %v8550_v27 = vpack.c.bf16 %v19235_v15, %v19234_v51  ;;  %v8934_v62 = vpack.c.bf16 %v19237_v6, %v19236_v11 }
 0x7dd   :  { %9673 = dma.done.wait [#allocation3], 98304 }
 0x7de   :  { %9674 = vsyncadd [#allocation3], 4294868992  ;;  %v19238_v29 = vld [vmem:[#allocation15_spill] sm:$0xff]  ;;  %v19240_v13 = vld [vmem:[#allocation17_spill] sm:$0xff]  ;;  %8549 = vmatprep.subr.bf16.mxu0 %v8548_v33  ;;  %8933 = vmatprep.subr.bf16.mxu1 %v8932_v2 }
 0x7df   :  { %v19239_v47 = vld [vmem:[#allocation19_spill] sm:$0xff]  ;;  %v19241_v54 = vld [vmem:[#allocation21_spill] sm:$0xff]  ;;  %8551 = vmatpush1.bf16.msra.mxu0 %v8550_v27  ;;  %8935 = vmatpush1.bf16.msra.mxu1 %v8934_v62  ;;  %v19242_v24 = vld [vmem:[#allocation14_spill] sm:$0xff] }
 0x7e0   :  { %v8552_v26 = vpack.c.bf16 %v19239_v47, %v19238_v29  ;;  %v8936_v3 = vpack.c.bf16 %v19241_v54, %v19240_v13  ;;  %v19243_v14 = vld [vmem:[#allocation18_spill] sm:$0xff]  ;;  %v19244_v40 = vld [vmem:[#allocation16_spill] sm:$0xff]  ;;  %v19246_v32 = vld [vmem:[#allocation23_spill] sm:$0xff] }
 0x7e1   :  { %v8554_v55 = vpack.c.bf16 %v19243_v14, %v19242_v24  ;;  %v19245_v0 = vld [vmem:[#allocation20_spill] sm:$0xff]  ;;  %v19247_v23 = vld [vmem:[#allocation27_spill] sm:$0xff]  ;;  %v19248_v36 = vld [vmem:[#allocation25_spill] sm:$0xff] }
 0x7e2   :  { %v8938_v37 = vpack.c.bf16 %v19245_v0, %v19244_v40  ;;  %8553 = vmatprep.subr.bf16.mxu0 %v8552_v26  ;;  %8937 = vmatprep.subr.bf16.mxu1 %v8936_v3  ;;  %v8556_v58 = vpack.c.bf16 %v19247_v23, %v19246_v32  ;;  %v19249_v7 = vld [vmem:[#allocation29_spill] sm:$0xff]  ;;  %v19250_v33 = vld [vmem:[#allocation22_spill] sm:$0xff]  ;;  %v19252_v27 = vld [vmem:[#allocation24_spill] sm:$0xff] }
 0x7e3   :  { %v8940_v51 = vpack.c.bf16 %v19249_v7, %v19248_v36  ;;  %8555 = vmatpush1.bf16.msra.mxu0 %v8554_v55  ;;  %v19251_v2 = vld [vmem:[#allocation26_spill] sm:$0xff]  ;;  %v19253_v11 = vld [vmem:[#allocation28_spill] sm:$0xff]  ;;  %v19254_v62 = vld [vmem:[#allocation31_spill] sm:$0xff] }
 0x7e4   :  { %8939 = vmatpush1.bf16.msra.mxu1 %v8938_v37  ;;  %v8558_v15 = vpack.c.bf16 %v19251_v2, %v19250_v33  ;;  %v8942_v6 = vpack.c.bf16 %v19253_v11, %v19252_v27  ;;  %8557 = vmatprep.subr.bf16.mxu0 %v8556_v58  ;;  %v19255_v29 = vld [vmem:[#allocation35_spill] sm:$0xff]  ;;  %v19256_v26 = vld [vmem:[#allocation33_spill] sm:$0xff]  ;;  %v19258_v3 = vld [vmem:[#allocation30_spill] sm:$0xff]  ;;  %v18353_v33 = vrot.slane %v16946_v20, 7 }
 0x7e5   :  { %8941 = vmatprep.subr.bf16.mxu1 %v8940_v51  ;;  %v8560_v47 = vpack.c.bf16 %v19255_v29, %v19254_v62  ;;  %v19257_v13 = vld [vmem:[#allocation37_spill] sm:$0xff]  ;;  %v19259_v24 = vld [vmem:[#allocation34_spill] sm:$0xff]  ;;  %v19260_v55 = vld [vmem:[#allocation32_spill] sm:$0xff]  ;;  %v5286_v51 = vrot.slane %v16922_v17, 7 }
 0x7e6   :  { %v8944_v54 = vpack.c.bf16 %v19257_v13, %v19256_v26  ;;  %v8562_v14 = vpack.c.bf16 %v19259_v24, %v19258_v3  ;;  %v19261_v40 = vld [vmem:[#allocation36_spill] sm:$0xff]  ;;  %v19262_v37 = vld [vmem:[#allocation39_spill] sm:$0xff]  ;;  %v19264_v58 = vld [vmem:[#allocation41_spill] sm:$0xff] }
 0x7e7   :  { %8559 = vmatpush1.bf16.msra.mxu0 %v8558_v15  ;;  %v8946_v0 = vpack.c.bf16 %v19261_v40, %v19260_v55  ;;  %v19263_v32 = vld [vmem:[#allocation43_spill] sm:$0xff]  ;;  %v19265_v36 = vld [vmem:[#allocation45_spill] sm:$0xff]  ;;  %v19266_v2 = vld [vmem:[#allocation38_spill] sm:$0xff]  ;;  %v5314_v24 = vsel %vm2504_vm0, %v18353_v33, %v5286_v51 }
 0x7e8   :  { %8943 = vmatpush1.bf16.msra.mxu1 %v8942_v6  ;;  %8561 = vmatprep.subr.bf16.mxu0 %v8560_v47  ;;  %v8564_v23 = vpack.c.bf16 %v19263_v32, %v19262_v37  ;;  %v8948_v7 = vpack.c.bf16 %v19265_v36, %v19264_v58  ;;  %v19267_v15 = vld [vmem:[#allocation42_spill] sm:$0xff]  ;;  %v19268_v11 = vld [vmem:[#allocation40_spill] sm:$0xff]  ;;  %v19270_v29 = vld [vmem:[#allocation47_spill] sm:$0xff] }
 0x7e9   :  { %8945 = vmatprep.subr.bf16.mxu1 %v8944_v54  ;;  %v8566_v27 = vpack.c.bf16 %v19267_v15, %v19266_v2  ;;  %v19269_v6 = vld [vmem:[#allocation44_spill] sm:$0xff]  ;;  %v19271_v47 = vld [vmem:[#allocation51_spill] sm:$0xff]  ;;  %v19272_v13 = vld [vmem:[#allocation49_spill] sm:$0xff] }
 0x7ea   :  { %v8950_v62 = vpack.c.bf16 %v19269_v6, %v19268_v11  ;;  %v8568_v26 = vpack.c.bf16 %v19271_v47, %v19270_v29  ;;  %v19273_v54 = vld [vmem:[#allocation53_spill] sm:$0xff]  ;;  %v19275_v55 = vld [vmem:[#allocation50_spill] sm:$0xff]  ;;  %v19277_v37 = vld [vmem:[#allocation52_spill] sm:$0xff] }
 0x7eb   :  { %8563 = vmatpush1.bf16.msra.mxu0 %v8562_v14  ;;  %v8952_v3 = vpack.c.bf16 %v19273_v54, %v19272_v13  ;;  %v19274_v14 = vld [vmem:[#allocation46_spill] sm:$0xff]  ;;  %v19279_v36 = vld [vmem:[#allocation55_spill] sm:$0xff]  ;;  %v19281_v15 = vld [vmem:[#allocation57_spill] sm:$0xff] }
 0x7ec   :  { %8947 = vmatpush1.bf16.msra.mxu1 %v8946_v0  ;;  %8565 = vmatprep.subr.bf16.mxu0 %v8564_v23  ;;  %v8570_v40 = vpack.c.bf16 %v19275_v55, %v19274_v14  ;;  %v19276_v0 = vld [vmem:[#allocation48_spill] sm:$0xff]  ;;  %v19278_v23 = vld [vmem:[#allocation774_spill] sm:$0xff]  ;;  %v19282_v11 = vld [vmem:[#allocation61_spill] sm:$0xff] }
 0x7ed   :  { %8949 = vmatprep.subr.bf16.mxu1 %v8948_v7  ;;  %v8954_v32 = vpack.c.bf16 %v19277_v37, %v19276_v0  ;;  %v5318_v58 = vmul.f32 %v5314_v24, %v19278_v23  ;;  %v19280_v7 = vld [vmem:[#allocation59_spill] sm:$0xff]  ;;  %v8956_v6 = vpack.c.bf16 %v19282_v11, %v19281_v15  ;;  %v19285_v47 = vld [vmem:[#allocation56_spill] sm:$0xff]  ;;  %v19289_v14 = vld [vmem:[#allocation65_spill] sm:$0xff] }
 0x7ee   :  { %v8572_v2 = vpack.c.bf16 %v19280_v7, %v19279_v36  ;;  %v19286_v13 = vld [vmem:[#allocation60_spill] sm:$0xff]  ;;  %v19290_v55 = vld [vmem:[#allocation69_spill] sm:$0xff]  ;;  %v19291_v37 = vld [vmem:[#allocation62_spill] sm:$0xff] }
 0x7ef   :  { %8567 = vmatpush1.bf16.msra.mxu0 %v8566_v27  ;;  %5445 = vmatprep.mubr.f32.mxu0 %v5318_v58  ;;  %v19283_v27 = vld [vmem:[#allocation54_spill] sm:$0xff]  ;;  %v8958_v54 = vpack.c.bf16 %v19286_v13, %v19285_v47  ;;  %v8960_v0 = vpack.c.bf16 %v19290_v55, %v19289_v14  ;;  %v19294_v36 = vld [vmem:[#allocation68_spill] sm:$0xff]  ;;  %v19295_v15 = vld [vmem:[#allocation71_spill] sm:$0xff] }
 0x7f0   :  { %8951 = vmatpush1.bf16.msra.mxu1 %v8950_v62  ;;  %8569 = vmatprep.subr.bf16.mxu0 %v8568_v26  ;;  %v19284_v62 = vld [vmem:[#allocation58_spill] sm:$0xff]  ;;  %v19287_v26 = vld [vmem:[#allocation63_spill] sm:$0xff]  ;;  %v19370_v33 = vld [vmem:[#allocation149_spill] sm:$0xff] }
 0x7f1   :  { %8953 = vmatprep.subr.bf16.mxu1 %v8952_v3  ;;  %5979 = vmatprep.mubr.f32.mxu1 %v5318_v58  ;;  %v8574_v29 = vpack.c.bf16 %v19284_v62, %v19283_v27  ;;  %v19288_v3 = vld [vmem:[#allocation67_spill] sm:$0xff]  ;;  %v19292_v58 = vld [vmem:[#allocation66_spill] sm:$0xff]  ;;  %v19298_v27 = vld [vmem:[#allocation77_spill] sm:$0xff] }
 0x7f2   :  { %v8576_v24 = vpack.c.bf16 %v19288_v3, %v19287_v26  ;;  %v19296_v11 = vld [vmem:[#allocation75_spill] sm:$0xff]  ;;  %v19299_v47 = vld [vmem:[#allocation70_spill] sm:$0xff]  ;;  %v19302_v26 = vld [vmem:[#allocation76_spill] sm:$0xff] }
 0x7f3   :  { %8571 = vmatpush1.bf16.msra.mxu0 %v8570_v40  ;;  %v8578_v40 = vpack.c.bf16 %v19292_v58, %v19291_v37  ;;  %v19300_v13 = vld [vmem:[#allocation74_spill] sm:$0xff]  ;;  %v19303_v14 = vld [vmem:[#allocation79_spill] sm:$0xff]  ;;  %v19306_v37 = vld [vmem:[#allocation85_spill] sm:$0xff] }
 0x7f4   :  { %8955 = vmatpush1.bf16.msra.mxu1 %v8954_v32  ;;  %8573 = vmatprep.subr.bf16.mxu0 %v8572_v2  ;;  %v19293_v32 = vld [vmem:[#allocation64_spill] sm:$0xff]  ;;  %v8580_v2 = vpack.c.bf16 %v19296_v11, %v19295_v15  ;;  %v19304_v55 = vld [vmem:[#allocation83_spill] sm:$0xff] }
 0x7f5   :  { %8957 = vmatprep.subr.bf16.mxu1 %v8956_v6  ;;  %v8962_v7 = vpack.c.bf16 %v19294_v36, %v19293_v32  ;;  %v19297_v6 = vld [vmem:[#allocation73_spill] sm:$0xff]  ;;  %v19307_v32 = vld [vmem:[#allocation78_spill] sm:$0xff]  ;;  %v19310_v15 = vld [vmem:[#allocation84_spill] sm:$0xff] }
 0x7f6   :  { %v8964_v62 = vpack.c.bf16 %v19298_v27, %v19297_v6  ;;  %v19308_v36 = vld [vmem:[#allocation82_spill] sm:$0xff]  ;;  %v19311_v6 = vld [vmem:[#allocation87_spill] sm:$0xff] }
 0x7f7   :  { %8575 = vmatpush1.bf16.msra.mxu0 %v8574_v29  ;;  %v8582_v29 = vpack.c.bf16 %v19300_v13, %v19299_v47  ;;  %v19312_v27 = vld [vmem:[#allocation91_spill] sm:$0xff]  ;;  %v19314_v47 = vld [vmem:[#allocation93_spill] sm:$0xff] }
 0x7f8   :  { %8959 = vmatpush1.bf16.msra.mxu1 %v8958_v54  ;;  %8577 = vmatprep.subr.bf16.mxu0 %v8576_v24  ;;  %v19301_v54 = vld [vmem:[#allocation72_spill] sm:$0xff]  ;;  %v8584_v24 = vpack.c.bf16 %v19304_v55, %v19303_v14  ;;  %v20009_v61 = vld [vmem:[#allocation783_spill] sm:$0xff] }
 0x7f9   :  { %8961 = vmatprep.subr.bf16.mxu1 %v8960_v0  ;;  %v8966_v3 = vpack.c.bf16 %v19302_v26, %v19301_v54  ;;  %v19305_v0 = vld [vmem:[#allocation81_spill] sm:$0xff]  ;;  %v19315_v54 = vld [vmem:[#allocation86_spill] sm:$0xff]  ;;  %v19318_v14 = vld [vmem:[#allocation92_spill] sm:$0xff] }
 0x7fa   :  { %v8968_v58 = vpack.c.bf16 %v19306_v37, %v19305_v0  ;;  %v19316_v26 = vld [vmem:[#allocation90_spill] sm:$0xff]  ;;  %v19319_v0 = vld [vmem:[#allocation95_spill] sm:$0xff] }
 0x7fb   :  { %8579 = vmatpush1.bf16.msra.mxu0 %v8578_v40  ;;  %v8586_v40 = vpack.c.bf16 %v19308_v36, %v19307_v32  ;;  %v19320_v37 = vld [vmem:[#allocation99_spill] sm:$0xff]  ;;  %v19322_v32 = vld [vmem:[#allocation101_spill] sm:$0xff] }
 0x7fc   :  { %8963 = vmatpush1.bf16.msra.mxu1 %v8962_v7  ;;  %8581 = vmatprep.subr.bf16.mxu0 %v8580_v2  ;;  %v19309_v7 = vld [vmem:[#allocation80_spill] sm:$0xff]  ;;  %v8588_v2 = vpack.c.bf16 %v19312_v27, %v19311_v6 }
 0x7fd   :  { %8965 = vmatprep.subr.bf16.mxu1 %v8964_v62  ;;  %v8970_v11 = vpack.c.bf16 %v19310_v15, %v19309_v7  ;;  %v19313_v62 = vld [vmem:[#allocation89_spill] sm:$0xff]  ;;  %v19323_v7 = vld [vmem:[#allocation94_spill] sm:$0xff]  ;;  %v19326_v6 = vld [vmem:[#allocation100_spill] sm:$0xff] }
 0x7fe   :  { %v8972_v13 = vpack.c.bf16 %v19314_v47, %v19313_v62  ;;  %v19324_v15 = vld [vmem:[#allocation98_spill] sm:$0xff]  ;;  %v19327_v62 = vld [vmem:[#allocation103_spill] sm:$0xff] }
 0x7ff   :  { %8583 = vmatpush1.bf16.msra.mxu0 %v8582_v29  ;;  %v8590_v29 = vpack.c.bf16 %v19316_v26, %v19315_v54  ;;  %v19328_v47 = vld [vmem:[#allocation107_spill] sm:$0xff]  ;;  %v19330_v54 = vld [vmem:[#allocation109_spill] sm:$0xff] }
 0x800   :  { %8967 = vmatpush1.bf16.msra.mxu1 %v8966_v3  ;;  %8585 = vmatprep.subr.bf16.mxu0 %v8584_v24  ;;  %v19317_v3 = vld [vmem:[#allocation88_spill] sm:$0xff]  ;;  %v8592_v24 = vpack.c.bf16 %v19320_v37, %v19319_v0 }
 0x801   :  { %8969 = vmatprep.subr.bf16.mxu1 %v8968_v58  ;;  %v8974_v55 = vpack.c.bf16 %v19318_v14, %v19317_v3  ;;  %v19321_v58 = vld [vmem:[#allocation97_spill] sm:$0xff]  ;;  %v19331_v3 = vld [vmem:[#allocation102_spill] sm:$0xff]  ;;  %v19334_v0 = vld [vmem:[#allocation108_spill] sm:$0xff] }
 0x802   :  { %v8976_v36 = vpack.c.bf16 %v19322_v32, %v19321_v58  ;;  %v19332_v14 = vld [vmem:[#allocation106_spill] sm:$0xff]  ;;  %v19335_v58 = vld [vmem:[#allocation111_spill] sm:$0xff] }
 0x803   :  { %8587 = vmatpush1.bf16.msra.mxu0 %v8586_v40  ;;  %v8594_v40 = vpack.c.bf16 %v19324_v15, %v19323_v7  ;;  %v19336_v32 = vld [vmem:[#allocation115_spill] sm:$0xff]  ;;  %v19338_v7 = vld [vmem:[#allocation117_spill] sm:$0xff] }
 0x804   :  { %8971 = vmatpush1.bf16.msra.mxu1 %v8970_v11  ;;  %8589 = vmatprep.subr.bf16.mxu0 %v8588_v2  ;;  %v19325_v11 = vld [vmem:[#allocation96_spill] sm:$0xff]  ;;  %v8596_v2 = vpack.c.bf16 %v19328_v47, %v19327_v62 }
 0x805   :  { %8973 = vmatprep.subr.bf16.mxu1 %v8972_v13  ;;  %v8978_v27 = vpack.c.bf16 %v19326_v6, %v19325_v11  ;;  %v19329_v13 = vld [vmem:[#allocation105_spill] sm:$0xff]  ;;  %v19339_v11 = vld [vmem:[#allocation110_spill] sm:$0xff]  ;;  %v19342_v62 = vld [vmem:[#allocation116_spill] sm:$0xff] }
 0x806   :  { %v8980_v26 = vpack.c.bf16 %v19330_v54, %v19329_v13  ;;  %v19340_v6 = vld [vmem:[#allocation114_spill] sm:$0xff]  ;;  %v19343_v13 = vld [vmem:[#allocation119_spill] sm:$0xff] }
 0x807   :  { %8591 = vmatpush1.bf16.msra.mxu0 %v8590_v29  ;;  %v8598_v29 = vpack.c.bf16 %v19332_v14, %v19331_v3  ;;  %v19344_v54 = vld [vmem:[#allocation123_spill] sm:$0xff]  ;;  %v19346_v3 = vld [vmem:[#allocation125_spill] sm:$0xff] }
 0x808   :  { %8975 = vmatpush1.bf16.msra.mxu1 %v8974_v55  ;;  %8593 = vmatprep.subr.bf16.mxu0 %v8592_v24  ;;  %v19333_v55 = vld [vmem:[#allocation104_spill] sm:$0xff]  ;;  %v8600_v24 = vpack.c.bf16 %v19336_v32, %v19335_v58 }
 0x809   :  { %8977 = vmatprep.subr.bf16.mxu1 %v8976_v36  ;;  %v8982_v37 = vpack.c.bf16 %v19334_v0, %v19333_v55  ;;  %v19337_v36 = vld [vmem:[#allocation113_spill] sm:$0xff]  ;;  %v19347_v55 = vld [vmem:[#allocation118_spill] sm:$0xff]  ;;  %v19350_v58 = vld [vmem:[#allocation124_spill] sm:$0xff] }
 0x80a   :  { %v8984_v15 = vpack.c.bf16 %v19338_v7, %v19337_v36  ;;  %v19348_v0 = vld [vmem:[#allocation122_spill] sm:$0xff]  ;;  %v5285_v36 = vrot.slane %v16920_v25, 7  ;;  %v5297_v7 = vrot.slane %v16944_v38, 7 }
 0x80b   :  { %8595 = vmatpush1.bf16.msra.mxu0 %v8594_v40  ;;  %v8602_v40 = vpack.c.bf16 %v19340_v6, %v19339_v11  ;;  %v19353_v6 = vld [vmem:[#allocation129_spill] sm:$0xff] }
 0x80c   :  { %8979 = vmatpush1.bf16.msra.mxu1 %v8978_v27  ;;  %8597 = vmatprep.subr.bf16.mxu0 %v8596_v2  ;;  %v19341_v27 = vld [vmem:[#allocation112_spill] sm:$0xff]  ;;  %v8604_v2 = vpack.c.bf16 %v19344_v54, %v19343_v13  ;;  %v19356_v13 = vld [vmem:[#allocation130_spill] sm:$0xff] }
 0x80d   :  { %8981 = vmatprep.subr.bf16.mxu1 %v8980_v26  ;;  %v8986_v47 = vpack.c.bf16 %v19342_v62, %v19341_v27  ;;  %v19345_v26 = vld [vmem:[#allocation121_spill] sm:$0xff] }
 0x80e   :  { %v8988_v14 = vpack.c.bf16 %v19346_v3, %v19345_v26  ;;  %v19354_v27 = vld [vmem:[#allocation133_spill] sm:$0xff]  ;;  %v19357_v26 = vld [vmem:[#allocation128_spill] sm:$0xff] }
 0x80f   :  { %8599 = vmatpush1.bf16.msra.mxu0 %v8598_v29  ;;  %v8606_v29 = vpack.c.bf16 %v19348_v0, %v19347_v55  ;;  %v8992_v62 = vpack.c.bf16 %v19354_v27, %v19353_v6  ;;  %v19358_v3 = vld [vmem:[#allocation132_spill] sm:$0xff]  ;;  %v19359_v0 = vld [vmem:[#allocation135_spill] sm:$0xff]  ;;  %v5294_v27 = vrot.slane %v16938_v59, 7 }
 0x810   :  { %8983 = vmatpush1.bf16.msra.mxu1 %v8982_v37  ;;  %8601 = vmatprep.subr.bf16.mxu0 %v8600_v24  ;;  %v19349_v37 = vld [vmem:[#allocation120_spill] sm:$0xff]  ;;  %v19351_v24 = vld [vmem:[#allocation127_spill] sm:$0xff]  ;;  %v8994_v55 = vpack.c.bf16 %v19358_v3, %v19357_v26 }
 0x811   :  { %8985 = vmatprep.subr.bf16.mxu1 %v8984_v15  ;;  %v8990_v32 = vpack.c.bf16 %v19350_v58, %v19349_v37  ;;  %v19352_v15 = vld [vmem:[#allocation131_spill] sm:$0xff]  ;;  %v19366_v26 = vld [vmem:[#allocation140_spill] sm:$0xff] }
 0x812   :  { %v8608_v11 = vpack.c.bf16 %v19352_v15, %v19351_v24  ;;  %v19360_v37 = vld [vmem:[#allocation139_spill] sm:$0xff]  ;;  %v19361_v24 = vld [vmem:[#allocation137_spill] sm:$0xff] }
 0x813   :  { %8603 = vmatpush1.bf16.msra.mxu0 %v8602_v40  ;;  %v5290_v40 = vrot.slane %v16930_v46, 7  ;;  %v8612_v58 = vpack.c.bf16 %v19360_v37, %v19359_v0  ;;  %v19362_v15 = vld [vmem:[#allocation141_spill] sm:$0xff]  ;;  %v19367_v37 = vld [vmem:[#allocation143_spill] sm:$0xff] }
 0x814   :  { %8987 = vmatpush1.bf16.msra.mxu1 %v8986_v47  ;;  %8605 = vmatprep.subr.bf16.mxu0 %v8604_v2  ;;  %v19355_v47 = vld [vmem:[#allocation126_spill] sm:$0xff]  ;;  %v5313_v2 = vsel %vm2504_vm0, %v5297_v7, %v5285_v36 }
 0x815   :  { %8989 = vmatprep.subr.bf16.mxu1 %v8988_v14  ;;  %v8610_v54 = vpack.c.bf16 %v19356_v13, %v19355_v47  ;;  %v5289_v14 = vrot.slane %v16928_v45, 7  ;;  %v5310_v6 = vsel %vm2504_vm0, %v5286_v51, %v5290_v40  ;;  %v19363_v47 = vld [vmem:[#allocation134_spill] sm:$0xff]  ;;  %v19365_v13 = vld [vmem:[#allocation136_spill] sm:$0xff] }
 0x816   :  { %v8998_v3 = vpack.c.bf16 %v19366_v26, %v19365_v13  ;;  %v19374_v13 = vld [vmem:[#allocation144_spill] sm:$0xff] }
 0x817   :  { %8607 = vmatpush1.bf16.msra.mxu0 %v8606_v29  ;;  %v8996_v29 = vpack.c.bf16 %v19362_v15, %v19361_v24  ;;  %v5309_v0 = vsel %vm2504_vm0, %v5285_v36, %v5289_v14  ;;  %v19368_v24 = vld [vmem:[#allocation147_spill] sm:$0xff]  ;;  %v19369_v15 = vld [vmem:[#allocation145_spill] sm:$0xff]  ;;  %v19372_v36 = vld [vmem:[#allocation142_spill] sm:$0xff] }
 0x818   :  { %8991 = vmatpush1.bf16.msra.mxu1 %v8990_v32  ;;  %8609 = vmatprep.subr.bf16.mxu0 %v8608_v11  ;;  %v5317_v32 = vmul.f32 %v5313_v2, %v19278_v23  ;;  %v19364_v11 = vld [vmem:[#allocation138_spill] sm:$0xff]  ;;  %v5293_v2 = vrot.slane %v16936_v48, 7  ;;  %v8616_v51 = vpack.c.bf16 %v19368_v24, %v19367_v37  ;;  %v19375_v26 = vld [vmem:[#allocation148_spill] sm:$0xff] }
 0x819   :  { %8993 = vmatprep.subr.bf16.mxu1 %v8992_v62  ;;  %v8614_v62 = vpack.c.bf16 %v19364_v11, %v19363_v47  ;;  %v5306_v11 = vsel %vm2504_vm0, %v5290_v40, %v5294_v27  ;;  %v9002_v37 = vpack.c.bf16 %v19375_v26, %v19374_v13  ;;  %v19380_v40 = vld [vmem:[#allocation775_spill] sm:$0xff]  ;;  %v19383_v13 = vld [vmem:[#allocation154_spill] sm:$0xff]  ;;  %v19384_v26 = vld [vmem:[#allocation152_spill] sm:$0xff] }
 0x81b   :  { %8611 = vmatpush1.bf16.msra.mxu0 %v8610_v54  ;;  %v9000_v54 = vpack.c.bf16 %v19370_v33, %v19369_v15  ;;  %v5305_v33 = vsel %vm2504_vm0, %v5289_v14, %v5293_v2  ;;  %v19379_v15 = vld [vmem:[#allocation157_spill] sm:$0xff] }
 0x81c   :  { %8995 = vmatpush1.bf16.msra.mxu1 %v8994_v55  ;;  %8613 = vmatprep.subr.bf16.mxu0 %v8612_v58  ;;  %v19371_v55 = vld [vmem:[#allocation776_spill] sm:$0xff]  ;;  %v19373_v58 = vld [vmem:[#allocation146_spill] sm:$0xff] }
 0x81d   :  { %8997 = vmatprep.subr.bf16.mxu1 %v8996_v29  ;;  %v5322_v22 = vmul.f32 %v5310_v6, %v19371_v55  ;;  %v5321_v47 = vmul.f32 %v5309_v0, %v19371_v55  ;;  %v8618_v29 = vpack.c.bf16 %v19373_v58, %v19372_v36  ;;  %v19376_v6 = vld [vmem:[#allocation151_spill] sm:$0xff]  ;;  %v19378_v0 = vld [vmem:[#allocation153_spill] sm:$0xff]  ;;  %v19381_v36 = vrot.slane %v16946_v20, 7  ;;  %v19382_v58 = vld [vmem:[#allocation150_spill] sm:$0xff] }
 0x81e   :  { %5446 = vmatmul.mubr.f32.vlgmr.msra.gmra.mrb[16].mxu0 %v5317_v32  ;;  %v9004_v53 = vpack.c.bf16 %v19379_v15, %v19378_v0  ;;  %v19388_v0 = vld [vmem:[#allocation161_spill] sm:$0xff] }
 0x81f   :  { %5980 = vmatmul.mubr.f32.vlgmr.msra.gmra.mrb[16].mxu1 %v5317_v32  ;;  %8615 = vmatpush1.bf16.msra.mxu0 %v8614_v62  ;;  %v19377_v32 = vld [vmem:[#allocation155_spill] sm:$0xff]  ;;  %v5326_v62 = vmul.f32 %v5306_v11, %v19380_v40  ;;  %v5302_v14 = vsel %vm2504_vm0, %v5294_v27, %v19381_v36  ;;  %v19385_v11 = vld [vmem:[#allocation156_spill] sm:$0xff]  ;;  %v19389_v15 = vld [vmem:[#allocation165_spill] sm:$0xff] }
 0x820   :  { %8999 = vmatpush1.bf16.msra.mxu1 %v8998_v3  ;;  %8617 = vmatprep.subr.bf16.mxu0 %v8616_v51  ;;  %v8620_v24 = vpack.c.bf16 %v19377_v32, %v19376_v6  ;;  %v5325_v3 = vmul.f32 %v5305_v33, %v19380_v40  ;;  %v5288_v51 = vrot.slane %v16926_v49, 7  ;;  %v9006_v6 = vpack.c.bf16 %v19385_v11, %v19384_v26  ;;  %v19386_v33 = vld [vmem:[#allocation159_spill] sm:$0xff] }
 0x821   :  { %9001 = vmatprep.subr.bf16.mxu1 %v9000_v54  ;;  %5451 = vmatprep.mubr.f32.mxu0 %v5322_v22  ;;  %v18358_v54 = vrot.slane %v16950_v63, 7  ;;  %v19387_v32 = vld [vmem:[#allocation163_spill] sm:$0xff]  ;;  %v9008_v36 = vpack.c.bf16 %v19389_v15, %v19388_v0 }
 0x822   :  { %5985 = vmatprep.mubr.f32.mxu1 %v5322_v22  ;;  %5452 = vmatmul.mubr.f32.gmra.mrb[18].mxu0 %v5321_v47  ;;  %v8622_v22 = vpack.c.bf16 %v19383_v13, %v19382_v58  ;;  %v8624_v27 = vpack.c.bf16 %v19387_v32, %v19386_v33  ;;  %v19393_v13 = vld [vmem:[#allocation160_spill] sm:$0xff]  ;;  %v19398_v33 = vld [vmem:[#allocation173_spill] sm:$0xff] }
 0x823   :  { %5986 = vmatmul.mubr.f32.gmra.mrb[18].mxu1 %v5321_v47  ;;  %8619 = vmatpush1.bf16.msra.mxu0 %v8618_v29  ;;  %v5301_v47 = vsel %vm2504_vm0, %v5293_v2, %v5297_v7  ;;  %v19390_v29 = vld [vmem:[#allocation777_spill] sm:$0xff]  ;;  %v19391_v7 = vld [vmem:[#allocation158_spill] sm:$0xff] }
 0x824   :  { %9003 = vmatpush1.bf16.msra.mxu1 %v9002_v37  ;;  %8621 = vmatprep.subr.bf16.mxu0 %v8620_v24  ;;  %v5330_v37 = vmul.f32 %v5302_v14, %v19390_v29  ;;  %v5329_v58 = vmul.f32 %v5301_v47, %v19390_v29  ;;  %v19392_v2 = vld [vmem:[#allocation162_spill] sm:$0xff]  ;;  %v19396_v14 = vld [vmem:[#allocation171_spill] sm:$0xff]  ;;  %v19397_v47 = vld [vmem:[#allocation169_spill] sm:$0xff] }
 0x825   :  { %9005 = vmatprep.subr.bf16.mxu1 %v9004_v53  ;;  %5457 = vmatprep.mubr.f32.mxu0 %v5326_v62  ;;  %v5316_v53 = vsel %vm2504_vm0, %v18358_v54, %v5288_v51  ;;  %v8626_v24 = vpack.c.bf16 %v19392_v2, %v19391_v7  ;;  %v9012_v32 = vpack.c.bf16 %v19398_v33, %v19397_v47  ;;  %v19401_v7 = vld [vmem:[#allocation168_spill] sm:$0xff]  ;;  %v19403_v2 = vld [vmem:[#allocation175_spill] sm:$0xff]  ;;  %v19502_v54 = vld [vmem:[#allocation277_spill] sm:$0xff] }
 0x826   :  { %5991 = vmatprep.mubr.f32.mxu1 %v5326_v62  ;;  %5458 = vmatmul.mubr.f32.gmra.mrb[20].mxu0 %v5325_v3  ;;  %v19394_v62 = vld [vmem:[#allocation164_spill] sm:$0xff]  ;;  %v5320_v0 = vmul.f32 %v5316_v53, %v19278_v23  ;;  %v19408_v53 = vld [vmem:[#allocation178_spill] sm:$0xff] }
 0x827   :  { %5992 = vmatmul.mubr.f32.gmra.mrb[20].mxu1 %v5325_v3  ;;  %8623 = vmatpush1.bf16.msra.mxu0 %v8622_v22  ;;  %v9010_v26 = vpack.c.bf16 %v19394_v62, %v19393_v13  ;;  %v19395_v3 = vld [vmem:[#allocation167_spill] sm:$0xff]  ;;  %v19399_v22 = vld [vmem:[#allocation166_spill] sm:$0xff]  ;;  %v19410_v47 = vld [vmem:[#allocation180_spill] sm:$0xff] }
 0x828   :  { %9007 = vmatpush1.bf16.msra.mxu1 %v9006_v6  ;;  %8625 = vmatprep.subr.bf16.mxu0 %v8624_v27  ;;  %v8628_v11 = vpack.c.bf16 %v19396_v14, %v19395_v3  ;;  %v19400_v6 = vld [vmem:[#allocation170_spill] sm:$0xff]  ;;  %v19402_v27 = vld [vmem:[#allocation172_spill] sm:$0xff]  ;;  %v19404_v13 = vld [vmem:[#allocation179_spill] sm:$0xff] }
 0x829   :  { %9009 = vmatprep.subr.bf16.mxu1 %v9008_v36  ;;  %5463 = vmatprep.mubr.f32.mxu0 %v5330_v37  ;;  %v8630_v15 = vpack.c.bf16 %v19400_v6, %v19399_v22  ;;  %v9014_v36 = vpack.c.bf16 %v19402_v27, %v19401_v7  ;;  %v8632_v62 = vpack.c.bf16 %v19404_v13, %v19403_v2  ;;  %v19405_v3 = vld [vmem:[#allocation177_spill] sm:$0xff]  ;;  %v19415_v2 = vld [vmem:[#allocation182_spill] sm:$0xff]  ;;  %v19418_v13 = vld [vmem:[#allocation188_spill] sm:$0xff] }
 0x82a   :  { %5997 = vmatprep.mubr.f32.mxu1 %v5330_v37  ;;  %5464 = vmatmul.mubr.f32.gmra.mrb[22].mxu0 %v5329_v58  ;;  %v19406_v14 = vld [vmem:[#allocation181_spill] sm:$0xff] }
 0x82b   :  { %5998 = vmatmul.mubr.f32.gmra.mrb[22].mxu1 %v5329_v58  ;;  %8627 = vmatpush1.bf16.msra.mxu0 %v8626_v24  ;;  %v9016_v37 = vpack.c.bf16 %v19406_v14, %v19405_v3  ;;  %v19407_v58 = vld [vmem:[#allocation174_spill] sm:$0xff]  ;;  %v19413_v6 = vld [vmem:[#allocation185_spill] sm:$0xff]  ;;  %v19419_v14 = vld [vmem:[#allocation191_spill] sm:$0xff] }
 0x82c   :  { %9011 = vmatpush1.bf16.msra.mxu1 %v9010_v26  ;;  %8629 = vmatprep.subr.bf16.mxu0 %v8628_v11  ;;  %v8634_v24 = vpack.c.bf16 %v19408_v53, %v19407_v58  ;;  %v19409_v26 = vld [vmem:[#allocation176_spill] sm:$0xff]  ;;  %v19411_v11 = vld [vmem:[#allocation183_spill] sm:$0xff]  ;;  %v19414_v7 = vld [vmem:[#allocation189_spill] sm:$0xff] }
 0x82d   :  { %9013 = vmatprep.subr.bf16.mxu1 %v9012_v32  ;;  %5534 = vmatprep.mubr.f32.mxu0 %v5320_v0  ;;  %v9018_v33 = vpack.c.bf16 %v19410_v47, %v19409_v26  ;;  %v19412_v32 = vld [vmem:[#allocation187_spill] sm:$0xff]  ;;  %v9020_v27 = vpack.c.bf16 %v19414_v7, %v19413_v6  ;;  %v19422_v53 = vld [vmem:[#allocation197_spill] sm:$0xff]  ;;  %v19423_v47 = vld [vmem:[#allocation190_spill] sm:$0xff] }
 0x82e   :  { %6068 = vmatprep.mubr.f32.mxu1 %v5320_v0  ;;  %v8636_v22 = vpack.c.bf16 %v19412_v32, %v19411_v11  ;;  %v19416_v0 = vld [vmem:[#allocation186_spill] sm:$0xff]  ;;  %v19420_v58 = vld [vmem:[#allocation195_spill] sm:$0xff]  ;;  %v19426_v32 = vld [vmem:[#allocation196_spill] sm:$0xff] }
 0x82f   :  { %8631 = vmatpush1.bf16.msra.mxu0 %v8630_v15  ;;  %v8638_v15 = vpack.c.bf16 %v19416_v0, %v19415_v2  ;;  %v19424_v11 = vld [vmem:[#allocation194_spill] sm:$0xff]  ;;  %v19427_v7 = vld [vmem:[#allocation199_spill] sm:$0xff]  ;;  %v19430_v0 = vld [vmem:[#allocation205_spill] sm:$0xff] }
 0x830   :  { %9015 = vmatpush1.bf16.msra.mxu1 %v9014_v36  ;;  %8633 = vmatprep.subr.bf16.mxu0 %v8632_v62  ;;  %v19417_v36 = vld [vmem:[#allocation184_spill] sm:$0xff]  ;;  %v8640_v62 = vpack.c.bf16 %v19420_v58, %v19419_v14  ;;  %v19428_v2 = vld [vmem:[#allocation203_spill] sm:$0xff]  ;;  %v19432_v14 = vld [vmem:[#allocation202_spill] sm:$0xff] }
 0x831   :  { %9017 = vmatprep.subr.bf16.mxu1 %v9016_v37  ;;  %v9022_v3 = vpack.c.bf16 %v19418_v13, %v19417_v36  ;;  %v19421_v37 = vld [vmem:[#allocation193_spill] sm:$0xff]  ;;  %v19431_v13 = vld [vmem:[#allocation198_spill] sm:$0xff]  ;;  %v19434_v58 = vld [vmem:[#allocation204_spill] sm:$0xff] }
 0x832   :  { %v9024_v26 = vpack.c.bf16 %v19422_v53, %v19421_v37  ;;  %v19435_v53 = vld [vmem:[#allocation207_spill] sm:$0xff] }
 0x833   :  { %8635 = vmatpush1.bf16.msra.mxu0 %v8634_v24  ;;  %v8642_v24 = vpack.c.bf16 %v19424_v11, %v19423_v47  ;;  %v19436_v47 = vld [vmem:[#allocation211_spill] sm:$0xff]  ;;  %v19438_v11 = vld [vmem:[#allocation213_spill] sm:$0xff] }
 0x834   :  { %9019 = vmatpush1.bf16.msra.mxu1 %v9018_v33  ;;  %8637 = vmatprep.subr.bf16.mxu0 %v8636_v22  ;;  %v19425_v33 = vld [vmem:[#allocation192_spill] sm:$0xff]  ;;  %v8644_v22 = vpack.c.bf16 %v19428_v2, %v19427_v7  ;;  %v19440_v7 = vld [vmem:[#allocation210_spill] sm:$0xff] }
 0x835   :  { %9021 = vmatprep.subr.bf16.mxu1 %v9020_v27  ;;  %v9026_v6 = vpack.c.bf16 %v19426_v32, %v19425_v33  ;;  %v19429_v27 = vld [vmem:[#allocation201_spill] sm:$0xff]  ;;  %v19439_v32 = vld [vmem:[#allocation206_spill] sm:$0xff]  ;;  %v19442_v2 = vld [vmem:[#allocation212_spill] sm:$0xff] }
 0x836   :  { %v9028_v36 = vpack.c.bf16 %v19430_v0, %v19429_v27  ;;  %v19443_v0 = vld [vmem:[#allocation215_spill] sm:$0xff] }
 0x837   :  { %8639 = vmatpush1.bf16.msra.mxu0 %v8638_v15  ;;  %v8646_v15 = vpack.c.bf16 %v19432_v14, %v19431_v13  ;;  %v19444_v13 = vld [vmem:[#allocation219_spill] sm:$0xff]  ;;  %v19446_v14 = vld [vmem:[#allocation221_spill] sm:$0xff] }
 0x838   :  { %9023 = vmatpush1.bf16.msra.mxu1 %v9022_v3  ;;  %8641 = vmatprep.subr.bf16.mxu0 %v8640_v62  ;;  %v19433_v3 = vld [vmem:[#allocation200_spill] sm:$0xff]  ;;  %v8648_v62 = vpack.c.bf16 %v19436_v47, %v19435_v53  ;;  %v19448_v53 = vld [vmem:[#allocation218_spill] sm:$0xff] }
 0x839   :  { %9025 = vmatprep.subr.bf16.mxu1 %v9024_v26  ;;  %v9030_v37 = vpack.c.bf16 %v19434_v58, %v19433_v3  ;;  %v19437_v26 = vld [vmem:[#allocation209_spill] sm:$0xff]  ;;  %v19447_v58 = vld [vmem:[#allocation214_spill] sm:$0xff]  ;;  %v19450_v47 = vld [vmem:[#allocation220_spill] sm:$0xff] }
 0x83a   :  { %v9032_v33 = vpack.c.bf16 %v19438_v11, %v19437_v26  ;;  %v19451_v11 = vld [vmem:[#allocation223_spill] sm:$0xff] }
 0x83b   :  { %8643 = vmatpush1.bf16.msra.mxu0 %v8642_v24  ;;  %v8650_v24 = vpack.c.bf16 %v19440_v7, %v19439_v32  ;;  %v19452_v32 = vld [vmem:[#allocation227_spill] sm:$0xff]  ;;  %v19454_v7 = vld [vmem:[#allocation229_spill] sm:$0xff] }
 0x83c   :  { %9027 = vmatpush1.bf16.msra.mxu1 %v9026_v6  ;;  %8645 = vmatprep.subr.bf16.mxu0 %v8644_v22  ;;  %v19441_v6 = vld [vmem:[#allocation208_spill] sm:$0xff]  ;;  %v8652_v22 = vpack.c.bf16 %v19444_v13, %v19443_v0  ;;  %v19456_v0 = vld [vmem:[#allocation226_spill] sm:$0xff] }
 0x83d   :  { %9029 = vmatprep.subr.bf16.mxu1 %v9028_v36  ;;  %v9034_v27 = vpack.c.bf16 %v19442_v2, %v19441_v6  ;;  %v19445_v36 = vld [vmem:[#allocation217_spill] sm:$0xff]  ;;  %v19455_v2 = vld [vmem:[#allocation222_spill] sm:$0xff]  ;;  %v19458_v13 = vld [vmem:[#allocation228_spill] sm:$0xff] }
 0x83e   :  { %v9036_v3 = vpack.c.bf16 %v19446_v14, %v19445_v36  ;;  %v19459_v14 = vld [vmem:[#allocation231_spill] sm:$0xff] }
 0x83f   :  { %8647 = vmatpush1.bf16.msra.mxu0 %v8646_v15  ;;  %v8654_v15 = vpack.c.bf16 %v19448_v53, %v19447_v58  ;;  %v19460_v58 = vld [vmem:[#allocation235_spill] sm:$0xff]  ;;  %v19462_v53 = vld [vmem:[#allocation237_spill] sm:$0xff] }
 0x840   :  { %9031 = vmatpush1.bf16.msra.mxu1 %v9030_v37  ;;  %8649 = vmatprep.subr.bf16.mxu0 %v8648_v62  ;;  %v19449_v37 = vld [vmem:[#allocation216_spill] sm:$0xff]  ;;  %v8656_v62 = vpack.c.bf16 %v19452_v32, %v19451_v11  ;;  %v19464_v11 = vld [vmem:[#allocation234_spill] sm:$0xff] }
 0x841   :  { %9033 = vmatprep.subr.bf16.mxu1 %v9032_v33  ;;  %v9038_v26 = vpack.c.bf16 %v19450_v47, %v19449_v37  ;;  %v19453_v33 = vld [vmem:[#allocation225_spill] sm:$0xff]  ;;  %v19463_v47 = vld [vmem:[#allocation230_spill] sm:$0xff]  ;;  %v19466_v32 = vld [vmem:[#allocation236_spill] sm:$0xff] }
 0x842   :  { %v9040_v6 = vpack.c.bf16 %v19454_v7, %v19453_v33  ;;  %v19467_v7 = vld [vmem:[#allocation239_spill] sm:$0xff] }
 0x843   :  { %8651 = vmatpush1.bf16.msra.mxu0 %v8650_v24  ;;  %v8658_v24 = vpack.c.bf16 %v19456_v0, %v19455_v2  ;;  %v19468_v2 = vld [vmem:[#allocation243_spill] sm:$0xff]  ;;  %v19470_v0 = vld [vmem:[#allocation245_spill] sm:$0xff] }
 0x844   :  { %9035 = vmatpush1.bf16.msra.mxu1 %v9034_v27  ;;  %8653 = vmatprep.subr.bf16.mxu0 %v8652_v22  ;;  %v19457_v27 = vld [vmem:[#allocation224_spill] sm:$0xff]  ;;  %v8660_v22 = vpack.c.bf16 %v19460_v58, %v19459_v14  ;;  %v19472_v14 = vld [vmem:[#allocation242_spill] sm:$0xff] }
 0x845   :  { %9037 = vmatprep.subr.bf16.mxu1 %v9036_v3  ;;  %v9042_v36 = vpack.c.bf16 %v19458_v13, %v19457_v27  ;;  %v19461_v3 = vld [vmem:[#allocation233_spill] sm:$0xff]  ;;  %v19471_v13 = vld [vmem:[#allocation238_spill] sm:$0xff]  ;;  %v19474_v58 = vld [vmem:[#allocation244_spill] sm:$0xff] }
 0x846   :  { %v9044_v37 = vpack.c.bf16 %v19462_v53, %v19461_v3  ;;  %v19475_v53 = vld [vmem:[#allocation247_spill] sm:$0xff] }
 0x847   :  { %8655 = vmatpush1.bf16.msra.mxu0 %v8654_v15  ;;  %v8662_v15 = vpack.c.bf16 %v19464_v11, %v19463_v47  ;;  %v19476_v47 = vld [vmem:[#allocation251_spill] sm:$0xff]  ;;  %v19478_v11 = vld [vmem:[#allocation253_spill] sm:$0xff] }
 0x848   :  { %9039 = vmatpush1.bf16.msra.mxu1 %v9038_v26  ;;  %8657 = vmatprep.subr.bf16.mxu0 %v8656_v62  ;;  %v19465_v26 = vld [vmem:[#allocation232_spill] sm:$0xff]  ;;  %v8664_v62 = vpack.c.bf16 %v19468_v2, %v19467_v7  ;;  %v19480_v7 = vld [vmem:[#allocation250_spill] sm:$0xff] }
 0x849   :  { %9041 = vmatprep.subr.bf16.mxu1 %v9040_v6  ;;  %v9046_v33 = vpack.c.bf16 %v19466_v32, %v19465_v26  ;;  %v19469_v6 = vld [vmem:[#allocation241_spill] sm:$0xff]  ;;  %v19479_v32 = vld [vmem:[#allocation246_spill] sm:$0xff]  ;;  %v19482_v2 = vld [vmem:[#allocation252_spill] sm:$0xff] }
 0x84a   :  { %v9048_v27 = vpack.c.bf16 %v19470_v0, %v19469_v6  ;;  %v5287_v0 = vrot.slane %v16924_v50, 7 }
 0x84b   :  { %8659 = vmatpush1.bf16.msra.mxu0 %v8658_v24  ;;  %v8666_v24 = vpack.c.bf16 %v19472_v14, %v19471_v13  ;;  %v5299_v13 = vrot.slane %v16948_v28, 7 }
 0x84c   :  { %9043 = vmatpush1.bf16.msra.mxu1 %v9042_v36  ;;  %8661 = vmatprep.subr.bf16.mxu0 %v8660_v22  ;;  %v19473_v36 = vld [vmem:[#allocation240_spill] sm:$0xff]  ;;  %v8668_v22 = vpack.c.bf16 %v19476_v47, %v19475_v53  ;;  %v19488_v47 = vld [vmem:[#allocation258_spill] sm:$0xff] }
 0x84d   :  { %9045 = vmatprep.subr.bf16.mxu1 %v9044_v37  ;;  %v9050_v3 = vpack.c.bf16 %v19474_v58, %v19473_v36  ;;  %v19477_v37 = vld [vmem:[#allocation249_spill] sm:$0xff] }
 0x84e   :  { %v9052_v26 = vpack.c.bf16 %v19478_v11, %v19477_v37  ;;  %v19485_v36 = vld [vmem:[#allocation257_spill] sm:$0xff]  ;;  %v19489_v11 = vld [vmem:[#allocation256_spill] sm:$0xff] }
 0x84f   :  { %8663 = vmatpush1.bf16.msra.mxu0 %v8662_v15  ;;  %v8670_v15 = vpack.c.bf16 %v19480_v7, %v19479_v32  ;;  %v19486_v58 = vld [vmem:[#allocation261_spill] sm:$0xff]  ;;  %v19490_v32 = vld [vmem:[#allocation260_spill] sm:$0xff] }
 0x850   :  { %9047 = vmatpush1.bf16.msra.mxu1 %v9046_v33  ;;  %8665 = vmatprep.subr.bf16.mxu0 %v8664_v62  ;;  %v19481_v33 = vld [vmem:[#allocation248_spill] sm:$0xff]  ;;  %v19483_v62 = vld [vmem:[#allocation255_spill] sm:$0xff]  ;;  %v9056_v53 = vpack.c.bf16 %v19486_v58, %v19485_v36  ;;  %v9058_v7 = vpack.c.bf16 %v19490_v32, %v19489_v11  ;;  %v19494_v36 = vld [vmem:[#allocation269_spill] sm:$0xff] }
 0x851   :  { %9049 = vmatprep.subr.bf16.mxu1 %v9048_v27  ;;  %v9054_v6 = vpack.c.bf16 %v19482_v2, %v19481_v33  ;;  %v19484_v27 = vld [vmem:[#allocation259_spill] sm:$0xff]  ;;  %v19497_v11 = vld [vmem:[#allocation264_spill] sm:$0xff] }
 0x852   :  { %v8672_v14 = vpack.c.bf16 %v19484_v27, %v19483_v62  ;;  %v19491_v33 = vld [vmem:[#allocation263_spill] sm:$0xff]  ;;  %v19493_v27 = vld [vmem:[#allocation265_spill] sm:$0xff]  ;;  %v19498_v32 = vld [vmem:[#allocation268_spill] sm:$0xff] }
 0x853   :  { %8667 = vmatpush1.bf16.msra.mxu0 %v8666_v24  ;;  %v5292_v24 = vrot.slane %v16934_v60, 7  ;;  %v19492_v2 = vld [vmem:[#allocation267_spill] sm:$0xff] }
 0x854   :  { %9051 = vmatpush1.bf16.msra.mxu1 %v9050_v3  ;;  %8669 = vmatprep.subr.bf16.mxu0 %v8668_v22  ;;  %v19487_v3 = vld [vmem:[#allocation254_spill] sm:$0xff]  ;;  %v5315_v22 = vsel %vm2504_vm0, %v5299_v13, %v5287_v0  ;;  %v8676_v62 = vpack.c.bf16 %v19492_v2, %v19491_v33  ;;  %v9062_v33 = vpack.c.bf16 %v19498_v32, %v19497_v11  ;;  %v19505_v11 = vld [vmem:[#allocation272_spill] sm:$0xff] }
 0x855   :  { %9053 = vmatprep.subr.bf16.mxu1 %v9052_v26  ;;  %v8674_v37 = vpack.c.bf16 %v19488_v47, %v19487_v3  ;;  %v5291_v26 = vrot.slane %v16932_v31, 7  ;;  %v5312_v58 = vsel %vm2504_vm0, %v5288_v51, %v5292_v24  ;;  %v5296_v3 = vrot.slane %v16942_v4, 7  ;;  %v19495_v47 = vld [vmem:[#allocation262_spill] sm:$0xff]  ;;  %v19506_v32 = vld [vmem:[#allocation276_spill] sm:$0xff] }
 0x857   :  { %8671 = vmatpush1.bf16.msra.mxu0 %v8670_v15  ;;  %v9060_v15 = vpack.c.bf16 %v19494_v36, %v19493_v27  ;;  %v5311_v2 = vsel %vm2504_vm0, %v5287_v0, %v5291_v26  ;;  %v19500_v27 = vld [vmem:[#allocation275_spill] sm:$0xff]  ;;  %v19501_v36 = vld [vmem:[#allocation273_spill] sm:$0xff]  ;;  %v19503_v0 = vld [vmem:[#allocation270_spill] sm:$0xff] }
 0x858   :  { %9055 = vmatpush1.bf16.msra.mxu1 %v9054_v6  ;;  %8673 = vmatprep.subr.bf16.mxu0 %v8672_v14  ;;  %v5319_v6 = vmul.f32 %v5315_v22, %v19278_v23  ;;  %v19496_v14 = vld [vmem:[#allocation266_spill] sm:$0xff]  ;;  %v5295_v23 = vrot.slane %v16940_v5, 7  ;;  %v19499_v22 = vld [vmem:[#allocation271_spill] sm:$0xff] }
 0x859   :  { %9057 = vmatprep.subr.bf16.mxu1 %v9056_v53  ;;  %v8678_v53 = vpack.c.bf16 %v19496_v14, %v19495_v47  ;;  %v8680_v51 = vpack.c.bf16 %v19500_v27, %v19499_v22  ;;  %v5323_v47 = vmul.f32 %v5311_v2, %v19371_v55  ;;  %v5308_v14 = vsel %vm2504_vm0, %v5292_v24, %v5296_v3  ;;  %v19510_v2 = vld [vmem:[#allocation285_spill] sm:$0xff] }
 0x85a   :  { %v9066_v22 = vpack.c.bf16 %v19506_v32, %v19505_v11  ;;  %v5328_v24 = vmul.f32 %v5308_v14, %v19380_v40  ;;  %v19515_v11 = vld [vmem:[#allocation284_spill] sm:$0xff] }
 0x85b   :  { %8675 = vmatpush1.bf16.msra.mxu0 %v8674_v37  ;;  %v9064_v37 = vpack.c.bf16 %v19502_v54, %v19501_v36  ;;  %v5307_v54 = vsel %vm2504_vm0, %v5291_v26, %v5295_v23 }
 0x85c   :  { %9059 = vmatpush1.bf16.msra.mxu1 %v9058_v7  ;;  %8677 = vmatprep.subr.bf16.mxu0 %v8676_v62  ;;  %v5324_v7 = vmul.f32 %v5312_v58, %v19371_v55  ;;  %v19504_v62 = vld [vmem:[#allocation274_spill] sm:$0xff]  ;;  %v19507_v58 = vld [vmem:[#allocation279_spill] sm:$0xff]  ;;  %v19509_v55 = vld [vmem:[#allocation281_spill] sm:$0xff] }
 0x85d   :  { %9061 = vmatprep.subr.bf16.mxu1 %v9060_v15  ;;  %v8682_v15 = vpack.c.bf16 %v19504_v62, %v19503_v0  ;;  %v9068_v36 = vpack.c.bf16 %v19510_v2, %v19509_v55  ;;  %v19514_v62 = vld [vmem:[#allocation280_spill] sm:$0xff] }
 0x85e   :  { %5535 = vmatmul.mubr.f32.vlgmr.msra.gmra.mrb[16].mxu0 %v5319_v6  ;;  %v9070_v32 = vpack.c.bf16 %v19515_v11, %v19514_v62  ;;  %v19523_v55 = vld [vmem:[#allocation292_spill] sm:$0xff] }
 0x85f   :  { %6069 = vmatmul.mubr.f32.vlgmr.msra.gmra.mrb[16].mxu1 %v5319_v6  ;;  %8679 = vmatpush1.bf16.msra.mxu0 %v8678_v53  ;;  %v19508_v6 = vld [vmem:[#allocation283_spill] sm:$0xff]  ;;  %v5327_v53 = vmul.f32 %v5307_v54, %v19380_v40  ;;  %v19518_v54 = vld [vmem:[#allocation289_spill] sm:$0xff]  ;;  %v19530_v62 = vld [vmem:[#allocation296_spill] sm:$0xff] }
 0x860   :  { %9063 = vmatpush1.bf16.msra.mxu1 %v9062_v33  ;;  %8681 = vmatprep.subr.bf16.mxu0 %v8680_v51  ;;  %v8684_v27 = vpack.c.bf16 %v19508_v6, %v19507_v58  ;;  %v19511_v33 = vrot.slane %v16950_v63, 7  ;;  %v19512_v51 = vld [vmem:[#allocation278_spill] sm:$0xff]  ;;  %v19517_v40 = vld [vmem:[#allocation291_spill] sm:$0xff]  ;;  %v19519_v58 = vld [vmem:[#allocation293_spill] sm:$0xff] }
 0x861   :  { %9065 = vmatprep.subr.bf16.mxu1 %v9064_v37  ;;  %5540 = vmatprep.mubr.f32.mxu0 %v5324_v7  ;;  %v19513_v37 = vld [vmem:[#allocation282_spill] sm:$0xff]  ;;  %v9072_v6 = vpack.c.bf16 %v19519_v58, %v19518_v54  ;;  %v19531_v11 = vld [vmem:[#allocation300_spill] sm:$0xff]  ;;  %v19535_v54 = vld [vmem:[#allocation309_spill] sm:$0xff] }
 0x862   :  { %6074 = vmatprep.mubr.f32.mxu1 %v5324_v7  ;;  %5541 = vmatmul.mubr.f32.gmra.mrb[18].mxu0 %v5323_v47  ;;  %v5304_v26 = vsel %vm2504_vm0, %v5296_v3, %v19511_v33  ;;  %v8686_v0 = vpack.c.bf16 %v19513_v37, %v19512_v51  ;;  %v5303_v7 = vsel %vm2504_vm0, %v5295_v23, %v5299_v13  ;;  %v19521_v13 = vld [vmem:[#allocation290_spill] sm:$0xff]  ;;  %v19525_v33 = vld [vmem:[#allocation299_spill] sm:$0xff]  ;;  %v19527_v37 = vld [vmem:[#allocation301_spill] sm:$0xff] }
 0x863   :  { %6075 = vmatmul.mubr.f32.gmra.mrb[18].mxu1 %v5323_v47  ;;  %8683 = vmatpush1.bf16.msra.mxu0 %v8682_v15  ;;  %v19516_v47 = vld [vmem:[#allocation287_spill] sm:$0xff]  ;;  %v5332_v3 = vmul.f32 %v5304_v26, %v19390_v29  ;;  %v5331_v15 = vmul.f32 %v5303_v7, %v19390_v29  ;;  %v19528_v29 = vld [vmem:[#allocation294_spill] sm:$0xff] }
 0x864   :  { %9067 = vmatpush1.bf16.msra.mxu1 %v9066_v22  ;;  %8685 = vmatprep.subr.bf16.mxu0 %v8684_v27  ;;  %v8688_v14 = vpack.c.bf16 %v19517_v40, %v19516_v47  ;;  %v19520_v22 = vld [vmem:[#allocation286_spill] sm:$0xff]  ;;  %v19522_v27 = vld [vmem:[#allocation288_spill] sm:$0xff]  ;;  %v19532_v7 = vld [vmem:[#allocation303_spill] sm:$0xff] }
 0x865   :  { %9069 = vmatprep.subr.bf16.mxu1 %v9068_v36  ;;  %5546 = vmatprep.mubr.f32.mxu0 %v5328_v24  ;;  %v8690_v23 = vpack.c.bf16 %v19521_v13, %v19520_v22  ;;  %v9074_v2 = vpack.c.bf16 %v19523_v55, %v19522_v27  ;;  %v19524_v36 = vld [vmem:[#allocation295_spill] sm:$0xff]  ;;  %v19538_v22 = vld [vmem:[#allocation304_spill] sm:$0xff] }
 0x866   :  { %6080 = vmatprep.mubr.f32.mxu1 %v5328_v24  ;;  %5547 = vmatmul.mubr.f32.gmra.mrb[20].mxu0 %v5327_v53  ;;  %v8692_v51 = vpack.c.bf16 %v19525_v33, %v19524_v36  ;;  %v19526_v24 = vld [vmem:[#allocation297_spill] sm:$0xff]  ;;  %v19533_v47 = vld [vmem:[#allocation307_spill] sm:$0xff]  ;;  %v19539_v13 = vld [vmem:[#allocation308_spill] sm:$0xff] }
 0x867   :  { %6081 = vmatmul.mubr.f32.gmra.mrb[20].mxu1 %v5327_v53  ;;  %8687 = vmatpush1.bf16.msra.mxu0 %v8686_v0  ;;  %v9076_v26 = vpack.c.bf16 %v19527_v37, %v19526_v24  ;;  %v19529_v53 = vld [vmem:[#allocation298_spill] sm:$0xff]  ;;  %v8696_v40 = vpack.c.bf16 %v19533_v47, %v19532_v7  ;;  %v19540_v27 = vld [vmem:[#allocation311_spill] sm:$0xff]  ;;  %v19542_v36 = vld [vmem:[#allocation313_spill] sm:$0xff] }
 0x868   :  { %9071 = vmatpush1.bf16.msra.mxu1 %v9070_v32  ;;  %8689 = vmatprep.subr.bf16.mxu0 %v8688_v14  ;;  %v8694_v0 = vpack.c.bf16 %v19529_v53, %v19528_v29  ;;  %v9078_v32 = vpack.c.bf16 %v19531_v11, %v19530_v62  ;;  %v19534_v14 = vld [vmem:[#allocation305_spill] sm:$0xff]  ;;  %v19541_v55 = vld [vmem:[#allocation315_spill] sm:$0xff]  ;;  %v19544_v24 = vld [vmem:[#allocation310_spill] sm:$0xff] }
 0x869   :  { %9073 = vmatprep.subr.bf16.mxu1 %v9072_v6  ;;  %5552 = vmatprep.mubr.f32.mxu0 %v5332_v3  ;;  %v9080_v58 = vpack.c.bf16 %v19535_v54, %v19534_v14  ;;  %v19536_v6 = vld [vmem:[#allocation302_spill] sm:$0xff]  ;;  %v19543_v33 = vld [vmem:[#allocation317_spill] sm:$0xff]  ;;  %v19546_v29 = vld [vmem:[#allocation312_spill] sm:$0xff] }
 0x86a   :  { %6086 = vmatprep.mubr.f32.mxu1 %v5332_v3  ;;  %5553 = vmatmul.mubr.f32.gmra.mrb[22].mxu0 %v5331_v15  ;;  %v19537_v3 = vld [vmem:[#allocation306_spill] sm:$0xff]  ;;  %v19547_v53 = vld [vmem:[#allocation316_spill] sm:$0xff]  ;;  %v19548_v62 = vld [vmem:[#allocation319_spill] sm:$0xff] }
 0x86b   :  { %6087 = vmatmul.mubr.f32.gmra.mrb[22].mxu1 %v5331_v15  ;;  %8691 = vmatpush1.bf16.msra.mxu0 %v8690_v23  ;;  %v8698_v15 = vpack.c.bf16 %v19537_v3, %v19536_v6  ;;  %v9082_v23 = vpack.c.bf16 %v19539_v13, %v19538_v22  ;;  %v19545_v37 = vld [vmem:[#allocation314_spill] sm:$0xff]  ;;  %v19549_v11 = vld [vmem:[#allocation323_spill] sm:$0xff]  ;;  %v19550_v7 = vld [vmem:[#allocation321_spill] sm:$0xff] }
 0x86c   :  { %9075 = vmatpush1.bf16.msra.mxu1 %v9074_v2  ;;  %8693 = vmatprep.subr.bf16.mxu0 %v8692_v51  ;;  %v8700_v2 = vpack.c.bf16 %v19541_v55, %v19540_v27  ;;  %v9084_v51 = vpack.c.bf16 %v19543_v33, %v19542_v36  ;;  %v19551_v47 = vld [vmem:[#allocation325_spill] sm:$0xff]  ;;  %v19552_v14 = vld [vmem:[#allocation318_spill] sm:$0xff]  ;;  %v19554_v6 = vld [vmem:[#allocation320_spill] sm:$0xff] }
 0x86d   :  { %9077 = vmatprep.subr.bf16.mxu1 %v9076_v26  ;;  %5623 = vmatprep.mubr.f32.mxu0 %v16922_v17  ;;  %v8702_v26 = vpack.c.bf16 %v19545_v37, %v19544_v24  ;;  %v19553_v54 = vld [vmem:[#allocation322_spill] sm:$0xff]  ;;  %v19555_v3 = vld [vmem:[#allocation324_spill] sm:$0xff]  ;;  %v19556_v22 = vld [vmem:[#allocation327_spill] sm:$0xff] }
 0x86e   :  { %6157 = vmatprep.mubr.f32.mxu1 %v16922_v17  ;;  %v19557_v13 = vld [vmem:[#allocation331_spill] sm:$0xff]  ;;  %v19558_v27 = vld [vmem:[#allocation329_spill] sm:$0xff]  ;;  %v19560_v36 = vld [vmem:[#allocation326_spill] sm:$0xff] }
 0x86f   :  { %8695 = vmatpush1.bf16.msra.mxu0 %v8694_v0  ;;  %v9086_v0 = vpack.c.bf16 %v19547_v53, %v19546_v29  ;;  %v19559_v55 = vld [vmem:[#allocation333_spill] sm:$0xff]  ;;  %v19561_v33 = vld [vmem:[#allocation330_spill] sm:$0xff]  ;;  %v19562_v24 = vld [vmem:[#allocation328_spill] sm:$0xff] }
 0x870   :  { %9079 = vmatpush1.bf16.msra.mxu1 %v9078_v32  ;;  %8697 = vmatprep.subr.bf16.mxu0 %v8696_v40  ;;  %v8704_v32 = vpack.c.bf16 %v19549_v11, %v19548_v62  ;;  %v9088_v40 = vpack.c.bf16 %v19551_v47, %v19550_v7  ;;  %v19563_v37 = vld [vmem:[#allocation332_spill] sm:$0xff]  ;;  %v19564_v29 = vld [vmem:[#allocation335_spill] sm:$0xff]  ;;  %v19566_v62 = vld [vmem:[#allocation337_spill] sm:$0xff] }
 0x871   :  { %9081 = vmatprep.subr.bf16.mxu1 %v9080_v58  ;;  %v8706_v58 = vpack.c.bf16 %v19553_v54, %v19552_v14  ;;  %v19565_v53 = vld [vmem:[#allocation339_spill] sm:$0xff]  ;;  %v19567_v11 = vld [vmem:[#allocation341_spill] sm:$0xff]  ;;  %v19568_v7 = vld [vmem:[#allocation334_spill] sm:$0xff] }
 0x872   :  { %v19569_v47 = vld [vmem:[#allocation338_spill] sm:$0xff]  ;;  %v19570_v14 = vld [vmem:[#allocation336_spill] sm:$0xff] }
 0x873   :  { %8699 = vmatpush1.bf16.msra.mxu0 %v8698_v15  ;;  %v9090_v15 = vpack.c.bf16 %v19555_v3, %v19554_v6  ;;  %v19571_v54 = vld [vmem:[#allocation340_spill] sm:$0xff]  ;;  %v19572_v6 = vld [vmem:[#allocation343_spill] sm:$0xff] }
 0x874   :  { %9083 = vmatpush1.bf16.msra.mxu1 %v9082_v23  ;;  %8701 = vmatprep.subr.bf16.mxu0 %v8700_v2  ;;  %v8708_v23 = vpack.c.bf16 %v19557_v13, %v19556_v22  ;;  %v9092_v2 = vpack.c.bf16 %v19559_v55, %v19558_v27  ;;  %v19573_v3 = vld [vmem:[#allocation347_spill] sm:$0xff]  ;;  %v19574_v22 = vld [vmem:[#allocation345_spill] sm:$0xff]  ;;  %v19576_v27 = vld [vmem:[#allocation342_spill] sm:$0xff] }
 0x875   :  { %9085 = vmatprep.subr.bf16.mxu1 %v9084_v51  ;;  %v8710_v51 = vpack.c.bf16 %v19561_v33, %v19560_v36  ;;  %v19575_v13 = vld [vmem:[#allocation349_spill] sm:$0xff]  ;;  %v19577_v55 = vld [vmem:[#allocation346_spill] sm:$0xff]  ;;  %v19578_v36 = vld [vmem:[#allocation344_spill] sm:$0xff] }
 0x876   :  { %v19579_v33 = vld [vmem:[#allocation348_spill] sm:$0xff] }
 0x877   :  { %8703 = vmatpush1.bf16.msra.mxu0 %v8702_v26  ;;  %v9094_v26 = vpack.c.bf16 %v19563_v37, %v19562_v24  ;;  %v19580_v24 = vld [vmem:[#allocation351_spill] sm:$0xff] }
 0x878   :  { %9087 = vmatpush1.bf16.msra.mxu1 %v9086_v0  ;;  %8705 = vmatprep.subr.bf16.mxu0 %v8704_v32  ;;  %v8712_v0 = vpack.c.bf16 %v19565_v53, %v19564_v29  ;;  %v9096_v32 = vpack.c.bf16 %v19567_v11, %v19566_v62  ;;  %v19581_v37 = vld [vmem:[#allocation355_spill] sm:$0xff]  ;;  %v19582_v29 = vld [vmem:[#allocation353_spill] sm:$0xff]  ;;  %v19584_v62 = vld [vmem:[#allocation350_spill] sm:$0xff] }
 0x879   :  { %9089 = vmatprep.subr.bf16.mxu1 %v9088_v40  ;;  %v8714_v40 = vpack.c.bf16 %v19569_v47, %v19568_v7  ;;  %v19583_v53 = vld [vmem:[#allocation357_spill] sm:$0xff]  ;;  %v19585_v11 = vld [vmem:[#allocation354_spill] sm:$0xff]  ;;  %v19586_v7 = vld [vmem:[#allocation352_spill] sm:$0xff] }
 0x87a   :  { %v19587_v47 = vld [vmem:[#allocation356_spill] sm:$0xff] }
 0x87b   :  { %8707 = vmatpush1.bf16.msra.mxu0 %v8706_v58  ;;  %v9098_v58 = vpack.c.bf16 %v19571_v54, %v19570_v14  ;;  %v19588_v14 = vld [vmem:[#allocation359_spill] sm:$0xff] }
 0x87c   :  { %9091 = vmatpush1.bf16.msra.mxu1 %v9090_v15  ;;  %8709 = vmatprep.subr.bf16.mxu0 %v8708_v23  ;;  %v8716_v15 = vpack.c.bf16 %v19573_v3, %v19572_v6  ;;  %v9100_v23 = vpack.c.bf16 %v19575_v13, %v19574_v22  ;;  %v19589_v54 = vld [vmem:[#allocation363_spill] sm:$0xff]  ;;  %v19590_v6 = vld [vmem:[#allocation361_spill] sm:$0xff]  ;;  %v19592_v22 = vld [vmem:[#allocation358_spill] sm:$0xff] }
 0x87d   :  { %9093 = vmatprep.subr.bf16.mxu1 %v9092_v2  ;;  %v8718_v2 = vpack.c.bf16 %v19577_v55, %v19576_v27  ;;  %v19591_v3 = vld [vmem:[#allocation365_spill] sm:$0xff]  ;;  %v19593_v13 = vld [vmem:[#allocation362_spill] sm:$0xff]  ;;  %v19594_v27 = vld [vmem:[#allocation360_spill] sm:$0xff] }
 0x87e   :  { %v19595_v55 = vld [vmem:[#allocation364_spill] sm:$0xff] }
 0x87f   :  { %8711 = vmatpush1.bf16.msra.mxu0 %v8710_v51  ;;  %v9102_v51 = vpack.c.bf16 %v19579_v33, %v19578_v36  ;;  %v19596_v36 = vld [vmem:[#allocation367_spill] sm:$0xff] }
 0x880   :  { %9095 = vmatpush1.bf16.msra.mxu1 %v9094_v26  ;;  %8713 = vmatprep.subr.bf16.mxu0 %v8712_v0  ;;  %v8720_v26 = vpack.c.bf16 %v19581_v37, %v19580_v24  ;;  %v9104_v0 = vpack.c.bf16 %v19583_v53, %v19582_v29  ;;  %v19597_v33 = vld [vmem:[#allocation371_spill] sm:$0xff]  ;;  %v19598_v24 = vld [vmem:[#allocation369_spill] sm:$0xff]  ;;  %v19600_v29 = vld [vmem:[#allocation366_spill] sm:$0xff] }
 0x881   :  { %9097 = vmatprep.subr.bf16.mxu1 %v9096_v32  ;;  %v8722_v32 = vpack.c.bf16 %v19585_v11, %v19584_v62  ;;  %v19599_v37 = vld [vmem:[#allocation373_spill] sm:$0xff]  ;;  %v19601_v53 = vld [vmem:[#allocation370_spill] sm:$0xff]  ;;  %v19602_v62 = vld [vmem:[#allocation368_spill] sm:$0xff] }
 0x882   :  { %v19603_v11 = vld [vmem:[#allocation372_spill] sm:$0xff] }
 0x883   :  { %8715 = vmatpush1.bf16.msra.mxu0 %v8714_v40  ;;  %v9106_v40 = vpack.c.bf16 %v19587_v47, %v19586_v7  ;;  %v19604_v7 = vld [vmem:[#allocation375_spill] sm:$0xff] }
 0x884   :  { %9099 = vmatpush1.bf16.msra.mxu1 %v9098_v58  ;;  %8717 = vmatprep.subr.bf16.mxu0 %v8716_v15  ;;  %v8724_v58 = vpack.c.bf16 %v19589_v54, %v19588_v14  ;;  %v9108_v15 = vpack.c.bf16 %v19591_v3, %v19590_v6  ;;  %v19605_v47 = vld [vmem:[#allocation379_spill] sm:$0xff]  ;;  %v19606_v14 = vld [vmem:[#allocation377_spill] sm:$0xff]  ;;  %v19608_v6 = vld [vmem:[#allocation374_spill] sm:$0xff] }
 0x885   :  { %9101 = vmatprep.subr.bf16.mxu1 %v9100_v23  ;;  %v8726_v23 = vpack.c.bf16 %v19593_v13, %v19592_v22  ;;  %v19607_v54 = vld [vmem:[#allocation381_spill] sm:$0xff]  ;;  %v19609_v3 = vld [vmem:[#allocation378_spill] sm:$0xff]  ;;  %v19610_v22 = vld [vmem:[#allocation376_spill] sm:$0xff] }
 0x886   :  { %v19611_v13 = vld [vmem:[#allocation380_spill] sm:$0xff] }
 0x887   :  { %8719 = vmatpush1.bf16.msra.mxu0 %v8718_v2  ;;  %v9110_v2 = vpack.c.bf16 %v19595_v55, %v19594_v27  ;;  %v19612_v27 = vld [vmem:[#allocation383_spill] sm:$0xff] }
 0x888   :  { %9103 = vmatpush1.bf16.msra.mxu1 %v9102_v51  ;;  %8721 = vmatprep.subr.bf16.mxu0 %v8720_v26  ;;  %v8728_v51 = vpack.c.bf16 %v19597_v33, %v19596_v36  ;;  %v9112_v26 = vpack.c.bf16 %v19599_v37, %v19598_v24  ;;  %v19613_v55 = vld [vmem:[#allocation387_spill] sm:$0xff]  ;;  %v19614_v36 = vld [vmem:[#allocation385_spill] sm:$0xff]  ;;  %v19616_v24 = vld [vmem:[#allocation382_spill] sm:$0xff] }
 0x889   :  { %9105 = vmatprep.subr.bf16.mxu1 %v9104_v0  ;;  %v8730_v0 = vpack.c.bf16 %v19601_v53, %v19600_v29  ;;  %v19615_v33 = vld [vmem:[#allocation389_spill] sm:$0xff]  ;;  %v19617_v37 = vld [vmem:[#allocation386_spill] sm:$0xff]  ;;  %v19618_v29 = vld [vmem:[#allocation384_spill] sm:$0xff] }
 0x88a   :  { %v19619_v53 = vld [vmem:[#allocation388_spill] sm:$0xff] }
 0x88b   :  { %8723 = vmatpush1.bf16.msra.mxu0 %v8722_v32  ;;  %v9114_v32 = vpack.c.bf16 %v19603_v11, %v19602_v62  ;;  %v19620_v62 = vld [vmem:[#allocation391_spill] sm:$0xff] }
 0x88c   :  { %9107 = vmatpush1.bf16.msra.mxu1 %v9106_v40  ;;  %8725 = vmatprep.subr.bf16.mxu0 %v8724_v58  ;;  %v8732_v40 = vpack.c.bf16 %v19605_v47, %v19604_v7  ;;  %v9116_v58 = vpack.c.bf16 %v19607_v54, %v19606_v14  ;;  %v19621_v11 = vld [vmem:[#allocation395_spill] sm:$0xff]  ;;  %v19622_v7 = vld [vmem:[#allocation393_spill] sm:$0xff]  ;;  %v19624_v14 = vld [vmem:[#allocation390_spill] sm:$0xff] }
 0x88d   :  { %9109 = vmatprep.subr.bf16.mxu1 %v9108_v15  ;;  %v8734_v15 = vpack.c.bf16 %v19609_v3, %v19608_v6  ;;  %v19623_v47 = vld [vmem:[#allocation397_spill] sm:$0xff]  ;;  %v19625_v54 = vld [vmem:[#allocation394_spill] sm:$0xff]  ;;  %v19626_v6 = vld [vmem:[#allocation392_spill] sm:$0xff] }
 0x88e   :  { %v19627_v3 = vld [vmem:[#allocation396_spill] sm:$0xff] }
 0x88f   :  { %8727 = vmatpush1.bf16.msra.mxu0 %v8726_v23  ;;  %v9118_v23 = vpack.c.bf16 %v19611_v13, %v19610_v22  ;;  %v19628_v22 = vld [vmem:[#allocation399_spill] sm:$0xff] }
 0x890   :  { %9111 = vmatpush1.bf16.msra.mxu1 %v9110_v2  ;;  %8729 = vmatprep.subr.bf16.mxu0 %v8728_v51  ;;  %v8736_v2 = vpack.c.bf16 %v19613_v55, %v19612_v27  ;;  %v9120_v51 = vpack.c.bf16 %v19615_v33, %v19614_v36  ;;  %v19629_v13 = vld [vmem:[#allocation403_spill] sm:$0xff]  ;;  %v19630_v27 = vld [vmem:[#allocation401_spill] sm:$0xff]  ;;  %v19632_v36 = vld [vmem:[#allocation398_spill] sm:$0xff] }
 0x891   :  { %9113 = vmatprep.subr.bf16.mxu1 %v9112_v26  ;;  %v8738_v26 = vpack.c.bf16 %v19617_v37, %v19616_v24  ;;  %v19631_v55 = vld [vmem:[#allocation405_spill] sm:$0xff]  ;;  %v19633_v33 = vld [vmem:[#allocation402_spill] sm:$0xff]  ;;  %v19634_v24 = vld [vmem:[#allocation400_spill] sm:$0xff] }
 0x892   :  { %v19635_v37 = vld [vmem:[#allocation404_spill] sm:$0xff] }
 0x893   :  { %8731 = vmatpush1.bf16.msra.mxu0 %v8730_v0  ;;  %v9122_v0 = vpack.c.bf16 %v19619_v53, %v19618_v29  ;;  %v19636_v29 = vld [vmem:[#allocation407_spill] sm:$0xff] }
 0x894   :  { %9115 = vmatpush1.bf16.msra.mxu1 %v9114_v32  ;;  %8733 = vmatprep.subr.bf16.mxu0 %v8732_v40  ;;  %v8740_v32 = vpack.c.bf16 %v19621_v11, %v19620_v62  ;;  %v9124_v40 = vpack.c.bf16 %v19623_v47, %v19622_v7  ;;  %v19637_v53 = vld [vmem:[#allocation411_spill] sm:$0xff]  ;;  %v19638_v62 = vld [vmem:[#allocation409_spill] sm:$0xff]  ;;  %v19640_v7 = vld [vmem:[#allocation406_spill] sm:$0xff] }
 0x895   :  { %9117 = vmatprep.subr.bf16.mxu1 %v9116_v58  ;;  %v8742_v58 = vpack.c.bf16 %v19625_v54, %v19624_v14  ;;  %v19639_v11 = vld [vmem:[#allocation413_spill] sm:$0xff]  ;;  %v19641_v47 = vld [vmem:[#allocation410_spill] sm:$0xff]  ;;  %v19642_v14 = vld [vmem:[#allocation408_spill] sm:$0xff] }
 0x896   :  { %v19643_v54 = vld [vmem:[#allocation412_spill] sm:$0xff] }
 0x897   :  { %8735 = vmatpush1.bf16.msra.mxu0 %v8734_v15  ;;  %v9126_v15 = vpack.c.bf16 %v19627_v3, %v19626_v6  ;;  %v19644_v6 = vld [vmem:[#allocation415_spill] sm:$0xff] }
 0x898   :  { %9119 = vmatpush1.bf16.msra.mxu1 %v9118_v23  ;;  %8737 = vmatprep.subr.bf16.mxu0 %v8736_v2  ;;  %v8744_v23 = vpack.c.bf16 %v19629_v13, %v19628_v22  ;;  %v9128_v2 = vpack.c.bf16 %v19631_v55, %v19630_v27  ;;  %v19645_v3 = vld [vmem:[#allocation419_spill] sm:$0xff]  ;;  %v19646_v22 = vld [vmem:[#allocation417_spill] sm:$0xff]  ;;  %v19648_v27 = vld [vmem:[#allocation414_spill] sm:$0xff] }
 0x899   :  { %9121 = vmatprep.subr.bf16.mxu1 %v9120_v51  ;;  %v8746_v51 = vpack.c.bf16 %v19633_v33, %v19632_v36  ;;  %v19647_v13 = vld [vmem:[#allocation421_spill] sm:$0xff]  ;;  %v19649_v55 = vld [vmem:[#allocation418_spill] sm:$0xff]  ;;  %v19650_v36 = vld [vmem:[#allocation416_spill] sm:$0xff] }
 0x89a   :  { %v19651_v33 = vld [vmem:[#allocation420_spill] sm:$0xff] }
 0x89b   :  { %8739 = vmatpush1.bf16.msra.mxu0 %v8738_v26  ;;  %v9130_v26 = vpack.c.bf16 %v19635_v37, %v19634_v24  ;;  %v19652_v24 = vld [vmem:[#allocation423_spill] sm:$0xff] }
 0x89c   :  { %9123 = vmatpush1.bf16.msra.mxu1 %v9122_v0  ;;  %8741 = vmatprep.subr.bf16.mxu0 %v8740_v32  ;;  %v8748_v0 = vpack.c.bf16 %v19637_v53, %v19636_v29  ;;  %v9132_v32 = vpack.c.bf16 %v19639_v11, %v19638_v62  ;;  %v19653_v37 = vld [vmem:[#allocation427_spill] sm:$0xff]  ;;  %v19654_v29 = vld [vmem:[#allocation425_spill] sm:$0xff]  ;;  %v19656_v62 = vld [vmem:[#allocation422_spill] sm:$0xff] }
 0x89d   :  { %9125 = vmatprep.subr.bf16.mxu1 %v9124_v40  ;;  %v8750_v40 = vpack.c.bf16 %v19641_v47, %v19640_v7  ;;  %v19655_v53 = vld [vmem:[#allocation429_spill] sm:$0xff]  ;;  %v19657_v11 = vld [vmem:[#allocation426_spill] sm:$0xff]  ;;  %v19658_v7 = vld [vmem:[#allocation424_spill] sm:$0xff] }
 0x89e   :  { %5624 = vmatmul.mubr.f32.vlgmr.msra.gmra.mrb[16].mxu0 %v16920_v25  ;;  %v19659_v47 = vld [vmem:[#allocation428_spill] sm:$0xff] }
 0x89f   :  { %6158 = vmatmul.mubr.f32.vlgmr.msra.gmra.mrb[16].mxu1 %v16920_v25  ;;  %8743 = vmatpush1.bf16.msra.mxu0 %v8742_v58  ;;  %v9134_v58 = vpack.c.bf16 %v19643_v54, %v19642_v14  ;;  %v19660_v14 = vld [vmem:[#allocation431_spill] sm:$0xff] }
 0x8a0   :  { %9127 = vmatpush1.bf16.msra.mxu1 %v9126_v15  ;;  %8745 = vmatprep.subr.bf16.mxu0 %v8744_v23  ;;  %v8752_v15 = vpack.c.bf16 %v19645_v3, %v19644_v6  ;;  %v9136_v23 = vpack.c.bf16 %v19647_v13, %v19646_v22  ;;  %v19661_v54 = vld [vmem:[#allocation435_spill] sm:$0xff]  ;;  %v19662_v6 = vld [vmem:[#allocation433_spill] sm:$0xff]  ;;  %v19664_v22 = vld [vmem:[#allocation430_spill] sm:$0xff] }
 0x8a1   :  { %9129 = vmatprep.subr.bf16.mxu1 %v9128_v2  ;;  %5629 = vmatprep.mubr.f32.mxu0 %v16930_v46  ;;  %v8754_v2 = vpack.c.bf16 %v19649_v55, %v19648_v27  ;;  %v19663_v3 = vld [vmem:[#allocation437_spill] sm:$0xff]  ;;  %v19665_v13 = vld [vmem:[#allocation434_spill] sm:$0xff]  ;;  %v19666_v27 = vld [vmem:[#allocation432_spill] sm:$0xff] }
 0x8a2   :  { %6163 = vmatprep.mubr.f32.mxu1 %v16930_v46  ;;  %5630 = vmatmul.mubr.f32.gmra.mrb[18].mxu0 %v16928_v45  ;;  %v19667_v55 = vld [vmem:[#allocation436_spill] sm:$0xff] }
 0x8a3   :  { %6164 = vmatmul.mubr.f32.gmra.mrb[18].mxu1 %v16928_v45  ;;  %8747 = vmatpush1.bf16.msra.mxu0 %v8746_v51  ;;  %v9138_v51 = vpack.c.bf16 %v19651_v33, %v19650_v36  ;;  %v19668_v36 = vld [vmem:[#allocation439_spill] sm:$0xff] }
 0x8a4   :  { %9131 = vmatpush1.bf16.msra.mxu1 %v9130_v26  ;;  %8749 = vmatprep.subr.bf16.mxu0 %v8748_v0  ;;  %v8756_v26 = vpack.c.bf16 %v19653_v37, %v19652_v24  ;;  %v9140_v0 = vpack.c.bf16 %v19655_v53, %v19654_v29  ;;  %v19669_v33 = vld [vmem:[#allocation443_spill] sm:$0xff]  ;;  %v19670_v24 = vld [vmem:[#allocation441_spill] sm:$0xff]  ;;  %v19672_v29 = vld [vmem:[#allocation438_spill] sm:$0xff] }
 0x8a5   :  { %9133 = vmatprep.subr.bf16.mxu1 %v9132_v32  ;;  %5635 = vmatprep.mubr.f32.mxu0 %v16938_v59  ;;  %v8758_v32 = vpack.c.bf16 %v19657_v11, %v19656_v62  ;;  %v19671_v37 = vld [vmem:[#allocation445_spill] sm:$0xff]  ;;  %v19673_v53 = vld [vmem:[#allocation442_spill] sm:$0xff]  ;;  %v19674_v62 = vld [vmem:[#allocation440_spill] sm:$0xff] }
 0x8a6   :  { %6169 = vmatprep.mubr.f32.mxu1 %v16938_v59  ;;  %5636 = vmatmul.mubr.f32.gmra.mrb[20].mxu0 %v16936_v48  ;;  %v19675_v11 = vld [vmem:[#allocation444_spill] sm:$0xff] }
 0x8a7   :  { %6170 = vmatmul.mubr.f32.gmra.mrb[20].mxu1 %v16936_v48  ;;  %8751 = vmatpush1.bf16.msra.mxu0 %v8750_v40  ;;  %v9142_v40 = vpack.c.bf16 %v19659_v47, %v19658_v7  ;;  %v19676_v7 = vld [vmem:[#allocation447_spill] sm:$0xff] }
 0x8a8   :  { %9135 = vmatpush1.bf16.msra.mxu1 %v9134_v58  ;;  %8753 = vmatprep.subr.bf16.mxu0 %v8752_v15  ;;  %v8760_v58 = vpack.c.bf16 %v19661_v54, %v19660_v14  ;;  %v9144_v15 = vpack.c.bf16 %v19663_v3, %v19662_v6  ;;  %v19677_v47 = vld [vmem:[#allocation451_spill] sm:$0xff]  ;;  %v19678_v14 = vld [vmem:[#allocation449_spill] sm:$0xff]  ;;  %v19680_v6 = vld [vmem:[#allocation446_spill] sm:$0xff] }
 0x8a9   :  { %9137 = vmatprep.subr.bf16.mxu1 %v9136_v23  ;;  %5641 = vmatprep.mubr.f32.mxu0 %v16946_v20  ;;  %v8762_v23 = vpack.c.bf16 %v19665_v13, %v19664_v22  ;;  %v19679_v54 = vld [vmem:[#allocation453_spill] sm:$0xff]  ;;  %v19681_v3 = vld [vmem:[#allocation450_spill] sm:$0xff]  ;;  %v19682_v22 = vld [vmem:[#allocation448_spill] sm:$0xff] }
 0x8aa   :  { %6175 = vmatprep.mubr.f32.mxu1 %v16946_v20  ;;  %5642 = vmatmul.mubr.f32.gmra.mrb[22].mxu0 %v16944_v38  ;;  %v19683_v13 = vld [vmem:[#allocation452_spill] sm:$0xff] }
 0x8ab   :  { %6176 = vmatmul.mubr.f32.gmra.mrb[22].mxu1 %v16944_v38  ;;  %8755 = vmatpush1.bf16.msra.mxu0 %v8754_v2  ;;  %v9146_v2 = vpack.c.bf16 %v19667_v55, %v19666_v27  ;;  %v19684_v27 = vld [vmem:[#allocation455_spill] sm:$0xff] }
 0x8ac   :  { %9139 = vmatpush1.bf16.msra.mxu1 %v9138_v51  ;;  %8757 = vmatprep.subr.bf16.mxu0 %v8756_v26  ;;  %v8764_v51 = vpack.c.bf16 %v19669_v33, %v19668_v36  ;;  %v9148_v26 = vpack.c.bf16 %v19671_v37, %v19670_v24  ;;  %v19685_v55 = vld [vmem:[#allocation459_spill] sm:$0xff]  ;;  %v19686_v36 = vld [vmem:[#allocation457_spill] sm:$0xff]  ;;  %v19688_v24 = vld [vmem:[#allocation454_spill] sm:$0xff] }
 0x8ad   :  { %9141 = vmatprep.subr.bf16.mxu1 %v9140_v0  ;;  %5712 = vmatprep.mubr.f32.mxu0 %v16926_v49  ;;  %v8766_v0 = vpack.c.bf16 %v19673_v53, %v19672_v29  ;;  %v19687_v33 = vld [vmem:[#allocation461_spill] sm:$0xff]  ;;  %v19689_v37 = vld [vmem:[#allocation458_spill] sm:$0xff]  ;;  %v19690_v29 = vld [vmem:[#allocation456_spill] sm:$0xff] }
 0x8ae   :  { %6246 = vmatprep.mubr.f32.mxu1 %v16926_v49  ;;  %v19691_v53 = vld [vmem:[#allocation460_spill] sm:$0xff] }
 0x8af   :  { %8759 = vmatpush1.bf16.msra.mxu0 %v8758_v32  ;;  %v9150_v32 = vpack.c.bf16 %v19675_v11, %v19674_v62  ;;  %v19692_v62 = vld [vmem:[#allocation463_spill] sm:$0xff] }
 0x8b0   :  { %9143 = vmatpush1.bf16.msra.mxu1 %v9142_v40  ;;  %8761 = vmatprep.subr.bf16.mxu0 %v8760_v58  ;;  %v8768_v40 = vpack.c.bf16 %v19677_v47, %v19676_v7  ;;  %v9152_v58 = vpack.c.bf16 %v19679_v54, %v19678_v14  ;;  %v19693_v11 = vld [vmem:[#allocation467_spill] sm:$0xff]  ;;  %v19694_v7 = vld [vmem:[#allocation465_spill] sm:$0xff]  ;;  %v19696_v14 = vld [vmem:[#allocation462_spill] sm:$0xff] }
 0x8b1   :  { %9145 = vmatprep.subr.bf16.mxu1 %v9144_v15  ;;  %v8770_v15 = vpack.c.bf16 %v19681_v3, %v19680_v6  ;;  %v19695_v47 = vld [vmem:[#allocation469_spill] sm:$0xff]  ;;  %v19697_v54 = vld [vmem:[#allocation466_spill] sm:$0xff]  ;;  %v19698_v6 = vld [vmem:[#allocation464_spill] sm:$0xff] }
 0x8b2   :  { %v19699_v3 = vld [vmem:[#allocation468_spill] sm:$0xff] }
 0x8b3   :  { %8763 = vmatpush1.bf16.msra.mxu0 %v8762_v23  ;;  %v9154_v23 = vpack.c.bf16 %v19683_v13, %v19682_v22  ;;  %v19700_v22 = vld [vmem:[#allocation471_spill] sm:$0xff] }
 0x8b4   :  { %9147 = vmatpush1.bf16.msra.mxu1 %v9146_v2  ;;  %8765 = vmatprep.subr.bf16.mxu0 %v8764_v51  ;;  %v8772_v2 = vpack.c.bf16 %v19685_v55, %v19684_v27  ;;  %v9156_v51 = vpack.c.bf16 %v19687_v33, %v19686_v36  ;;  %v19701_v13 = vld [vmem:[#allocation475_spill] sm:$0xff]  ;;  %v19702_v27 = vld [vmem:[#allocation473_spill] sm:$0xff]  ;;  %v19704_v36 = vld [vmem:[#allocation470_spill] sm:$0xff] }
 0x8b5   :  { %9149 = vmatprep.subr.bf16.mxu1 %v9148_v26  ;;  %v8774_v26 = vpack.c.bf16 %v19689_v37, %v19688_v24  ;;  %v19703_v55 = vld [vmem:[#allocation477_spill] sm:$0xff]  ;;  %v19705_v33 = vld [vmem:[#allocation474_spill] sm:$0xff]  ;;  %v19706_v24 = vld [vmem:[#allocation472_spill] sm:$0xff] }
 0x8b6   :  { %v19707_v37 = vld [vmem:[#allocation476_spill] sm:$0xff] }
 0x8b7   :  { %8767 = vmatpush1.bf16.msra.mxu0 %v8766_v0  ;;  %v9158_v0 = vpack.c.bf16 %v19691_v53, %v19690_v29  ;;  %v19708_v29 = vld [vmem:[#allocation479_spill] sm:$0xff] }
 0x8b8   :  { %9151 = vmatpush1.bf16.msra.mxu1 %v9150_v32  ;;  %8769 = vmatprep.subr.bf16.mxu0 %v8768_v40  ;;  %v8776_v32 = vpack.c.bf16 %v19693_v11, %v19692_v62  ;;  %v9160_v40 = vpack.c.bf16 %v19695_v47, %v19694_v7  ;;  %v19709_v53 = vld [vmem:[#allocation483_spill] sm:$0xff]  ;;  %v19710_v62 = vld [vmem:[#allocation481_spill] sm:$0xff]  ;;  %v19712_v7 = vld [vmem:[#allocation478_spill] sm:$0xff] }
 0x8b9   :  { %9153 = vmatprep.subr.bf16.mxu1 %v9152_v58  ;;  %v8778_v58 = vpack.c.bf16 %v19697_v54, %v19696_v14  ;;  %v19711_v11 = vld [vmem:[#allocation485_spill] sm:$0xff]  ;;  %v19713_v47 = vld [vmem:[#allocation482_spill] sm:$0xff]  ;;  %v19714_v14 = vld [vmem:[#allocation480_spill] sm:$0xff] }
 0x8ba   :  { %v19715_v54 = vld [vmem:[#allocation484_spill] sm:$0xff] }
 0x8bb   :  { %8771 = vmatpush1.bf16.msra.mxu0 %v8770_v15  ;;  %v9162_v15 = vpack.c.bf16 %v19699_v3, %v19698_v6  ;;  %v19716_v6 = vld [vmem:[#allocation487_spill] sm:$0xff] }
 0x8bc   :  { %9155 = vmatpush1.bf16.msra.mxu1 %v9154_v23  ;;  %8773 = vmatprep.subr.bf16.mxu0 %v8772_v2  ;;  %v8780_v23 = vpack.c.bf16 %v19701_v13, %v19700_v22  ;;  %v9164_v2 = vpack.c.bf16 %v19703_v55, %v19702_v27  ;;  %v19717_v3 = vld [vmem:[#allocation491_spill] sm:$0xff]  ;;  %v19718_v22 = vld [vmem:[#allocation489_spill] sm:$0xff]  ;;  %v19720_v27 = vld [vmem:[#allocation486_spill] sm:$0xff] }
 0x8bd   :  { %9157 = vmatprep.subr.bf16.mxu1 %v9156_v51  ;;  %v8782_v51 = vpack.c.bf16 %v19705_v33, %v19704_v36  ;;  %v19719_v13 = vld [vmem:[#allocation493_spill] sm:$0xff]  ;;  %v19721_v55 = vld [vmem:[#allocation490_spill] sm:$0xff]  ;;  %v19722_v36 = vld [vmem:[#allocation488_spill] sm:$0xff] }
 0x8be   :  { %v19723_v33 = vld [vmem:[#allocation492_spill] sm:$0xff] }
 0x8bf   :  { %8775 = vmatpush1.bf16.msra.mxu0 %v8774_v26  ;;  %v9166_v26 = vpack.c.bf16 %v19707_v37, %v19706_v24  ;;  %v19724_v24 = vld [vmem:[#allocation495_spill] sm:$0xff] }
 0x8c0   :  { %9159 = vmatpush1.bf16.msra.mxu1 %v9158_v0  ;;  %8777 = vmatprep.subr.bf16.mxu0 %v8776_v32  ;;  %v8784_v0 = vpack.c.bf16 %v19709_v53, %v19708_v29  ;;  %v9168_v32 = vpack.c.bf16 %v19711_v11, %v19710_v62  ;;  %v19725_v37 = vld [vmem:[#allocation499_spill] sm:$0xff]  ;;  %v19726_v29 = vld [vmem:[#allocation497_spill] sm:$0xff]  ;;  %v19728_v62 = vld [vmem:[#allocation494_spill] sm:$0xff] }
 0x8c1   :  { %9161 = vmatprep.subr.bf16.mxu1 %v9160_v40  ;;  %v8786_v40 = vpack.c.bf16 %v19713_v47, %v19712_v7  ;;  %v19727_v53 = vld [vmem:[#allocation501_spill] sm:$0xff]  ;;  %v19729_v11 = vld [vmem:[#allocation498_spill] sm:$0xff]  ;;  %v19730_v7 = vld [vmem:[#allocation496_spill] sm:$0xff] }
 0x8c2   :  { %v19731_v47 = vld [vmem:[#allocation500_spill] sm:$0xff] }
 0x8c3   :  { %8779 = vmatpush1.bf16.msra.mxu0 %v8778_v58  ;;  %v9170_v58 = vpack.c.bf16 %v19715_v54, %v19714_v14  ;;  %v19732_v14 = vld [vmem:[#allocation503_spill] sm:$0xff] }
 0x8c4   :  { %9163 = vmatpush1.bf16.msra.mxu1 %v9162_v15  ;;  %8781 = vmatprep.subr.bf16.mxu0 %v8780_v23  ;;  %v8788_v15 = vpack.c.bf16 %v19717_v3, %v19716_v6  ;;  %v9172_v23 = vpack.c.bf16 %v19719_v13, %v19718_v22  ;;  %v19733_v54 = vld [vmem:[#allocation507_spill] sm:$0xff]  ;;  %v19734_v6 = vld [vmem:[#allocation505_spill] sm:$0xff]  ;;  %v19736_v22 = vld [vmem:[#allocation502_spill] sm:$0xff] }
 0x8c5   :  { %9165 = vmatprep.subr.bf16.mxu1 %v9164_v2  ;;  %v8790_v2 = vpack.c.bf16 %v19721_v55, %v19720_v27  ;;  %v19735_v3 = vld [vmem:[#allocation509_spill] sm:$0xff]  ;;  %v19737_v13 = vld [vmem:[#allocation506_spill] sm:$0xff]  ;;  %v19738_v27 = vld [vmem:[#allocation504_spill] sm:$0xff] }
 0x8c6   :  { %v19739_v55 = vld [vmem:[#allocation508_spill] sm:$0xff] }
 0x8c7   :  { %8783 = vmatpush1.bf16.msra.mxu0 %v8782_v51  ;;  %v9174_v51 = vpack.c.bf16 %v19723_v33, %v19722_v36  ;;  %v19740_v36 = vld [vmem:[#allocation511_spill] sm:$0xff] }
 0x8c8   :  { %9167 = vmatpush1.bf16.msra.mxu1 %v9166_v26  ;;  %8785 = vmatprep.subr.bf16.mxu0 %v8784_v0  ;;  %v8792_v26 = vpack.c.bf16 %v19725_v37, %v19724_v24  ;;  %v9176_v0 = vpack.c.bf16 %v19727_v53, %v19726_v29  ;;  %v19741_v33 = vld [vmem:[#allocation515_spill] sm:$0xff]  ;;  %v19742_v24 = vld [vmem:[#allocation513_spill] sm:$0xff]  ;;  %v19744_v29 = vld [vmem:[#allocation510_spill] sm:$0xff] }
 0x8c9   :  { %9169 = vmatprep.subr.bf16.mxu1 %v9168_v32  ;;  %v8794_v32 = vpack.c.bf16 %v19729_v11, %v19728_v62  ;;  %v19743_v37 = vld [vmem:[#allocation517_spill] sm:$0xff]  ;;  %v19745_v53 = vld [vmem:[#allocation514_spill] sm:$0xff]  ;;  %v19746_v62 = vld [vmem:[#allocation512_spill] sm:$0xff] }
 0x8ca   :  { %v19747_v11 = vld [vmem:[#allocation516_spill] sm:$0xff] }
 0x8cb   :  { %8787 = vmatpush1.bf16.msra.mxu0 %v8786_v40  ;;  %v9178_v40 = vpack.c.bf16 %v19731_v47, %v19730_v7  ;;  %v19748_v7 = vld [vmem:[#allocation519_spill] sm:$0xff] }
 0x8cc   :  { %9171 = vmatpush1.bf16.msra.mxu1 %v9170_v58  ;;  %8789 = vmatprep.subr.bf16.mxu0 %v8788_v15  ;;  %v8796_v58 = vpack.c.bf16 %v19733_v54, %v19732_v14  ;;  %v9180_v15 = vpack.c.bf16 %v19735_v3, %v19734_v6  ;;  %v19749_v47 = vld [vmem:[#allocation523_spill] sm:$0xff]  ;;  %v19750_v14 = vld [vmem:[#allocation521_spill] sm:$0xff]  ;;  %v19752_v6 = vld [vmem:[#allocation518_spill] sm:$0xff] }
 0x8cd   :  { %9173 = vmatprep.subr.bf16.mxu1 %v9172_v23  ;;  %v8798_v23 = vpack.c.bf16 %v19737_v13, %v19736_v22  ;;  %v19751_v54 = vld [vmem:[#allocation525_spill] sm:$0xff]  ;;  %v19753_v3 = vld [vmem:[#allocation522_spill] sm:$0xff]  ;;  %v19754_v22 = vld [vmem:[#allocation520_spill] sm:$0xff] }
 0x8ce   :  { %v19755_v13 = vld [vmem:[#allocation524_spill] sm:$0xff] }
 0x8cf   :  { %8791 = vmatpush1.bf16.msra.mxu0 %v8790_v2  ;;  %v9182_v2 = vpack.c.bf16 %v19739_v55, %v19738_v27  ;;  %v19756_v27 = vld [vmem:[#allocation527_spill] sm:$0xff] }
 0x8d0   :  { %9175 = vmatpush1.bf16.msra.mxu1 %v9174_v51  ;;  %8793 = vmatprep.subr.bf16.mxu0 %v8792_v26  ;;  %v8800_v51 = vpack.c.bf16 %v19741_v33, %v19740_v36  ;;  %v9184_v26 = vpack.c.bf16 %v19743_v37, %v19742_v24  ;;  %v19757_v55 = vld [vmem:[#allocation531_spill] sm:$0xff]  ;;  %v19758_v36 = vld [vmem:[#allocation529_spill] sm:$0xff]  ;;  %v19760_v24 = vld [vmem:[#allocation526_spill] sm:$0xff] }
 0x8d1   :  { %9177 = vmatprep.subr.bf16.mxu1 %v9176_v0  ;;  %v8802_v0 = vpack.c.bf16 %v19745_v53, %v19744_v29  ;;  %v19759_v33 = vld [vmem:[#allocation533_spill] sm:$0xff]  ;;  %v19761_v37 = vld [vmem:[#allocation530_spill] sm:$0xff]  ;;  %v19762_v29 = vld [vmem:[#allocation528_spill] sm:$0xff] }
 0x8d2   :  { %v19763_v53 = vld [vmem:[#allocation532_spill] sm:$0xff] }
 0x8d3   :  { %8795 = vmatpush1.bf16.msra.mxu0 %v8794_v32  ;;  %v9186_v32 = vpack.c.bf16 %v19747_v11, %v19746_v62  ;;  %v19764_v62 = vld [vmem:[#allocation535_spill] sm:$0xff] }
 0x8d4   :  { %9179 = vmatpush1.bf16.msra.mxu1 %v9178_v40  ;;  %8797 = vmatprep.subr.bf16.mxu0 %v8796_v58  ;;  %v8804_v40 = vpack.c.bf16 %v19749_v47, %v19748_v7  ;;  %v9188_v58 = vpack.c.bf16 %v19751_v54, %v19750_v14  ;;  %v19765_v11 = vld [vmem:[#allocation539_spill] sm:$0xff]  ;;  %v19766_v7 = vld [vmem:[#allocation537_spill] sm:$0xff]  ;;  %v5334_v14 = vrot.slane %v16922_v17, 1  ;;  %v5338_v54 = vrot.slane %v16930_v46, 1 }
 0x8d5   :  { %9181 = vmatprep.subr.bf16.mxu1 %v9180_v15  ;;  %v8806_v15 = vpack.c.bf16 %v19753_v3, %v19752_v6  ;;  %v19767_v47 = vld [vmem:[#allocation541_spill] sm:$0xff]  ;;  %v19769_v6 = vld [vmem:[#allocation538_spill] sm:$0xff]  ;;  %v19885_v46 = vld [vmem:[#allocation655_spill] sm:$0xff] }
 0x8d6   :  { %v19903_v17 = vld [vmem:[#allocation671_spill] sm:$0xff] }
 0x8d7   :  { %8799 = vmatpush1.bf16.msra.mxu0 %v8798_v23  ;;  %v9190_v23 = vpack.c.bf16 %v19755_v13, %v19754_v22  ;;  %v19771_v22 = vld [vmem:[#allocation540_spill] sm:$0xff] }
 0x8d8   :  { %9183 = vmatpush1.bf16.msra.mxu1 %v9182_v2  ;;  %8801 = vmatprep.subr.bf16.mxu0 %v8800_v51  ;;  %v8808_v2 = vpack.c.bf16 %v19757_v55, %v19756_v27  ;;  %v9192_v51 = vpack.c.bf16 %v19759_v33, %v19758_v36  ;;  %v19773_v27 = vld [vmem:[#allocation547_spill] sm:$0xff]  ;;  %v19775_v36 = vld [vmem:[#allocation549_spill] sm:$0xff] }
 0x8d9   :  { %9185 = vmatprep.subr.bf16.mxu1 %v9184_v26  ;;  %v8810_v26 = vpack.c.bf16 %v19761_v37, %v19760_v24  ;;  %v19776_v24 = vld [vmem:[#allocation542_spill] sm:$0xff] }
 0x8da   :  { %v19777_v37 = vld [vmem:[#allocation546_spill] sm:$0xff] }
 0x8db   :  { %8803 = vmatpush1.bf16.msra.mxu0 %v8802_v0  ;;  %v9194_v0 = vpack.c.bf16 %v19763_v53, %v19762_v29  ;;  %v19778_v29 = vld [vmem:[#allocation544_spill] sm:$0xff] }
 0x8dc   :  { %9187 = vmatpush1.bf16.msra.mxu1 %v9186_v32  ;;  %8805 = vmatprep.subr.bf16.mxu0 %v8804_v40  ;;  %v8812_v32 = vpack.c.bf16 %v19765_v11, %v19764_v62  ;;  %v9196_v40 = vpack.c.bf16 %v19767_v47, %v19766_v7  ;;  %v19779_v53 = vld [vmem:[#allocation548_spill] sm:$0xff]  ;;  %v19780_v62 = vld [vmem:[#allocation551_spill] sm:$0xff]  ;;  %v19782_v7 = vld [vmem:[#allocation553_spill] sm:$0xff] }
 0x8dd   :  { %9189 = vmatprep.subr.bf16.mxu1 %v9188_v58  ;;  %v19768_v58 = vld [vmem:[#allocation534_spill] sm:$0xff]  ;;  %v19781_v11 = vld [vmem:[#allocation555_spill] sm:$0xff]  ;;  %v19783_v47 = vld [vmem:[#allocation557_spill] sm:$0xff] }
 0x8de   :  { %5713 = vmatmul.mubr.f32.vlgmr.msra.gmra.mrb[16].mxu0 %v16924_v50  ;;  %v8814_v3 = vpack.c.bf16 %v19769_v6, %v19768_v58  ;;  %v19784_v58 = vld [vmem:[#allocation778_spill] sm:$0xff] }
 0x8df   :  { %6247 = vmatmul.mubr.f32.vlgmr.msra.gmra.mrb[16].mxu1 %v16924_v50  ;;  %8807 = vmatpush1.bf16.msra.mxu0 %v8806_v15  ;;  %v19770_v15 = vld [vmem:[#allocation536_spill] sm:$0xff] }
 0x8e0   :  { %9191 = vmatpush1.bf16.msra.mxu1 %v9190_v23  ;;  %8809 = vmatprep.subr.bf16.mxu0 %v8808_v2  ;;  %v9198_v13 = vpack.c.bf16 %v19771_v22, %v19770_v15  ;;  %v19772_v23 = vld [vmem:[#allocation543_spill] sm:$0xff]  ;;  %v19774_v2 = vld [vmem:[#allocation545_spill] sm:$0xff]  ;;  %v19786_v15 = vld [vmem:[#allocation554_spill] sm:$0xff] }
 0x8e1   :  { %9193 = vmatprep.subr.bf16.mxu1 %v9192_v51  ;;  %5718 = vmatprep.mubr.f32.mxu0 %v16934_v60  ;;  %v8816_v55 = vpack.c.bf16 %v19773_v27, %v19772_v23  ;;  %v9200_v33 = vpack.c.bf16 %v19775_v36, %v19774_v2  ;;  %v5358_v51 = vsel %vm2573_vm1, %v5334_v14, %v5338_v54  ;;  %v19788_v23 = vld [vmem:[#allocation556_spill] sm:$0xff]  ;;  %v19790_v2 = vld [vmem:[#allocation563_spill] sm:$0xff] }
 0x8e2   :  { %6252 = vmatprep.mubr.f32.mxu1 %v16934_v60  ;;  %5719 = vmatmul.mubr.f32.gmra.mrb[18].mxu0 %v16932_v31  ;;  %v5366_v6 = vmul.f32 %v5358_v51, %v19784_v58 }
 0x8e3   :  { %6253 = vmatmul.mubr.f32.gmra.mrb[18].mxu1 %v16932_v31  ;;  %8811 = vmatpush1.bf16.msra.mxu0 %v8810_v26  ;;  %v8818_v26 = vpack.c.bf16 %v19777_v37, %v19776_v24  ;;  %v19792_v24 = vld [vmem:[#allocation565_spill] sm:$0xff]  ;;  %v19793_v37 = vld [vmem:[#allocation558_spill] sm:$0xff] }
 0x8e4   :  { %9195 = vmatpush1.bf16.msra.mxu1 %v9194_v0  ;;  %8813 = vmatprep.subr.bf16.mxu0 %v8812_v32  ;;  %v9202_v0 = vpack.c.bf16 %v19779_v53, %v19778_v29  ;;  %v8820_v32 = vpack.c.bf16 %v19781_v11, %v19780_v62  ;;  %v19795_v53 = vld [vmem:[#allocation560_spill] sm:$0xff]  ;;  %v19797_v11 = vld [vmem:[#allocation567_spill] sm:$0xff] }
 0x8e5   :  { %9197 = vmatprep.subr.bf16.mxu1 %v9196_v40  ;;  %5724 = vmatprep.mubr.f32.mxu0 %v16942_v4  ;;  %v9204_v40 = vpack.c.bf16 %v19783_v47, %v19782_v7  ;;  %v19799_v47 = vld [vmem:[#allocation569_spill] sm:$0xff] }
 0x8e6   :  { %6258 = vmatprep.mubr.f32.mxu1 %v16942_v4  ;;  %5725 = vmatmul.mubr.f32.gmra.mrb[20].mxu0 %v16940_v5 }
 0x8e7   :  { %6259 = vmatmul.mubr.f32.gmra.mrb[20].mxu1 %v16940_v5  ;;  %8815 = vmatpush1.bf16.msra.mxu0 %v8814_v3  ;;  %v19785_v3 = vld [vmem:[#allocation550_spill] sm:$0xff] }
 0x8e8   :  { %9199 = vmatpush1.bf16.msra.mxu1 %v9198_v13  ;;  %8817 = vmatprep.subr.bf16.mxu0 %v8816_v55  ;;  %v8822_v22 = vpack.c.bf16 %v19786_v15, %v19785_v3  ;;  %v19787_v13 = vld [vmem:[#allocation552_spill] sm:$0xff]  ;;  %v19789_v55 = vld [vmem:[#allocation559_spill] sm:$0xff]  ;;  %v19801_v15 = vld [vmem:[#allocation566_spill] sm:$0xff] }
 0x8e9   :  { %9201 = vmatprep.subr.bf16.mxu1 %v9200_v33  ;;  %5730 = vmatprep.mubr.f32.mxu0 %v16950_v63  ;;  %v9206_v27 = vpack.c.bf16 %v19788_v23, %v19787_v13  ;;  %v8824_v36 = vpack.c.bf16 %v19790_v2, %v19789_v55  ;;  %v19791_v33 = vld [vmem:[#allocation561_spill] sm:$0xff]  ;;  %v19803_v13 = vld [vmem:[#allocation568_spill] sm:$0xff]  ;;  %v19805_v55 = vld [vmem:[#allocation575_spill] sm:$0xff] }
 0x8ea   :  { %6264 = vmatprep.mubr.f32.mxu1 %v16950_v63  ;;  %5731 = vmatmul.mubr.f32.gmra.mrb[22].mxu0 %v16948_v28  ;;  %v9208_v51 = vpack.c.bf16 %v19792_v24, %v19791_v33  ;;  %v19804_v23 = vld [vmem:[#allocation572_spill] sm:$0xff]  ;;  %v19806_v2 = vld [vmem:[#allocation579_spill] sm:$0xff]  ;;  %v19807_v33 = vld [vmem:[#allocation577_spill] sm:$0xff] }
 0x8eb   :  { %6265 = vmatmul.mubr.f32.gmra.mrb[22].mxu1 %v16948_v28  ;;  %8819 = vmatpush1.bf16.msra.mxu0 %v8818_v26  ;;  %v19794_v26 = vld [vmem:[#allocation562_spill] sm:$0xff]  ;;  %v19808_v24 = vld [vmem:[#allocation581_spill] sm:$0xff] }
 0x8ec   :  { %9203 = vmatpush1.bf16.msra.mxu1 %v9202_v0  ;;  %8821 = vmatprep.subr.bf16.mxu0 %v8820_v32  ;;  %v8826_v29 = vpack.c.bf16 %v19794_v26, %v19793_v37  ;;  %v19796_v0 = vld [vmem:[#allocation564_spill] sm:$0xff]  ;;  %v19798_v32 = vld [vmem:[#allocation571_spill] sm:$0xff]  ;;  %v19809_v37 = vld [vmem:[#allocation574_spill] sm:$0xff] }
 0x8ed   :  { %9205 = vmatprep.subr.bf16.mxu1 %v9204_v40  ;;  %5801 = vmatprep.mubr.f32.mxu0 %v5366_v6  ;;  %v9210_v62 = vpack.c.bf16 %v19796_v0, %v19795_v53  ;;  %v8828_v7 = vpack.c.bf16 %v19798_v32, %v19797_v11  ;;  %v19800_v40 = vld [vmem:[#allocation573_spill] sm:$0xff]  ;;  %v19810_v26 = vld [vmem:[#allocation578_spill] sm:$0xff]  ;;  %v19811_v53 = vld [vmem:[#allocation576_spill] sm:$0xff] }
 0x8ee   :  { %6335 = vmatprep.mubr.f32.mxu1 %v5366_v6  ;;  %v9212_v3 = vpack.c.bf16 %v19800_v40, %v19799_v47  ;;  %v19802_v6 = vld [vmem:[#allocation570_spill] sm:$0xff]  ;;  %v19812_v0 = vld [vmem:[#allocation580_spill] sm:$0xff]  ;;  %v19813_v11 = vld [vmem:[#allocation583_spill] sm:$0xff] }
 0x8ef   :  { %8823 = vmatpush1.bf16.msra.mxu0 %v8822_v22  ;;  %v8830_v22 = vpack.c.bf16 %v19802_v6, %v19801_v15  ;;  %v19814_v32 = vld [vmem:[#allocation587_spill] sm:$0xff]  ;;  %v19815_v47 = vld [vmem:[#allocation585_spill] sm:$0xff]  ;;  %v19817_v15 = vld [vmem:[#allocation582_spill] sm:$0xff] }
 0x8f0   :  { %9207 = vmatpush1.bf16.msra.mxu1 %v9206_v27  ;;  %8825 = vmatprep.subr.bf16.mxu0 %v8824_v36  ;;  %v9214_v27 = vpack.c.bf16 %v19804_v23, %v19803_v13  ;;  %v8832_v36 = vpack.c.bf16 %v19806_v2, %v19805_v55  ;;  %v19816_v40 = vld [vmem:[#allocation589_spill] sm:$0xff]  ;;  %v19818_v6 = vld [vmem:[#allocation586_spill] sm:$0xff]  ;;  %v19819_v13 = vld [vmem:[#allocation584_spill] sm:$0xff] }
 0x8f1   :  { %9209 = vmatprep.subr.bf16.mxu1 %v9208_v51  ;;  %v9216_v51 = vpack.c.bf16 %v19808_v24, %v19807_v33  ;;  %v19820_v23 = vld [vmem:[#allocation588_spill] sm:$0xff]  ;;  %v19821_v55 = vld [vmem:[#allocation591_spill] sm:$0xff]  ;;  %v19823_v33 = vld [vmem:[#allocation593_spill] sm:$0xff] }
 0x8f2   :  { %v19822_v2 = vld [vmem:[#allocation595_spill] sm:$0xff]  ;;  %v19824_v24 = vld [vmem:[#allocation597_spill] sm:$0xff] }
 0x8f3   :  { %8827 = vmatpush1.bf16.msra.mxu0 %v8826_v29  ;;  %v8834_v29 = vpack.c.bf16 %v19810_v26, %v19809_v37  ;;  %v19825_v37 = vld [vmem:[#allocation590_spill] sm:$0xff] }
 0x8f4   :  { %9211 = vmatpush1.bf16.msra.mxu1 %v9210_v62  ;;  %8829 = vmatprep.subr.bf16.mxu0 %v8828_v7  ;;  %v9218_v62 = vpack.c.bf16 %v19812_v0, %v19811_v53  ;;  %v8836_v7 = vpack.c.bf16 %v19814_v32, %v19813_v11  ;;  %v19826_v26 = vld [vmem:[#allocation594_spill] sm:$0xff]  ;;  %v19827_v53 = vld [vmem:[#allocation592_spill] sm:$0xff]  ;;  %v19829_v11 = vld [vmem:[#allocation599_spill] sm:$0xff] }
 0x8f5   :  { %9213 = vmatprep.subr.bf16.mxu1 %v9212_v3  ;;  %v9220_v3 = vpack.c.bf16 %v19816_v40, %v19815_v47  ;;  %v19828_v0 = vld [vmem:[#allocation596_spill] sm:$0xff]  ;;  %v19830_v32 = vld [vmem:[#allocation603_spill] sm:$0xff]  ;;  %v19831_v47 = vld [vmem:[#allocation601_spill] sm:$0xff] }
 0x8f6   :  { %v19832_v40 = vld [vmem:[#allocation605_spill] sm:$0xff] }
 0x8f7   :  { %8831 = vmatpush1.bf16.msra.mxu0 %v8830_v22  ;;  %v8838_v22 = vpack.c.bf16 %v19818_v6, %v19817_v15  ;;  %v19833_v15 = vld [vmem:[#allocation598_spill] sm:$0xff] }
 0x8f8   :  { %9215 = vmatpush1.bf16.msra.mxu1 %v9214_v27  ;;  %8833 = vmatprep.subr.bf16.mxu0 %v8832_v36  ;;  %v9222_v27 = vpack.c.bf16 %v19820_v23, %v19819_v13  ;;  %v8840_v36 = vpack.c.bf16 %v19822_v2, %v19821_v55  ;;  %v19834_v6 = vld [vmem:[#allocation602_spill] sm:$0xff]  ;;  %v19835_v13 = vld [vmem:[#allocation600_spill] sm:$0xff]  ;;  %v19837_v55 = vld [vmem:[#allocation607_spill] sm:$0xff] }
 0x8f9   :  { %9217 = vmatprep.subr.bf16.mxu1 %v9216_v51  ;;  %v9224_v51 = vpack.c.bf16 %v19824_v24, %v19823_v33  ;;  %v19836_v23 = vld [vmem:[#allocation604_spill] sm:$0xff]  ;;  %v19838_v2 = vld [vmem:[#allocation611_spill] sm:$0xff]  ;;  %v19839_v33 = vld [vmem:[#allocation609_spill] sm:$0xff] }
 0x8fa   :  { %v19840_v24 = vld [vmem:[#allocation613_spill] sm:$0xff] }
 0x8fb   :  { %8835 = vmatpush1.bf16.msra.mxu0 %v8834_v29  ;;  %v8842_v29 = vpack.c.bf16 %v19826_v26, %v19825_v37  ;;  %v19841_v37 = vld [vmem:[#allocation606_spill] sm:$0xff] }
 0x8fc   :  { %9219 = vmatpush1.bf16.msra.mxu1 %v9218_v62  ;;  %8837 = vmatprep.subr.bf16.mxu0 %v8836_v7  ;;  %v9226_v62 = vpack.c.bf16 %v19828_v0, %v19827_v53  ;;  %v8844_v7 = vpack.c.bf16 %v19830_v32, %v19829_v11  ;;  %v19842_v26 = vld [vmem:[#allocation610_spill] sm:$0xff]  ;;  %v19843_v53 = vld [vmem:[#allocation608_spill] sm:$0xff]  ;;  %v19845_v11 = vld [vmem:[#allocation615_spill] sm:$0xff] }
 0x8fd   :  { %9221 = vmatprep.subr.bf16.mxu1 %v9220_v3  ;;  %v9228_v3 = vpack.c.bf16 %v19832_v40, %v19831_v47  ;;  %v19844_v0 = vld [vmem:[#allocation612_spill] sm:$0xff]  ;;  %v19846_v32 = vld [vmem:[#allocation619_spill] sm:$0xff]  ;;  %v19847_v47 = vld [vmem:[#allocation617_spill] sm:$0xff] }
 0x8fe   :  { %v19848_v40 = vld [vmem:[#allocation621_spill] sm:$0xff] }
 0x8ff   :  { %8839 = vmatpush1.bf16.msra.mxu0 %v8838_v22  ;;  %v8846_v22 = vpack.c.bf16 %v19834_v6, %v19833_v15  ;;  %v19849_v15 = vld [vmem:[#allocation614_spill] sm:$0xff] }
 0x900   :  { %9223 = vmatpush1.bf16.msra.mxu1 %v9222_v27  ;;  %8841 = vmatprep.subr.bf16.mxu0 %v8840_v36  ;;  %v9230_v27 = vpack.c.bf16 %v19836_v23, %v19835_v13  ;;  %v8848_v36 = vpack.c.bf16 %v19838_v2, %v19837_v55  ;;  %v19850_v6 = vld [vmem:[#allocation618_spill] sm:$0xff]  ;;  %v19851_v13 = vld [vmem:[#allocation616_spill] sm:$0xff]  ;;  %v19853_v55 = vld [vmem:[#allocation623_spill] sm:$0xff] }
 0x901   :  { %9225 = vmatprep.subr.bf16.mxu1 %v9224_v51  ;;  %v9232_v51 = vpack.c.bf16 %v19840_v24, %v19839_v33  ;;  %v19852_v23 = vld [vmem:[#allocation620_spill] sm:$0xff]  ;;  %v19854_v2 = vld [vmem:[#allocation627_spill] sm:$0xff]  ;;  %v19855_v33 = vld [vmem:[#allocation625_spill] sm:$0xff] }
 0x902   :  { %v19856_v24 = vld [vmem:[#allocation629_spill] sm:$0xff] }
 0x903   :  { %8843 = vmatpush1.bf16.msra.mxu0 %v8842_v29  ;;  %v8850_v29 = vpack.c.bf16 %v19842_v26, %v19841_v37  ;;  %v19857_v37 = vld [vmem:[#allocation622_spill] sm:$0xff] }
 0x904   :  { %9227 = vmatpush1.bf16.msra.mxu1 %v9226_v62  ;;  %8845 = vmatprep.subr.bf16.mxu0 %v8844_v7  ;;  %v9234_v62 = vpack.c.bf16 %v19844_v0, %v19843_v53  ;;  %v8852_v7 = vpack.c.bf16 %v19846_v32, %v19845_v11  ;;  %v19858_v26 = vld [vmem:[#allocation626_spill] sm:$0xff]  ;;  %v19859_v53 = vld [vmem:[#allocation624_spill] sm:$0xff]  ;;  %v19861_v11 = vld [vmem:[#allocation631_spill] sm:$0xff] }
 0x905   :  { %9229 = vmatprep.subr.bf16.mxu1 %v9228_v3  ;;  %v9236_v3 = vpack.c.bf16 %v19848_v40, %v19847_v47  ;;  %v19860_v0 = vld [vmem:[#allocation628_spill] sm:$0xff]  ;;  %v19862_v32 = vld [vmem:[#allocation635_spill] sm:$0xff]  ;;  %v19863_v47 = vld [vmem:[#allocation633_spill] sm:$0xff] }
 0x906   :  { %v19864_v40 = vld [vmem:[#allocation637_spill] sm:$0xff] }
 0x907   :  { %8847 = vmatpush1.bf16.msra.mxu0 %v8846_v22  ;;  %v8854_v22 = vpack.c.bf16 %v19850_v6, %v19849_v15  ;;  %v19865_v15 = vld [vmem:[#allocation630_spill] sm:$0xff] }
 0x908   :  { %9231 = vmatpush1.bf16.msra.mxu1 %v9230_v27  ;;  %8849 = vmatprep.subr.bf16.mxu0 %v8848_v36  ;;  %v9238_v27 = vpack.c.bf16 %v19852_v23, %v19851_v13  ;;  %v8856_v36 = vpack.c.bf16 %v19854_v2, %v19853_v55  ;;  %v19866_v6 = vld [vmem:[#allocation634_spill] sm:$0xff]  ;;  %v19867_v13 = vld [vmem:[#allocation632_spill] sm:$0xff]  ;;  %v5333_v55 = vrot.slane %v16920_v25, 1  ;;  %v5337_v2 = vrot.slane %v16928_v45, 1 }
 0x909   :  { %9233 = vmatprep.subr.bf16.mxu1 %v9232_v51  ;;  %v9240_v51 = vpack.c.bf16 %v19856_v24, %v19855_v33  ;;  %v19868_v23 = vld [vmem:[#allocation636_spill] sm:$0xff]  ;;  %v19870_v33 = vld [vmem:[#allocation643_spill] sm:$0xff] }
 0x90a   :  { %v5357_v45 = vsel %vm2573_vm1, %v5333_v55, %v5337_v2 }
 0x90b   :  { %8851 = vmatpush1.bf16.msra.mxu0 %v8850_v29  ;;  %v8858_v29 = vpack.c.bf16 %v19858_v26, %v19857_v37  ;;  %v19872_v37 = vld [vmem:[#allocation645_spill] sm:$0xff] }
 0x90c   :  { %9235 = vmatpush1.bf16.msra.mxu1 %v9234_v62  ;;  %8853 = vmatprep.subr.bf16.mxu0 %v8852_v7  ;;  %v9242_v62 = vpack.c.bf16 %v19860_v0, %v19859_v53  ;;  %v8860_v7 = vpack.c.bf16 %v19862_v32, %v19861_v11  ;;  %v19873_v53 = vld [vmem:[#allocation638_spill] sm:$0xff]  ;;  %v19875_v11 = vld [vmem:[#allocation640_spill] sm:$0xff] }
 0x90d   :  { %9237 = vmatprep.subr.bf16.mxu1 %v9236_v3  ;;  %v9244_v3 = vpack.c.bf16 %v19864_v40, %v19863_v47  ;;  %v19874_v0 = vld [vmem:[#allocation642_spill] sm:$0xff]  ;;  %v19876_v32 = vld [vmem:[#allocation644_spill] sm:$0xff]  ;;  %v19877_v47 = vld [vmem:[#allocation647_spill] sm:$0xff] }
 0x90e   :  { %v9250_v25 = vpack.c.bf16 %v19876_v32, %v19875_v11  ;;  %v19878_v40 = vld [vmem:[#allocation651_spill] sm:$0xff] }
 0x90f   :  { %8855 = vmatpush1.bf16.msra.mxu0 %v8854_v22  ;;  %v8862_v22 = vpack.c.bf16 %v19866_v6, %v19865_v15  ;;  %v19879_v15 = vld [vmem:[#allocation649_spill] sm:$0xff]  ;;  %v19889_v11 = vld [vmem:[#allocation779_spill] sm:$0xff] }
 0x910   :  { %9239 = vmatpush1.bf16.msra.mxu1 %v9238_v27  ;;  %8857 = vmatprep.subr.bf16.mxu0 %v8856_v36  ;;  %v9246_v27 = vpack.c.bf16 %v19868_v23, %v19867_v13  ;;  %v19869_v36 = vld [vmem:[#allocation639_spill] sm:$0xff]  ;;  %v5346_v23 = vrot.slane %v16946_v20, 1  ;;  %v19888_v20 = vld [vmem:[#allocation661_spill] sm:$0xff] }
 0x911   :  { %9241 = vmatprep.subr.bf16.mxu1 %v9240_v51  ;;  %v8864_v24 = vpack.c.bf16 %v19870_v33, %v19869_v36  ;;  %v19871_v51 = vld [vmem:[#allocation641_spill] sm:$0xff]  ;;  %v19883_v33 = vld [vmem:[#allocation648_spill] sm:$0xff] }
 0x912   :  { %v9248_v26 = vpack.c.bf16 %v19872_v37, %v19871_v51 }
 0x913   :  { %8859 = vmatpush1.bf16.msra.mxu0 %v8858_v29  ;;  %v5342_v29 = vrot.slane %v16938_v59, 1  ;;  %v19880_v59 = vld [vmem:[#allocation653_spill] sm:$0xff] }
 0x914   :  { %9243 = vmatpush1.bf16.msra.mxu1 %v9242_v62  ;;  %8861 = vmatprep.subr.bf16.mxu0 %v8860_v7  ;;  %v8866_v62 = vpack.c.bf16 %v19874_v0, %v19873_v53  ;;  %v5341_v7 = vrot.slane %v16936_v48, 1  ;;  %v9252_v6 = vpack.c.bf16 %v19880_v59, %v19879_v15  ;;  %v19881_v48 = vld [vmem:[#allocation646_spill] sm:$0xff]  ;;  %v19886_v53 = vld [vmem:[#allocation659_spill] sm:$0xff]  ;;  %v19887_v0 = vld [vmem:[#allocation657_spill] sm:$0xff] }
 0x915   :  { %9245 = vmatprep.subr.bf16.mxu1 %v9244_v3  ;;  %v8868_v3 = vpack.c.bf16 %v19878_v40, %v19877_v47  ;;  %v5354_v13 = vsel %vm2573_vm1, %v5338_v54, %v5342_v29  ;;  %v8872_v54 = vpack.c.bf16 %v19886_v53, %v19885_v46  ;;  %v19892_v40 = vld [vmem:[#allocation656_spill] sm:$0xff]  ;;  %v19899_v46 = vld [vmem:[#allocation662_spill] sm:$0xff] }
 0x916   :  { %v5353_v37 = vsel %vm2573_vm1, %v5337_v2, %v5341_v7  ;;  %v5370_v32 = vmul.f32 %v5354_v13, %v19889_v11  ;;  %v19891_v2 = vld [vmem:[#allocation658_spill] sm:$0xff] }
 0x917   :  { %8863 = vmatpush1.bf16.msra.mxu0 %v8862_v22  ;;  %v5365_v22 = vmul.f32 %v5357_v45, %v19784_v58  ;;  %v5350_v45 = vsel %vm2573_vm1, %v5342_v29, %v5346_v23  ;;  %v19898_v29 = vld [vmem:[#allocation780_spill] sm:$0xff]  ;;  %v19900_v53 = vld [vmem:[#allocation666_spill] sm:$0xff] }
 0x918   :  { %9247 = vmatpush1.bf16.msra.mxu1 %v9246_v27  ;;  %8865 = vmatprep.subr.bf16.mxu0 %v8864_v24  ;;  %v19882_v27 = vld [vmem:[#allocation650_spill] sm:$0xff]  ;;  %v19884_v24 = vld [vmem:[#allocation652_spill] sm:$0xff] }
 0x919   :  { %9249 = vmatprep.subr.bf16.mxu1 %v9248_v26  ;;  %v8870_v36 = vpack.c.bf16 %v19882_v27, %v19881_v48  ;;  %v9254_v51 = vpack.c.bf16 %v19884_v24, %v19883_v33  ;;  %v5345_v26 = vrot.slane %v16944_v38, 1  ;;  %v19890_v38 = vld [vmem:[#allocation654_spill] sm:$0xff]  ;;  %v19896_v48 = vld [vmem:[#allocation665_spill] sm:$0xff] }
 0x91a   :  { %v8874_v47 = vpack.c.bf16 %v19891_v2, %v19890_v38  ;;  %v19897_v27 = vld [vmem:[#allocation669_spill] sm:$0xff] }
 0x91b   :  { %8867 = vmatpush1.bf16.msra.mxu0 %v8866_v62  ;;  %v9256_v62 = vpack.c.bf16 %v19888_v20, %v19887_v0  ;;  %v5349_v59 = vsel %vm2573_vm1, %v5341_v7, %v5345_v26  ;;  %v9260_v33 = vpack.c.bf16 %v19897_v27, %v19896_v48  ;;  %v5362_v7 = vsel %vm2573_vm1, %v5346_v23, %v5334_v14  ;;  %v19901_v0 = vld [vmem:[#allocation664_spill] sm:$0xff]  ;;  %v19905_v23 = vld [vmem:[#allocation673_spill] sm:$0xff]  ;;  %v19913_v48 = vld [vmem:[#allocation683_spill] sm:$0xff] }
 0x91c   :  { %9251 = vmatpush1.bf16.msra.mxu1 %v9250_v25  ;;  %8869 = vmatprep.subr.bf16.mxu0 %v8868_v3  ;;  %v5369_v25 = vmul.f32 %v5353_v37, %v19889_v11  ;;  %v19893_v3 = vld [vmem:[#allocation660_spill] sm:$0xff]  ;;  %v5373_v24 = vmul.f32 %v5349_v59, %v19898_v29  ;;  %v5340_v37 = vrot.slane %v16934_v60, 1  ;;  %v19907_v2 = vld [vmem:[#allocation781_spill] sm:$0xff] }
 0x91d   :  { %9253 = vmatprep.subr.bf16.mxu1 %v9252_v6  ;;  %v9258_v15 = vpack.c.bf16 %v19893_v3, %v19892_v40  ;;  %v19894_v6 = vld [vmem:[#allocation663_spill] sm:$0xff]  ;;  %v19902_v20 = vld [vmem:[#allocation668_spill] sm:$0xff]  ;;  %v19909_v3 = vld [vmem:[#allocation674_spill] sm:$0xff] }
 0x91e   :  { %5802 = vmatmul.mubr.f32.vlgmr.msra.gmra.mrb[16].mxu0 %v5365_v22  ;;  %v19910_v59 = vld [vmem:[#allocation672_spill] sm:$0xff] }
 0x91f   :  { %6336 = vmatmul.mubr.f32.vlgmr.msra.gmra.mrb[16].mxu1 %v5365_v22  ;;  %8871 = vmatpush1.bf16.msra.mxu0 %v8870_v36  ;;  %v19895_v22 = vld [vmem:[#allocation667_spill] sm:$0xff]  ;;  %v5374_v36 = vmul.f32 %v5350_v45, %v19898_v29  ;;  %v19906_v45 = vld [vmem:[#allocation677_spill] sm:$0xff] }
 0x920   :  { %9255 = vmatpush1.bf16.msra.mxu1 %v9254_v51  ;;  %8873 = vmatprep.subr.bf16.mxu0 %v8872_v54  ;;  %v8876_v13 = vpack.c.bf16 %v19895_v22, %v19894_v6  ;;  %v5336_v51 = vrot.slane %v16926_v49, 1  ;;  %v8878_v54 = vpack.c.bf16 %v19900_v53, %v19899_v46  ;;  %v9264_v38 = vpack.c.bf16 %v19906_v45, %v19905_v23  ;;  %v19911_v6 = vld [vmem:[#allocation676_spill] sm:$0xff]  ;;  %v19916_v46 = vld [vmem:[#allocation678_spill] sm:$0xff]  ;;  %v19923_v23 = vld [vmem:[#allocation693_spill] sm:$0xff] }
 0x921   :  { %9257 = vmatprep.subr.bf16.mxu1 %v9256_v62  ;;  %5807 = vmatprep.mubr.f32.mxu0 %v5370_v32  ;;  %v9262_v62 = vpack.c.bf16 %v19902_v20, %v19901_v0  ;;  %v9266_v22 = vpack.c.bf16 %v19911_v6, %v19910_v59  ;;  %v19917_v53 = vld [vmem:[#allocation682_spill] sm:$0xff]  ;;  %v19918_v0 = vld [vmem:[#allocation680_spill] sm:$0xff]  ;;  %v19929_v59 = vld [vmem:[#allocation699_spill] sm:$0xff] }
 0x922   :  { %6341 = vmatprep.mubr.f32.mxu1 %v5370_v32  ;;  %5808 = vmatmul.mubr.f32.gmra.mrb[18].mxu0 %v5369_v25  ;;  %v5361_v32 = vsel %vm2573_vm1, %v5345_v26, %v5333_v55  ;;  %v5360_v55 = vsel %vm2573_vm1, %v5336_v51, %v5340_v37  ;;  %v19908_v26 = vld [vmem:[#allocation670_spill] sm:$0xff]  ;;  %v19919_v20 = vld [vmem:[#allocation684_spill] sm:$0xff] }
 0x923   :  { %6342 = vmatmul.mubr.f32.gmra.mrb[18].mxu1 %v5369_v25  ;;  %8875 = vmatpush1.bf16.msra.mxu0 %v8874_v47  ;;  %v19904_v25 = vld [vmem:[#allocation675_spill] sm:$0xff]  ;;  %v5378_v47 = vmul.f32 %v5362_v7, %v19907_v2  ;;  %v5377_v40 = vmul.f32 %v5361_v32, %v19907_v2  ;;  %v5368_v7 = vmul.f32 %v5360_v55, %v19784_v58  ;;  %v19926_v55 = vld [vmem:[#allocation688_spill] sm:$0xff] }
 0x924   :  { %9259 = vmatpush1.bf16.msra.mxu1 %v9258_v15  ;;  %8877 = vmatprep.subr.bf16.mxu0 %v8876_v13  ;;  %v8880_v14 = vpack.c.bf16 %v19904_v25, %v19903_v17  ;;  %v8882_v15 = vpack.c.bf16 %v19909_v3, %v19908_v26  ;;  %v19912_v13 = vld [vmem:[#allocation679_spill] sm:$0xff]  ;;  %v19927_v26 = vld [vmem:[#allocation692_spill] sm:$0xff] }
 0x925   :  { %9261 = vmatprep.subr.bf16.mxu1 %v9260_v33  ;;  %5813 = vmatprep.mubr.f32.mxu0 %v5374_v36  ;;  %v8884_v27 = vpack.c.bf16 %v19913_v48, %v19912_v13  ;;  %v19914_v33 = vld [vmem:[#allocation681_spill] sm:$0xff]  ;;  %v19920_v32 = vld [vmem:[#allocation687_spill] sm:$0xff]  ;;  %v9274_v3 = vpack.c.bf16 %v19927_v26, %v19926_v55 }
 0x926   :  { %6347 = vmatprep.mubr.f32.mxu1 %v5374_v36  ;;  %5814 = vmatmul.mubr.f32.gmra.mrb[20].mxu0 %v5373_v24  ;;  %v19915_v36 = vld [vmem:[#allocation685_spill] sm:$0xff]  ;;  %v19921_v17 = vld [vmem:[#allocation691_spill] sm:$0xff] }
 0x927   :  { %6348 = vmatmul.mubr.f32.gmra.mrb[20].mxu1 %v5373_v24  ;;  %8879 = vmatpush1.bf16.msra.mxu0 %v8878_v54  ;;  %v9268_v24 = vpack.c.bf16 %v19915_v36, %v19914_v33  ;;  %v8886_v54 = vpack.c.bf16 %v19917_v53, %v19916_v46  ;;  %v8888_v25 = vpack.c.bf16 %v19921_v17, %v19920_v32  ;;  %v19931_v13 = vld [vmem:[#allocation701_spill] sm:$0xff]  ;;  %v19933_v33 = vld [vmem:[#allocation698_spill] sm:$0xff]  ;;  %v19936_v53 = vld [vmem:[#allocation703_spill] sm:$0xff] }
 0x928   :  { %9263 = vmatpush1.bf16.msra.mxu1 %v9262_v62  ;;  %8881 = vmatprep.subr.bf16.mxu0 %v8880_v14  ;;  %v9270_v62 = vpack.c.bf16 %v19919_v20, %v19918_v0  ;;  %v19922_v14 = vld [vmem:[#allocation689_spill] sm:$0xff]  ;;  %v19940_v17 = vld [vmem:[#allocation702_spill] sm:$0xff] }
 0x929   :  { %9265 = vmatprep.subr.bf16.mxu1 %v9264_v38  ;;  %5819 = vmatprep.mubr.f32.mxu0 %v5378_v47  ;;  %v9272_v45 = vpack.c.bf16 %v19923_v23, %v19922_v14  ;;  %v19924_v38 = vld [vmem:[#allocation686_spill] sm:$0xff]  ;;  %v19938_v20 = vld [vmem:[#allocation705_spill] sm:$0xff]  ;;  %v19942_v23 = vld [vmem:[#allocation704_spill] sm:$0xff] }
 0x92a   :  { %6353 = vmatprep.mubr.f32.mxu1 %v5378_v47  ;;  %5820 = vmatmul.mubr.f32.gmra.mrb[22].mxu0 %v5377_v40  ;;  %v19925_v47 = vld [vmem:[#allocation690_spill] sm:$0xff]  ;;  %v19946_v26 = vld [vmem:[#allocation713_spill] sm:$0xff] }
 0x92b   :  { %6354 = vmatmul.mubr.f32.gmra.mrb[22].mxu1 %v5377_v40  ;;  %8883 = vmatpush1.bf16.msra.mxu0 %v8882_v15  ;;  %v8890_v40 = vpack.c.bf16 %v19925_v47, %v19924_v38  ;;  %v19928_v15 = vld [vmem:[#allocation695_spill] sm:$0xff] }
 0x92c   :  { %9267 = vmatpush1.bf16.msra.mxu1 %v9266_v22  ;;  %8885 = vmatprep.subr.bf16.mxu0 %v8884_v27  ;;  %v8892_v6 = vpack.c.bf16 %v19929_v59, %v19928_v15  ;;  %v19930_v22 = vld [vmem:[#allocation697_spill] sm:$0xff]  ;;  %v19932_v27 = vld [vmem:[#allocation694_spill] sm:$0xff]  ;;  %v19944_v47 = vld [vmem:[#allocation711_spill] sm:$0xff] }
 0x92d   :  { %9269 = vmatprep.subr.bf16.mxu1 %v9268_v24  ;;  %5890 = vmatprep.mubr.f32.mxu0 %v5368_v7  ;;  %v9276_v48 = vpack.c.bf16 %v19931_v13, %v19930_v22  ;;  %v8894_v36 = vpack.c.bf16 %v19933_v33, %v19932_v27  ;;  %v19934_v24 = vld [vmem:[#allocation696_spill] sm:$0xff]  ;;  %v19948_v59 = vld [vmem:[#allocation710_spill] sm:$0xff]  ;;  %v19952_v33 = vld [vmem:[#allocation719_spill] sm:$0xff] }
 0x92e   :  { %6424 = vmatprep.mubr.f32.mxu1 %v5368_v7  ;;  %v19935_v7 = vld [vmem:[#allocation700_spill] sm:$0xff] }
 0x92f   :  { %8887 = vmatpush1.bf16.msra.mxu0 %v8886_v54  ;;  %v9278_v46 = vpack.c.bf16 %v19935_v7, %v19934_v24  ;;  %v19937_v54 = vld [vmem:[#allocation707_spill] sm:$0xff]  ;;  %v19950_v13 = vld [vmem:[#allocation712_spill] sm:$0xff]  ;;  %v19954_v7 = vld [vmem:[#allocation721_spill] sm:$0xff] }
 0x930   :  { %9271 = vmatpush1.bf16.msra.mxu1 %v9270_v62  ;;  %8889 = vmatprep.subr.bf16.mxu0 %v8888_v25  ;;  %v8896_v0 = vpack.c.bf16 %v19937_v54, %v19936_v53  ;;  %v19939_v62 = vld [vmem:[#allocation709_spill] sm:$0xff]  ;;  %v19941_v25 = vld [vmem:[#allocation706_spill] sm:$0xff] }
 0x931   :  { %9273 = vmatprep.subr.bf16.mxu1 %v9272_v45  ;;  %v9280_v32 = vpack.c.bf16 %v19939_v62, %v19938_v20  ;;  %v8898_v14 = vpack.c.bf16 %v19941_v25, %v19940_v17  ;;  %v19943_v45 = vld [vmem:[#allocation708_spill] sm:$0xff]  ;;  %v19956_v54 = vld [vmem:[#allocation718_spill] sm:$0xff]  ;;  %v19960_v25 = vld [vmem:[#allocation727_spill] sm:$0xff] }
 0x932   :  { %v9282_v38 = vpack.c.bf16 %v19943_v45, %v19942_v23  ;;  %v19958_v62 = vld [vmem:[#allocation720_spill] sm:$0xff]  ;;  %v19962_v45 = vld [vmem:[#allocation729_spill] sm:$0xff] }
 0x933   :  { %8891 = vmatpush1.bf16.msra.mxu0 %v8890_v40  ;;  %v19945_v40 = vld [vmem:[#allocation715_spill] sm:$0xff] }
 0x934   :  { %9275 = vmatpush1.bf16.msra.mxu1 %v9274_v3  ;;  %8893 = vmatprep.subr.bf16.mxu0 %v8892_v6  ;;  %v8900_v55 = vpack.c.bf16 %v19945_v40, %v19944_v47  ;;  %v19947_v3 = vld [vmem:[#allocation717_spill] sm:$0xff]  ;;  %v19949_v6 = vld [vmem:[#allocation714_spill] sm:$0xff] }
 0x935   :  { %9277 = vmatprep.subr.bf16.mxu1 %v9276_v48  ;;  %v9284_v15 = vpack.c.bf16 %v19947_v3, %v19946_v26  ;;  %v8902_v22 = vpack.c.bf16 %v19949_v6, %v19948_v59  ;;  %v19951_v48 = vld [vmem:[#allocation716_spill] sm:$0xff]  ;;  %v19964_v40 = vld [vmem:[#allocation726_spill] sm:$0xff]  ;;  %v19968_v6 = vld [vmem:[#allocation735_spill] sm:$0xff] }
 0x936   :  { %v9286_v27 = vpack.c.bf16 %v19951_v48, %v19950_v13  ;;  %v19966_v3 = vld [vmem:[#allocation728_spill] sm:$0xff]  ;;  %v19970_v48 = vld [vmem:[#allocation737_spill] sm:$0xff] }
 0x937   :  { %8895 = vmatpush1.bf16.msra.mxu0 %v8894_v36  ;;  %v19953_v36 = vld [vmem:[#allocation723_spill] sm:$0xff] }
 0x938   :  { %9279 = vmatpush1.bf16.msra.mxu1 %v9278_v46  ;;  %8897 = vmatprep.subr.bf16.mxu0 %v8896_v0  ;;  %v8904_v24 = vpack.c.bf16 %v19953_v36, %v19952_v33  ;;  %v19955_v46 = vld [vmem:[#allocation725_spill] sm:$0xff]  ;;  %v19957_v0 = vld [vmem:[#allocation722_spill] sm:$0xff] }
 0x939   :  { %9281 = vmatprep.subr.bf16.mxu1 %v9280_v32  ;;  %v9288_v53 = vpack.c.bf16 %v19955_v46, %v19954_v7  ;;  %v8906_v20 = vpack.c.bf16 %v19957_v0, %v19956_v54  ;;  %v19959_v32 = vld [vmem:[#allocation724_spill] sm:$0xff]  ;;  %v19972_v36 = vld [vmem:[#allocation734_spill] sm:$0xff]  ;;  %v19976_v0 = vld [vmem:[#allocation743_spill] sm:$0xff] }
 0x93a   :  { %v9290_v17 = vpack.c.bf16 %v19959_v32, %v19958_v62  ;;  %v19974_v46 = vld [vmem:[#allocation736_spill] sm:$0xff]  ;;  %v19978_v32 = vld [vmem:[#allocation745_spill] sm:$0xff] }
 0x93b   :  { %8899 = vmatpush1.bf16.msra.mxu0 %v8898_v14  ;;  %v19961_v14 = vld [vmem:[#allocation731_spill] sm:$0xff] }
 0x93c   :  { %9283 = vmatpush1.bf16.msra.mxu1 %v9282_v38  ;;  %8901 = vmatprep.subr.bf16.mxu0 %v8900_v55  ;;  %v8908_v23 = vpack.c.bf16 %v19961_v14, %v19960_v25  ;;  %v19963_v38 = vld [vmem:[#allocation733_spill] sm:$0xff]  ;;  %v19965_v55 = vld [vmem:[#allocation730_spill] sm:$0xff] }
 0x93d   :  { %9285 = vmatprep.subr.bf16.mxu1 %v9284_v15  ;;  %v9292_v47 = vpack.c.bf16 %v19963_v38, %v19962_v45  ;;  %v8910_v26 = vpack.c.bf16 %v19965_v55, %v19964_v40  ;;  %v19967_v15 = vld [vmem:[#allocation732_spill] sm:$0xff]  ;;  %v19980_v14 = vld [vmem:[#allocation742_spill] sm:$0xff]  ;;  %v19984_v55 = vld [vmem:[#allocation751_spill] sm:$0xff] }
 0x93e   :  { %v9294_v59 = vpack.c.bf16 %v19967_v15, %v19966_v3  ;;  %v19982_v38 = vld [vmem:[#allocation744_spill] sm:$0xff]  ;;  %v19986_v15 = vld [vmem:[#allocation753_spill] sm:$0xff] }
 0x93f   :  { %8903 = vmatpush1.bf16.msra.mxu0 %v8902_v22  ;;  %v19969_v22 = vld [vmem:[#allocation739_spill] sm:$0xff] }
 0x940   :  { %9287 = vmatpush1.bf16.msra.mxu1 %v9286_v27  ;;  %8905 = vmatprep.subr.bf16.mxu0 %v8904_v24  ;;  %v8912_v13 = vpack.c.bf16 %v19969_v22, %v19968_v6  ;;  %v19971_v27 = vld [vmem:[#allocation741_spill] sm:$0xff]  ;;  %v19973_v24 = vld [vmem:[#allocation738_spill] sm:$0xff] }
 0x941   :  { %9289 = vmatprep.subr.bf16.mxu1 %v9288_v53  ;;  %v9296_v33 = vpack.c.bf16 %v19971_v27, %v19970_v48  ;;  %v8914_v7 = vpack.c.bf16 %v19973_v24, %v19972_v36  ;;  %v19975_v53 = vld [vmem:[#allocation740_spill] sm:$0xff]  ;;  %v19988_v22 = vld [vmem:[#allocation750_spill] sm:$0xff]  ;;  %v19992_v24 = vld [vmem:[#allocation759_spill] sm:$0xff] }
 0x942   :  { %v9298_v54 = vpack.c.bf16 %v19975_v53, %v19974_v46  ;;  %v19990_v27 = vld [vmem:[#allocation752_spill] sm:$0xff]  ;;  %v19994_v53 = vld [vmem:[#allocation761_spill] sm:$0xff] }
 0x943   :  { %8907 = vmatpush1.bf16.msra.mxu0 %v8906_v20  ;;  %v19977_v20 = vld [vmem:[#allocation747_spill] sm:$0xff] }
 0x944   :  { %9291 = vmatpush1.bf16.msra.mxu1 %v9290_v17  ;;  %8909 = vmatprep.subr.bf16.mxu0 %v8908_v23  ;;  %v8916_v62 = vpack.c.bf16 %v19977_v20, %v19976_v0  ;;  %v19979_v17 = vld [vmem:[#allocation749_spill] sm:$0xff]  ;;  %v19981_v23 = vld [vmem:[#allocation746_spill] sm:$0xff] }
 0x945   :  { %9293 = vmatprep.subr.bf16.mxu1 %v9292_v47  ;;  %v9300_v25 = vpack.c.bf16 %v19979_v17, %v19978_v32  ;;  %v8918_v45 = vpack.c.bf16 %v19981_v23, %v19980_v14  ;;  %v19983_v47 = vld [vmem:[#allocation748_spill] sm:$0xff]  ;;  %v19996_v20 = vld [vmem:[#allocation758_spill] sm:$0xff]  ;;  %v5335_v23 = vrot.slane %v16924_v50, 1 }
 0x946   :  { %v9302_v40 = vpack.c.bf16 %v19983_v47, %v19982_v38  ;;  %v19998_v17 = vld [vmem:[#allocation760_spill] sm:$0xff]  ;;  %v20000_v38 = vld [vmem:[#allocation767_spill] sm:$0xff] }
 0x947   :  { %8911 = vmatpush1.bf16.msra.mxu0 %v8910_v26  ;;  %v19985_v26 = vld [vmem:[#allocation755_spill] sm:$0xff] }
 0x948   :  { %9295 = vmatpush1.bf16.msra.mxu1 %v9294_v59  ;;  %8913 = vmatprep.subr.bf16.mxu0 %v8912_v13  ;;  %v8920_v3 = vpack.c.bf16 %v19985_v26, %v19984_v55  ;;  %v19987_v59 = vld [vmem:[#allocation757_spill] sm:$0xff]  ;;  %v19989_v13 = vld [vmem:[#allocation754_spill] sm:$0xff]  ;;  %v20001_v47 = vld [vmem:[#allocation771_spill] sm:$0xff] }
 0x949   :  { %9297 = vmatprep.subr.bf16.mxu1 %v9296_v33  ;;  %v9304_v6 = vpack.c.bf16 %v19987_v59, %v19986_v15  ;;  %v8922_v48 = vpack.c.bf16 %v19989_v13, %v19988_v22  ;;  %v19991_v33 = vld [vmem:[#allocation756_spill] sm:$0xff]  ;;  %v20002_v55 = vld [vmem:[#allocation769_spill] sm:$0xff]  ;;  %v5344_v15 = vrot.slane %v16942_v4, 1  ;;  %v20004_v59 = vld [vmem:[#allocation766_spill] sm:$0xff] }
 0x94a   :  { %v9306_v36 = vpack.c.bf16 %v19991_v33, %v19990_v27  ;;  %v20003_v26 = vld [vmem:[#allocation773_spill] sm:$0xff]  ;;  %v20006_v13 = vld [vmem:[#allocation768_spill] sm:$0xff]  ;;  %v5343_v27 = vrot.slane %v16940_v5, 1  ;;  %v5348_v33 = vrot.slane %v16950_v63, 1  ;;  %v5347_v5 = vrot.slane %v16948_v28, 1 }
 0x94b   :  { %8915 = vmatpush1.bf16.msra.mxu0 %v8914_v7  ;;  %v19993_v7 = vld [vmem:[#allocation763_spill] sm:$0xff]  ;;  %v5356_v4 = vsel %vm2573_vm1, %v5340_v37, %v5344_v15 }
 0x94c   :  { %9299 = vmatpush1.bf16.msra.mxu1 %v9298_v54  ;;  %8917 = vmatprep.subr.bf16.mxu0 %v8916_v62  ;;  %v8924_v46 = vpack.c.bf16 %v19993_v7, %v19992_v24  ;;  %v19995_v54 = vld [vmem:[#allocation765_spill] sm:$0xff]  ;;  %v19997_v62 = vld [vmem:[#allocation762_spill] sm:$0xff]  ;;  %v5372_v24 = vmul.f32 %v5356_v4, %v19889_v11  ;;  %v5364_v28 = vsel %vm2573_vm1, %v5348_v33, %v5336_v51 }
 0x94d   :  { %9301 = vmatprep.subr.bf16.mxu1 %v9300_v25  ;;  %v9308_v0 = vpack.c.bf16 %v19995_v54, %v19994_v53  ;;  %v8926_v32 = vpack.c.bf16 %v19997_v62, %v19996_v20  ;;  %v19999_v25 = vld [vmem:[#allocation764_spill] sm:$0xff]  ;;  %v5380_v37 = vmul.f32 %v5364_v28, %v19907_v2  ;;  %v5363_v49 = vsel %vm2573_vm1, %v5347_v5, %v5335_v23  ;;  %v20011_v54 = vld [vmem:[#allocation785_spill] sm:$0xff]  ;;  %v20013_v20 = vld [vmem:[#allocation787_spill] sm:$0xff] }
 0x94e   :  { %v9310_v14 = vpack.c.bf16 %v19999_v25, %v19998_v17  ;;  %v5379_v51 = vmul.f32 %v5363_v49, %v19907_v2  ;;  %v20010_v53 = vld [vmem:[#allocation784_spill] sm:$0xff]  ;;  %v20015_v2 = vld [vmem:[#allocation789_spill] sm:$0xff]  ;;  %v20017_v17 = vld [vmem:[#allocation791_spill] sm:$0xff] }
 0x94f   :  { %8919 = vmatpush1.bf16.msra.mxu0 %v8918_v45  ;;  %v5339_v45 = vrot.slane %v16932_v31, 1  ;;  %v20014_v62 = vld [vmem:[#allocation788_spill] sm:$0xff] }
 0x950   :  { %9303 = vmatpush1.bf16.msra.mxu1 %v9302_v40  ;;  %8921 = vmatprep.subr.bf16.mxu0 %v8920_v3  ;;  %v8928_v40 = vpack.c.bf16 %v20001_v47, %v20000_v38  ;;  %v9312_v3 = vpack.c.bf16 %v20003_v26, %v20002_v55  ;;  %v20018_v25 = vld [vmem:[#allocation792_spill] sm:$0xff]  ;;  %v20023_v47 = vld [vmem:[#allocation797_spill] sm:$0xff]  ;;  %v20025_v55 = vld [vmem:[#allocation799_spill] sm:$0xff] }
 0x951   :  { %9305 = vmatprep.subr.bf16.mxu1 %v9304_v6  ;;  %v20005_v6 = vld [vmem:[#allocation770_spill] sm:$0xff]  ;;  %v5359_v31 = vsel %vm2573_vm1, %v5335_v23, %v5339_v45  ;;  %v5355_v7 = vsel %vm2573_vm1, %v5339_v45, %v5343_v27  ;;  %v20021_v45 = vld [vmem:[#allocation795_spill] sm:$0xff]  ;;  %v20022_v38 = vld [vmem:[#allocation796_spill] sm:$0xff] }
 0x952   :  { %v8930_v22 = vpack.c.bf16 %v20005_v6, %v20004_v59  ;;  %v5371_v60 = vmul.f32 %v5355_v7, %v19889_v11  ;;  %v20020_v23 = vld [vmem:[#allocation794_spill] sm:$0xff]  ;;  %v20026_v26 = vld [vmem:[#allocation800_spill] sm:$0xff]  ;;  %v20029_v59 = vld [vmem:[#allocation815_spill] sm:$0xff] }
 0x953   :  { %8923 = vmatpush1.bf16.msra.mxu0 %v8922_v48  ;;  %v20007_v48 = vld [vmem:[#allocation772_spill] sm:$0xff] }
 0x954   :  { %9307 = vmatpush1.bf16.msra.mxu1 %v9306_v36  ;;  %8925 = vmatprep.subr.bf16.mxu0 %v8924_v46  ;;  %v9314_v50 = vpack.c.bf16 %v20007_v48, %v20006_v13  ;;  %v5367_v36 = vmul.f32 %v5359_v31, %v19784_v58  ;;  %v5352_v46 = vsel %vm2573_vm1, %v5344_v15, %v5348_v33  ;;  %v20028_v15 = vld [vmem:[#allocation802_spill] sm:$0xff]  ;;  %v20030_v6 = vld [vmem:[#allocation816_spill] sm:$0xff] }
 0x955   :  { %9309 = vmatprep.subr.bf16.mxu1 %v9308_v0  ;;  %v5376_v63 = vmul.f32 %v5352_v46, %v19898_v29  ;;  %v5351_v58 = vsel %vm2573_vm1, %v5343_v27, %v5347_v5  ;;  %v20012_v0 = vld [vmem:[#allocation786_spill] sm:$0xff] }
 0x956   :  { %v5375_v11 = vmul.f32 %v5351_v58, %v19898_v29  ;;  %v20008_v29 = vld [vmem:[#allocation782_spill] sm:$0xff] }
 0x957   :  { %8927 = vmatpush1.bf16.msra.mxu0 %v8926_v32  ;;  %v20016_v32 = vld [vmem:[#allocation790_spill] sm:$0xff] }
 0x958   :  { %9311 = vmatpush1.bf16.msra.mxu1 %v9310_v14  ;;  %8929 = vmatprep.subr.bf16.mxu0 %v8928_v40  ;;  %v20019_v14 = vld [vmem:[#allocation793_spill] sm:$0xff]  ;;  %v20024_v40 = vld [vmem:[#allocation798_spill] sm:$0xff] }
 0x959   :  { %9313 = vmatprep.subr.bf16.mxu1 %v9312_v3  ;;  %v20027_v3 = vld [vmem:[#allocation801_spill] sm:$0xff] }
 0x95b   :  { %8931 = vmatpush1.bf16.msra.mxu0 %v8930_v22 }
 0x95c   :  { %9315 = vmatpush1.bf16.msra.mxu1 %v9314_v50  ;;  %9317 = vmatprep.subr.bf16.mxu0 %v16330_v30 }
 0x95d   :  { %9349 = vmatprep.subr.bf16.mxu1 %v16332_v44 }
 0x95e   :  { %5891 = vmatmul.mubr.f32.vlgmr.msra.gmra.mrb[16].mxu0 %v5367_v36 }
 0x95f   :  { %6425 = vmatmul.mubr.f32.vlgmr.msra.gmra.mrb[16].mxu1 %v5367_v36  ;;  %5896 = vmatprep.mubr.f32.mxu0 %v5372_v24 }
 0x960   :  { %6430 = vmatprep.mubr.f32.mxu1 %v5372_v24  ;;  %9319 = vmatpush3.bf16.msra.mxu0 %v16347_v19 }
 0x961   :  { %9351 = vmatpush3.bf16.msra.mxu1 %v16350_v21  ;;  %9321 = vmatprep.subr.bf16.mxu0 %v16377_v56 }
 0x962   :  { %9353 = vmatprep.subr.bf16.mxu1 %v16388_v16  ;;  %5897 = vmatmul.mubr.f32.gmra.mrb[18].mxu0 %v5371_v60 }
 0x963   :  { %6431 = vmatmul.mubr.f32.gmra.mrb[18].mxu1 %v5371_v60  ;;  %5902 = vmatprep.mubr.f32.mxu0 %v5376_v63 }
 0x964   :  { %6436 = vmatprep.mubr.f32.mxu1 %v5376_v63  ;;  %9323 = vmatpush3.bf16.msra.mxu0 %v16390_v41 }
 0x965   :  { %9355 = vmatpush3.bf16.msra.mxu1 %v16399_v18  ;;  %9325 = vmatprep.subr.bf16.mxu0 %v16413_v57 }
 0x966   :  { %9357 = vmatprep.subr.bf16.mxu1 %v16424_v52  ;;  %5903 = vmatmul.mubr.f32.gmra.mrb[20].mxu0 %v5375_v11 }
 0x967   :  { %6437 = vmatmul.mubr.f32.gmra.mrb[20].mxu1 %v5375_v11  ;;  %5908 = vmatprep.mubr.f32.mxu0 %v5380_v37 }
 0x968   :  { %6442 = vmatprep.mubr.f32.mxu1 %v5380_v37  ;;  %9327 = vmatpush3.bf16.msra.mxu0 %v16426_v43 }
 0x969   :  { %9359 = vmatpush3.bf16.msra.mxu1 %v20008_v29  ;;  %9329 = vmatprep.subr.bf16.mxu0 %v20009_v61 }
 0x96a   :  { %9361 = vmatprep.subr.bf16.mxu1 %v20010_v53  ;;  %5909 = vmatmul.mubr.f32.gmra.mrb[22].mxu0 %v5379_v51 }
 0x96b   :  { %6443 = vmatmul.mubr.f32.gmra.mrb[22].mxu1 %v5379_v51 }
 0x96c   :  { %9331 = vmatpush3.bf16.msra.mxu0 %v20011_v54 }
 0x96d   :  { %9363 = vmatpush3.bf16.msra.mxu1 %v20012_v0  ;;  %9333 = vmatprep.subr.bf16.mxu0 %v20013_v20 }
 0x96e   :  { %9365 = vmatprep.subr.bf16.mxu1 %v20014_v62 }
 0x970   :  { %9335 = vmatpush3.bf16.msra.mxu0 %v20015_v2 }
 0x971   :  { %9367 = vmatpush3.bf16.msra.mxu1 %v20016_v32  ;;  %9337 = vmatprep.subr.bf16.mxu0 %v20017_v17 }
 0x972   :  { %9369 = vmatprep.subr.bf16.mxu1 %v20018_v25 }
 0x974   :  { %9339 = vmatpush3.bf16.msra.mxu0 %v20019_v14 }
 0x975   :  { %9371 = vmatpush3.bf16.msra.mxu1 %v20020_v23  ;;  %9341 = vmatprep.subr.bf16.mxu0 %v20021_v45 }
 0x976   :  { %9373 = vmatprep.subr.bf16.mxu1 %v20022_v38 }
 0x978   :  { %9343 = vmatpush3.bf16.msra.mxu0 %v20023_v47 }
 0x979   :  { %9375 = vmatpush3.bf16.msra.mxu1 %v20024_v40  ;;  %9345 = vmatprep.subr.bf16.mxu0 %v20025_v55 }
 0x97a   :  { %9377 = vmatprep.subr.bf16.mxu1 %v20026_v26 }
 0x97c   :  { %9347 = vmatpush3.bf16.msra.mxu0 %v20027_v3 }
 0x97d   :  { %9379 = vmatpush3.bf16.msra.mxu1 %v20028_v15  ;;  %9381 = vmatprep.subr.bf16.mxu0 %v20029_v59 }
 0x97e   :  { %9389 = vmatprep.subr.bf16.mxu1 %v20030_v6 }
 0xa31   :  { %v17946_v22 = vpop.f32.mrb[16].mxu0 }
 0xa32   :  { %20031 = vst [vmem:[#allocation804_spill] sm:$0xff] %v17946_v22  ;;  %v17948_v13 = vpop.f32.mrb[16].mxu1  ;;  %v17950_v48 = vpop.f32.mrb[17].mxu0 }
 0xa33   :  { %20032 = vst [vmem:[#allocation807_spill] sm:$0xff] %v17948_v13  ;;  %20033 = vst [vmem:[#allocation810_spill] sm:$0xff] %v17950_v48  ;;  %v17952_v50 = vpop.f32.mrb[17].mxu1 }
 0xa34   :  { %20034 = vst [vmem:[#allocation813_spill] sm:$0xff] %v17952_v50 }
 0xa35   :  { %v17954_v31 = vpop.f32.mrb[18].mxu0 }
 0xa36   :  { %20035 = vst [vmem:[#allocation805_spill] sm:$0xff] %v17954_v31  ;;  %v17956_v27 = vpop.f32.mrb[18].mxu1  ;;  %v6449_v4 = vadd.f32 %v17954_v31, %v17946_v22  ;;  %v17962_v36 = vpop.f32.mrb[19].mxu0 }
 0xa37   :  { %20036 = vst [vmem:[#allocation808_spill] sm:$0xff] %v17956_v27  ;;  %v6467_v33 = vadd.f32 %v17956_v27, %v17948_v13  ;;  %20037 = vst [vmem:[#allocation811_spill] sm:$0xff] %v17962_v36  ;;  %v17964_v24 = vpop.f32.mrb[19].mxu1  ;;  %v6458_v7 = vadd.f32 %v17962_v36, %v17950_v48 }
 0xa38   :  { %20038 = vst [vmem:[#allocation814_spill] sm:$0xff] %v17964_v24  ;;  %v6476_v5 = vadd.f32 %v17964_v24, %v17952_v50 }
 0xa39   :  { %v17970_v46 = vpop.f32.mrb[20].mxu0 }
 0xa3a   :  { %20039 = vst [vmem:[#allocation7_spill] sm:$0xff] %v17970_v46  ;;  %v17972_v60 = vpop.f32.mrb[20].mxu1  ;;  %v6450_v63 = vadd.f32 %v6449_v4, %v17970_v46  ;;  %v17976_v28 = vpop.f32.mrb[21].mxu0 }
 0xa3b   :  { %20040 = vst [vmem:[#allocation11_spill] sm:$0xff] %v17972_v60  ;;  %v6468_v58 = vadd.f32 %v6467_v33, %v17972_v60  ;;  %20041 = vst [vmem:[#allocation9_spill] sm:$0xff] %v17976_v28  ;;  %v17978_v11 = vpop.f32.mrb[21].mxu1  ;;  %v6459_v37 = vadd.f32 %v6458_v7, %v17976_v28 }
 0xa3c   :  { %20042 = vst [vmem:[#allocation13_spill] sm:$0xff] %v17978_v11  ;;  %v6477_v49 = vadd.f32 %v6476_v5, %v17978_v11 }
 0xa3d   :  { %v17982_v51 = vpop.f32.mrb[22].mxu0 }
 0xa3e   :  { %20043 = vst [vmem:[#allocation6_spill] sm:$0xff] %v17982_v51  ;;  %v17984_v1 = vpop.f32.mrb[22].mxu1  ;;  %v6451_v24 = vadd.f32 %v6450_v63, %v17982_v51  ;;  %v17988_v36 = vpop.f32.mrb[23].mxu0 }
 0xa3f   :  { %20044 = vst [vmem:[#allocation10_spill] sm:$0xff] %v17984_v1  ;;  %v6469_v50 = vadd.f32 %v6468_v58, %v17984_v1  ;;  %20045 = vst [vmem:[#allocation8_spill] sm:$0xff] %v17988_v36  ;;  %v17990_v4 = vpop.f32.mrb[23].mxu1  ;;  %v6460_v33 = vadd.f32 %v6459_v37, %v17988_v36 }
 0xa40   :  { %20046 = vst [vmem:[#allocation12_spill] sm:$0xff] %v17990_v4  ;;  %v6478_v48 = vadd.f32 %v6477_v49, %v17990_v4  ;;  %v6452_v60 = vrot.slane %v6451_v24, 4 }
 0xa41   :  { %v6470_v7 = vrot.slane %v6469_v50, 4  ;;  %v6461_v28 = vrot.slane %v6460_v33, 4 }
 0xa42   :  { %v6479_v5 = vrot.slane %v6478_v48, 4  ;;  %v6453_v11 = vadd.f32 %v6452_v60, %v6451_v24 }
 0xa43   :  { %v6471_v27 = vadd.f32 %v6470_v7, %v6469_v50  ;;  %v6462_v13 = vadd.f32 %v6461_v28, %v6460_v33  ;;  %v20061_v28 = vld [vmem:[#allocation810_spill] sm:$0xff]  ;;  %v20063_v33 = vld [vmem:[#allocation9_spill] sm:$0xff] }
 0xa44   :  { %v6480_v46 = vadd.f32 %v6479_v5, %v6478_v48  ;;  %v6454_v31 = vrot.slane %v6453_v11, 2 }
 0xa45   :  { %v6472_v63 = vrot.slane %v6471_v27, 2  ;;  %v6463_v51 = vrot.slane %v6462_v13, 2 }
 0xa46   :  { %v6481_v58 = vrot.slane %v6480_v46, 2  ;;  %v6455_v1 = vadd.f32 %v6454_v31, %v6453_v11 }
 0xa47   :  { %v6473_v22 = vadd.f32 %v6472_v63, %v6471_v27  ;;  %v6464_v8 = vadd.f32 %v6463_v51, %v6462_v13  ;;  %v20062_v51 = vld [vmem:[#allocation811_spill] sm:$0xff]  ;;  %v20064_v63 = vld [vmem:[#allocation8_spill] sm:$0xff] }
 0xa48   :  { %v6482_v6 = vadd.f32 %v6481_v58, %v6480_v46  ;;  %v6456_v59 = vrot.slane %v6455_v1, 1 }
 0xa49   :  { %v6474_v37 = vrot.slane %v6473_v22, 1  ;;  %v6465_v36 = vrot.slane %v6464_v8, 1 }
 0xa4a   :  { %v6483_v49 = vrot.slane %v6482_v6, 1  ;;  %v6457_v3 = vadd.f32 %v6456_v59, %v6455_v1 }
 0xa4b   :  { %v6466_v4 = vadd.f32 %v6465_v36, %v6464_v8  ;;  %v6475_v26 = vadd.f32 %v6474_v37, %v6473_v22  ;;  %v20065_v37 = vld [vmem:[#allocation813_spill] sm:$0xff] }
 0xa4c   :  { %v6484_v15 = vadd.f32 %v6483_v49, %v6482_v6 }
 0xa4d   :  { %6549 = vmatprep.mubr.f32.mxu0 %v6466_v4 }
 0xa4e   :  { %6619 = vmatprep.mubr.f32.mxu1 %v6484_v15  ;;  %6550 = vmatmul.mubr.f32.vlgmr.msra.gmra.mrb[24].mxu0 %v6457_v3 }
 0xa4f   :  { %6620 = vmatmul.mubr.f32.vlgmr.msra.gmra.mrb[24].mxu1 %v6475_v26  ;;  %9383 = vmatpush1.bf16.msra.mxu0 %v16695_v9 }
 0xa50   :  { %9391 = vmatpush1.bf16.msra.mxu1 %v16706_v34  ;;  %9385 = vmatprep.subr.bf16.mxu0 %v16708_v39 }
 0xa51   :  { %9393 = vmatprep.subr.bf16.mxu1 %v16722_v42  ;;  %6693 = vmatprep.mubr.f32.mxu0 %v19225_v35 }
 0xa52   :  { %6764 = vmatprep.mubr.f32.mxu1 %v19225_v35 }
 0xa53   :  { %9387 = vmatpush1.bf16.msra.mxu0 %v16735_v10 }
 0xa54   :  { %9395 = vmatpush1.bf16.msra.mxu1 %v16737_v12  ;;  %9397 = vmatprep.subr.bf16.mxu0 %v16330_v30  ;;  %v20047_v30 = vld [vmem:[#allocation800_spill] sm:$0xff] }
 0xa55   :  { %9429 = vmatprep.subr.bf16.mxu1 %v16332_v44  ;;  %v20048_v44 = vld [vmem:[#allocation801_spill] sm:$0xff] }
 0xb21   :  { %v7512_v8 = vpop.f32.mrb[24].mxu0 }
 0xb22   :  { %v7547_v1 = vpop.f32.mrb[24].mxu1  ;;  %v7513_v26 = vpop.f32.mrb[25].mxu0 }
 0xb23   :  { %v7548_v3 = vpop.f32.mrb[25].mxu1  ;;  %v7514_v15 = vadd.f32 %v7513_v26, %v7512_v8  ;;  %v20066_v8 = vld [vmem:[#allocation814_spill] sm:$0xff] }
 0xb24   :  { %v7549_v59 = vadd.f32 %v7548_v3, %v7547_v1 }
 0xb26   :  { %v6622_v6 = vadd.f32 %v7549_v59, %v7514_v15 }
 0xb28   :  { %v6625_v22 = vmul.f32 0.001953125, %v6622_v6 }
 0xb2a   :  { %7335 = vmatmul.mubr.msk.f32.vlgmr.msra.gmra.mrb[26].mxu0 %vm3871_vm2, %v6625_v22  ;;  %7336 = vmatmul.mubr.msk.f32.vlgmr.msra.gmra.mrb[26].mxu1 %vm3871_vm2, %v6625_v22 }
 0xb2b   :  { %9399 = vmatpush3.bf16.msra.mxu0 %v16347_v19  ;;  %9431 = vmatpush3.bf16.msra.mxu1 %v16350_v21  ;;  %v20049_v19 = vld [vmem:[#allocation802_spill] sm:$0xff]  ;;  %v20050_v21 = vld [vmem:[#allocation815_spill] sm:$0xff] }
 0xb2c   :  { %9401 = vmatprep.subr.bf16.mxu0 %v16377_v56  ;;  %9433 = vmatprep.subr.bf16.mxu1 %v16388_v16  ;;  %v20051_v56 = vld [vmem:[#allocation816_spill] sm:$0xff] }
 0xb2f   :  { %9403 = vmatpush3.bf16.msra.mxu0 %v16390_v41  ;;  %9435 = vmatpush3.bf16.msra.mxu1 %v16399_v18  ;;  %v20052_v18 = vld [vmem:[#allocation817_spill] sm:$0xff] }
 0xb30   :  { %9405 = vmatprep.subr.bf16.mxu0 %v16413_v57  ;;  %9437 = vmatprep.subr.bf16.mxu1 %v16424_v52 }
 0xb33   :  { %9407 = vmatpush3.bf16.msra.mxu0 %v16426_v43  ;;  %9439 = vmatpush3.bf16.msra.mxu1 %v20008_v29 }
 0xb34   :  { %9409 = vmatprep.subr.bf16.mxu0 %v20009_v61  ;;  %9441 = vmatprep.subr.bf16.mxu1 %v20010_v53 }
 0xb37   :  { %9411 = vmatpush3.bf16.msra.mxu0 %v20011_v54  ;;  %9443 = vmatpush3.bf16.msra.mxu1 %v20012_v0  ;;  %v20053_v54 = vld [vmem:[#allocation804_spill] sm:$0xff] }
 0xb38   :  { %9413 = vmatprep.subr.bf16.mxu0 %v20013_v20  ;;  %9445 = vmatprep.subr.bf16.mxu1 %v20014_v62  ;;  %v20054_v20 = vld [vmem:[#allocation805_spill] sm:$0xff] }
 0xb3b   :  { %9415 = vmatpush3.bf16.msra.mxu0 %v20015_v2  ;;  %9447 = vmatpush3.bf16.msra.mxu1 %v20016_v32  ;;  %v20055_v2 = vld [vmem:[#allocation7_spill] sm:$0xff] }
 0xb3c   :  { %9417 = vmatprep.subr.bf16.mxu0 %v20017_v17  ;;  %9449 = vmatprep.subr.bf16.mxu1 %v20018_v25  ;;  %v20056_v17 = vld [vmem:[#allocation6_spill] sm:$0xff] }
 0xb3f   :  { %9419 = vmatpush3.bf16.msra.mxu0 %v20019_v14  ;;  %9451 = vmatpush3.bf16.msra.mxu1 %v20020_v23  ;;  %v20057_v14 = vld [vmem:[#allocation807_spill] sm:$0xff] }
 0xb40   :  { %9421 = vmatprep.subr.bf16.mxu0 %v20021_v45  ;;  %9453 = vmatprep.subr.bf16.mxu1 %v20022_v38  ;;  %v20058_v45 = vld [vmem:[#allocation808_spill] sm:$0xff] }
 0xb43   :  { %9423 = vmatpush3.bf16.msra.mxu0 %v20023_v47  ;;  %9455 = vmatpush3.bf16.msra.mxu1 %v20024_v40  ;;  %v20059_v47 = vld [vmem:[#allocation11_spill] sm:$0xff] }
 0xb44   :  { %9425 = vmatprep.subr.bf16.mxu0 %v20025_v55  ;;  %9457 = vmatprep.subr.bf16.mxu1 %v20047_v30  ;;  %v20060_v55 = vld [vmem:[#allocation10_spill] sm:$0xff]  ;;  %v20067_v30 = vld [vmem:[#allocation13_spill] sm:$0xff] }
 0xb47   :  { %9427 = vmatpush3.bf16.msra.mxu0 %v20048_v44  ;;  %9459 = vmatpush3.bf16.msra.mxu1 %v20049_v19  ;;  %v20068_v19 = vld [vmem:[#allocation12_spill] sm:$0xff] }
 0xb48   :  { %9461 = vmatprep.subr.bf16.mxu0 %v20050_v21  ;;  %9469 = vmatprep.subr.bf16.mxu1 %v20051_v56 }
 0xbfd   :  { %v6695_v16 = vpop.f32.mrb[26].mxu0  ;;  %v6766_v41 = vpop.f32.mrb[26].mxu1 }
 0xbfe   :  { %v6774_v57 = vrot.slane %v6695_v16, %v20052_v18  ;;  %v6782_v52 = vrot.slane %v6766_v41, %v20052_v18  ;;  %v6697_v43 = vpop.f32.mrb[27].mxu0  ;;  %v6768_v29 = vpop.f32.mrb[27].mxu1 }
 0xbff   :  { %v6778_v61 = vrot.slane %v6697_v43, %v20052_v18  ;;  %v6786_v53 = vrot.slane %v6768_v29, %v20052_v18 }
 0xc00   :  { %v18043_v0 = vsub.f32 %v20053_v54, %v6774_v57  ;;  %v18046_v62 = vsub.f32 %v20054_v20, %v6774_v57  ;;  %v18049_v32 = vsub.f32 %v20055_v2, %v6774_v57  ;;  %v18052_v25 = vsub.f32 %v20056_v17, %v6774_v57 }
 0xc01   :  { %v18055_v23 = vsub.f32 %v20057_v14, %v6782_v52  ;;  %v18058_v38 = vsub.f32 %v20058_v45, %v6782_v52  ;;  %v18061_v40 = vsub.f32 %v20059_v47, %v6782_v52  ;;  %v18064_v13 = vsub.f32 %v20060_v55, %v6782_v52 }
 0xc02   :  { %v6803_v48 = vmul.f32 %v18043_v0, %v18043_v0  ;;  %v6807_v50 = vmul.f32 %v18046_v62, %v18046_v62  ;;  %v6811_v31 = vmul.f32 %v18049_v32, %v18049_v32  ;;  %v6815_v27 = vmul.f32 %v18052_v25, %v18052_v25 }
 0xc03   :  { %v6805_v36 = vmul.f32 %v18055_v23, %v18055_v23  ;;  %v6809_v24 = vmul.f32 %v18058_v38, %v18058_v38  ;;  %v6813_v46 = vmul.f32 %v18061_v40, %v18061_v40  ;;  %v18081_v11 = vsub.f32 %v20061_v28, %v6778_v61 }
 0xc04   :  { %v6819_v60 = vadd.f32 %v6807_v50, %v6803_v48  ;;  %v18084_v4 = vsub.f32 %v20062_v51, %v6778_v61  ;;  %v18087_v7 = vsub.f32 %v20063_v33, %v6778_v61  ;;  %v18090_v58 = vsub.f32 %v20064_v63, %v6778_v61 }
 0xc05   :  { %v6837_v5 = vadd.f32 %v6809_v24, %v6805_v36  ;;  %v18093_v49 = vsub.f32 %v20065_v37, %v6786_v53  ;;  %v18096_v1 = vsub.f32 %v20066_v8, %v6786_v53  ;;  %v6817_v3 = vmul.f32 %v18064_v13, %v18064_v13 }
 0xc06   :  { %v6820_v26 = vadd.f32 %v6819_v60, %v6811_v31  ;;  %v6804_v15 = vmul.f32 %v18081_v11, %v18081_v11  ;;  %v6808_v59 = vmul.f32 %v18084_v4, %v18084_v4  ;;  %v6812_v22 = vmul.f32 %v18087_v7, %v18087_v7 }
 0xc07   :  { %v6838_v6 = vadd.f32 %v6837_v5, %v6813_v46  ;;  %v18107_v44 = vsub.f32 %v20067_v30, %v6786_v53  ;;  %v18110_v21 = vsub.f32 %v20068_v19, %v6786_v53  ;;  %v6806_v41 = vmul.f32 %v18093_v49, %v18093_v49 }
 0xc08   :  { %v6821_v56 = vadd.f32 %v6820_v26, %v6815_v27  ;;  %v6828_v16 = vadd.f32 %v6808_v59, %v6804_v15  ;;  %v6810_v57 = vmul.f32 %v18096_v1, %v18096_v1  ;;  %v6816_v43 = vmul.f32 %v18090_v58, %v18090_v58 }
 0xc09   :  { %v6839_v52 = vadd.f32 %v6838_v6, %v6817_v3  ;;  %v6814_v29 = vmul.f32 %v18107_v44, %v18107_v44  ;;  %v6818_v2 = vmul.f32 %v18110_v21, %v18110_v21 }
 0xc0a   :  { %v6846_v61 = vadd.f32 %v6810_v57, %v6806_v41  ;;  %v6829_v54 = vadd.f32 %v6828_v16, %v6812_v22  ;;  %v6822_v20 = vrot.slane %v6821_v56, 4 }
 0xc0b   :  { %v6840_v53 = vrot.slane %v6839_v52, 4 }
 0xc0c   :  { %v6830_v17 = vadd.f32 %v6829_v54, %v6816_v43  ;;  %v6847_v14 = vadd.f32 %v6846_v61, %v6814_v29  ;;  %v6823_v45 = vadd.f32 %v6822_v20, %v6821_v56 }
 0xc0d   :  { %v6841_v47 = vadd.f32 %v6840_v53, %v6839_v52 }
 0xc0e   :  { %v6831_v55 = vrot.slane %v6830_v17, 4  ;;  %v6848_v48 = vadd.f32 %v6847_v14, %v6818_v2  ;;  %v6824_v50 = vrot.slane %v6823_v45, 2 }
 0xc0f   :  { %v6842_v31 = vrot.slane %v6841_v47, 2 }
 0xc10   :  { %v6832_v27 = vadd.f32 %v6831_v55, %v6830_v17  ;;  %v6849_v36 = vrot.slane %v6848_v48, 4  ;;  %v6825_v24 = vadd.f32 %v6824_v50, %v6823_v45  ;;  %v20069_v17 = vld [vmem:[#allocation803_spill] sm:$0xff]  ;;  %v5283_v55 = vld [vmem:[%s18270_s9] sm:$0xf] }
 0xc11   :  { %v6843_v28 = vadd.f32 %v6842_v31, %v6841_v47  ;;  %v5284_v50 = vld [vmem:[%s18271_s10] sm:$0xf] }
 0xc12   :  { %v6833_v46 = vrot.slane %v6832_v27, 2  ;;  %v6850_v60 = vadd.f32 %v6849_v36, %v6848_v48  ;;  %v6826_v5 = vrot.slane %v6825_v24, 1  ;;  %v20070_v36 = vld [vmem:[#allocation806_spill] sm:$0xff] }
 0xc13   :  { %v6844_v8 = vrot.slane %v6843_v28, 1 }
 0xc14   :  { %v6834_v51 = vadd.f32 %v6833_v46, %v6832_v27  ;;  %v6851_v33 = vrot.slane %v6850_v60, 2  ;;  %v6827_v15 = vadd.f32 %v6826_v5, %v6825_v24  ;;  %v20071_v46 = vld [vmem:[#allocation809_spill] sm:$0xff]  ;;  %v7220_v5 = vrot.slane %v5284_v50, %v20070_v36 }
 0xc15   :  { %v6845_v6 = vadd.f32 %v6844_v8, %v6843_v28  ;;  %v20072_v28 = vld [vmem:[#allocation812_spill] sm:$0xff] }
 0xc16   :  { %v6835_v63 = vrot.slane %v6834_v51, 1  ;;  %v6852_v37 = vadd.f32 %v6851_v33, %v6850_v60  ;;  %v7216_v33 = vrot.slane %v5284_v50, %v20052_v18 }
 0xc18   :  { %v6836_v26 = vadd.f32 %v6835_v63, %v6834_v51  ;;  %v6853_v3 = vrot.slane %v6852_v37, 1  ;;  %v7224_v63 = vrot.slane %v5284_v50, %v20071_v46 }
 0xc1a   :  { %6919 = vmatprep.mubr.f32.mxu0 %v6836_v26  ;;  %v6854_v59 = vadd.f32 %v6853_v3, %v6852_v37  ;;  %v7228_v37 = vrot.slane %v5284_v50, %v20072_v28 }
 0xc1b   :  { %6920 = vmatmul.mubr.f32.vlgmr.msra.gmra.mrb[28].mxu0 %v6827_v15 }
 0xc1c   :  { %6989 = vmatprep.mubr.f32.mxu1 %v6854_v59  ;;  %9463 = vmatpush1.bf16.msra.mxu0 %v16695_v9 }
 0xc1d   :  { %6990 = vmatmul.mubr.f32.vlgmr.msra.gmra.mrb[28].mxu1 %v6845_v6  ;;  %9465 = vmatprep.subr.bf16.mxu0 %v16708_v39 }
 0xc1e   :  { %9471 = vmatpush1.bf16.msra.mxu1 %v16706_v34  ;;  %7063 = vmatprep.mubr.f32.mxu0 %v19225_v35 }
 0xc1f   :  { %9473 = vmatprep.subr.bf16.mxu1 %v16722_v42  ;;  %7134 = vmatprep.mubr.f32.mxu1 %v19225_v35 }
 0xc20   :  { %9467 = vmatpush1.bf16.msra.mxu0 %v16735_v10 }
 0xc22   :  { %9475 = vmatpush1.bf16.msra.mxu1 %v16737_v12 }
 0xcee   :  { %v7582_v22 = vpop.f32.mrb[28].mxu0 }
 0xcef   :  { %v7583_v30 = vpop.f32.mrb[29].mxu0 }
 0xcf0   :  { %v7617_v19 = vpop.f32.mrb[28].mxu1  ;;  %v7584_v56 = vadd.f32 %v7583_v30, %v7582_v22 }
 0xcf1   :  { %v7618_v9 = vpop.f32.mrb[29].mxu1 }
 0xcf2   :  { %v7619_v16 = vadd.f32 %v7618_v9, %v7617_v19 }
 0xcf4   :  { %v6992_v41 = vadd.f32 %v7619_v16, %v7584_v56  ;;  %v7253_v16 = vld [vmem:[%s18261_s0 + $0x20] sm:$0xff] }
 0xcf6   :  { %v6995_v39 = vmul.f32 0.001953125, %v6992_v41  ;;  %v7254_v41 = vld [vmem:[%s18261_s0 + $0x28] sm:$0xff] }
 0xcf8   :  { %7337 = vmatmul.mubr.msk.f32.vlgmr.msra.gmra.mrb[30].mxu0 %vm3871_vm2, %v6995_v39  ;;  %7338 = vmatmul.mubr.msk.f32.vlgmr.msra.gmra.mrb[30].mxu1 %vm3871_vm2, %v6995_v39  ;;  %v7255_v39 = vld [vmem:[%s18261_s0 + $0x30] sm:$0xff] }
 0xdcb   :  { %v7065_v34 = vpop.f32.mrb[30].mxu0  ;;  %v7136_v42 = vpop.f32.mrb[30].mxu1 }
 0xdcc   :  { %v7066_v57 = vadd.f32 1e-05, %v7065_v34  ;;  %v7137_v35 = vadd.f32 1e-05, %v7136_v42  ;;  %v7067_v52 = vpop.f32.mrb[31].mxu0  ;;  %v7138_v10 = vpop.f32.mrb[31].mxu1 }
 0xdcd   :  { %v7068_v43 = vadd.f32 1e-05, %v7067_v52  ;;  %v7139_v12 = vadd.f32 1e-05, %v7138_v10  ;;  %v7256_v52 = vld [vmem:[%s18261_s0 + $0x38] sm:$0xff]  ;;  %v7257_v10 = vld [vmem:[%s18261_s0 + $0x40] sm:$0xff] }
 0xdce   :  { %9665 = vrsqrt.f32 %v7066_v57 }
 0xdcf   :  { %9667 = vrsqrt.f32 %v7137_v35 }
 0xdd0   :  { %9669 = vrsqrt.f32 %v7068_v43  ;;  %v7258_v43 = vld [vmem:[%s18261_s0 + $0x48] sm:$0xff] }
 0xdd1   :  { %9671 = vrsqrt.f32 %v7139_v12 }
 0xdd8   :  { %v9666_v29 = vpop.eup %9665 }
 0xdd9   :  { %v9668_v61 = vpop.eup %9667 }
 0xdda   :  { %v9670_v54 = vpop.eup %9669 }
 0xddb   :  { %v9672_v20 = vpop.eup %9671  ;;  %v7149_v53 = vcombine.low %v9666_v29, %v9670_v54 }
 0xddc   :  { %v7150_v2 = vcombine.low %v9668_v61, %v9672_v20  ;;  %v7259_v20 = vld [vmem:[%s18261_s0 + $0x50] sm:$0xff] }
 0xddd   :  { %v7157_v14 = vrot.slane %v7149_v53, %v20069_v17  ;;  %v7260_v53 = vld [vmem:[%s18261_s0 + $0x58] sm:$0xff] }
 0xdde   :  { %v7164_v45 = vrot.slane %v7150_v2, %v20069_v17  ;;  %v7261_v2 = vld [vmem:[%s18261_s0 + $0x60] sm:$0xff] }
 0xde0   :  { %v7165_v47 = vcombine.low %v7157_v14, %v7164_v45  ;;  %v7263_v14 = vld [vmem:[%s18261_s0 + $0x70] sm:$0xff]  ;;  %v7264_v45 = vld [vmem:[%s18261_s0 + $0x78] sm:$0xff] }
 0xde2   :  { %v7172_v48 = vrot.slane %v7165_v47, %v20069_v17  ;;  %v7262_v17 = vld [vmem:[%s18261_s0 + $0x68] sm:$0xff] }
 0xde4   :  { %v7174_v31 = vmul.f32 %v7172_v48, %v5283_v55 }
 0xde6   :  { %v7179_v27 = vrot.slane %v7174_v31, %v20052_v18  ;;  %v7183_v24 = vrot.slane %v7174_v31, %v20070_v36  ;;  %v7187_v60 = vrot.slane %v7174_v31, %v20071_v46  ;;  %v7191_v51 = vrot.slane %v7174_v31, %v20072_v28 }
 0xde8   :  { %v7196_v8 = vmul.f32 %v7179_v27, %v18043_v0  ;;  %v7197_v26 = vmul.f32 %v7183_v24, %v18081_v11  ;;  %v7198_v3 = vmul.f32 %v7187_v60, %v18055_v23  ;;  %v7199_v15 = vmul.f32 %v7191_v51, %v18093_v49 }
 0xde9   :  { %v7200_v59 = vmul.f32 %v7179_v27, %v18046_v62  ;;  %v7201_v6 = vmul.f32 %v7183_v24, %v18084_v4  ;;  %v7202_v18 = vmul.f32 %v7187_v60, %v18058_v38  ;;  %v7203_v22 = vmul.f32 %v7191_v51, %v18096_v1  ;;  %v7249_v38 = vld [vmem:[%s18261_s0] sm:$0xff] }
 0xdea   :  { %v7204_v30 = vmul.f32 %v7179_v27, %v18049_v32  ;;  %v7205_v19 = vmul.f32 %v7183_v24, %v18087_v7  ;;  %v7206_v0 = vmul.f32 %v7187_v60, %v18061_v40  ;;  %v7207_v11 = vmul.f32 %v7191_v51, %v18107_v44  ;;  %v7250_v40 = vld [vmem:[%s18261_s0 + $0x8] sm:$0xff] }
 0xdeb   :  { %v7208_v23 = vmul.f32 %v7179_v27, %v18052_v25  ;;  %v7209_v49 = vmul.f32 %v7183_v24, %v18090_v58  ;;  %v7210_v62 = vmul.f32 %v7187_v60, %v18064_v13  ;;  %v7211_v4 = vmul.f32 %v7191_v51, %v18110_v21  ;;  %v7251_v25 = vld [vmem:[%s18261_s0 + $0x10] sm:$0xff]  ;;  %v7252_v13 = vld [vmem:[%s18261_s0 + $0x18] sm:$0xff] }
 0xdec   :  { %v7233_v1 = vadd.f32 %v7216_v33, %v7196_v8  ;;  %v7234_v32 = vadd.f32 %v7220_v5, %v7197_v26  ;;  %v7235_v56 = vadd.f32 %v7224_v63, %v7198_v3  ;;  %v7236_v7 = vadd.f32 %v7228_v37, %v7199_v15 }
 0xded   :  { %v7237_v58 = vadd.f32 %v7216_v33, %v7200_v59  ;;  %v7238_v44 = vadd.f32 %v7220_v5, %v7201_v6  ;;  %v7239_v21 = vadd.f32 %v7224_v63, %v7202_v18  ;;  %v7240_v9 = vadd.f32 %v7228_v37, %v7203_v22 }
 0xdee   :  { %v7241_v34 = vadd.f32 %v7216_v33, %v7204_v30  ;;  %v7242_v42 = vadd.f32 %v7220_v5, %v7205_v19  ;;  %v7243_v57 = vadd.f32 %v7224_v63, %v7206_v0  ;;  %v7244_v35 = vadd.f32 %v7228_v37, %v7207_v11 }
 0xdef   :  { %v7245_v12 = vadd.f32 %v7216_v33, %v7208_v23  ;;  %v7246_v29 = vadd.f32 %v7220_v5, %v7209_v49  ;;  %v7247_v61 = vadd.f32 %v7224_v63, %v7210_v62  ;;  %v7248_v54 = vadd.f32 %v7228_v37, %v7211_v4 }
 0xdf0   :  { %v7265_v47 = vadd.f32 %v7249_v38, %v7233_v1  ;;  %v7266_v55 = vadd.f32 %v7250_v40, %v7234_v32  ;;  %v7267_v48 = vadd.f32 %v7251_v25, %v7235_v56  ;;  %v7268_v50 = vadd.f32 %v7252_v13, %v7236_v7 }
 0xdf1   :  { %v7269_v31 = vadd.f32 %v7253_v16, %v7237_v58  ;;  %v7270_v27 = vadd.f32 %v7254_v41, %v7238_v44  ;;  %v7271_v36 = vadd.f32 %v7255_v39, %v7239_v21  ;;  %v7272_v24 = vadd.f32 %v7256_v52, %v7240_v9 }
 0xdf2   :  { %v7273_v46 = vadd.f32 %v7257_v10, %v7241_v34  ;;  %v7274_v60 = vadd.f32 %v7258_v43, %v7242_v42  ;;  %v7275_v28 = vadd.f32 %v7259_v20, %v7243_v57  ;;  %v7276_v51 = vadd.f32 %v7260_v53, %v7244_v35 }
 0xdf3   :  { %v7277_v33 = vadd.f32 %v7261_v2, %v7245_v12  ;;  %v7278_v5 = vadd.f32 %v7262_v17, %v7246_v29  ;;  %v7279_v63 = vadd.f32 %v7263_v14, %v7247_v61  ;;  %v7280_v37 = vadd.f32 %v7264_v45, %v7248_v54 }
 0xdf4   :  { %v7281_v8 = vmax.f32 %v7265_v47, 0.0  ;;  %v7282_v26 = vmax.f32 %v7266_v55, 0.0  ;;  %v7283_v3 = vmax.f32 %v7267_v48, 0.0  ;;  %v7284_v15 = vmax.f32 %v7268_v50, 0.0 }
 0xdf5   :  { %v7285_v59 = vmax.f32 %v7269_v31, 0.0  ;;  %v7286_v6 = vmax.f32 %v7270_v27, 0.0  ;;  %v7287_v18 = vmax.f32 %v7271_v36, 0.0  ;;  %v7288_v22 = vmax.f32 %v7272_v24, 0.0 }
 0xdf6   :  { %v7289_v30 = vmax.f32 %v7273_v46, 0.0  ;;  %v7290_v19 = vmax.f32 %v7274_v60, 0.0  ;;  %v7291_v0 = vmax.f32 %v7275_v28, 0.0  ;;  %v7292_v11 = vmax.f32 %v7276_v51, 0.0  ;;  %7297 = vst [vmem:[%s18272_s11] sm:$0xff] %v7281_v8  ;;  %7298 = vst [vmem:[%s18272_s11 + $0x8] sm:$0xff] %v7282_v26 }
 0xdf7   :  { %7299 = vst [vmem:[%s18272_s11 + $0x10] sm:$0xff] %v7283_v3  ;;  %7300 = vst [vmem:[%s18272_s11 + $0x18] sm:$0xff] %v7284_v15  ;;  %v7293_v23 = vmax.f32 %v7277_v33, 0.0  ;;  %v7294_v49 = vmax.f32 %v7278_v5, 0.0  ;;  %v7295_v62 = vmax.f32 %v7279_v63, 0.0  ;;  %v7296_v4 = vmax.f32 %v7280_v37, 0.0 }
 0xdf8   :  { %7301 = vst [vmem:[%s18272_s11 + $0x20] sm:$0xff] %v7285_v59  ;;  %7302 = vst [vmem:[%s18272_s11 + $0x28] sm:$0xff] %v7286_v6 }
 0xdf9   :  { %7303 = vst [vmem:[%s18272_s11 + $0x30] sm:$0xff] %v7287_v18  ;;  %7304 = vst [vmem:[%s18272_s11 + $0x38] sm:$0xff] %v7288_v22 }
 0xdfa   :  { %7305 = vst [vmem:[%s18272_s11 + $0x40] sm:$0xff] %v7289_v30  ;;  %7306 = vst [vmem:[%s18272_s11 + $0x48] sm:$0xff] %v7290_v19 }
 0xdfb   :  { %7307 = vst [vmem:[%s18272_s11 + $0x50] sm:$0xff] %v7291_v0  ;;  %7308 = vst [vmem:[%s18272_s11 + $0x58] sm:$0xff] %v7292_v11 }
 0xdfc   :  { %7309 = vst [vmem:[%s18272_s11 + $0x60] sm:$0xff] %v7293_v23  ;;  %7310 = vst [vmem:[%s18272_s11 + $0x68] sm:$0xff] %v7294_v49 }
 0xdfd   :  { %7311 = vst [vmem:[%s18272_s11 + $0x70] sm:$0xff] %v7295_v62  ;;  %7312 = vst [vmem:[%s18272_s11 + $0x78] sm:$0xff] %v7296_v4 }
 0xdfe   :  { %7317 = vsyncmov [#allocation3] }
 0xe01   :  { %s7318_s6 = vpop.sfrf %7317 }
 0xe02   :  { %p7339_p0 = scmp.ne.s32.totalorder %s7318_s6, 0 }
 0xe04   :  { %7322 = shalt.err (%p7339_p0)  }

</bundles_post_ra>
